<compile_context>
chip_gen: v6e
topology: v6e:2x2x1
jax: 0.10.0
libtpu: 0.0.40
codegen_flags: <defaults>
</compile_context>

<pallas_src>
import functools

import numpy as np
import jax
import jax.numpy as jnp
from jax import lax
from jax.experimental import pallas as pl
from jax.experimental.pallas import tpu as pltpu

# ---------------- configuration (small, consistent with the module) ----------
K = 8              # cfg.DATASET.KEYPOINT.NUM
INPLANE_S = 7
INPLANE_M = 4
EMBED = 256
HEADS = 4
SCALAR = 100.0
OUT_PAD = 128      # pad the 3-channel output linears to a lane-dense width

SINGLE_VIEW_LAYERS = [INPLANE_S, 32, 64, 128, 256]
INIT3D_LAYERS = [INPLANE_M, 32, 64, 128, 256]
SINGLE_UPDATE = [256, 128, 128, 32, 32]
FINAL3D_LAYERS = [256, 128, 128, 32, 32]


def _const_spec(shape):
    nd = len(shape)
    return pl.BlockSpec(shape, lambda *_: (0,) * nd)


def _head_map(e, heads):
    dh = e // heads
    hm = np.zeros((e, heads), dtype=np.float32)
    for h in range(heads):
        hm[h * dh:(h + 1) * dh, h] = 1.0
    return hm


def build_adjacency(k):
    """Symmetric-normalized skeleton adjacency with self-loops (PyG GCNConv norm)."""
    edges = [(0, 1), (1, 2), (2, 3), (3, 4), (4, 5), (5, 6), (6, 7), (2, 5)]
    a = np.zeros((k, k), dtype=np.float32)
    for i, j in edges:
        a[i, j] += 1.0
        a[j, i] += 1.0
    a += np.eye(k, dtype=np.float32)
    deg = a.sum(axis=1)
    dinv = 1.0 / np.sqrt(deg)
    return (a * dinv[:, None] * dinv[None, :]).astype(np.float32)


# ---------------------------- the fused kernel --------------------------------
def _fused_pose_gcn_kernel(*refs, V, PB, K, E, heads):
    upd_ref, fin_ref = refs[-2], refs[-1]
    in_refs = refs[:-2]
    cur = [0]

    def take():
        v = in_refs[cur[0]][...]
        cur[0] += 1
        return v

    def take_stack(n):
        return [(take(), take()) for _ in range(n)]

    T = PB * K                      # tokens per person-block (per view)
    dh = E // heads
    scale = 1.0 / float(np.sqrt(dh))

    def bf(x):
        return x.astype(jnp.bfloat16)

    def fdot(a, b):                 # bf16 operands, f32 accumulation (MXU-native)
        return jnp.dot(bf(a), bf(b), preferred_element_type=jnp.float32)

    def gcn_layer(x, adj, w, b):
        cin, cout = w.shape
        if cin < cout:
            y = fdot(fdot(adj, x), w)        # (A @ X) @ W cheaper when widening
        else:
            y = fdot(adj, fdot(x, w))
        return jnp.maximum(y + b, 0.0)       # eval-mode BN folded into w / b

    def gcn_stack(x, adj, wbs):
        for w, b in wbs:
            x = gcn_layer(x, adj, w, b)
        return x

    def layer_norm(x, g, beta):
        mu = jnp.mean(x, axis=-1, keepdims=True)
        var = jnp.mean((x - mu) ** 2, axis=-1, keepdims=True)
        return (x - mu) * lax.rsqrt(var + 1e-5) * g + beta

    def mha_res_ln(q_rows, kv_rows, pairs, wq, bq, wkv, bkv, wo, bo, g, beta, hm, hmt):
        # q_rows: (nq*T, E); kv_rows: (nk*T, E).  pairs[gi] lists the source
        # groups for query group gi.  Token-wise attention over groups (the
        # reference MHA's (L, N, E) layout with batch = P*K tokens).
        qp = fdot(q_rows, wq) + bq
        kvp = fdot(kv_rows, wkv) + bkv       # merged K/V projection: one (·, 2E) matmul
        kp, vp = kvp[:, :E], kvp[:, E:]

        offs = [0]
        for srcs in pairs:
            offs.append(offs[-1] + len(srcs))

        prods = []
        for gi, srcs in enumerate(pairs):
            qg = qp[gi * T:(gi + 1) * T]
            for u in srcs:
                prods.append(qg * kp[u * T:(u + 1) * T])
        # one selector matmul for ALL (query, source) pairs -> per-head scores
        sc = fdot(jnp.concatenate(prods, axis=0), hm) * scale      # (npairs*T, H)

        # stable softmax over each query group's sources, single exp pass
        m_parts = []
        for gi, srcs in enumerate(pairs):
            b0 = offs[gi]
            m = sc[b0 * T:(b0 + 1) * T]
            for s in range(1, len(srcs)):
                m = jnp.maximum(m, sc[(b0 + s) * T:(b0 + s + 1) * T])
            m_parts.extend([m] * len(srcs))
        e = jnp.exp(sc - jnp.concatenate(m_parts, axis=0))

        w_parts = []
        for gi, srcs in enumerate(pairs):
            b0 = offs[gi]
            den = e[b0 * T:(b0 + 1) * T]
            for s in range(1, len(srcs)):
                den = den + e[(b0 + s) * T:(b0 + s + 1) * T]
            inv = pl.reciprocal(den, approx=True)                  # EUP slot
            for s in range(len(srcs)):
                w_parts.append(e[(b0 + s) * T:(b0 + s + 1) * T] * inv)
        # TODO(synk): attention dropout p=0.5 is train-mode only; eval => identity.

        # expand per-head weights back to E lanes with the transposed selector
        wfull = fdot(jnp.concatenate(w_parts, axis=0), hmt)        # (npairs*T, E)

        outs = []
        for gi, srcs in enumerate(pairs):
            b0 = offs[gi]
            acc = wfull[b0 * T:(b0 + 1) * T] * vp[srcs[0] * T:(srcs[0] + 1) * T]
            for s in range(1, len(srcs)):
                u = srcs[s]
                acc = acc + wfull[(b0 + s) * T:(b0 + s + 1) * T] * vp[u * T:(u + 1) * T]
            outs.append(acc)
        attn = outs[0] if len(outs) == 1 else jnp.concatenate(outs, axis=0)
        attn = fdot(attn, wo) + bo
        return layer_norm(attn + q_rows, g, beta)

    # ---------------- unpack (order must match the wrapper) -------------------
    xsv = take()        # (V*T, 7)   f32   single-view features, (v, p, k) order
    score = take()      # (V*T, 1)   f32   per-graph detection score
    x3 = take()         # (T, 4)     f32   init-3d features, (p, k) order
    adj_sv = take()     # (V*T, V*T) bf16  kron(I_{V*PB}, A_hat)
    adj_3d = take()     # (T, T)     bf16  kron(I_{PB}, A_hat)
    hm = take()         # (E, H)     bf16  one-hot head selector
    hmt = take()        # (H, E)     bf16

    sv_wb = take_stack(len(SINGLE_VIEW_LAYERS) - 1)
    enc_wf, enc_ws, enc_b = take(), take(), take()
    i3_wb = take_stack(len(INIT3D_LAYERS) - 1)
    sa = [take() for _ in range(6)]                  # wq, bq, wkv, bkv, wo, bo
    ls_g, ls_b = take(), take()
    up_wb = take_stack(len(SINGLE_UPDATE) - 1)
    so_w, so_b = take(), take()
    ca = [take() for _ in range(6)]
    lc_g, lc_b = take(), take()
    f3_wb = take_stack(len(FINAL3D_LAYERS) - 1)
    out_w, out_b = take(), take()

    # ---------------- forward: all intermediates stay in VMEM -----------------
    # single-view GCN stack (7 -> 256) + encode_score tail (score folded in as
    # a rank-1 term, no 257-lane concat)
    x = gcn_stack(xsv, adj_sv, sv_wb)                               # (V*T, 256)
    enc = jnp.maximum(fdot(x, enc_wf) + score * enc_ws + enc_b, 0.0)

    # init-3d GCN stack (4 -> 256)
    qf = gcn_stack(x3, adj_3d, i3_wb)                               # (T, 256)

    # per-view self-attention: each token attends over the other views
    others = [[u for u in range(V) if u != v] for v in range(V)]
    new_v = mha_res_ln(enc, enc, others, *sa, ls_g, ls_b, hm, hmt)  # (V*T, 256)

    # single-view update GCN stack + padded 3-channel linear (lane-dense store)
    upd = gcn_stack(new_v, adj_sv, up_wb)                           # (V*T, 32)
    upd_ref[...] = fdot(upd, so_w) + so_b                           # (V*T, 128)

    # cross-view attention fuse (query = init-3d features, sources = all views)
    fuse = mha_res_ln(qf, new_v, [list(range(V))], *ca, lc_g, lc_b, hm, hmt)  # (T, 256)

    # final 3-D GCN stack + padded output linear (lane-dense store)
    fin = gcn_stack(fuse, adj_3d, f3_wb)                            # (T, 32)
    fin_ref[...] = fdot(fin, out_w) + out_b                         # (T, 128)


# ---------------------------- parameters ---------------------------------------
def init_params(key):
    keys = iter(jax.random.split(key, 96))

    def w_(cin, cout, std=0.1):
        return jax.random.normal(next(keys), (cin, cout), jnp.float32) * std

    def b_(cout):
        return jax.random.normal(next(keys), (1, cout), jnp.float32) * 0.01

    # Eval-mode BatchNorm1d with default running stats (mean=0, var=1, gamma=1,
    # beta=0) folded into the GCN weights: W' = W*scale, b' = b*scale + shift.
    # TODO(synk): re-fold from trained BN stats if real checkpoint weights are loaded.
    bn_scale = float(1.0 / np.sqrt(1.0 + 1e-5))

    def gcn_stack_params(layers):
        out = []
        for cin, cout in zip(layers[:-1], layers[1:]):
            out.append({"w": (w_(cin, cout) * bn_scale).astype(jnp.bfloat16),
                        "b": b_(cout) * bn_scale})                  # shift = 0
        return out

    def mha(e, std=0.05):
        wq, bq = w_(e, e, std), b_(e)
        wk, bk = w_(e, e, std), b_(e)
        wv, bv = w_(e, e, std), b_(e)
        wo, bo = w_(e, e, std), b_(e)
        return {"wq": wq.astype(jnp.bfloat16), "bq": bq,
                "wkv": jnp.concatenate([wk, wv], axis=1).astype(jnp.bfloat16),
                "bkv": jnp.concatenate([bk, bv], axis=1),
                "wo": wo.astype(jnp.bfloat16), "bo": bo}

    def ln(e):
        return {"g": jnp.ones((1, e), jnp.float32), "b": jnp.zeros((1, e), jnp.float32)}

    enc_w, enc_b = w_(EMBED + 1, EMBED), b_(EMBED)
    encode_score = {"w_feat": enc_w[:EMBED].astype(jnp.bfloat16),
                    "w_score": enc_w[EMBED:],        # (1, E) f32, used elementwise
                    "b": enc_b}

    def out3(cin):
        w, b = w_(cin, 3), b_(3)
        w_pad = jnp.zeros((cin, OUT_PAD), jnp.float32).at[:, :3].set(w)
        b_pad = jnp.zeros((1, OUT_PAD), jnp.float32).at[:, :3].set(b)
        return {"w": w_pad.astype(jnp.bfloat16), "b": b_pad}

    return {
        "single_view": gcn_stack_params(SINGLE_VIEW_LAYERS),
        "init3d": gcn_stack_params(INIT3D_LAYERS),
        "encode_score": encode_score,
        "self_attn": mha(EMBED),
        "ln_self": ln(EMBED),
        "cross_attn": mha(EMBED),
        "ln_cross": ln(EMBED),
        "single_up": gcn_stack_params(SINGLE_UPDATE),
        "single_out": out3(SINGLE_UPDATE[-1]),
        "final3d": gcn_stack_params(FINAL3D_LAYERS),
        "output": out3(FINAL3D_LAYERS[-1]),
    }


# ------------------------------ forward pass ----------------------------------
def pose_gcn_forward(params, adj_np, pose_single, init_3d):
    # pose_single: (V, P, K, 7); init_3d: (B, Mp, K, 4)
    B, Mp, Kk, _ = init_3d.shape
    V = pose_single.shape[0]
    P = B * Mp
    # People are fully independent through the whole network (block-diag graphs,
    # token-wise attention), so grid over person blocks; "parallel" lets v7x's
    # two TensorCores split the work (a no-op / one extra tiny step on v5e/v6e).
    NB = 2 if P % 2 == 0 else 1
    PB = P // NB
    T = PB * Kk
    Msv = V * T

    # ---------------- cheap elementwise preprocessing (XLA) --------------------
    init_3d_valid = jnp.sum((init_3d[..., 3] > 0).astype(jnp.int32), axis=-1).reshape(-1)
    init_3d_pos = (init_3d[..., :3] / SCALAR).reshape(P, Kk, 3)
    valid_people = init_3d_valid > 3
    mean_full = init_3d_pos[:, 2:3, :]                              # (P, 1, 3)
    init_3d_pos = jnp.where(valid_people[:, None, None], init_3d_pos - mean_full, init_3d_pos)
    origin_pos = init_3d_pos

    pose_single_view = pose_single.reshape(V * P, Kk, INPLANE_S)
    score = jnp.sum(pose_single.reshape(V, P, Kk, INPLANE_S)[..., 6], axis=-1, keepdims=True)
    score = jnp.broadcast_to(score[..., None], (V, P, Kk, 1))

    valid_v = jnp.tile(valid_people, (V,))
    mean_v = jnp.tile(mean_full, (V, 1, 1))
    xyz = jnp.where(valid_v[:, None, None],
                    pose_single_view[..., :3] / SCALAR - mean_v,
                    pose_single_view[..., :3])
    svf = jnp.concatenate([xyz, pose_single_view[..., 3:]], axis=-1).reshape(V, P, Kk, INPLANE_S)
    current_pos = svf[..., :3]                                      # pose_single_view_bak[..., :3]

    init_w = (init_3d[..., 3] > 0).reshape(P, Kk, 1).astype(jnp.float32)
    x3 = jnp.concatenate([init_3d_pos, init_w], axis=-1)            # (P, K, 4)

    # ------- block layout: person-block major, (view, person, keypoint) inside
    xsv_blk = (svf.reshape(V, NB, PB, Kk, INPLANE_S)
               .transpose(1, 0, 2, 3, 4).reshape(NB * Msv, INPLANE_S))
    score_blk = (score.reshape(V, NB, PB, Kk, 1)
                 .transpose(1, 0, 2, 3, 4).reshape(NB * Msv, 1))
    x3_blk = x3.reshape(NB * T, INPLANE_M)

    # Per-block adjacency tiles (reused by every grid step) instead of the full
    # kron over all graphs — scales with PB, not with the whole batch.
    adj_sv = jnp.asarray(np.kron(np.eye(V * PB, dtype=np.float32), adj_np), jnp.bfloat16)
    adj_3d = jnp.asarray(np.kron(np.eye(PB, dtype=np.float32), adj_np), jnp.bfloat16)
    hm_np = _head_map(EMBED, HEADS)
    hm = jnp.asarray(hm_np, jnp.bfloat16)
    hmt = jnp.asarray(hm_np.T.copy(), jnp.bfloat16)

    # ---------------- assemble the single fused pallas_call --------------------
    ins, specs = [], []

    def add_blocked(arr, block):
        ins.append(arr)
        specs.append(pl.BlockSpec(block, lambda i: (i, 0)))

    def add_const(*arrs):
        for a in arrs:
            ins.append(a)
            specs.append(_const_spec(a.shape))

    add_blocked(xsv_blk, (Msv, INPLANE_S))
    add_blocked(score_blk, (Msv, 1))
    add_blocked(x3_blk, (T, INPLANE_M))
    add_const(adj_sv, adj_3d, hm, hmt)
    for p in params["single_view"]:
        add_const(p["w"], p["b"])
    es = params["encode_score"]
    add_const(es["w_feat"], es["w_score"], es["b"])
    for p in params["init3d"]:
        add_const(p["w"], p["b"])
    sa = params["self_attn"]
    add_const(sa["wq"], sa["bq"], sa["wkv"], sa["bkv"], sa["wo"], sa["bo"])
    add_const(params["ln_self"]["g"], params["ln_self"]["b"])
    for p in params["single_up"]:
        add_const(p["w"], p["b"])
    add_const(params["single_out"]["w"], params["single_out"]["b"])
    ca = params["cross_attn"]
    add_const(ca["wq"], ca["bq"], ca["wkv"], ca["bkv"], ca["wo"], ca["bo"])
    add_const(params["ln_cross"]["g"], params["ln_cross"]["b"])
    for p in params["final3d"]:
        add_const(p["w"], p["b"])
    add_const(params["output"]["w"], params["output"]["b"])

    upd_pad, fin_pad = pl.pallas_call(
        functools.partial(_fused_pose_gcn_kernel, V=V, PB=PB, K=Kk, E=EMBED, heads=HEADS),
        out_shape=(jax.ShapeDtypeStruct((NB * Msv, OUT_PAD), jnp.float32),
                   jax.ShapeDtypeStruct((NB * T, OUT_PAD), jnp.float32)),
        grid=(NB,),
        in_specs=specs,
        out_specs=(pl.BlockSpec((Msv, OUT_PAD), lambda i: (i, 0)),
                   pl.BlockSpec((T, OUT_PAD), lambda i: (i, 0))),
        compiler_params=pltpu.CompilerParams(dimension_semantics=("parallel",)),
    )(*ins)

    # ---------------- cheap elementwise postprocessing (XLA) -------------------
    upd = upd_pad.reshape(NB, V, PB, Kk, OUT_PAD)[..., :3]
    upd = upd.transpose(1, 0, 2, 3, 4).reshape(V, P, Kk, 3)
    fin = fin_pad.reshape(P, Kk, OUT_PAD)[..., :3]

    rp = current_pos + upd
    rp = jnp.where(valid_people[None, :, None, None], rp + mean_full[None], rp)
    refined_single_pos = (rp * SCALAR).reshape(V, B, Mp, Kk, 3)

    refined_pose = fin + origin_pos
    abs_residue = jnp.mean(jnp.sqrt(jnp.sum(fin ** 2, axis=-1)))
    refined_pose = jnp.where(valid_people[:, None, None], refined_pose + mean_full, refined_pose)
    refined_pose = (refined_pose * SCALAR).reshape(B, Mp, Kk, 3)
    return refined_pose, abs_residue, refined_single_pos


# ---------------------------------- main ---------------------------------------
if __name__ == "__main__":
    B, Mp, V = 2, 2, 3                         # batch, people-per-batch, views
    key = jax.random.PRNGKey(0)
    k1, k2, k3 = jax.random.split(key, 3)

    pose_single = jax.random.normal(k1, (V, B * Mp, K, INPLANE_S), jnp.float32) * 50.0
    det_score = jax.random.uniform(k2, (V, B * Mp, K, 1), jnp.float32)
    pose_single = pose_single.at[..., 6:7].set(det_score)           # channel 6 = score

    init_3d = jax.random.normal(k3, (B, Mp, K, INPLANE_M), jnp.float32) * 50.0
    init_3d = init_3d.at[..., 3].set(jnp.abs(init_3d[..., 3]) / 50.0)  # positive confidences

    params = init_params(jax.random.PRNGKey(42))
    adj_np = build_adjacency(K)

    fwd = jax.jit(lambda ps, i3: pose_gcn_forward(params, adj_np, ps, i3))
    refined_pose, abs_residue, refined_single_pos = fwd(pose_single, init_3d)
    jax.block_until_ready((refined_pose, abs_residue, refined_single_pos))

    assert refined_pose.shape == (B, Mp, K, 3)
    assert refined_single_pos.shape == (V, B, Mp, K, 3)
    assert abs_residue.shape == ()
    assert bool(jnp.all(jnp.isfinite(refined_pose)))
    assert bool(jnp.all(jnp.isfinite(refined_single_pos)))
    print("KERNEL_OK")
</pallas_src>

<mosaic_0001>
module attributes {stable_mosaic.version = 11 : i64} {
  func.func @_fused_pose_gcn_kernel(%arg0: i32, %arg1: memref<48x7xf32, #tpu.memory_space<vmem>>, %arg2: memref<48x1xf32, #tpu.memory_space<vmem>>, %arg3: memref<16x4xf32, #tpu.memory_space<vmem>>, %arg4: memref<48x48xbf16, #tpu.memory_space<vmem>>, %arg5: memref<16x16xbf16, #tpu.memory_space<vmem>>, %arg6: memref<256x4xbf16, #tpu.memory_space<vmem>>, %arg7: memref<4x256xbf16, #tpu.memory_space<vmem>>, %arg8: memref<7x32xbf16, #tpu.memory_space<vmem>>, %arg9: memref<1x32xf32, #tpu.memory_space<vmem>>, %arg10: memref<32x64xbf16, #tpu.memory_space<vmem>>, %arg11: memref<1x64xf32, #tpu.memory_space<vmem>>, %arg12: memref<64x128xbf16, #tpu.memory_space<vmem>>, %arg13: memref<1x128xf32, #tpu.memory_space<vmem>>, %arg14: memref<128x256xbf16, #tpu.memory_space<vmem>>, %arg15: memref<1x256xf32, #tpu.memory_space<vmem>>, %arg16: memref<256x256xbf16, #tpu.memory_space<vmem>>, %arg17: memref<1x256xf32, #tpu.memory_space<vmem>>, %arg18: memref<1x256xf32, #tpu.memory_space<vmem>>, %arg19: memref<4x32xbf16, #tpu.memory_space<vmem>>, %arg20: memref<1x32xf32, #tpu.memory_space<vmem>>, %arg21: memref<32x64xbf16, #tpu.memory_space<vmem>>, %arg22: memref<1x64xf32, #tpu.memory_space<vmem>>, %arg23: memref<64x128xbf16, #tpu.memory_space<vmem>>, %arg24: memref<1x128xf32, #tpu.memory_space<vmem>>, %arg25: memref<128x256xbf16, #tpu.memory_space<vmem>>, %arg26: memref<1x256xf32, #tpu.memory_space<vmem>>, %arg27: memref<256x256xbf16, #tpu.memory_space<vmem>>, %arg28: memref<1x256xf32, #tpu.memory_space<vmem>>, %arg29: memref<256x512xbf16, #tpu.memory_space<vmem>>, %arg30: memref<1x512xf32, #tpu.memory_space<vmem>>, %arg31: memref<256x256xbf16, #tpu.memory_space<vmem>>, %arg32: memref<1x256xf32, #tpu.memory_space<vmem>>, %arg33: memref<1x256xf32, #tpu.memory_space<vmem>>, %arg34: memref<1x256xf32, #tpu.memory_space<vmem>>, %arg35: memref<256x128xbf16, #tpu.memory_space<vmem>>, %arg36: memref<1x128xf32, #tpu.memory_space<vmem>>, %arg37: memref<128x128xbf16, #tpu.memory_space<vmem>>, %arg38: memref<1x128xf32, #tpu.memory_space<vmem>>, %arg39: memref<128x32xbf16, #tpu.memory_space<vmem>>, %arg40: memref<1x32xf32, #tpu.memory_space<vmem>>, %arg41: memref<32x32xbf16, #tpu.memory_space<vmem>>, %arg42: memref<1x32xf32, #tpu.memory_space<vmem>>, %arg43: memref<32x128xbf16, #tpu.memory_space<vmem>>, %arg44: memref<1x128xf32, #tpu.memory_space<vmem>>, %arg45: memref<256x256xbf16, #tpu.memory_space<vmem>>, %arg46: memref<1x256xf32, #tpu.memory_space<vmem>>, %arg47: memref<256x512xbf16, #tpu.memory_space<vmem>>, %arg48: memref<1x512xf32, #tpu.memory_space<vmem>>, %arg49: memref<256x256xbf16, #tpu.memory_space<vmem>>, %arg50: memref<1x256xf32, #tpu.memory_space<vmem>>, %arg51: memref<1x256xf32, #tpu.memory_space<vmem>>, %arg52: memref<1x256xf32, #tpu.memory_space<vmem>>, %arg53: memref<256x128xbf16, #tpu.memory_space<vmem>>, %arg54: memref<1x128xf32, #tpu.memory_space<vmem>>, %arg55: memref<128x128xbf16, #tpu.memory_space<vmem>>, %arg56: memref<1x128xf32, #tpu.memory_space<vmem>>, %arg57: memref<128x32xbf16, #tpu.memory_space<vmem>>, %arg58: memref<1x32xf32, #tpu.memory_space<vmem>>, %arg59: memref<32x32xbf16, #tpu.memory_space<vmem>>, %arg60: memref<1x32xf32, #tpu.memory_space<vmem>>, %arg61: memref<32x128xbf16, #tpu.memory_space<vmem>>, %arg62: memref<1x128xf32, #tpu.memory_space<vmem>>, %arg63: memref<48x128xf32, #tpu.memory_space<vmem>>, %arg64: memref<16x128xf32, #tpu.memory_space<vmem>>) attributes {dimension_semantics = [#tpu.dimension_semantics<parallel>], iteration_bounds = array<i64: 2>, scalar_prefetch = 0 : i64, scratch_operands = 0 : i64, tpu.core_type = #tpu.core_type<tc>, window_params = [{transform_indices = @transform_0, window_bounds = array<i64: 48, 7>}, {transform_indices = @transform_1, window_bounds = array<i64: 48, 1>}, {transform_indices = @transform_2, window_bounds = array<i64: 16, 4>}, {pipeline_mode = #tpu.pipeline_mode<synchronous>, transform_indices = @transform_3, window_bounds = array<i64: 48, 48>}, {pipeline_mode = #tpu.pipeline_mode<synchronous>, transform_indices = @transform_4, window_bounds = array<i64: 16, 16>}, {pipeline_mode = #tpu.pipeline_mode<synchronous>, transform_indices = @transform_5, window_bounds = array<i64: 256, 4>}, {pipeline_mode = #tpu.pipeline_mode<synchronous>, transform_indices = @transform_6, window_bounds = array<i64: 4, 256>}, {pipeline_mode = #tpu.pipeline_mode<synchronous>, transform_indices = @transform_7, window_bounds = array<i64: 7, 32>}, {pipeline_mode = #tpu.pipeline_mode<synchronous>, transform_indices = @transform_8, window_bounds = array<i64: 1, 32>}, {pipeline_mode = #tpu.pipeline_mode<synchronous>, transform_indices = @transform_9, window_bounds = array<i64: 32, 64>}, {pipeline_mode = #tpu.pipeline_mode<synchronous>, transform_indices = @transform_10, window_bounds = array<i64: 1, 64>}, {pipeline_mode = #tpu.pipeline_mode<synchronous>, transform_indices = @transform_11, window_bounds = array<i64: 64, 128>}, {pipeline_mode = #tpu.pipeline_mode<synchronous>, transform_indices = @transform_12, window_bounds = array<i64: 1, 128>}, {pipeline_mode = #tpu.pipeline_mode<synchronous>, transform_indices = @transform_13, window_bounds = array<i64: 128, 256>}, {pipeline_mode = #tpu.pipeline_mode<synchronous>, transform_indices = @transform_14, window_bounds = array<i64: 1, 256>}, {pipeline_mode = #tpu.pipeline_mode<synchronous>, transform_indices = @transform_15, window_bounds = array<i64: 256, 256>}, {pipeline_mode = #tpu.pipeline_mode<synchronous>, transform_indices = @transform_16, window_bounds = array<i64: 1, 256>}, {pipeline_mode = #tpu.pipeline_mode<synchronous>, transform_indices = @transform_17, window_bounds = array<i64: 1, 256>}, {pipeline_mode = #tpu.pipeline_mode<synchronous>, transform_indices = @transform_18, window_bounds = array<i64: 4, 32>}, {pipeline_mode = #tpu.pipeline_mode<synchronous>, transform_indices = @transform_19, window_bounds = array<i64: 1, 32>}, {pipeline_mode = #tpu.pipeline_mode<synchronous>, transform_indices = @transform_20, window_bounds = array<i64: 32, 64>}, {pipeline_mode = #tpu.pipeline_mode<synchronous>, transform_indices = @transform_21, window_bounds = array<i64: 1, 64>}, {pipeline_mode = #tpu.pipeline_mode<synchronous>, transform_indices = @transform_22, window_bounds = array<i64: 64, 128>}, {pipeline_mode = #tpu.pipeline_mode<synchronous>, transform_indices = @transform_23, window_bounds = array<i64: 1, 128>}, {pipeline_mode = #tpu.pipeline_mode<synchronous>, transform_indices = @transform_24, window_bounds = array<i64: 128, 256>}, {pipeline_mode = #tpu.pipeline_mode<synchronous>, transform_indices = @transform_25, window_bounds = array<i64: 1, 256>}, {pipeline_mode = #tpu.pipeline_mode<synchronous>, transform_indices = @transform_26, window_bounds = array<i64: 256, 256>}, {pipeline_mode = #tpu.pipeline_mode<synchronous>, transform_indices = @transform_27, window_bounds = array<i64: 1, 256>}, {pipeline_mode = #tpu.pipeline_mode<synchronous>, transform_indices = @transform_28, window_bounds = array<i64: 256, 512>}, {pipeline_mode = #tpu.pipeline_mode<synchronous>, transform_indices = @transform_29, window_bounds = array<i64: 1, 512>}, {pipeline_mode = #tpu.pipeline_mode<synchronous>, transform_indices = @transform_30, window_bounds = array<i64: 256, 256>}, {pipeline_mode = #tpu.pipeline_mode<synchronous>, transform_indices = @transform_31, window_bounds = array<i64: 1, 256>}, {pipeline_mode = #tpu.pipeline_mode<synchronous>, transform_indices = @transform_32, window_bounds = array<i64: 1, 256>}, {pipeline_mode = #tpu.pipeline_mode<synchronous>, transform_indices = @transform_33, window_bounds = array<i64: 1, 256>}, {pipeline_mode = #tpu.pipeline_mode<synchronous>, transform_indices = @transform_34, window_bounds = array<i64: 256, 128>}, {pipeline_mode = #tpu.pipeline_mode<synchronous>, transform_indices = @transform_35, window_bounds = array<i64: 1, 128>}, {pipeline_mode = #tpu.pipeline_mode<synchronous>, transform_indices = @transform_36, window_bounds = array<i64: 128, 128>}, {pipeline_mode = #tpu.pipeline_mode<synchronous>, transform_indices = @transform_37, window_bounds = array<i64: 1, 128>}, {pipeline_mode = #tpu.pipeline_mode<synchronous>, transform_indices = @transform_38, window_bounds = array<i64: 128, 32>}, {pipeline_mode = #tpu.pipeline_mode<synchronous>, transform_indices = @transform_39, window_bounds = array<i64: 1, 32>}, {pipeline_mode = #tpu.pipeline_mode<synchronous>, transform_indices = @transform_40, window_bounds = array<i64: 32, 32>}, {pipeline_mode = #tpu.pipeline_mode<synchronous>, transform_indices = @transform_41, window_bounds = array<i64: 1, 32>}, {pipeline_mode = #tpu.pipeline_mode<synchronous>, transform_indices = @transform_42, window_bounds = array<i64: 32, 128>}, {pipeline_mode = #tpu.pipeline_mode<synchronous>, transform_indices = @transform_43, window_bounds = array<i64: 1, 128>}, {pipeline_mode = #tpu.pipeline_mode<synchronous>, transform_indices = @transform_44, window_bounds = array<i64: 256, 256>}, {pipeline_mode = #tpu.pipeline_mode<synchronous>, transform_indices = @transform_45, window_bounds = array<i64: 1, 256>}, {pipeline_mode = #tpu.pipeline_mode<synchronous>, transform_indices = @transform_46, window_bounds = array<i64: 256, 512>}, {pipeline_mode = #tpu.pipeline_mode<synchronous>, transform_indices = @transform_47, window_bounds = array<i64: 1, 512>}, {pipeline_mode = #tpu.pipeline_mode<synchronous>, transform_indices = @transform_48, window_bounds = array<i64: 256, 256>}, {pipeline_mode = #tpu.pipeline_mode<synchronous>, transform_indices = @transform_49, window_bounds = array<i64: 1, 256>}, {pipeline_mode = #tpu.pipeline_mode<synchronous>, transform_indices = @transform_50, window_bounds = array<i64: 1, 256>}, {pipeline_mode = #tpu.pipeline_mode<synchronous>, transform_indices = @transform_51, window_bounds = array<i64: 1, 256>}, {pipeline_mode = #tpu.pipeline_mode<synchronous>, transform_indices = @transform_52, window_bounds = array<i64: 256, 128>}, {pipeline_mode = #tpu.pipeline_mode<synchronous>, transform_indices = @transform_53, window_bounds = array<i64: 1, 128>}, {pipeline_mode = #tpu.pipeline_mode<synchronous>, transform_indices = @transform_54, window_bounds = array<i64: 128, 128>}, {pipeline_mode = #tpu.pipeline_mode<synchronous>, transform_indices = @transform_55, window_bounds = array<i64: 1, 128>}, {pipeline_mode = #tpu.pipeline_mode<synchronous>, transform_indices = @transform_56, window_bounds = array<i64: 128, 32>}, {pipeline_mode = #tpu.pipeline_mode<synchronous>, transform_indices = @transform_57, window_bounds = array<i64: 1, 32>}, {pipeline_mode = #tpu.pipeline_mode<synchronous>, transform_indices = @transform_58, window_bounds = array<i64: 32, 32>}, {pipeline_mode = #tpu.pipeline_mode<synchronous>, transform_indices = @transform_59, window_bounds = array<i64: 1, 32>}, {pipeline_mode = #tpu.pipeline_mode<synchronous>, transform_indices = @transform_60, window_bounds = array<i64: 32, 128>}, {pipeline_mode = #tpu.pipeline_mode<synchronous>, transform_indices = @transform_61, window_bounds = array<i64: 1, 128>}, {transform_indices = @transform_62, window_bounds = array<i64: 48, 128>}, {transform_indices = @transform_63, window_bounds = array<i64: 16, 128>}]} {
    %c0 = arith.constant 0 : index
    %c0_0 = arith.constant 0 : index
    %0 = vector.load %arg1[%c0, %c0_0] : memref<48x7xf32, #tpu.memory_space<vmem>>, vector<48x7xf32>
    %c0_1 = arith.constant 0 : index
    %c0_2 = arith.constant 0 : index
    %1 = vector.load %arg2[%c0_1, %c0_2] : memref<48x1xf32, #tpu.memory_space<vmem>>, vector<48x1xf32>
    %c0_3 = arith.constant 0 : index
    %c0_4 = arith.constant 0 : index
    %2 = vector.load %arg3[%c0_3, %c0_4] : memref<16x4xf32, #tpu.memory_space<vmem>>, vector<16x4xf32>
    %c0_5 = arith.constant 0 : index
    %c0_6 = arith.constant 0 : index
    %3 = vector.load %arg4[%c0_5, %c0_6] : memref<48x48xbf16, #tpu.memory_space<vmem>>, vector<48x48xbf16>
    %c0_7 = arith.constant 0 : index
    %c0_8 = arith.constant 0 : index
    %4 = vector.load %arg5[%c0_7, %c0_8] : memref<16x16xbf16, #tpu.memory_space<vmem>>, vector<16x16xbf16>
    %c0_9 = arith.constant 0 : index
    %c0_10 = arith.constant 0 : index
    %5 = vector.load %arg6[%c0_9, %c0_10] : memref<256x4xbf16, #tpu.memory_space<vmem>>, vector<256x4xbf16>
    %c0_11 = arith.constant 0 : index
    %c0_12 = arith.constant 0 : index
    %6 = vector.load %arg7[%c0_11, %c0_12] : memref<4x256xbf16, #tpu.memory_space<vmem>>, vector<4x256xbf16>
    %c0_13 = arith.constant 0 : index
    %c0_14 = arith.constant 0 : index
    %7 = vector.load %arg8[%c0_13, %c0_14] : memref<7x32xbf16, #tpu.memory_space<vmem>>, vector<7x32xbf16>
    %c0_15 = arith.constant 0 : index
    %c0_16 = arith.constant 0 : index
    %8 = vector.load %arg9[%c0_15, %c0_16] : memref<1x32xf32, #tpu.memory_space<vmem>>, vector<1x32xf32>
    %c0_17 = arith.constant 0 : index
    %c0_18 = arith.constant 0 : index
    %9 = vector.load %arg10[%c0_17, %c0_18] : memref<32x64xbf16, #tpu.memory_space<vmem>>, vector<32x64xbf16>
    %c0_19 = arith.constant 0 : index
    %c0_20 = arith.constant 0 : index
    %10 = vector.load %arg11[%c0_19, %c0_20] : memref<1x64xf32, #tpu.memory_space<vmem>>, vector<1x64xf32>
    %c0_21 = arith.constant 0 : index
    %c0_22 = arith.constant 0 : index
    %11 = vector.load %arg12[%c0_21, %c0_22] : memref<64x128xbf16, #tpu.memory_space<vmem>>, vector<64x128xbf16>
    %c0_23 = arith.constant 0 : index
    %c0_24 = arith.constant 0 : index
    %12 = vector.load %arg13[%c0_23, %c0_24] : memref<1x128xf32, #tpu.memory_space<vmem>>, vector<1x128xf32>
    %c0_25 = arith.constant 0 : index
    %c0_26 = arith.constant 0 : index
    %13 = vector.load %arg14[%c0_25, %c0_26] : memref<128x256xbf16, #tpu.memory_space<vmem>>, vector<128x256xbf16>
    %c0_27 = arith.constant 0 : index
    %c0_28 = arith.constant 0 : index
    %14 = vector.load %arg15[%c0_27, %c0_28] : memref<1x256xf32, #tpu.memory_space<vmem>>, vector<1x256xf32>
    %c0_29 = arith.constant 0 : index
    %c0_30 = arith.constant 0 : index
    %15 = vector.load %arg16[%c0_29, %c0_30] : memref<256x256xbf16, #tpu.memory_space<vmem>>, vector<256x256xbf16>
    %c0_31 = arith.constant 0 : index
    %c0_32 = arith.constant 0 : index
    %16 = vector.load %arg17[%c0_31, %c0_32] : memref<1x256xf32, #tpu.memory_space<vmem>>, vector<1x256xf32>
    %c0_33 = arith.constant 0 : index
    %c0_34 = arith.constant 0 : index
    %17 = vector.load %arg18[%c0_33, %c0_34] : memref<1x256xf32, #tpu.memory_space<vmem>>, vector<1x256xf32>
    %c0_35 = arith.constant 0 : index
    %c0_36 = arith.constant 0 : index
    %18 = vector.load %arg19[%c0_35, %c0_36] : memref<4x32xbf16, #tpu.memory_space<vmem>>, vector<4x32xbf16>
    %c0_37 = arith.constant 0 : index
    %c0_38 = arith.constant 0 : index
    %19 = vector.load %arg20[%c0_37, %c0_38] : memref<1x32xf32, #tpu.memory_space<vmem>>, vector<1x32xf32>
    %c0_39 = arith.constant 0 : index
    %c0_40 = arith.constant 0 : index
    %20 = vector.load %arg21[%c0_39, %c0_40] : memref<32x64xbf16, #tpu.memory_space<vmem>>, vector<32x64xbf16>
    %c0_41 = arith.constant 0 : index
    %c0_42 = arith.constant 0 : index
    %21 = vector.load %arg22[%c0_41, %c0_42] : memref<1x64xf32, #tpu.memory_space<vmem>>, vector<1x64xf32>
    %c0_43 = arith.constant 0 : index
    %c0_44 = arith.constant 0 : index
    %22 = vector.load %arg23[%c0_43, %c0_44] : memref<64x128xbf16, #tpu.memory_space<vmem>>, vector<64x128xbf16>
    %c0_45 = arith.constant 0 : index
    %c0_46 = arith.constant 0 : index
    %23 = vector.load %arg24[%c0_45, %c0_46] : memref<1x128xf32, #tpu.memory_space<vmem>>, vector<1x128xf32>
    %c0_47 = arith.constant 0 : index
    %c0_48 = arith.constant 0 : index
    %24 = vector.load %arg25[%c0_47, %c0_48] : memref<128x256xbf16, #tpu.memory_space<vmem>>, vector<128x256xbf16>
    %c0_49 = arith.constant 0 : index
    %c0_50 = arith.constant 0 : index
    %25 = vector.load %arg26[%c0_49, %c0_50] : memref<1x256xf32, #tpu.memory_space<vmem>>, vector<1x256xf32>
    %c0_51 = arith.constant 0 : index
    %c0_52 = arith.constant 0 : index
    %26 = vector.load %arg27[%c0_51, %c0_52] : memref<256x256xbf16, #tpu.memory_space<vmem>>, vector<256x256xbf16>
    %c0_53 = arith.constant 0 : index
    %c0_54 = arith.constant 0 : index
    %27 = vector.load %arg28[%c0_53, %c0_54] : memref<1x256xf32, #tpu.memory_space<vmem>>, vector<1x256xf32>
    %c0_55 = arith.constant 0 : index
    %c0_56 = arith.constant 0 : index
    %28 = vector.load %arg29[%c0_55, %c0_56] : memref<256x512xbf16, #tpu.memory_space<vmem>>, vector<256x512xbf16>
    %c0_57 = arith.constant 0 : index
    %c0_58 = arith.constant 0 : index
    %29 = vector.load %arg30[%c0_57, %c0_58] : memref<1x512xf32, #tpu.memory_space<vmem>>, vector<1x512xf32>
    %c0_59 = arith.constant 0 : index
    %c0_60 = arith.constant 0 : index
    %30 = vector.load %arg31[%c0_59, %c0_60] : memref<256x256xbf16, #tpu.memory_space<vmem>>, vector<256x256xbf16>
    %c0_61 = arith.constant 0 : index
    %c0_62 = arith.constant 0 : index
    %31 = vector.load %arg32[%c0_61, %c0_62] : memref<1x256xf32, #tpu.memory_space<vmem>>, vector<1x256xf32>
    %c0_63 = arith.constant 0 : index
    %c0_64 = arith.constant 0 : index
    %32 = vector.load %arg33[%c0_63, %c0_64] : memref<1x256xf32, #tpu.memory_space<vmem>>, vector<1x256xf32>
    %c0_65 = arith.constant 0 : index
    %c0_66 = arith.constant 0 : index
    %33 = vector.load %arg34[%c0_65, %c0_66] : memref<1x256xf32, #tpu.memory_space<vmem>>, vector<1x256xf32>
    %c0_67 = arith.constant 0 : index
    %c0_68 = arith.constant 0 : index
    %34 = vector.load %arg35[%c0_67, %c0_68] : memref<256x128xbf16, #tpu.memory_space<vmem>>, vector<256x128xbf16>
    %c0_69 = arith.constant 0 : index
    %c0_70 = arith.constant 0 : index
    %35 = vector.load %arg36[%c0_69, %c0_70] : memref<1x128xf32, #tpu.memory_space<vmem>>, vector<1x128xf32>
    %c0_71 = arith.constant 0 : index
    %c0_72 = arith.constant 0 : index
    %36 = vector.load %arg37[%c0_71, %c0_72] : memref<128x128xbf16, #tpu.memory_space<vmem>>, vector<128x128xbf16>
    %c0_73 = arith.constant 0 : index
    %c0_74 = arith.constant 0 : index
    %37 = vector.load %arg38[%c0_73, %c0_74] : memref<1x128xf32, #tpu.memory_space<vmem>>, vector<1x128xf32>
    %c0_75 = arith.constant 0 : index
    %c0_76 = arith.constant 0 : index
    %38 = vector.load %arg39[%c0_75, %c0_76] : memref<128x32xbf16, #tpu.memory_space<vmem>>, vector<128x32xbf16>
    %c0_77 = arith.constant 0 : index
    %c0_78 = arith.constant 0 : index
    %39 = vector.load %arg40[%c0_77, %c0_78] : memref<1x32xf32, #tpu.memory_space<vmem>>, vector<1x32xf32>
    %c0_79 = arith.constant 0 : index
    %c0_80 = arith.constant 0 : index
    %40 = vector.load %arg41[%c0_79, %c0_80] : memref<32x32xbf16, #tpu.memory_space<vmem>>, vector<32x32xbf16>
    %c0_81 = arith.constant 0 : index
    %c0_82 = arith.constant 0 : index
    %41 = vector.load %arg42[%c0_81, %c0_82] : memref<1x32xf32, #tpu.memory_space<vmem>>, vector<1x32xf32>
    %c0_83 = arith.constant 0 : index
    %c0_84 = arith.constant 0 : index
    %42 = vector.load %arg43[%c0_83, %c0_84] : memref<32x128xbf16, #tpu.memory_space<vmem>>, vector<32x128xbf16>
    %c0_85 = arith.constant 0 : index
    %c0_86 = arith.constant 0 : index
    %43 = vector.load %arg44[%c0_85, %c0_86] : memref<1x128xf32, #tpu.memory_space<vmem>>, vector<1x128xf32>
    %c0_87 = arith.constant 0 : index
    %c0_88 = arith.constant 0 : index
    %44 = vector.load %arg45[%c0_87, %c0_88] : memref<256x256xbf16, #tpu.memory_space<vmem>>, vector<256x256xbf16>
    %c0_89 = arith.constant 0 : index
    %c0_90 = arith.constant 0 : index
    %45 = vector.load %arg46[%c0_89, %c0_90] : memref<1x256xf32, #tpu.memory_space<vmem>>, vector<1x256xf32>
    %c0_91 = arith.constant 0 : index
    %c0_92 = arith.constant 0 : index
    %46 = vector.load %arg47[%c0_91, %c0_92] : memref<256x512xbf16, #tpu.memory_space<vmem>>, vector<256x512xbf16>
    %c0_93 = arith.constant 0 : index
    %c0_94 = arith.constant 0 : index
    %47 = vector.load %arg48[%c0_93, %c0_94] : memref<1x512xf32, #tpu.memory_space<vmem>>, vector<1x512xf32>
    %c0_95 = arith.constant 0 : index
    %c0_96 = arith.constant 0 : index
    %48 = vector.load %arg49[%c0_95, %c0_96] : memref<256x256xbf16, #tpu.memory_space<vmem>>, vector<256x256xbf16>
    %c0_97 = arith.constant 0 : index
    %c0_98 = arith.constant 0 : index
    %49 = vector.load %arg50[%c0_97, %c0_98] : memref<1x256xf32, #tpu.memory_space<vmem>>, vector<1x256xf32>
    %c0_99 = arith.constant 0 : index
    %c0_100 = arith.constant 0 : index
    %50 = vector.load %arg51[%c0_99, %c0_100] : memref<1x256xf32, #tpu.memory_space<vmem>>, vector<1x256xf32>
    %c0_101 = arith.constant 0 : index
    %c0_102 = arith.constant 0 : index
    %51 = vector.load %arg52[%c0_101, %c0_102] : memref<1x256xf32, #tpu.memory_space<vmem>>, vector<1x256xf32>
    %c0_103 = arith.constant 0 : index
    %c0_104 = arith.constant 0 : index
    %52 = vector.load %arg53[%c0_103, %c0_104] : memref<256x128xbf16, #tpu.memory_space<vmem>>, vector<256x128xbf16>
    %c0_105 = arith.constant 0 : index
    %c0_106 = arith.constant 0 : index
    %53 = vector.load %arg54[%c0_105, %c0_106] : memref<1x128xf32, #tpu.memory_space<vmem>>, vector<1x128xf32>
    %c0_107 = arith.constant 0 : index
    %c0_108 = arith.constant 0 : index
    %54 = vector.load %arg55[%c0_107, %c0_108] : memref<128x128xbf16, #tpu.memory_space<vmem>>, vector<128x128xbf16>
    %c0_109 = arith.constant 0 : index
    %c0_110 = arith.constant 0 : index
    %55 = vector.load %arg56[%c0_109, %c0_110] : memref<1x128xf32, #tpu.memory_space<vmem>>, vector<1x128xf32>
    %c0_111 = arith.constant 0 : index
    %c0_112 = arith.constant 0 : index
    %56 = vector.load %arg57[%c0_111, %c0_112] : memref<128x32xbf16, #tpu.memory_space<vmem>>, vector<128x32xbf16>
    %c0_113 = arith.constant 0 : index
    %c0_114 = arith.constant 0 : index
    %57 = vector.load %arg58[%c0_113, %c0_114] : memref<1x32xf32, #tpu.memory_space<vmem>>, vector<1x32xf32>
    %c0_115 = arith.constant 0 : index
    %c0_116 = arith.constant 0 : index
    %58 = vector.load %arg59[%c0_115, %c0_116] : memref<32x32xbf16, #tpu.memory_space<vmem>>, vector<32x32xbf16>
    %c0_117 = arith.constant 0 : index
    %c0_118 = arith.constant 0 : index
    %59 = vector.load %arg60[%c0_117, %c0_118] : memref<1x32xf32, #tpu.memory_space<vmem>>, vector<1x32xf32>
    %c0_119 = arith.constant 0 : index
    %c0_120 = arith.constant 0 : index
    %60 = vector.load %arg61[%c0_119, %c0_120] : memref<32x128xbf16, #tpu.memory_space<vmem>>, vector<32x128xbf16>
    %c0_121 = arith.constant 0 : index
    %c0_122 = arith.constant 0 : index
    %61 = vector.load %arg62[%c0_121, %c0_122] : memref<1x128xf32, #tpu.memory_space<vmem>>, vector<1x128xf32>
    %62 = arith.truncf %0 : vector<48x7xf32> to vector<48x7xbf16>
    %cst = arith.constant dense<0.000000e+00> : vector<48x7xf32>
    %63 = tpu.matmul %3, %62, %cst {dimension_numbers = #tpu.dot_dimension_numbers<[1], [0], [0], [1], [0, 0, 1, 1], [], []>} : vector<48x48xbf16>, vector<48x7xbf16>, vector<48x7xf32> -> vector<48x7xf32>
    %64 = arith.truncf %63 : vector<48x7xf32> to vector<48x7xbf16>
    %cst_123 = arith.constant dense<0.000000e+00> : vector<48x32xf32>
    %65 = tpu.matmul %64, %7, %cst_123 {dimension_numbers = #tpu.dot_dimension_numbers<[1], [0], [0], [1], [0, 0, 1, 1], [], []>} : vector<48x7xbf16>, vector<7x32xbf16>, vector<48x32xf32> -> vector<48x32xf32>
    %66 = vector.broadcast %8 : vector<1x32xf32> to vector<48x32xf32>
    %67 = arith.addf %65, %66 : vector<48x32xf32>
    %cst_124 = arith.constant 0.000000e+00 : f32
    %68 = vector.broadcast %cst_124 : f32 to vector<48x32xf32>
    %69 = arith.maximumf %67, %68 : vector<48x32xf32>
    %70 = arith.truncf %69 : vector<48x32xf32> to vector<48x32xbf16>
    %cst_125 = arith.constant dense<0.000000e+00> : vector<48x32xf32>
    %71 = tpu.matmul %3, %70, %cst_125 {dimension_numbers = #tpu.dot_dimension_numbers<[1], [0], [0], [1], [0, 0, 1, 1], [], []>} : vector<48x48xbf16>, vector<48x32xbf16>, vector<48x32xf32> -> vector<48x32xf32>
    %72 = arith.truncf %71 : vector<48x32xf32> to vector<48x32xbf16>
    %cst_126 = arith.constant dense<0.000000e+00> : vector<48x64xf32>
    %73 = tpu.matmul %72, %9, %cst_126 {dimension_numbers = #tpu.dot_dimension_numbers<[1], [0], [0], [1], [0, 0, 1, 1], [], []>} : vector<48x32xbf16>, vector<32x64xbf16>, vector<48x64xf32> -> vector<48x64xf32>
    %74 = vector.broadcast %10 : vector<1x64xf32> to vector<48x64xf32>
    %75 = arith.addf %73, %74 : vector<48x64xf32>
    %cst_127 = arith.constant 0.000000e+00 : f32
    %76 = vector.broadcast %cst_127 : f32 to vector<48x64xf32>
    %77 = arith.maximumf %75, %76 : vector<48x64xf32>
    %78 = arith.truncf %77 : vector<48x64xf32> to vector<48x64xbf16>
    %cst_128 = arith.constant dense<0.000000e+00> : vector<48x64xf32>
    %79 = tpu.matmul %3, %78, %cst_128 {dimension_numbers = #tpu.dot_dimension_numbers<[1], [0], [0], [1], [0, 0, 1, 1], [], []>} : vector<48x48xbf16>, vector<48x64xbf16>, vector<48x64xf32> -> vector<48x64xf32>
    %80 = arith.truncf %79 : vector<48x64xf32> to vector<48x64xbf16>
    %cst_129 = arith.constant dense<0.000000e+00> : vector<48x128xf32>
    %81 = tpu.matmul %80, %11, %cst_129 {dimension_numbers = #tpu.dot_dimension_numbers<[1], [0], [0], [1], [0, 0, 1, 1], [], []>} : vector<48x64xbf16>, vector<64x128xbf16>, vector<48x128xf32> -> vector<48x128xf32>
    %82 = vector.broadcast %12 : vector<1x128xf32> to vector<48x128xf32>
    %83 = arith.addf %81, %82 : vector<48x128xf32>
    %cst_130 = arith.constant 0.000000e+00 : f32
    %84 = vector.broadcast %cst_130 : f32 to vector<48x128xf32>
    %85 = arith.maximumf %83, %84 : vector<48x128xf32>
    %86 = arith.truncf %85 : vector<48x128xf32> to vector<48x128xbf16>
    %cst_131 = arith.constant dense<0.000000e+00> : vector<48x128xf32>
    %87 = tpu.matmul %3, %86, %cst_131 {dimension_numbers = #tpu.dot_dimension_numbers<[1], [0], [0], [1], [0, 0, 1, 1], [], []>} : vector<48x48xbf16>, vector<48x128xbf16>, vector<48x128xf32> -> vector<48x128xf32>
    %88 = arith.truncf %87 : vector<48x128xf32> to vector<48x128xbf16>
    %cst_132 = arith.constant dense<0.000000e+00> : vector<48x256xf32>
    %89 = tpu.matmul %88, %13, %cst_132 {dimension_numbers = #tpu.dot_dimension_numbers<[1], [0], [0], [1], [0, 0, 1, 1], [], []>} : vector<48x128xbf16>, vector<128x256xbf16>, vector<48x256xf32> -> vector<48x256xf32>
    %90 = vector.broadcast %14 : vector<1x256xf32> to vector<48x256xf32>
    %91 = arith.addf %89, %90 : vector<48x256xf32>
    %cst_133 = arith.constant 0.000000e+00 : f32
    %92 = vector.broadcast %cst_133 : f32 to vector<48x256xf32>
    %93 = arith.maximumf %91, %92 : vector<48x256xf32>
    %94 = arith.truncf %93 : vector<48x256xf32> to vector<48x256xbf16>
    %cst_134 = arith.constant dense<0.000000e+00> : vector<48x256xf32>
    %95 = tpu.matmul %94, %15, %cst_134 {dimension_numbers = #tpu.dot_dimension_numbers<[1], [0], [0], [1], [0, 0, 1, 1], [], []>} : vector<48x256xbf16>, vector<256x256xbf16>, vector<48x256xf32> -> vector<48x256xf32>
    %96 = vector.broadcast %1 : vector<48x1xf32> to vector<48x256xf32>
    %97 = vector.broadcast %16 : vector<1x256xf32> to vector<48x256xf32>
    %98 = arith.mulf %96, %97 : vector<48x256xf32>
    %99 = arith.addf %95, %98 : vector<48x256xf32>
    %100 = vector.broadcast %17 : vector<1x256xf32> to vector<48x256xf32>
    %101 = arith.addf %99, %100 : vector<48x256xf32>
    %cst_135 = arith.constant 0.000000e+00 : f32
    %102 = vector.broadcast %cst_135 : f32 to vector<48x256xf32>
    %103 = arith.maximumf %101, %102 : vector<48x256xf32>
    %104 = arith.truncf %2 : vector<16x4xf32> to vector<16x4xbf16>
    %cst_136 = arith.constant dense<0.000000e+00> : vector<16x4xf32>
    %105 = tpu.matmul %4, %104, %cst_136 {dimension_numbers = #tpu.dot_dimension_numbers<[1], [0], [0], [1], [0, 0, 1, 1], [], []>} : vector<16x16xbf16>, vector<16x4xbf16>, vector<16x4xf32> -> vector<16x4xf32>
    %106 = arith.truncf %105 : vector<16x4xf32> to vector<16x4xbf16>
    %cst_137 = arith.constant dense<0.000000e+00> : vector<16x32xf32>
    %107 = tpu.matmul %106, %18, %cst_137 {dimension_numbers = #tpu.dot_dimension_numbers<[1], [0], [0], [1], [0, 0, 1, 1], [], []>} : vector<16x4xbf16>, vector<4x32xbf16>, vector<16x32xf32> -> vector<16x32xf32>
    %108 = vector.broadcast %19 : vector<1x32xf32> to vector<16x32xf32>
    %109 = arith.addf %107, %108 : vector<16x32xf32>
    %cst_138 = arith.constant 0.000000e+00 : f32
    %110 = vector.broadcast %cst_138 : f32 to vector<16x32xf32>
    %111 = arith.maximumf %109, %110 : vector<16x32xf32>
    %112 = arith.truncf %111 : vector<16x32xf32> to vector<16x32xbf16>
    %cst_139 = arith.constant dense<0.000000e+00> : vector<16x32xf32>
    %113 = tpu.matmul %4, %112, %cst_139 {dimension_numbers = #tpu.dot_dimension_numbers<[1], [0], [0], [1], [0, 0, 1, 1], [], []>} : vector<16x16xbf16>, vector<16x32xbf16>, vector<16x32xf32> -> vector<16x32xf32>
    %114 = arith.truncf %113 : vector<16x32xf32> to vector<16x32xbf16>
    %cst_140 = arith.constant dense<0.000000e+00> : vector<16x64xf32>
    %115 = tpu.matmul %114, %20, %cst_140 {dimension_numbers = #tpu.dot_dimension_numbers<[1], [0], [0], [1], [0, 0, 1, 1], [], []>} : vector<16x32xbf16>, vector<32x64xbf16>, vector<16x64xf32> -> vector<16x64xf32>
    %116 = vector.broadcast %21 : vector<1x64xf32> to vector<16x64xf32>
    %117 = arith.addf %115, %116 : vector<16x64xf32>
    %cst_141 = arith.constant 0.000000e+00 : f32
    %118 = vector.broadcast %cst_141 : f32 to vector<16x64xf32>
    %119 = arith.maximumf %117, %118 : vector<16x64xf32>
    %120 = arith.truncf %119 : vector<16x64xf32> to vector<16x64xbf16>
    %cst_142 = arith.constant dense<0.000000e+00> : vector<16x64xf32>
    %121 = tpu.matmul %4, %120, %cst_142 {dimension_numbers = #tpu.dot_dimension_numbers<[1], [0], [0], [1], [0, 0, 1, 1], [], []>} : vector<16x16xbf16>, vector<16x64xbf16>, vector<16x64xf32> -> vector<16x64xf32>
    %122 = arith.truncf %121 : vector<16x64xf32> to vector<16x64xbf16>
    %cst_143 = arith.constant dense<0.000000e+00> : vector<16x128xf32>
    %123 = tpu.matmul %122, %22, %cst_143 {dimension_numbers = #tpu.dot_dimension_numbers<[1], [0], [0], [1], [0, 0, 1, 1], [], []>} : vector<16x64xbf16>, vector<64x128xbf16>, vector<16x128xf32> -> vector<16x128xf32>
    %124 = vector.broadcast %23 : vector<1x128xf32> to vector<16x128xf32>
    %125 = arith.addf %123, %124 : vector<16x128xf32>
    %cst_144 = arith.constant 0.000000e+00 : f32
    %126 = vector.broadcast %cst_144 : f32 to vector<16x128xf32>
    %127 = arith.maximumf %125, %126 : vector<16x128xf32>
    %128 = arith.truncf %127 : vector<16x128xf32> to vector<16x128xbf16>
    %cst_145 = arith.constant dense<0.000000e+00> : vector<16x128xf32>
    %129 = tpu.matmul %4, %128, %cst_145 {dimension_numbers = #tpu.dot_dimension_numbers<[1], [0], [0], [1], [0, 0, 1, 1], [], []>} : vector<16x16xbf16>, vector<16x128xbf16>, vector<16x128xf32> -> vector<16x128xf32>
    %130 = arith.truncf %129 : vector<16x128xf32> to vector<16x128xbf16>
    %cst_146 = arith.constant dense<0.000000e+00> : vector<16x256xf32>
    %131 = tpu.matmul %130, %24, %cst_146 {dimension_numbers = #tpu.dot_dimension_numbers<[1], [0], [0], [1], [0, 0, 1, 1], [], []>} : vector<16x128xbf16>, vector<128x256xbf16>, vector<16x256xf32> -> vector<16x256xf32>
    %132 = vector.broadcast %25 : vector<1x256xf32> to vector<16x256xf32>
    %133 = arith.addf %131, %132 : vector<16x256xf32>
    %cst_147 = arith.constant 0.000000e+00 : f32
    %134 = vector.broadcast %cst_147 : f32 to vector<16x256xf32>
    %135 = arith.maximumf %133, %134 : vector<16x256xf32>
    %136 = arith.truncf %103 : vector<48x256xf32> to vector<48x256xbf16>
    %cst_148 = arith.constant dense<0.000000e+00> : vector<48x256xf32>
    %137 = tpu.matmul %136, %26, %cst_148 {dimension_numbers = #tpu.dot_dimension_numbers<[1], [0], [0], [1], [0, 0, 1, 1], [], []>} : vector<48x256xbf16>, vector<256x256xbf16>, vector<48x256xf32> -> vector<48x256xf32>
    %138 = vector.broadcast %27 : vector<1x256xf32> to vector<48x256xf32>
    %139 = arith.addf %137, %138 : vector<48x256xf32>
    %140 = arith.truncf %103 : vector<48x256xf32> to vector<48x256xbf16>
    %cst_149 = arith.constant dense<0.000000e+00> : vector<48x512xf32>
    %141 = tpu.matmul %140, %28, %cst_149 {dimension_numbers = #tpu.dot_dimension_numbers<[1], [0], [0], [1], [0, 0, 1, 1], [], []>} : vector<48x256xbf16>, vector<256x512xbf16>, vector<48x512xf32> -> vector<48x512xf32>
    %142 = vector.broadcast %29 : vector<1x512xf32> to vector<48x512xf32>
    %143 = arith.addf %141, %142 : vector<48x512xf32>
    %144 = vector.extract_strided_slice %143 {offsets = [0, 0], sizes = [48, 256], strides = [1, 1]} : vector<48x512xf32> to vector<48x256xf32>
    %145 = vector.extract_strided_slice %143 {offsets = [0, 256], sizes = [48, 256], strides = [1, 1]} : vector<48x512xf32> to vector<48x256xf32>
    %146 = vector.extract_strided_slice %139 {offsets = [0, 0], sizes = [16, 256], strides = [1, 1]} : vector<48x256xf32> to vector<16x256xf32>
    %147 = vector.extract_strided_slice %144 {offsets = [16, 0], sizes = [16, 256], strides = [1, 1]} : vector<48x256xf32> to vector<16x256xf32>
    %148 = arith.mulf %146, %147 : vector<16x256xf32>
    %149 = vector.extract_strided_slice %144 {offsets = [32, 0], sizes = [16, 256], strides = [1, 1]} : vector<48x256xf32> to vector<16x256xf32>
    %150 = arith.mulf %146, %149 : vector<16x256xf32>
    %151 = vector.extract_strided_slice %139 {offsets = [16, 0], sizes = [16, 256], strides = [1, 1]} : vector<48x256xf32> to vector<16x256xf32>
    %152 = vector.extract_strided_slice %144 {offsets = [0, 0], sizes = [16, 256], strides = [1, 1]} : vector<48x256xf32> to vector<16x256xf32>
    %153 = arith.mulf %151, %152 : vector<16x256xf32>
    %154 = vector.extract_strided_slice %144 {offsets = [32, 0], sizes = [16, 256], strides = [1, 1]} : vector<48x256xf32> to vector<16x256xf32>
    %155 = arith.mulf %151, %154 : vector<16x256xf32>
    %156 = vector.extract_strided_slice %139 {offsets = [32, 0], sizes = [16, 256], strides = [1, 1]} : vector<48x256xf32> to vector<16x256xf32>
    %157 = vector.extract_strided_slice %144 {offsets = [0, 0], sizes = [16, 256], strides = [1, 1]} : vector<48x256xf32> to vector<16x256xf32>
    %158 = arith.mulf %156, %157 : vector<16x256xf32>
    %159 = vector.extract_strided_slice %144 {offsets = [16, 0], sizes = [16, 256], strides = [1, 1]} : vector<48x256xf32> to vector<16x256xf32>
    %160 = arith.mulf %156, %159 : vector<16x256xf32>
    %161 = tpu.concatenate %148, %150, %153, %155, %158, %160 in 0 : vector<16x256xf32>, vector<16x256xf32>, vector<16x256xf32>, vector<16x256xf32>, vector<16x256xf32>, vector<16x256xf32> -> vector<96x256xf32>
    %162 = arith.truncf %161 : vector<96x256xf32> to vector<96x256xbf16>
    %cst_150 = arith.constant dense<0.000000e+00> : vector<96x4xf32>
    %163 = tpu.matmul %162, %5, %cst_150 {dimension_numbers = #tpu.dot_dimension_numbers<[1], [0], [0], [1], [0, 0, 1, 1], [], []>} : vector<96x256xbf16>, vector<256x4xbf16>, vector<96x4xf32> -> vector<96x4xf32>
    %cst_151 = arith.constant 1.250000e-01 : f32
    %164 = vector.broadcast %cst_151 : f32 to vector<96x4xf32>
    %165 = arith.mulf %163, %164 : vector<96x4xf32>
    %166 = vector.extract_strided_slice %165 {offsets = [0, 0], sizes = [16, 4], strides = [1, 1]} : vector<96x4xf32> to vector<16x4xf32>
    %167 = vector.extract_strided_slice %165 {offsets = [16, 0], sizes = [16, 4], strides = [1, 1]} : vector<96x4xf32> to vector<16x4xf32>
    %168 = arith.maximumf %166, %167 : vector<16x4xf32>
    %169 = vector.extract_strided_slice %165 {offsets = [32, 0], sizes = [16, 4], strides = [1, 1]} : vector<96x4xf32> to vector<16x4xf32>
    %170 = vector.extract_strided_slice %165 {offsets = [48, 0], sizes = [16, 4], strides = [1, 1]} : vector<96x4xf32> to vector<16x4xf32>
    %171 = arith.maximumf %169, %170 : vector<16x4xf32>
    %172 = vector.extract_strided_slice %165 {offsets = [64, 0], sizes = [16, 4], strides = [1, 1]} : vector<96x4xf32> to vector<16x4xf32>
    %173 = vector.extract_strided_slice %165 {offsets = [80, 0], sizes = [16, 4], strides = [1, 1]} : vector<96x4xf32> to vector<16x4xf32>
    %174 = arith.maximumf %172, %173 : vector<16x4xf32>
    %175 = tpu.concatenate %168, %168, %171, %171, %174, %174 in 0 : vector<16x4xf32>, vector<16x4xf32>, vector<16x4xf32>, vector<16x4xf32>, vector<16x4xf32>, vector<16x4xf32> -> vector<96x4xf32>
    %176 = arith.subf %165, %175 : vector<96x4xf32>
    %177 = math.exp %176 : vector<96x4xf32>
    %178 = vector.extract_strided_slice %177 {offsets = [0, 0], sizes = [16, 4], strides = [1, 1]} : vector<96x4xf32> to vector<16x4xf32>
    %179 = vector.extract_strided_slice %177 {offsets = [16, 0], sizes = [16, 4], strides = [1, 1]} : vector<96x4xf32> to vector<16x4xf32>
    %180 = arith.addf %178, %179 : vector<16x4xf32>
    %181 = tpu.reciprocal %180 {approx = true} : vector<16x4xf32> -> vector<16x4xf32>
    %182 = vector.extract_strided_slice %177 {offsets = [0, 0], sizes = [16, 4], strides = [1, 1]} : vector<96x4xf32> to vector<16x4xf32>
    %183 = arith.mulf %182, %181 : vector<16x4xf32>
    %184 = vector.extract_strided_slice %177 {offsets = [16, 0], sizes = [16, 4], strides = [1, 1]} : vector<96x4xf32> to vector<16x4xf32>
    %185 = arith.mulf %184, %181 : vector<16x4xf32>
    %186 = vector.extract_strided_slice %177 {offsets = [32, 0], sizes = [16, 4], strides = [1, 1]} : vector<96x4xf32> to vector<16x4xf32>
    %187 = vector.extract_strided_slice %177 {offsets = [48, 0], sizes = [16, 4], strides = [1, 1]} : vector<96x4xf32> to vector<16x4xf32>
    %188 = arith.addf %186, %187 : vector<16x4xf32>
    %189 = tpu.reciprocal %188 {approx = true} : vector<16x4xf32> -> vector<16x4xf32>
    %190 = vector.extract_strided_slice %177 {offsets = [32, 0], sizes = [16, 4], strides = [1, 1]} : vector<96x4xf32> to vector<16x4xf32>
    %191 = arith.mulf %190, %189 : vector<16x4xf32>
    %192 = vector.extract_strided_slice %177 {offsets = [48, 0], sizes = [16, 4], strides = [1, 1]} : vector<96x4xf32> to vector<16x4xf32>
    %193 = arith.mulf %192, %189 : vector<16x4xf32>
    %194 = vector.extract_strided_slice %177 {offsets = [64, 0], sizes = [16, 4], strides = [1, 1]} : vector<96x4xf32> to vector<16x4xf32>
    %195 = vector.extract_strided_slice %177 {offsets = [80, 0], sizes = [16, 4], strides = [1, 1]} : vector<96x4xf32> to vector<16x4xf32>
    %196 = arith.addf %194, %195 : vector<16x4xf32>
    %197 = tpu.reciprocal %196 {approx = true} : vector<16x4xf32> -> vector<16x4xf32>
    %198 = vector.extract_strided_slice %177 {offsets = [64, 0], sizes = [16, 4], strides = [1, 1]} : vector<96x4xf32> to vector<16x4xf32>
    %199 = arith.mulf %198, %197 : vector<16x4xf32>
    %200 = vector.extract_strided_slice %177 {offsets = [80, 0], sizes = [16, 4], strides = [1, 1]} : vector<96x4xf32> to vector<16x4xf32>
    %201 = arith.mulf %200, %197 : vector<16x4xf32>
    %202 = tpu.concatenate %183, %185, %191, %193, %199, %201 in 0 : vector<16x4xf32>, vector<16x4xf32>, vector<16x4xf32>, vector<16x4xf32>, vector<16x4xf32>, vector<16x4xf32> -> vector<96x4xf32>
    %203 = arith.truncf %202 : vector<96x4xf32> to vector<96x4xbf16>
    %cst_152 = arith.constant dense<0.000000e+00> : vector<96x256xf32>
    %204 = tpu.matmul %203, %6, %cst_152 {dimension_numbers = #tpu.dot_dimension_numbers<[1], [0], [0], [1], [0, 0, 1, 1], [], []>} : vector<96x4xbf16>, vector<4x256xbf16>, vector<96x256xf32> -> vector<96x256xf32>
    %205 = vector.extract_strided_slice %204 {offsets = [0, 0], sizes = [16, 256], strides = [1, 1]} : vector<96x256xf32> to vector<16x256xf32>
    %206 = vector.extract_strided_slice %145 {offsets = [16, 0], sizes = [16, 256], strides = [1, 1]} : vector<48x256xf32> to vector<16x256xf32>
    %207 = arith.mulf %205, %206 : vector<16x256xf32>
    %208 = vector.extract_strided_slice %204 {offsets = [16, 0], sizes = [16, 256], strides = [1, 1]} : vector<96x256xf32> to vector<16x256xf32>
    %209 = vector.extract_strided_slice %145 {offsets = [32, 0], sizes = [16, 256], strides = [1, 1]} : vector<48x256xf32> to vector<16x256xf32>
    %210 = arith.mulf %208, %209 : vector<16x256xf32>
    %211 = arith.addf %207, %210 : vector<16x256xf32>
    %212 = vector.extract_strided_slice %204 {offsets = [32, 0], sizes = [16, 256], strides = [1, 1]} : vector<96x256xf32> to vector<16x256xf32>
    %213 = vector.extract_strided_slice %145 {offsets = [0, 0], sizes = [16, 256], strides = [1, 1]} : vector<48x256xf32> to vector<16x256xf32>
    %214 = arith.mulf %212, %213 : vector<16x256xf32>
    %215 = vector.extract_strided_slice %204 {offsets = [48, 0], sizes = [16, 256], strides = [1, 1]} : vector<96x256xf32> to vector<16x256xf32>
    %216 = vector.extract_strided_slice %145 {offsets = [32, 0], sizes = [16, 256], strides = [1, 1]} : vector<48x256xf32> to vector<16x256xf32>
    %217 = arith.mulf %215, %216 : vector<16x256xf32>
    %218 = arith.addf %214, %217 : vector<16x256xf32>
    %219 = vector.extract_strided_slice %204 {offsets = [64, 0], sizes = [16, 256], strides = [1, 1]} : vector<96x256xf32> to vector<16x256xf32>
    %220 = vector.extract_strided_slice %145 {offsets = [0, 0], sizes = [16, 256], strides = [1, 1]} : vector<48x256xf32> to vector<16x256xf32>
    %221 = arith.mulf %219, %220 : vector<16x256xf32>
    %222 = vector.extract_strided_slice %204 {offsets = [80, 0], sizes = [16, 256], strides = [1, 1]} : vector<96x256xf32> to vector<16x256xf32>
    %223 = vector.extract_strided_slice %145 {offsets = [16, 0], sizes = [16, 256], strides = [1, 1]} : vector<48x256xf32> to vector<16x256xf32>
    %224 = arith.mulf %222, %223 : vector<16x256xf32>
    %225 = arith.addf %221, %224 : vector<16x256xf32>
    %226 = tpu.concatenate %211, %218, %225 in 0 : vector<16x256xf32>, vector<16x256xf32>, vector<16x256xf32> -> vector<48x256xf32>
    %227 = arith.truncf %226 : vector<48x256xf32> to vector<48x256xbf16>
    %cst_153 = arith.constant dense<0.000000e+00> : vector<48x256xf32>
    %228 = tpu.matmul %227, %30, %cst_153 {dimension_numbers = #tpu.dot_dimension_numbers<[1], [0], [0], [1], [0, 0, 1, 1], [], []>} : vector<48x256xbf16>, vector<256x256xbf16>, vector<48x256xf32> -> vector<48x256xf32>
    %229 = vector.broadcast %31 : vector<1x256xf32> to vector<48x256xf32>
    %230 = arith.addf %228, %229 : vector<48x256xf32>
    %231 = arith.addf %230, %103 : vector<48x256xf32>
    %cst_154 = arith.constant dense<0.000000e+00> : vector<48xf32>
    %232 = vector.multi_reduction <add>, %231, %cst_154 [1] : vector<48x256xf32> to vector<48xf32>
    %233 = vector.shape_cast %232 : vector<48xf32> to vector<48x1xf32>
    %cst_155 = arith.constant 2.560000e+02 : f32
    %234 = vector.broadcast %cst_155 : f32 to vector<48x1xf32>
    %235 = arith.divf %233, %234 : vector<48x1xf32>
    %236 = vector.broadcast %235 : vector<48x1xf32> to vector<48x256xf32>
    %237 = arith.subf %231, %236 : vector<48x256xf32>
    %238 = arith.mulf %237, %237 : vector<48x256xf32>
    %cst_156 = arith.constant dense<0.000000e+00> : vector<48xf32>
    %239 = vector.multi_reduction <add>, %238, %cst_156 [1] : vector<48x256xf32> to vector<48xf32>
    %240 = vector.shape_cast %239 : vector<48xf32> to vector<48x1xf32>
    %cst_157 = arith.constant 2.560000e+02 : f32
    %241 = vector.broadcast %cst_157 : f32 to vector<48x1xf32>
    %242 = arith.divf %240, %241 : vector<48x1xf32>
    %243 = vector.broadcast %235 : vector<48x1xf32> to vector<48x256xf32>
    %244 = arith.subf %231, %243 : vector<48x256xf32>
    %cst_158 = arith.constant 9.99999974E-6 : f32
    %245 = vector.broadcast %cst_158 : f32 to vector<48x1xf32>
    %246 = arith.addf %242, %245 : vector<48x1xf32>
    %247 = math.rsqrt %246 : vector<48x1xf32>
    %248 = vector.broadcast %247 : vector<48x1xf32> to vector<48x256xf32>
    %249 = arith.mulf %244, %248 : vector<48x256xf32>
    %250 = vector.broadcast %32 : vector<1x256xf32> to vector<48x256xf32>
    %251 = arith.mulf %249, %250 : vector<48x256xf32>
    %252 = vector.broadcast %33 : vector<1x256xf32> to vector<48x256xf32>
    %253 = arith.addf %251, %252 : vector<48x256xf32>
    %254 = arith.truncf %253 : vector<48x256xf32> to vector<48x256xbf16>
    %cst_159 = arith.constant dense<0.000000e+00> : vector<48x128xf32>
    %255 = tpu.matmul %254, %34, %cst_159 {dimension_numbers = #tpu.dot_dimension_numbers<[1], [0], [0], [1], [0, 0, 1, 1], [], []>} : vector<48x256xbf16>, vector<256x128xbf16>, vector<48x128xf32> -> vector<48x128xf32>
    %256 = arith.truncf %255 : vector<48x128xf32> to vector<48x128xbf16>
    %cst_160 = arith.constant dense<0.000000e+00> : vector<48x128xf32>
    %257 = tpu.matmul %3, %256, %cst_160 {dimension_numbers = #tpu.dot_dimension_numbers<[1], [0], [0], [1], [0, 0, 1, 1], [], []>} : vector<48x48xbf16>, vector<48x128xbf16>, vector<48x128xf32> -> vector<48x128xf32>
    %258 = vector.broadcast %35 : vector<1x128xf32> to vector<48x128xf32>
    %259 = arith.addf %257, %258 : vector<48x128xf32>
    %cst_161 = arith.constant 0.000000e+00 : f32
    %260 = vector.broadcast %cst_161 : f32 to vector<48x128xf32>
    %261 = arith.maximumf %259, %260 : vector<48x128xf32>
    %262 = arith.truncf %261 : vector<48x128xf32> to vector<48x128xbf16>
    %cst_162 = arith.constant dense<0.000000e+00> : vector<48x128xf32>
    %263 = tpu.matmul %262, %36, %cst_162 {dimension_numbers = #tpu.dot_dimension_numbers<[1], [0], [0], [1], [0, 0, 1, 1], [], []>} : vector<48x128xbf16>, vector<128x128xbf16>, vector<48x128xf32> -> vector<48x128xf32>
    %264 = arith.truncf %263 : vector<48x128xf32> to vector<48x128xbf16>
    %cst_163 = arith.constant dense<0.000000e+00> : vector<48x128xf32>
    %265 = tpu.matmul %3, %264, %cst_163 {dimension_numbers = #tpu.dot_dimension_numbers<[1], [0], [0], [1], [0, 0, 1, 1], [], []>} : vector<48x48xbf16>, vector<48x128xbf16>, vector<48x128xf32> -> vector<48x128xf32>
    %266 = vector.broadcast %37 : vector<1x128xf32> to vector<48x128xf32>
    %267 = arith.addf %265, %266 : vector<48x128xf32>
    %cst_164 = arith.constant 0.000000e+00 : f32
    %268 = vector.broadcast %cst_164 : f32 to vector<48x128xf32>
    %269 = arith.maximumf %267, %268 : vector<48x128xf32>
    %270 = arith.truncf %269 : vector<48x128xf32> to vector<48x128xbf16>
    %cst_165 = arith.constant dense<0.000000e+00> : vector<48x32xf32>
    %271 = tpu.matmul %270, %38, %cst_165 {dimension_numbers = #tpu.dot_dimension_numbers<[1], [0], [0], [1], [0, 0, 1, 1], [], []>} : vector<48x128xbf16>, vector<128x32xbf16>, vector<48x32xf32> -> vector<48x32xf32>
    %272 = arith.truncf %271 : vector<48x32xf32> to vector<48x32xbf16>
    %cst_166 = arith.constant dense<0.000000e+00> : vector<48x32xf32>
    %273 = tpu.matmul %3, %272, %cst_166 {dimension_numbers = #tpu.dot_dimension_numbers<[1], [0], [0], [1], [0, 0, 1, 1], [], []>} : vector<48x48xbf16>, vector<48x32xbf16>, vector<48x32xf32> -> vector<48x32xf32>
    %274 = vector.broadcast %39 : vector<1x32xf32> to vector<48x32xf32>
    %275 = arith.addf %273, %274 : vector<48x32xf32>
    %cst_167 = arith.constant 0.000000e+00 : f32
    %276 = vector.broadcast %cst_167 : f32 to vector<48x32xf32>
    %277 = arith.maximumf %275, %276 : vector<48x32xf32>
    %278 = arith.truncf %277 : vector<48x32xf32> to vector<48x32xbf16>
    %cst_168 = arith.constant dense<0.000000e+00> : vector<48x32xf32>
    %279 = tpu.matmul %278, %40, %cst_168 {dimension_numbers = #tpu.dot_dimension_numbers<[1], [0], [0], [1], [0, 0, 1, 1], [], []>} : vector<48x32xbf16>, vector<32x32xbf16>, vector<48x32xf32> -> vector<48x32xf32>
    %280 = arith.truncf %279 : vector<48x32xf32> to vector<48x32xbf16>
    %cst_169 = arith.constant dense<0.000000e+00> : vector<48x32xf32>
    %281 = tpu.matmul %3, %280, %cst_169 {dimension_numbers = #tpu.dot_dimension_numbers<[1], [0], [0], [1], [0, 0, 1, 1], [], []>} : vector<48x48xbf16>, vector<48x32xbf16>, vector<48x32xf32> -> vector<48x32xf32>
    %282 = vector.broadcast %41 : vector<1x32xf32> to vector<48x32xf32>
    %283 = arith.addf %281, %282 : vector<48x32xf32>
    %cst_170 = arith.constant 0.000000e+00 : f32
    %284 = vector.broadcast %cst_170 : f32 to vector<48x32xf32>
    %285 = arith.maximumf %283, %284 : vector<48x32xf32>
    %286 = arith.truncf %285 : vector<48x32xf32> to vector<48x32xbf16>
    %cst_171 = arith.constant dense<0.000000e+00> : vector<48x128xf32>
    %287 = tpu.matmul %286, %42, %cst_171 {dimension_numbers = #tpu.dot_dimension_numbers<[1], [0], [0], [1], [0, 0, 1, 1], [], []>} : vector<48x32xbf16>, vector<32x128xbf16>, vector<48x128xf32> -> vector<48x128xf32>
    %288 = vector.broadcast %43 : vector<1x128xf32> to vector<48x128xf32>
    %289 = arith.addf %287, %288 : vector<48x128xf32>
    %c0_172 = arith.constant 0 : index
    %c0_173 = arith.constant 0 : index
    %290 = vector.load %arg63[%c0_172, %c0_173] : memref<48x128xf32, #tpu.memory_space<vmem>>, vector<48x128xf32>
    tpu.vector_store %arg63[%c0_172, %c0_173], %289 {strides = array<i32>} : memref<48x128xf32, #tpu.memory_space<vmem>>, vector<48x128xf32>,
    %291 = arith.truncf %135 : vector<16x256xf32> to vector<16x256xbf16>
    %cst_174 = arith.constant dense<0.000000e+00> : vector<16x256xf32>
    %292 = tpu.matmul %291, %44, %cst_174 {dimension_numbers = #tpu.dot_dimension_numbers<[1], [0], [0], [1], [0, 0, 1, 1], [], []>} : vector<16x256xbf16>, vector<256x256xbf16>, vector<16x256xf32> -> vector<16x256xf32>
    %293 = vector.broadcast %45 : vector<1x256xf32> to vector<16x256xf32>
    %294 = arith.addf %292, %293 : vector<16x256xf32>
    %295 = arith.truncf %253 : vector<48x256xf32> to vector<48x256xbf16>
    %cst_175 = arith.constant dense<0.000000e+00> : vector<48x512xf32>
    %296 = tpu.matmul %295, %46, %cst_175 {dimension_numbers = #tpu.dot_dimension_numbers<[1], [0], [0], [1], [0, 0, 1, 1], [], []>} : vector<48x256xbf16>, vector<256x512xbf16>, vector<48x512xf32> -> vector<48x512xf32>
    %297 = vector.broadcast %47 : vector<1x512xf32> to vector<48x512xf32>
    %298 = arith.addf %296, %297 : vector<48x512xf32>
    %299 = vector.extract_strided_slice %298 {offsets = [0, 0], sizes = [48, 256], strides = [1, 1]} : vector<48x512xf32> to vector<48x256xf32>
    %300 = vector.extract_strided_slice %298 {offsets = [0, 256], sizes = [48, 256], strides = [1, 1]} : vector<48x512xf32> to vector<48x256xf32>
    %301 = vector.extract_strided_slice %299 {offsets = [0, 0], sizes = [16, 256], strides = [1, 1]} : vector<48x256xf32> to vector<16x256xf32>
    %302 = arith.mulf %294, %301 : vector<16x256xf32>
    %303 = vector.extract_strided_slice %299 {offsets = [16, 0], sizes = [16, 256], strides = [1, 1]} : vector<48x256xf32> to vector<16x256xf32>
    %304 = arith.mulf %294, %303 : vector<16x256xf32>
    %305 = vector.extract_strided_slice %299 {offsets = [32, 0], sizes = [16, 256], strides = [1, 1]} : vector<48x256xf32> to vector<16x256xf32>
    %306 = arith.mulf %294, %305 : vector<16x256xf32>
    %307 = tpu.concatenate %302, %304, %306 in 0 : vector<16x256xf32>, vector<16x256xf32>, vector<16x256xf32> -> vector<48x256xf32>
    %308 = arith.truncf %307 : vector<48x256xf32> to vector<48x256xbf16>
    %cst_176 = arith.constant dense<0.000000e+00> : vector<48x4xf32>
    %309 = tpu.matmul %308, %5, %cst_176 {dimension_numbers = #tpu.dot_dimension_numbers<[1], [0], [0], [1], [0, 0, 1, 1], [], []>} : vector<48x256xbf16>, vector<256x4xbf16>, vector<48x4xf32> -> vector<48x4xf32>
    %cst_177 = arith.constant 1.250000e-01 : f32
    %310 = vector.broadcast %cst_177 : f32 to vector<48x4xf32>
    %311 = arith.mulf %309, %310 : vector<48x4xf32>
    %312 = vector.extract_strided_slice %311 {offsets = [0, 0], sizes = [16, 4], strides = [1, 1]} : vector<48x4xf32> to vector<16x4xf32>
    %313 = vector.extract_strided_slice %311 {offsets = [16, 0], sizes = [16, 4], strides = [1, 1]} : vector<48x4xf32> to vector<16x4xf32>
    %314 = arith.maximumf %312, %313 : vector<16x4xf32>
    %315 = vector.extract_strided_slice %311 {offsets = [32, 0], sizes = [16, 4], strides = [1, 1]} : vector<48x4xf32> to vector<16x4xf32>
    %316 = arith.maximumf %314, %315 : vector<16x4xf32>
    %317 = tpu.concatenate %316, %316, %316 in 0 : vector<16x4xf32>, vector<16x4xf32>, vector<16x4xf32> -> vector<48x4xf32>
    %318 = arith.subf %311, %317 : vector<48x4xf32>
    %319 = math.exp %318 : vector<48x4xf32>
    %320 = vector.extract_strided_slice %319 {offsets = [0, 0], sizes = [16, 4], strides = [1, 1]} : vector<48x4xf32> to vector<16x4xf32>
    %321 = vector.extract_strided_slice %319 {offsets = [16, 0], sizes = [16, 4], strides = [1, 1]} : vector<48x4xf32> to vector<16x4xf32>
    %322 = arith.addf %320, %321 : vector<16x4xf32>
    %323 = vector.extract_strided_slice %319 {offsets = [32, 0], sizes = [16, 4], strides = [1, 1]} : vector<48x4xf32> to vector<16x4xf32>
    %324 = arith.addf %322, %323 : vector<16x4xf32>
    %325 = tpu.reciprocal %324 {approx = true} : vector<16x4xf32> -> vector<16x4xf32>
    %326 = vector.extract_strided_slice %319 {offsets = [0, 0], sizes = [16, 4], strides = [1, 1]} : vector<48x4xf32> to vector<16x4xf32>
    %327 = arith.mulf %326, %325 : vector<16x4xf32>
    %328 = vector.extract_strided_slice %319 {offsets = [16, 0], sizes = [16, 4], strides = [1, 1]} : vector<48x4xf32> to vector<16x4xf32>
    %329 = arith.mulf %328, %325 : vector<16x4xf32>
    %330 = vector.extract_strided_slice %319 {offsets = [32, 0], sizes = [16, 4], strides = [1, 1]} : vector<48x4xf32> to vector<16x4xf32>
    %331 = arith.mulf %330, %325 : vector<16x4xf32>
    %332 = tpu.concatenate %327, %329, %331 in 0 : vector<16x4xf32>, vector<16x4xf32>, vector<16x4xf32> -> vector<48x4xf32>
    %333 = arith.truncf %332 : vector<48x4xf32> to vector<48x4xbf16>
    %cst_178 = arith.constant dense<0.000000e+00> : vector<48x256xf32>
    %334 = tpu.matmul %333, %6, %cst_178 {dimension_numbers = #tpu.dot_dimension_numbers<[1], [0], [0], [1], [0, 0, 1, 1], [], []>} : vector<48x4xbf16>, vector<4x256xbf16>, vector<48x256xf32> -> vector<48x256xf32>
    %335 = vector.extract_strided_slice %334 {offsets = [0, 0], sizes = [16, 256], strides = [1, 1]} : vector<48x256xf32> to vector<16x256xf32>
    %336 = vector.extract_strided_slice %300 {offsets = [0, 0], sizes = [16, 256], strides = [1, 1]} : vector<48x256xf32> to vector<16x256xf32>
    %337 = arith.mulf %335, %336 : vector<16x256xf32>
    %338 = vector.extract_strided_slice %334 {offsets = [16, 0], sizes = [16, 256], strides = [1, 1]} : vector<48x256xf32> to vector<16x256xf32>
    %339 = vector.extract_strided_slice %300 {offsets = [16, 0], sizes = [16, 256], strides = [1, 1]} : vector<48x256xf32> to vector<16x256xf32>
    %340 = arith.mulf %338, %339 : vector<16x256xf32>
    %341 = arith.addf %337, %340 : vector<16x256xf32>
    %342 = vector.extract_strided_slice %334 {offsets = [32, 0], sizes = [16, 256], strides = [1, 1]} : vector<48x256xf32> to vector<16x256xf32>
    %343 = vector.extract_strided_slice %300 {offsets = [32, 0], sizes = [16, 256], strides = [1, 1]} : vector<48x256xf32> to vector<16x256xf32>
    %344 = arith.mulf %342, %343 : vector<16x256xf32>
    %345 = arith.addf %341, %344 : vector<16x256xf32>
    %346 = arith.truncf %345 : vector<16x256xf32> to vector<16x256xbf16>
    %cst_179 = arith.constant dense<0.000000e+00> : vector<16x256xf32>
    %347 = tpu.matmul %346, %48, %cst_179 {dimension_numbers = #tpu.dot_dimension_numbers<[1], [0], [0], [1], [0, 0, 1, 1], [], []>} : vector<16x256xbf16>, vector<256x256xbf16>, vector<16x256xf32> -> vector<16x256xf32>
    %348 = vector.broadcast %49 : vector<1x256xf32> to vector<16x256xf32>
    %349 = arith.addf %347, %348 : vector<16x256xf32>
    %350 = arith.addf %349, %135 : vector<16x256xf32>
    %cst_180 = arith.constant dense<0.000000e+00> : vector<16xf32>
    %351 = vector.multi_reduction <add>, %350, %cst_180 [1] : vector<16x256xf32> to vector<16xf32>
    %352 = vector.shape_cast %351 : vector<16xf32> to vector<16x1xf32>
    %cst_181 = arith.constant 2.560000e+02 : f32
    %353 = vector.broadcast %cst_181 : f32 to vector<16x1xf32>
    %354 = arith.divf %352, %353 : vector<16x1xf32>
    %355 = vector.broadcast %354 : vector<16x1xf32> to vector<16x256xf32>
    %356 = arith.subf %350, %355 : vector<16x256xf32>
    %357 = arith.mulf %356, %356 : vector<16x256xf32>
    %cst_182 = arith.constant dense<0.000000e+00> : vector<16xf32>
    %358 = vector.multi_reduction <add>, %357, %cst_182 [1] : vector<16x256xf32> to vector<16xf32>
    %359 = vector.shape_cast %358 : vector<16xf32> to vector<16x1xf32>
    %cst_183 = arith.constant 2.560000e+02 : f32
    %360 = vector.broadcast %cst_183 : f32 to vector<16x1xf32>
    %361 = arith.divf %359, %360 : vector<16x1xf32>
    %362 = vector.broadcast %354 : vector<16x1xf32> to vector<16x256xf32>
    %363 = arith.subf %350, %362 : vector<16x256xf32>
    %cst_184 = arith.constant 9.99999974E-6 : f32
    %364 = vector.broadcast %cst_184 : f32 to vector<16x1xf32>
    %365 = arith.addf %361, %364 : vector<16x1xf32>
    %366 = math.rsqrt %365 : vector<16x1xf32>
    %367 = vector.broadcast %366 : vector<16x1xf32> to vector<16x256xf32>
    %368 = arith.mulf %363, %367 : vector<16x256xf32>
    %369 = vector.broadcast %50 : vector<1x256xf32> to vector<16x256xf32>
    %370 = arith.mulf %368, %369 : vector<16x256xf32>
    %371 = vector.broadcast %51 : vector<1x256xf32> to vector<16x256xf32>
    %372 = arith.addf %370, %371 : vector<16x256xf32>
    %373 = arith.truncf %372 : vector<16x256xf32> to vector<16x256xbf16>
    %cst_185 = arith.constant dense<0.000000e+00> : vector<16x128xf32>
    %374 = tpu.matmul %373, %52, %cst_185 {dimension_numbers = #tpu.dot_dimension_numbers<[1], [0], [0], [1], [0, 0, 1, 1], [], []>} : vector<16x256xbf16>, vector<256x128xbf16>, vector<16x128xf32> -> vector<16x128xf32>
    %375 = arith.truncf %374 : vector<16x128xf32> to vector<16x128xbf16>
    %cst_186 = arith.constant dense<0.000000e+00> : vector<16x128xf32>
    %376 = tpu.matmul %4, %375, %cst_186 {dimension_numbers = #tpu.dot_dimension_numbers<[1], [0], [0], [1], [0, 0, 1, 1], [], []>} : vector<16x16xbf16>, vector<16x128xbf16>, vector<16x128xf32> -> vector<16x128xf32>
    %377 = vector.broadcast %53 : vector<1x128xf32> to vector<16x128xf32>
    %378 = arith.addf %376, %377 : vector<16x128xf32>
    %cst_187 = arith.constant 0.000000e+00 : f32
    %379 = vector.broadcast %cst_187 : f32 to vector<16x128xf32>
    %380 = arith.maximumf %378, %379 : vector<16x128xf32>
    %381 = arith.truncf %380 : vector<16x128xf32> to vector<16x128xbf16>
    %cst_188 = arith.constant dense<0.000000e+00> : vector<16x128xf32>
    %382 = tpu.matmul %381, %54, %cst_188 {dimension_numbers = #tpu.dot_dimension_numbers<[1], [0], [0], [1], [0, 0, 1, 1], [], []>} : vector<16x128xbf16>, vector<128x128xbf16>, vector<16x128xf32> -> vector<16x128xf32>
    %383 = arith.truncf %382 : vector<16x128xf32> to vector<16x128xbf16>
    %cst_189 = arith.constant dense<0.000000e+00> : vector<16x128xf32>
    %384 = tpu.matmul %4, %383, %cst_189 {dimension_numbers = #tpu.dot_dimension_numbers<[1], [0], [0], [1], [0, 0, 1, 1], [], []>} : vector<16x16xbf16>, vector<16x128xbf16>, vector<16x128xf32> -> vector<16x128xf32>
    %385 = vector.broadcast %55 : vector<1x128xf32> to vector<16x128xf32>
    %386 = arith.addf %384, %385 : vector<16x128xf32>
    %cst_190 = arith.constant 0.000000e+00 : f32
    %387 = vector.broadcast %cst_190 : f32 to vector<16x128xf32>
    %388 = arith.maximumf %386, %387 : vector<16x128xf32>
    %389 = arith.truncf %388 : vector<16x128xf32> to vector<16x128xbf16>
    %cst_191 = arith.constant dense<0.000000e+00> : vector<16x32xf32>
    %390 = tpu.matmul %389, %56, %cst_191 {dimension_numbers = #tpu.dot_dimension_numbers<[1], [0], [0], [1], [0, 0, 1, 1], [], []>} : vector<16x128xbf16>, vector<128x32xbf16>, vector<16x32xf32> -> vector<16x32xf32>
    %391 = arith.truncf %390 : vector<16x32xf32> to vector<16x32xbf16>
    %cst_192 = arith.constant dense<0.000000e+00> : vector<16x32xf32>
    %392 = tpu.matmul %4, %391, %cst_192 {dimension_numbers = #tpu.dot_dimension_numbers<[1], [0], [0], [1], [0, 0, 1, 1], [], []>} : vector<16x16xbf16>, vector<16x32xbf16>, vector<16x32xf32> -> vector<16x32xf32>
    %393 = vector.broadcast %57 : vector<1x32xf32> to vector<16x32xf32>
    %394 = arith.addf %392, %393 : vector<16x32xf32>
    %cst_193 = arith.constant 0.000000e+00 : f32
    %395 = vector.broadcast %cst_193 : f32 to vector<16x32xf32>
    %396 = arith.maximumf %394, %395 : vector<16x32xf32>
    %397 = arith.truncf %396 : vector<16x32xf32> to vector<16x32xbf16>
    %cst_194 = arith.constant dense<0.000000e+00> : vector<16x32xf32>
    %398 = tpu.matmul %397, %58, %cst_194 {dimension_numbers = #tpu.dot_dimension_numbers<[1], [0], [0], [1], [0, 0, 1, 1], [], []>} : vector<16x32xbf16>, vector<32x32xbf16>, vector<16x32xf32> -> vector<16x32xf32>
    %399 = arith.truncf %398 : vector<16x32xf32> to vector<16x32xbf16>
    %cst_195 = arith.constant dense<0.000000e+00> : vector<16x32xf32>
    %400 = tpu.matmul %4, %399, %cst_195 {dimension_numbers = #tpu.dot_dimension_numbers<[1], [0], [0], [1], [0, 0, 1, 1], [], []>} : vector<16x16xbf16>, vector<16x32xbf16>, vector<16x32xf32> -> vector<16x32xf32>
    %401 = vector.broadcast %59 : vector<1x32xf32> to vector<16x32xf32>
    %402 = arith.addf %400, %401 : vector<16x32xf32>
    %cst_196 = arith.constant 0.000000e+00 : f32
    %403 = vector.broadcast %cst_196 : f32 to vector<16x32xf32>
    %404 = arith.maximumf %402, %403 : vector<16x32xf32>
    %405 = arith.truncf %404 : vector<16x32xf32> to vector<16x32xbf16>
    %cst_197 = arith.constant dense<0.000000e+00> : vector<16x128xf32>
    %406 = tpu.matmul %405, %60, %cst_197 {dimension_numbers = #tpu.dot_dimension_numbers<[1], [0], [0], [1], [0, 0, 1, 1], [], []>} : vector<16x32xbf16>, vector<32x128xbf16>, vector<16x128xf32> -> vector<16x128xf32>
    %407 = vector.broadcast %61 : vector<1x128xf32> to vector<16x128xf32>
    %408 = arith.addf %406, %407 : vector<16x128xf32>
    %c0_198 = arith.constant 0 : index
    %c0_199 = arith.constant 0 : index
    %409 = vector.load %arg64[%c0_198, %c0_199] : memref<16x128xf32, #tpu.memory_space<vmem>>, vector<16x128xf32>
    tpu.vector_store %arg64[%c0_198, %c0_199], %408 {strides = array<i32>} : memref<16x128xf32, #tpu.memory_space<vmem>>, vector<16x128xf32>,
    return
  }
  func.func @transform_0(%arg0: i32) -> (i32, i32) {
    %c0_i32 = arith.constant 0 : i32
    %c0_i32_0 = arith.constant 0 : i32
    return %arg0, %c0_i32 : i32, i32
  }
  func.func @transform_1(%arg0: i32) -> (i32, i32) {
    %c0_i32 = arith.constant 0 : i32
    %c0_i32_0 = arith.constant 0 : i32
    return %arg0, %c0_i32 : i32, i32
  }
  func.func @transform_2(%arg0: i32) -> (i32, i32) {
    %c0_i32 = arith.constant 0 : i32
    %c0_i32_0 = arith.constant 0 : i32
    return %arg0, %c0_i32 : i32, i32
  }
  func.func @transform_3(%arg0: i32) -> (i32, i32) {
    %c0_i32 = arith.constant 0 : i32
    %c0_i32_0 = arith.constant 0 : i32
    %c0_i32_1 = arith.constant 0 : i32
    return %c0_i32, %c0_i32_0 : i32, i32
  }
  func.func @transform_4(%arg0: i32) -> (i32, i32) {
    %c0_i32 = arith.constant 0 : i32
    %c0_i32_0 = arith.constant 0 : i32
    %c0_i32_1 = arith.constant 0 : i32
    return %c0_i32, %c0_i32_0 : i32, i32
  }
  func.func @transform_5(%arg0: i32) -> (i32, i32) {
    %c0_i32 = arith.constant 0 : i32
    %c0_i32_0 = arith.constant 0 : i32
    %c0_i32_1 = arith.constant 0 : i32
    return %c0_i32, %c0_i32_0 : i32, i32
  }
  func.func @transform_6(%arg0: i32) -> (i32, i32) {
    %c0_i32 = arith.constant 0 : i32
    %c0_i32_0 = arith.constant 0 : i32
    %c0_i32_1 = arith.constant 0 : i32
    return %c0_i32, %c0_i32_0 : i32, i32
  }
  func.func @transform_7(%arg0: i32) -> (i32, i32) {
    %c0_i32 = arith.constant 0 : i32
    %c0_i32_0 = arith.constant 0 : i32
    %c0_i32_1 = arith.constant 0 : i32
    return %c0_i32, %c0_i32_0 : i32, i32
  }
  func.func @transform_8(%arg0: i32) -> (i32, i32) {
    %c0_i32 = arith.constant 0 : i32
    %c0_i32_0 = arith.constant 0 : i32
    %c0_i32_1 = arith.constant 0 : i32
    return %c0_i32, %c0_i32_0 : i32, i32
  }
  func.func @transform_9(%arg0: i32) -> (i32, i32) {
    %c0_i32 = arith.constant 0 : i32
    %c0_i32_0 = arith.constant 0 : i32
    %c0_i32_1 = arith.constant 0 : i32
    return %c0_i32, %c0_i32_0 : i32, i32
  }
  func.func @transform_10(%arg0: i32) -> (i32, i32) {
    %c0_i32 = arith.constant 0 : i32
    %c0_i32_0 = arith.constant 0 : i32
    %c0_i32_1 = arith.constant 0 : i32
    return %c0_i32, %c0_i32_0 : i32, i32
  }
  func.func @transform_11(%arg0: i32) -> (i32, i32) {
    %c0_i32 = arith.constant 0 : i32
    %c0_i32_0 = arith.constant 0 : i32
    %c0_i32_1 = arith.constant 0 : i32
    return %c0_i32, %c0_i32_0 : i32, i32
  }
  func.func @transform_12(%arg0: i32) -> (i32, i32) {
    %c0_i32 = arith.constant 0 : i32
    %c0_i32_0 = arith.constant 0 : i32
    %c0_i32_1 = arith.constant 0 : i32
    return %c0_i32, %c0_i32_0 : i32, i32
  }
  func.func @transform_13(%arg0: i32) -> (i32, i32) {
    %c0_i32 = arith.constant 0 : i32
    %c0_i32_0 = arith.constant 0 : i32
    %c0_i32_1 = arith.constant 0 : i32
    return %c0_i32, %c0_i32_0 : i32, i32
  }
  func.func @transform_14(%arg0: i32) -> (i32, i32) {
    %c0_i32 = arith.constant 0 : i32
    %c0_i32_0 = arith.constant 0 : i32
    %c0_i32_1 = arith.constant 0 : i32
    return %c0_i32, %c0_i32_0 : i32, i32
  }
  func.func @transform_15(%arg0: i32) -> (i32, i32) {
    %c0_i32 = arith.constant 0 : i32
    %c0_i32_0 = arith.constant 0 : i32
    %c0_i32_1 = arith.constant 0 : i32
    return %c0_i32, %c0_i32_0 : i32, i32
  }
  func.func @transform_16(%arg0: i32) -> (i32, i32) {
    %c0_i32 = arith.constant 0 : i32
    %c0_i32_0 = arith.constant 0 : i32
    %c0_i32_1 = arith.constant 0 : i32
    return %c0_i32, %c0_i32_0 : i32, i32
  }
  func.func @transform_17(%arg0: i32) -> (i32, i32) {
    %c0_i32 = arith.constant 0 : i32
    %c0_i32_0 = arith.constant 0 : i32
    %c0_i32_1 = arith.constant 0 : i32
    return %c0_i32, %c0_i32_0 : i32, i32
  }
  func.func @transform_18(%arg0: i32) -> (i32, i32) {
    %c0_i32 = arith.constant 0 : i32
    %c0_i32_0 = arith.constant 0 : i32
    %c0_i32_1 = arith.constant 0 : i32
    return %c0_i32, %c0_i32_0 : i32, i32
  }
  func.func @transform_19(%arg0: i32) -> (i32, i32) {
    %c0_i32 = arith.constant 0 : i32
    %c0_i32_0 = arith.constant 0 : i32
    %c0_i32_1 = arith.constant 0 : i32
    return %c0_i32, %c0_i32_0 : i32, i32
  }
  func.func @transform_20(%arg0: i32) -> (i32, i32) {
    %c0_i32 = arith.constant 0 : i32
    %c0_i32_0 = arith.constant 0 : i32
    %c0_i32_1 = arith.constant 0 : i32
    return %c0_i32, %c0_i32_0 : i32, i32
  }
  func.func @transform_21(%arg0: i32) -> (i32, i32) {
    %c0_i32 = arith.constant 0 : i32
    %c0_i32_0 = arith.constant 0 : i32
    %c0_i32_1 = arith.constant 0 : i32
    return %c0_i32, %c0_i32_0 : i32, i32
  }
  func.func @transform_22(%arg0: i32) -> (i32, i32) {
    %c0_i32 = arith.constant 0 : i32
    %c0_i32_0 = arith.constant 0 : i32
    %c0_i32_1 = arith.constant 0 : i32
    return %c0_i32, %c0_i32_0 : i32, i32
  }
  func.func @transform_23(%arg0: i32) -> (i32, i32) {
    %c0_i32 = arith.constant 0 : i32
    %c0_i32_0 = arith.constant 0 : i32
    %c0_i32_1 = arith.constant 0 : i32
    return %c0_i32, %c0_i32_0 : i32, i32
  }
  func.func @transform_24(%arg0: i32) -> (i32, i32) {
    %c0_i32 = arith.constant 0 : i32
    %c0_i32_0 = arith.constant 0 : i32
    %c0_i32_1 = arith.constant 0 : i32
    return %c0_i32, %c0_i32_0 : i32, i32
  }
  func.func @transform_25(%arg0: i32) -> (i32, i32) {
    %c0_i32 = arith.constant 0 : i32
    %c0_i32_0 = arith.constant 0 : i32
    %c0_i32_1 = arith.constant 0 : i32
    return %c0_i32, %c0_i32_0 : i32, i32
  }
  func.func @transform_26(%arg0: i32) -> (i32, i32) {
    %c0_i32 = arith.constant 0 : i32
    %c0_i32_0 = arith.constant 0 : i32
    %c0_i32_1 = arith.constant 0 : i32
    return %c0_i32, %c0_i32_0 : i32, i32
  }
  func.func @transform_27(%arg0: i32) -> (i32, i32) {
    %c0_i32 = arith.constant 0 : i32
    %c0_i32_0 = arith.constant 0 : i32
    %c0_i32_1 = arith.constant 0 : i32
    return %c0_i32, %c0_i32_0 : i32, i32
  }
  func.func @transform_28(%arg0: i32) -> (i32, i32) {
    %c0_i32 = arith.constant 0 : i32
    %c0_i32_0 = arith.constant 0 : i32
    %c0_i32_1 = arith.constant 0 : i32
    return %c0_i32, %c0_i32_0 : i32, i32
  }
  func.func @transform_29(%arg0: i32) -> (i32, i32) {
    %c0_i32 = arith.constant 0 : i32
    %c0_i32_0 = arith.constant 0 : i32
    %c0_i32_1 = arith.constant 0 : i32
    return %c0_i32, %c0_i32_0 : i32, i32
  }
  func.func @transform_30(%arg0: i32) -> (i32, i32) {
    %c0_i32 = arith.constant 0 : i32
    %c0_i32_0 = arith.constant 0 : i32
    %c0_i32_1 = arith.constant 0 : i32
    return %c0_i32, %c0_i32_0 : i32, i32
  }
  func.func @transform_31(%arg0: i32) -> (i32, i32) {
    %c0_i32 = arith.constant 0 : i32
    %c0_i32_0 = arith.constant 0 : i32
    %c0_i32_1 = arith.constant 0 : i32
    return %c0_i32, %c0_i32_0 : i32, i32
  }
  func.func @transform_32(%arg0: i32) -> (i32, i32) {
    %c0_i32 = arith.constant 0 : i32
    %c0_i32_0 = arith.constant 0 : i32
    %c0_i32_1 = arith.constant 0 : i32
    return %c0_i32, %c0_i32_0 : i32, i32
  }
  func.func @transform_33(%arg0: i32) -> (i32, i32) {
    %c0_i32 = arith.constant 0 : i32
    %c0_i32_0 = arith.constant 0 : i32
    %c0_i32_1 = arith.constant 0 : i32
    return %c0_i32, %c0_i32_0 : i32, i32
  }
  func.func @transform_34(%arg0: i32) -> (i32, i32) {
    %c0_i32 = arith.constant 0 : i32
    %c0_i32_0 = arith.constant 0 : i32
    %c0_i32_1 = arith.constant 0 : i32
    return %c0_i32, %c0_i32_0 : i32, i32
  }
  func.func @transform_35(%arg0: i32) -> (i32, i32) {
    %c0_i32 = arith.constant 0 : i32
    %c0_i32_0 = arith.constant 0 : i32
    %c0_i32_1 = arith.constant 0 : i32
    return %c0_i32, %c0_i32_0 : i32, i32
  }
  func.func @transform_36(%arg0: i32) -> (i32, i32) {
    %c0_i32 = arith.constant 0 : i32
    %c0_i32_0 = arith.constant 0 : i32
    %c0_i32_1 = arith.constant 0 : i32
    return %c0_i32, %c0_i32_0 : i32, i32
  }
  func.func @transform_37(%arg0: i32) -> (i32, i32) {
    %c0_i32 = arith.constant 0 : i32
    %c0_i32_0 = arith.constant 0 : i32
    %c0_i32_1 = arith.constant 0 : i32
    return %c0_i32, %c0_i32_0 : i32, i32
  }
  func.func @transform_38(%arg0: i32) -> (i32, i32) {
    %c0_i32 = arith.constant 0 : i32
    %c0_i32_0 = arith.constant 0 : i32
    %c0_i32_1 = arith.constant 0 : i32
    return %c0_i32, %c0_i32_0 : i32, i32
  }
  func.func @transform_39(%arg0: i32) -> (i32, i32) {
    %c0_i32 = arith.constant 0 : i32
    %c0_i32_0 = arith.constant 0 : i32
    %c0_i32_1 = arith.constant 0 : i32
    return %c0_i32, %c0_i32_0 : i32, i32
  }
  func.func @transform_40(%arg0: i32) -> (i32, i32) {
    %c0_i32 = arith.constant 0 : i32
    %c0_i32_0 = arith.constant 0 : i32
    %c0_i32_1 = arith.constant 0 : i32
    return %c0_i32, %c0_i32_0 : i32, i32
  }
  func.func @transform_41(%arg0: i32) -> (i32, i32) {
    %c0_i32 = arith.constant 0 : i32
    %c0_i32_0 = arith.constant 0 : i32
    %c0_i32_1 = arith.constant 0 : i32
    return %c0_i32, %c0_i32_0 : i32, i32
  }
  func.func @transform_42(%arg0: i32) -> (i32, i32) {
    %c0_i32 = arith.constant 0 : i32
    %c0_i32_0 = arith.constant 0 : i32
    %c0_i32_1 = arith.constant 0 : i32
    return %c0_i32, %c0_i32_0 : i32, i32
  }
  func.func @transform_43(%arg0: i32) -> (i32, i32) {
    %c0_i32 = arith.constant 0 : i32
    %c0_i32_0 = arith.constant 0 : i32
    %c0_i32_1 = arith.constant 0 : i32
    return %c0_i32, %c0_i32_0 : i32, i32
  }
  func.func @transform_44(%arg0: i32) -> (i32, i32) {
    %c0_i32 = arith.constant 0 : i32
    %c0_i32_0 = arith.constant 0 : i32
    %c0_i32_1 = arith.constant 0 : i32
    return %c0_i32, %c0_i32_0 : i32, i32
  }
  func.func @transform_45(%arg0: i32) -> (i32, i32) {
    %c0_i32 = arith.constant 0 : i32
    %c0_i32_0 = arith.constant 0 : i32
    %c0_i32_1 = arith.constant 0 : i32
    return %c0_i32, %c0_i32_0 : i32, i32
  }
  func.func @transform_46(%arg0: i32) -> (i32, i32) {
    %c0_i32 = arith.constant 0 : i32
    %c0_i32_0 = arith.constant 0 : i32
    %c0_i32_1 = arith.constant 0 : i32
    return %c0_i32, %c0_i32_0 : i32, i32
  }
  func.func @transform_47(%arg0: i32) -> (i32, i32) {
    %c0_i32 = arith.constant 0 : i32
    %c0_i32_0 = arith.constant 0 : i32
    %c0_i32_1 = arith.constant 0 : i32
    return %c0_i32, %c0_i32_0 : i32, i32
  }
  func.func @transform_48(%arg0: i32) -> (i32, i32) {
    %c0_i32 = arith.constant 0 : i32
    %c0_i32_0 = arith.constant 0 : i32
    %c0_i32_1 = arith.constant 0 : i32
    return %c0_i32, %c0_i32_0 : i32, i32
  }
  func.func @transform_49(%arg0: i32) -> (i32, i32) {
    %c0_i32 = arith.constant 0 : i32
    %c0_i32_0 = arith.constant 0 : i32
    %c0_i32_1 = arith.constant 0 : i32
    return %c0_i32, %c0_i32_0 : i32, i32
  }
  func.func @transform_50(%arg0: i32) -> (i32, i32) {
    %c0_i32 = arith.constant 0 : i32
    %c0_i32_0 = arith.constant 0 : i32
    %c0_i32_1 = arith.constant 0 : i32
    return %c0_i32, %c0_i32_0 : i32, i32
  }
  func.func @transform_51(%arg0: i32) -> (i32, i32) {
    %c0_i32 = arith.constant 0 : i32
    %c0_i32_0 = arith.constant 0 : i32
    %c0_i32_1 = arith.constant 0 : i32
    return %c0_i32, %c0_i32_0 : i32, i32
  }
  func.func @transform_52(%arg0: i32) -> (i32, i32) {
    %c0_i32 = arith.constant 0 : i32
    %c0_i32_0 = arith.constant 0 : i32
    %c0_i32_1 = arith.constant 0 : i32
    return %c0_i32, %c0_i32_0 : i32, i32
  }
  func.func @transform_53(%arg0: i32) -> (i32, i32) {
    %c0_i32 = arith.constant 0 : i32
    %c0_i32_0 = arith.constant 0 : i32
    %c0_i32_1 = arith.constant 0 : i32
    return %c0_i32, %c0_i32_0 : i32, i32
  }
  func.func @transform_54(%arg0: i32) -> (i32, i32) {
    %c0_i32 = arith.constant 0 : i32
    %c0_i32_0 = arith.constant 0 : i32
    %c0_i32_1 = arith.constant 0 : i32
    return %c0_i32, %c0_i32_0 : i32, i32
  }
  func.func @transform_55(%arg0: i32) -> (i32, i32) {
    %c0_i32 = arith.constant 0 : i32
    %c0_i32_0 = arith.constant 0 : i32
    %c0_i32_1 = arith.constant 0 : i32
    return %c0_i32, %c0_i32_0 : i32, i32
  }
  func.func @transform_56(%arg0: i32) -> (i32, i32) {
    %c0_i32 = arith.constant 0 : i32
    %c0_i32_0 = arith.constant 0 : i32
    %c0_i32_1 = arith.constant 0 : i32
    return %c0_i32, %c0_i32_0 : i32, i32
  }
  func.func @transform_57(%arg0: i32) -> (i32, i32) {
    %c0_i32 = arith.constant 0 : i32
    %c0_i32_0 = arith.constant 0 : i32
    %c0_i32_1 = arith.constant 0 : i32
    return %c0_i32, %c0_i32_0 : i32, i32
  }
  func.func @transform_58(%arg0: i32) -> (i32, i32) {
    %c0_i32 = arith.constant 0 : i32
    %c0_i32_0 = arith.constant 0 : i32
    %c0_i32_1 = arith.constant 0 : i32
    return %c0_i32, %c0_i32_0 : i32, i32
  }
  func.func @transform_59(%arg0: i32) -> (i32, i32) {
    %c0_i32 = arith.constant 0 : i32
    %c0_i32_0 = arith.constant 0 : i32
    %c0_i32_1 = arith.constant 0 : i32
    return %c0_i32, %c0_i32_0 : i32, i32
  }
  func.func @transform_60(%arg0: i32) -> (i32, i32) {
    %c0_i32 = arith.constant 0 : i32
    %c0_i32_0 = arith.constant 0 : i32
    %c0_i32_1 = arith.constant 0 : i32
    return %c0_i32, %c0_i32_0 : i32, i32
  }
  func.func @transform_61(%arg0: i32) -> (i32, i32) {
    %c0_i32 = arith.constant 0 : i32
    %c0_i32_0 = arith.constant 0 : i32
    %c0_i32_1 = arith.constant 0 : i32
    return %c0_i32, %c0_i32_0 : i32, i32
  }
  func.func @transform_62(%arg0: i32) -> (i32, i32) {
    %c0_i32 = arith.constant 0 : i32
    %c0_i32_0 = arith.constant 0 : i32
    return %arg0, %c0_i32 : i32, i32
  }
  func.func @transform_63(%arg0: i32) -> (i32, i32) {
    %c0_i32 = arith.constant 0 : i32
    %c0_i32_0 = arith.constant 0 : i32
    return %arg0, %c0_i32 : i32, i32
  }
}

</mosaic_0001>

<bundles_post_ra>
// kernel: tile.13
= control target key start
LH: loop header
LB: loop body
LE: loop exit
PB: predicated region body
PF: predicated region fallthrough
CT: control target
= control target key end

     0   :  { %v14_v2 = vmov 0   ;;  %s31_s0 = inlined_call_operand.vmem [shape: pred[4], index: 0, kind: input, shape index: {}]   ;;  %s32_s1 = inlined_call_operand.vmem [shape: pred[3,4], index: 1, kind: output, shape index: {}]  }
   0x1   :  { %v4_v0 = vld [vmem:[%s31_s0] ss:$0 sm:$0xff] }
   0x2   :  { %v7_v1 = vand.u32 255, %v4_v0 }
   0x4   :  { %v8_v3 = vpack.c.b16 %v14_v2, %v7_v1 }
   0x6   :  { %v9_v4 = vpack.c.b8 %v14_v2, %v8_v3 }
   0x8   :  { %12 = vst [vmem:[%s32_s1] sm:$0x1] %v9_v4 }

// kernel: _lambda_.1
= control target key start
LH: loop header
LB: loop body
LE: loop exit
PB: predicated region body
PF: predicated region fallthrough
CT: control target
= control target key end

     0   :  { %s13141_s6 = smov 1   ;;  %s13142_s10 = smov 2   ;;  %s14992_s0 = inlined_call_operand.smem [shape: u32[64], index: -1, kind: input, shape index: {}] }
   0x1   :  { %s13267_s5 = sld [smem:[%s14992_s0]]   ;;  %s13143_s14 = smov 3  }
   0x2   :  { %s13272_s9 = sld [smem:[%s14992_s0 + %s13141_s6]]   ;;  %s13144_s18 = smov 4  }
   0x3   :  { %s13277_s13 = sld [smem:[%s14992_s0 + %s13142_s10]]   ;;  %s13145_s22 = smov 5  }
   0x4   :  { %s13282_s17 = sld [smem:[%s14992_s0 + %s13143_s14]]   ;;  %s13146_s26 = smov 6  }
   0x5   :  { %s13287_s21 = sld [smem:[%s14992_s0 + %s13144_s18]]   ;;  %s13147_s30 = smov 7  }
   0x6   :  { %s13292_s25 = sld [smem:[%s14992_s0 + %s13145_s22]]   ;;  %s13148_s4 = smov 8  }
   0x7   :  { %15023 = sst [smem:[#allocation97_spill]] %s13267_s5  ;;  %s13149_s10 = smov 9  }
   0x8   :  { %15024 = sst [smem:[#allocation98_spill]] %s13272_s9  ;;  %s13150_s15 = smov 10  }
   0x9   :  { %15025 = sst [smem:[#allocation99_spill]] %s13277_s13  ;;  %s13151_s20 = smov 11  }
   0xa   :  { %15026 = sst [smem:[#allocation100_spill]] %s13282_s17  ;;  %s13153_s1 = smov 13  }
   0xb   :  { %s13297_s29 = sld [smem:[%s14992_s0 + %s13146_s26]]   ;;  %s13152_s26 = smov 12  }
   0xc   :  { %15027 = sst [smem:[#allocation101_spill]] %s13292_s25  ;;  %s13154_s7 = smov 14  }
   0xd   :  { %s13302_s3 = sld [smem:[%s14992_s0 + %s13147_s30]]   ;;  %s13156_s22 = smov 16  }
   0xe   :  { %s13307_s8 = sld [smem:[%s14992_s0 + %s13148_s4]]   ;;  %s13157_s28 = smov 17  }
   0xf   :  { %s13312_s14 = sld [smem:[%s14992_s0 + %s13149_s10]]  }
  0x10   :  { %s13317_s19 = sld [smem:[%s14992_s0 + %s13150_s15]]   ;;  %s13155_s15 = smov 15  }
  0x11   :  { %s13322_s24 = sld [smem:[%s14992_s0 + %s13151_s20]]  }
  0x12   :  { %s13327_s30 = sld [smem:[%s14992_s0 + %s13152_s26]]  }
  0x13   :  { %15028 = sst [smem:[#allocation102_spill]] %s13302_s3 }
  0x14   :  { %15029 = sst [smem:[#allocation103_spill]] %s13307_s8 }
  0x15   :  { %15030 = sst [smem:[#allocation104_spill]] %s13312_s14 }
  0x16   :  { %s13332_s6 = sld [smem:[%s14992_s0 + %s13153_s1]]  }
  0x17   :  { %15031 = sst [smem:[#allocation105_spill]] %s13322_s24 }
  0x18   :  { %s13337_s12 = sld [smem:[%s14992_s0 + %s13154_s7]]   ;;  %s13158_s7 = smov 18  }
  0x19   :  { %s13342_s20 = sld [smem:[%s14992_s0 + %s13155_s15]]   ;;  %s13159_s15 = smov 19  }
  0x1a   :  { %s13347_s27 = sld [smem:[%s14992_s0 + %s13156_s22]]   ;;  %s13160_s22 = smov 20  }
  0x1b   :  { %s13352_s4 = sld [smem:[%s14992_s0 + %s13157_s28]]   ;;  %s13161_s28 = smov 21  }
  0x1c   :  { %15032 = sst [smem:[#allocation106_spill]] %s13332_s6 }
  0x1d   :  { %s13357_s9 = sld [smem:[%s14992_s0 + %s13158_s7]]   ;;  %s13162_s7 = smov 22  }
  0x1e   :  { %s13362_s13 = sld [smem:[%s14992_s0 + %s13159_s15]]   ;;  %s13163_s15 = smov 23  }
  0x1f   :  { %15033 = sst [smem:[#allocation107_spill]] %s13342_s20 }
  0x20   :  { %s13367_s5 = sld [smem:[%s14992_s0 + %s13160_s22]]   ;;  %s13164_s22 = smov 24  }
  0x21   :  { %15034 = sst [smem:[#allocation108_spill]] %s13352_s4 }
  0x22   :  { %s13372_s4 = sld [smem:[%s14992_s0 + %s13161_s28]]   ;;  %s13165_s28 = smov 25  }
  0x23   :  { %s13377_s20 = sld [smem:[%s14992_s0 + %s13162_s7]]   ;;  %s13166_s7 = smov 26  }
  0x24   :  { %15035 = sst [smem:[#allocation109_spill]] %s13362_s13 }
  0x25   :  { %s13382_s13 = sld [smem:[%s14992_s0 + %s13163_s15]]   ;;  %s13167_s15 = smov 27  }
  0x26   :  { %15036 = sst [smem:[#allocation110_spill]] %s13367_s5 }
  0x27   :  { %s13387_s6 = sld [smem:[%s14992_s0 + %s13164_s22]]   ;;  %s13168_s22 = smov 28  }
  0x28   :  { %15037 = sst [smem:[#allocation111_spill]] %s13372_s4 }
  0x29   :  { %s13392_s4 = sld [smem:[%s14992_s0 + %s13165_s28]]   ;;  %s13169_s28 = smov 29  }
  0x2a   :  { %s13397_s24 = sld [smem:[%s14992_s0 + %s13166_s7]]   ;;  %s13170_s7 = smov 30  }
  0x2b   :  { %15038 = sst [smem:[#allocation112_spill]] %s13382_s13 }
  0x2c   :  { %s13402_s13 = sld [smem:[%s14992_s0 + %s13167_s15]]   ;;  %s13171_s15 = smov 31  }
  0x2d   :  { %15039 = sst [smem:[#allocation113_spill]] %s13387_s6 }
  0x2e   :  { %s13407_s14 = sld [smem:[%s14992_s0 + %s13168_s22]]   ;;  %s13172_s22 = smov 32  }
  0x2f   :  { %15040 = sst [smem:[#allocation114_spill]] %s13392_s4 }
  0x30   :  { %s13412_s4 = sld [smem:[%s14992_s0 + %s13169_s28]]   ;;  %s13173_s28 = smov 33  }
  0x31   :  { %s13417_s3 = sld [smem:[%s14992_s0 + %s13170_s7]]   ;;  %s13174_s7 = smov 34  }
  0x32   :  { %15041 = sst [smem:[#allocation115_spill]] %s13402_s13 }
  0x33   :  { %s13422_s13 = sld [smem:[%s14992_s0 + %s13171_s15]]   ;;  %s13175_s15 = smov 35  }
  0x34   :  { %15042 = sst [smem:[#allocation116_spill]] %s13407_s14 }
  0x35   :  { %s13427_s14 = sld [smem:[%s14992_s0 + %s13172_s22]]   ;;  %s13176_s22 = smov 36  }
  0x36   :  { %15043 = sst [smem:[#allocation117_spill]] %s13412_s4 }
  0x37   :  { %15044 = sst [smem:[#allocation118_spill]] %s13417_s3 }
  0x38   :  { %s13432_s25 = sld [smem:[%s14992_s0 + %s13173_s28]]   ;;  %s13177_s28 = smov 37  }
  0x39   :  { %s13437_s3 = sld [smem:[%s14992_s0 + %s13174_s7]]   ;;  %s13178_s7 = smov 38  }
  0x3a   :  { %s13442_s17 = sld [smem:[%s14992_s0 + %s13175_s15]]   ;;  %s13179_s15 = smov 39  }
  0x3b   :  { %15045 = sst [smem:[#allocation119_spill]] %s13427_s14 }
  0x3c   :  { %s13447_s14 = sld [smem:[%s14992_s0 + %s13176_s22]]   ;;  %s13180_s22 = smov 40  }
  0x3e   :  { %15046 = sst [smem:[#allocation120_spill]] %s13432_s25 }
  0x3f   :  { %15047 = sst [smem:[#allocation121_spill]] %s13437_s3 }
  0x40   :  { %15048 = sst [smem:[#allocation122_spill]] %s13442_s17 }
  0x41   :  { %s13452_s25 = sld [smem:[%s14992_s0 + %s13177_s28]]   ;;  %s13181_s28 = smov 41  }
  0x42   :  { %15049 = sst [smem:[#allocation123_spill]] %s13447_s14 }
  0x43   :  { %s13457_s3 = sld [smem:[%s14992_s0 + %s13178_s7]]   ;;  %s13182_s7 = smov 42  }
  0x44   :  { %s13462_s17 = sld [smem:[%s14992_s0 + %s13179_s15]]   ;;  %s13183_s15 = smov 43  }
  0x45   :  { %s13467_s14 = sld [smem:[%s14992_s0 + %s13180_s22]]   ;;  %s13184_s22 = smov 44  }
  0x47   :  { %15050 = sst [smem:[#allocation124_spill]] %s13452_s25 }
  0x48   :  { %s13472_s25 = sld [smem:[%s14992_s0 + %s13181_s28]]   ;;  %s13185_s28 = smov 45  }
  0x49   :  { %15051 = sst [smem:[#allocation125_spill]] %s13457_s3 }
  0x4a   :  { %15052 = sst [smem:[#allocation126_spill]] %s13462_s17 }
  0x4b   :  { %15053 = sst [smem:[#allocation127_spill]] %s13467_s14 }
  0x4c   :  { %s13477_s3 = sld [smem:[%s14992_s0 + %s13182_s7]]   ;;  %s13186_s7 = smov 46  }
  0x4d   :  { %s13482_s17 = sld [smem:[%s14992_s0 + %s13183_s15]]   ;;  %s13187_s15 = smov 47  }
  0x4e   :  { %15054 = sst [smem:[#allocation128_spill]] %s13472_s25 }
  0x4f   :  { %s13487_s14 = sld [smem:[%s14992_s0 + %s13184_s22]]   ;;  %s13188_s22 = smov 48  }
  0x50   :  { %s13492_s25 = sld [smem:[%s14992_s0 + %s13185_s28]]   ;;  %s13189_s28 = smov 49  }
  0x52   :  { %15055 = sst [smem:[#allocation129_spill]] %s13477_s3 }
  0x53   :  { %15056 = sst [smem:[#allocation130_spill]] %s13482_s17 }
  0x54   :  { %s13497_s3 = sld [smem:[%s14992_s0 + %s13186_s7]]   ;;  %s13190_s7 = smov 50  }
  0x55   :  { %15057 = sst [smem:[#allocation131_spill]] %s13487_s14 }
  0x56   :  { %15058 = sst [smem:[#allocation132_spill]] %s13492_s25 }
  0x57   :  { %s13502_s17 = sld [smem:[%s14992_s0 + %s13187_s15]]   ;;  %s13191_s15 = smov 51  }
  0x58   :  { %s13507_s14 = sld [smem:[%s14992_s0 + %s13188_s22]]   ;;  %s13192_s22 = smov 52  }
  0x59   :  { %s13512_s25 = sld [smem:[%s14992_s0 + %s13189_s28]]   ;;  %s13193_s28 = smov 53  }
  0x5a   :  { %15059 = sst [smem:[#allocation133_spill]] %s13497_s3 }
  0x5b   :  { %s13517_s3 = sld [smem:[%s14992_s0 + %s13190_s7]]   ;;  %s13194_s7 = smov 54  }
  0x5d   :  { %15060 = sst [smem:[#allocation134_spill]] %s13502_s17 }
  0x5e   :  { %15061 = sst [smem:[#allocation135_spill]] %s13507_s14 }
  0x5f   :  { %15062 = sst [smem:[#allocation136_spill]] %s13512_s25 }
  0x60   :  { %s13522_s17 = sld [smem:[%s14992_s0 + %s13191_s15]]   ;;  %s13195_s15 = smov 55  }
  0x61   :  { %15063 = sst [smem:[#allocation137_spill]] %s13517_s3 }
  0x62   :  { %s13527_s14 = sld [smem:[%s14992_s0 + %s13192_s22]]   ;;  %s13196_s22 = smov 56  }
  0x63   :  { %s13532_s25 = sld [smem:[%s14992_s0 + %s13193_s28]]   ;;  %s13197_s28 = smov 57  }
  0x64   :  { %s13537_s3 = sld [smem:[%s14992_s0 + %s13194_s7]]   ;;  %s13198_s7 = smov 58  }
  0x66   :  { %15064 = sst [smem:[#allocation138_spill]] %s13522_s17 }
  0x67   :  { %s13542_s17 = sld [smem:[%s14992_s0 + %s13195_s15]]   ;;  %s13199_s15 = smov 59  }
  0x68   :  { %15065 = sst [smem:[#allocation139_spill]] %s13527_s14 }
  0x69   :  { %15066 = sst [smem:[#allocation140_spill]] %s13532_s25 }
  0x6a   :  { %15067 = sst [smem:[#allocation141_spill]] %s13537_s3 }
  0x6b   :  { %s13547_s14 = sld [smem:[%s14992_s0 + %s13196_s22]]   ;;  %s13200_s22 = smov 60  }
  0x6c   :  { %s13552_s25 = sld [smem:[%s14992_s0 + %s13197_s28]]   ;;  %s13201_s28 = smov 61  }
  0x6d   :  { %15068 = sst [smem:[#allocation142_spill]] %s13542_s17 }
  0x6e   :  { %s13557_s3 = sld [smem:[%s14992_s0 + %s13198_s7]]   ;;  %s13202_s7 = smov 62  }
  0x6f   :  { %s13562_s17 = sld [smem:[%s14992_s0 + %s13199_s15]]   ;;  %s13203_s15 = smov 63  }
  0x71   :  { %15069 = sst [smem:[#allocation143_spill]] %s13547_s14 }
  0x72   :  { %15070 = sst [smem:[#allocation144_spill]] %s13552_s25 }
  0x73   :  { %s13567_s14 = sld [smem:[%s14992_s0 + %s13200_s22]]  }
  0x74   :  { %15071 = sst [smem:[#allocation145_spill]] %s13557_s3 }
  0x75   :  { %15072 = sst [smem:[#allocation146_spill]] %s13562_s17 }
  0x76   :  { %s13572_s25 = sld [smem:[%s14992_s0 + %s13201_s28]]  }
  0x77   :  { %s13577_s3 = sld [smem:[%s14992_s0 + %s13202_s7]]  }
  0x78   :  { %s13582_s17 = sld [smem:[%s14992_s0 + %s13203_s15]]  }
  0x79   :  { %133 = vsyncpa [#allocation3], 0 }
  0x7a   :  { %134 = vsyncpa [#allocation5], 0 }
  0x7b   :  { %135 = vsyncpa [#allocation8], 0 }
  0x7c   :  { %136 = vsyncpa [#allocation11], 0 }
  0x7d   :  { %137 = vsyncpa [#allocation14], 0 }
  0x7e   :  { %138 = vsyncpa [#allocation17], 0 }
  0x7f   :  { %139 = vsyncpa [#allocation20], 0 }
  0x80   :  { %140 = vsyncpa [#allocation23], 0 }
  0x81   :  { %141 = vsyncpa [#allocation26], 0 }
  0x82   :  { %142 = vsyncpa [#allocation29], 0 }
  0x83   :  { %143 = vsyncpa [#allocation32], 0 }
  0x84   :  { %144 = vsyncpa [#allocation35], 0 }
  0x85   :  { %145 = vsyncpa [#allocation38], 0 }
  0x86   :  { %146 = vsyncpa [#allocation41], 0 }
  0x87   :  { %147 = vsyncpa [#allocation44], 0 }
  0x88   :  { %148 = vsyncpa [#allocation47], 0 }
  0x89   :  { %149 = vsyncpa [#allocation50], 0 }
  0x8a   :  { %150 = vsyncpa [#allocation53], 0 }
  0x8b   :  { %151 = vsyncpa [#allocation56], 0 }
  0x8c   :  { %152 = vsyncpa [#allocation59], 0 }
  0x8d   :  { %153 = vsyncpa [#allocation62], 0 }
  0x8e   :  { %154 = vsyncpa [#allocation65], 0 }
  0x8f   :  { %155 = vsyncpa [#allocation68], 0 }
  0x90   :  { %156 = vsyncpa [#allocation71], 0  ;;  %s13584_s0 = smov 0  }
  0x91 LB: > { %s13590_s22 = sadd.s32 4294967295, %s13139_s0   ;;  %p9514_p0 = scmp.ge.s32.totalorder %s13139_s0, 1  ;;  %s13139_s0 = sphi %s13584_s0, %s162_s0  }
  0x92   : > { %p1536_p1 = scmp.lt.s32.totalorder %s13139_s0, 3 }
  0x94   : > { %p13594_p2 = pnand %p9514_p0, %p1536_p1 }
  0x95   : > { %p11012_p3 = scmp.eq.s32.totalorder (!%p13594_p2), %s13590_s22, 0  ;;  %s13204_s26 = smov (!%p13594_p2), [#allocation4]  }
  0x96   : > { %1540 = sbr.rel (%p13594_p2) target bundleno = 686 (0x2ae), region = 12  ;;  %s1561_s28 = sshll.u32 (!%p13594_p2), %s13204_s26, 4  ;;  %s1562_s28 = int_to_ptr.vmem [resolvable:$true] %s1561_s28 }
  0x97   : > { %s13205_s1 = smov (!%p13594_p2), [#allocation7]   ;;  %s11919_s7 = scalar_lea.vmem (!%p13594_p2), %s1562_s28, 128 }
  0x98   : > { %s1588_s2 = sshll.u32 (!%p13594_p2), %s13205_s1, 4  ;;  %p11920_p4 = scmp.ne.s32.totalorder (!%p13594_p2), %s1562_s28, %s11919_s7  ;;  %s1589_s2 = int_to_ptr.vmem [resolvable:$true] %s1588_s2 }
  0x99   : > { %p11926_p7 = scmp.lt.s32.totalorder (!%p13594_p2), %s1562_s28, %s1562_s28  ;;  %p11927_p8 = scmp.lt.s32.totalorder (!%p13594_p2), %s11919_s7, %s11919_s7 }
  0x9a   : > { %p11921_p5 = pnand (!%p13594_p2), %p11920_p4, %p11012_p3 }
  0x9b   : > { %p11928_p9 = por %p11927_p8, %p11926_p7 }
  0x9c   : > { %p11922_p6 = pneg %p11921_p5 }
  0x9e   : > { %p11929_p10 = pnand %p11928_p9, %p11922_p6 }
  0xa0   : > { %11932 = shalt.err (!%p11929_p10)
}
  0xa1   : > { %s15000_s10 = smov 64   ;;  %s15002_s11 = smov 4  }
  0xa2   : > { %10827 = dma.hbm_to_vmem [thread:$0]  (%p11012_p3), %s13287_s21, 128, %s1562_s28, [#allocation5], %s15000_s10, %s15000_s10, %s15002_s11  }
  0xa3   : > { %s11943_s15 = scalar_lea.vmem %s1589_s2, 64  ;;  %p11950_p0 = scmp.lt.s32.totalorder %s1589_s2, %s1589_s2 }
  0xa4   : > { %p11944_p11 = scmp.ne.s32.totalorder %s1589_s2, %s11943_s15  ;;  %p11951_p1 = scmp.lt.s32.totalorder %s11943_s15, %s11943_s15 }
  0xa6   : > { %p11945_p12 = pnand %p11944_p11, %p11012_p3  ;;  %p11952_p4 = por %p11951_p1, %p11950_p0 }
  0xa8   : > { %p11946_p13 = pneg %p11945_p12 }
  0xaa   : > { %p11953_p5 = pnand %p11952_p4, %p11946_p13 }
  0xac   : > { %11956 = shalt.err (!%p11953_p5)
}
  0xad   : > { %10831 = dma.hbm_to_vmem [thread:$0]  (%p11012_p3), %s13297_s29, 64, %s1589_s2, [#allocation8]  }
  0xae   : > { %s13208_s16 = smov [#allocation10]   ;;  %s13209_s26 = smov [#allocation13]  }
  0xaf   : > { %s1610_s18 = sshll.u32 %s13208_s16, 4  ;;  %s1634_s28 = sshll.u32 %s13209_s26, 4  ;;  %s1611_s18 = int_to_ptr.vmem [resolvable:$true] %s1610_s18  ;;  %s1635_s28 = int_to_ptr.vmem [resolvable:$true] %s1634_s28 }
  0xb0   : > { %s11967_s1 = scalar_lea.vmem %s1611_s18, 16  ;;  %s11973_s7 = scalar_lea.vmem %s1611_s18, 32 }
  0xb1   : > { %p11968_p6 = scmp.ne.s32.totalorder %s1611_s18, %s11967_s1  ;;  %p11974_p9 = scmp.lt.s32.totalorder %s1611_s18, %s1611_s18 }
  0xb2   : > { %p11975_p10 = scmp.lt.s32.totalorder %s11973_s7, %s11967_s1 }
  0xb3   : > { %p11969_p7 = pnand %p11968_p6, %p11012_p3 }
  0xb4   : > { %p11976_p11 = por %p11975_p10, %p11974_p9 }
  0xb5   : > { %p11970_p8 = pneg %p11969_p7 }
  0xb7   : > { %p11977_p12 = pnand %p11976_p11, %p11970_p8 }
  0xb9   : > { %11980 = shalt.err (!%p11977_p12)
}
  0xba   : > { %s15074_s8 = sld [smem:[#allocation103_spill]]  ;;  %s11991_s2 = scalar_lea.vmem %s1635_s28, 16 }
  0xbb   : > { %p11992_p13 = scmp.ne.s32.totalorder %s1635_s28, %s11991_s2  ;;  %s11997_s15 = scalar_lea.vmem %s1635_s28, 32 }
  0xbc   : > { %p11998_p4 = scmp.lt.s32.totalorder %s1635_s28, %s1635_s28  ;;  %p11999_p5 = scmp.lt.s32.totalorder %s11997_s15, %s11991_s2 }
  0xbd   : > { %p11993_p0 = pnand %p11992_p13, %p11012_p3 }
  0xbe   : > { %p12000_p6 = por %p11999_p5, %p11998_p4 }
  0xbf   : > { %p11994_p1 = pneg %p11993_p0 }
  0xc0   : > { %10835 = dma.hbm_to_vmem [thread:$0]  (%p11012_p3), %s15074_s8, 16, %s1611_s18, [#allocation11]  }
  0xc1   : > { %p12001_p7 = pnand %p12000_p6, %p11994_p1 }
  0xc3   : > { %12004 = shalt.err (!%p12001_p7)
}
  0xc4   : > { %10839 = dma.hbm_to_vmem [thread:$0]  (%p11012_p3), %s13317_s19, 16, %s1635_s28, [#allocation14]  }
  0xc5   : > { %s13210_s16 = smov [#allocation16]   ;;  %s13211_s18 = smov [#allocation19]  }
  0xc6   : > { %s1658_s26 = sshll.u32 %s13210_s16, 4  ;;  %s1682_s1 = sshll.u32 %s13211_s18, 4  ;;  %s1659_s26 = int_to_ptr.vmem [resolvable:$true] %s1658_s26  ;;  %s1683_s1 = int_to_ptr.vmem [resolvable:$true] %s1682_s1 }
  0xc7   : > { %s12015_s7 = scalar_lea.vmem %s1659_s26, 16  ;;  %s12021_s10 = scalar_lea.vmem %s1659_s26, 32 }
  0xc8   : > { %p12016_p8 = scmp.ne.s32.totalorder %s1659_s26, %s12015_s7  ;;  %p12022_p11 = scmp.lt.s32.totalorder %s1659_s26, %s1659_s26 }
  0xc9   : > { %p12023_p12 = scmp.lt.s32.totalorder %s12021_s10, %s12015_s7 }
  0xca   : > { %p12017_p9 = pnand %p12016_p8, %p11012_p3 }
  0xcb   : > { %p12024_p13 = por %p12023_p12, %p12022_p11 }
  0xcc   : > { %p12018_p10 = pneg %p12017_p9 }
  0xce   : > { %p12025_p0 = pnand %p12024_p13, %p12018_p10 }
  0xd0   : > { %12028 = shalt.err (!%p12025_p0)
}
  0xd1   : > { %10843 = dma.hbm_to_vmem [thread:$0]  (%p11012_p3), %s13327_s30, 16, %s1659_s26, [#allocation17]  }
  0xd2   : > { %s12039_s28 = scalar_lea.vmem %s1683_s1, 32  ;;  %p12046_p6 = scmp.lt.s32.totalorder %s1683_s1, %s1683_s1 }
  0xd3   : > { %p12040_p1 = scmp.ne.s32.totalorder %s1683_s1, %s12039_s28  ;;  %p12047_p7 = scmp.lt.s32.totalorder %s12039_s28, %s12039_s28 }
  0xd5   : > { %p12041_p4 = pnand %p12040_p1, %p11012_p3  ;;  %p12048_p8 = por %p12047_p7, %p12046_p6 }
  0xd7   : > { %p12042_p5 = pneg %p12041_p4 }
  0xd9   : > { %p12049_p9 = pnand %p12048_p8, %p12042_p5 }
  0xdb   : > { %12052 = shalt.err (!%p12049_p9)
}
  0xdc   : > { %10847 = dma.hbm_to_vmem [thread:$0]  (%p11012_p3), %s13337_s12, 32, %s1683_s1, [#allocation20]  }
  0xdd   : > { %s13212_s10 = smov [#allocation22]   ;;  %s13213_s15 = smov [#allocation25]  }
  0xde   : > { %s1706_s2 = sshll.u32 %s13212_s10, 4  ;;  %s1728_s16 = sshll.u32 %s13213_s15, 4  ;;  %s1707_s2 = int_to_ptr.vmem [resolvable:$true] %s1706_s2  ;;  %s1729_s16 = int_to_ptr.vmem [resolvable:$true] %s1728_s16 }
  0xdf   : > { %s12063_s26 = scalar_lea.vmem %s1707_s2, 32  ;;  %p12070_p13 = scmp.lt.s32.totalorder %s1707_s2, %s1707_s2 }
  0xe0   : > { %p12064_p10 = scmp.ne.s32.totalorder %s1707_s2, %s12063_s26  ;;  %p12071_p0 = scmp.lt.s32.totalorder %s12063_s26, %s12063_s26 }
  0xe2   : > { %p12065_p11 = pnand %p12064_p10, %p11012_p3  ;;  %p12072_p1 = por %p12071_p0, %p12070_p13 }
  0xe4   : > { %p12066_p12 = pneg %p12065_p11 }
  0xe6   : > { %p12073_p4 = pnand %p12072_p1, %p12066_p12 }
  0xe8   : > { %12076 = shalt.err (!%p12073_p4)
}
  0xe9   : > { %10851 = dma.hbm_to_vmem [thread:$0]  (%p11012_p3), %s13347_s27, 32, %s1707_s2, [#allocation23]  }
  0xea   : > { %s12087_s18 = scalar_lea.vmem %s1729_s16, 32  ;;  %p12094_p8 = scmp.lt.s32.totalorder %s1729_s16, %s1729_s16 }
  0xeb   : > { %p12088_p5 = scmp.ne.s32.totalorder %s1729_s16, %s12087_s18  ;;  %p12095_p9 = scmp.lt.s32.totalorder %s12087_s18, %s12087_s18 }
  0xed   : > { %p12089_p6 = pnand %p12088_p5, %p11012_p3  ;;  %p12096_p10 = por %p12095_p9, %p12094_p8 }
  0xef   : > { %p12090_p7 = pneg %p12089_p6 }
  0xf1   : > { %p12097_p11 = pnand %p12096_p10, %p12090_p7 }
  0xf3   : > { %12100 = shalt.err (!%p12097_p11)
}
  0xf4   : > { %10855 = dma.hbm_to_vmem [thread:$0]  (%p11012_p3), %s13357_s9, 32, %s1729_s16, [#allocation26]  }
  0xf5   : > { %s13214_s1 = smov [#allocation28]   ;;  %s13215_s28 = smov [#allocation31]  }
  0xf6   : > { %s1749_s7 = sshll.u32 %s13214_s1, 4  ;;  %s1773_s10 = sshll.u32 %s13215_s28, 4  ;;  %s1750_s7 = int_to_ptr.vmem [resolvable:$true] %s1749_s7  ;;  %s1774_s10 = int_to_ptr.vmem [resolvable:$true] %s1773_s10 }
  0xf7   : > { %s12111_s2 = scalar_lea.vmem %s1750_s7, 256  ;;  %p12118_p1 = scmp.lt.s32.totalorder %s1750_s7, %s1750_s7 }
  0xf8   : > { %p12112_p12 = scmp.ne.s32.totalorder %s1750_s7, %s12111_s2  ;;  %p12119_p4 = scmp.lt.s32.totalorder %s12111_s2, %s12111_s2 }
  0xfa   : > { %p12113_p13 = pnand %p12112_p12, %p11012_p3  ;;  %p12120_p5 = por %p12119_p4, %p12118_p1 }
  0xfc   : > { %p12114_p0 = pneg %p12113_p13 }
  0xfe   : > { %p12121_p6 = pnand %p12120_p5, %p12114_p0 }
 0x100   : > { %12124 = shalt.err (!%p12121_p6)
}
 0x101   : > { %s15075_s15 = smov 64   ;;  %s15076_s5 = sld [smem:[#allocation110_spill]] }
 0x102   : > { %s12135_s16 = scalar_lea.vmem %s1774_s10, 512  ;;  %p12142_p10 = scmp.lt.s32.totalorder %s1774_s10, %s1774_s10 }
 0x103   : > { %p12136_p7 = scmp.ne.s32.totalorder %s1774_s10, %s12135_s16  ;;  %p12143_p11 = scmp.lt.s32.totalorder %s12135_s16, %s12135_s16 }
 0x105   : > { %p12137_p8 = pnand %p12136_p7, %p11012_p3  ;;  %p12144_p12 = por %p12143_p11, %p12142_p10 }
 0x107   : > { %10859 = dma.hbm_to_vmem [thread:$0]  (%p11012_p3), %s15076_s5, 256, %s1750_s7, [#allocation29], %s15075_s15, %s15075_s15, %s15002_s11  }
 0x108   : > { %p12138_p9 = pneg %p12137_p8 }
 0x10a   : > { %p12145_p13 = pnand %p12144_p12, %p12138_p9 }
 0x10c   : > { %12148 = shalt.err (!%p12145_p13)
}
 0x10d   : > { %10863 = dma.hbm_to_vmem [thread:$0]  (%p11012_p3), %s13377_s20, 512, %s1774_s10, [#allocation32], %s15075_s15, %s15075_s15, %s15002_s11  }
 0x10e   : > { %s13216_s26 = smov [#allocation34]   ;;  %s13217_s1 = smov [#allocation37]  }
 0x10f   : > { %s1797_s18 = sshll.u32 %s13216_s26, 4  ;;  %s1821_s7 = sshll.u32 %s13217_s1, 4  ;;  %s1798_s18 = int_to_ptr.vmem [resolvable:$true] %s1797_s18  ;;  %s1822_s7 = int_to_ptr.vmem [resolvable:$true] %s1821_s7 }
 0x110   : > { %s12159_s28 = scalar_lea.vmem %s1798_s18, 2048  ;;  %p12166_p5 = scmp.lt.s32.totalorder %s1798_s18, %s1798_s18 }
 0x111   : > { %p12160_p0 = scmp.ne.s32.totalorder %s1798_s18, %s12159_s28  ;;  %p12167_p6 = scmp.lt.s32.totalorder %s12159_s28, %s12159_s28 }
 0x113   : > { %p12161_p1 = pnand %p12160_p0, %p11012_p3  ;;  %p12168_p7 = por %p12167_p6, %p12166_p5 }
 0x115   : > { %p12162_p4 = pneg %p12161_p1 }
 0x117   : > { %p12169_p8 = pnand %p12168_p7, %p12162_p4 }
 0x119   : > { %12172 = shalt.err (!%p12169_p8)
}
 0x11a   : > { %s15004_s2 = smov 128   ;;  %s15077_s6 = sld [smem:[#allocation113_spill]] }
 0x11b   : > { %s15006_s10 = smov 8   ;;  %s12183_s16 = scalar_lea.vmem %s1822_s7, 4096 }
 0x11c   : > { %p12184_p9 = scmp.ne.s32.totalorder %s1822_s7, %s12183_s16  ;;  %p12190_p12 = scmp.lt.s32.totalorder %s1822_s7, %s1822_s7 }
 0x11d   : > { %p12191_p13 = scmp.lt.s32.totalorder %s12183_s16, %s12183_s16 }
 0x11e   : > { %p12185_p10 = pnand %p12184_p9, %p11012_p3 }
 0x11f   : > { %p12192_p0 = por %p12191_p13, %p12190_p12 }
 0x120   : > { %10867 = dma.hbm_to_vmem [thread:$0]  (%p11012_p3), %s15077_s6, 2048, %s1798_s18, [#allocation35], %s15004_s2, %s15004_s2, %s15006_s10  }
 0x121   : > { %p12186_p11 = pneg %p12185_p10 }
 0x123   : > { %p12193_p1 = pnand %p12192_p0, %p12186_p11 }
 0x125   : > { %12196 = shalt.err (!%p12193_p1)
}
 0x126   : > { %10871 = dma.hbm_to_vmem [thread:$0]  (%p11012_p3), %s13397_s24, 4096, %s1822_s7, [#allocation38], %s15004_s2, %s15004_s2, %s15006_s10  }
 0x127   : > { %s13220_s26 = smov [#allocation40]   ;;  %s13221_s1 = smov [#allocation43]  }
 0x128   : > { %s1849_s18 = sshll.u32 %s13220_s26, 4  ;;  %s1873_s28 = sshll.u32 %s13221_s1, 4  ;;  %s1850_s18 = int_to_ptr.vmem [resolvable:$true] %s1849_s18  ;;  %s1874_s28 = int_to_ptr.vmem [resolvable:$true] %s1873_s28 }
 0x129   : > { %s12207_s11 = scalar_lea.vmem %s1850_s18, 64  ;;  %p12214_p7 = scmp.lt.s32.totalorder %s1850_s18, %s1850_s18 }
 0x12a   : > { %p12208_p4 = scmp.ne.s32.totalorder %s1850_s18, %s12207_s11  ;;  %p12215_p8 = scmp.lt.s32.totalorder %s12207_s11, %s12207_s11 }
 0x12c   : > { %p12209_p5 = pnand %p12208_p4, %p11012_p3  ;;  %p12216_p9 = por %p12215_p8, %p12214_p7 }
 0x12e   : > { %p12210_p6 = pneg %p12209_p5 }
 0x130   : > { %p12217_p10 = pnand %p12216_p9, %p12210_p6 }
 0x132   : > { %12220 = shalt.err (!%p12217_p10)
}
 0x133   : > { %s15078_s4 = sld [smem:[#allocation117_spill]]  ;;  %s12231_s7 = scalar_lea.vmem %s1874_s28, 32 }
 0x134   : > { %p12232_p11 = scmp.ne.s32.totalorder %s1874_s28, %s12231_s7  ;;  %p12238_p0 = scmp.lt.s32.totalorder %s1874_s28, %s1874_s28 }
 0x135   : > { %p12239_p1 = scmp.lt.s32.totalorder %s12231_s7, %s12231_s7 }
 0x136   : > { %p12233_p12 = pnand %p12232_p11, %p11012_p3 }
 0x137   : > { %p12240_p4 = por %p12239_p1, %p12238_p0 }
 0x138   : > { %p12234_p13 = pneg %p12233_p12 }
 0x139   : > { %10875 = dma.hbm_to_vmem [thread:$0]  (%p11012_p3), %s15078_s4, 64, %s1850_s18, [#allocation41]  }
 0x13a   : > { %p12241_p5 = pnand %p12240_p4, %p12234_p13 }
 0x13c   : > { %12244 = shalt.err (!%p12241_p5)
}
 0x13d   : > { %10879 = dma.hbm_to_vmem [thread:$0]  (%p11012_p3), %s13422_s13, 32, %s1874_s28, [#allocation44]  }
 0x13e   : > { %s13222_s11 = smov [#allocation46]   ;;  %s13223_s26 = smov [#allocation49]  }
 0x13f   : > { %s1903_s16 = sshll.u32 %s13222_s11, 4  ;;  %s1927_s18 = sshll.u32 %s13223_s26, 4  ;;  %s1904_s16 = int_to_ptr.vmem [resolvable:$true] %s1903_s16  ;;  %s1928_s18 = int_to_ptr.vmem [resolvable:$true] %s1927_s18 }
 0x140   : > { %s12255_s1 = scalar_lea.vmem %s1904_s16, 16  ;;  %s12261_s2 = scalar_lea.vmem %s1904_s16, 32 }
 0x141   : > { %p12256_p6 = scmp.ne.s32.totalorder %s1904_s16, %s12255_s1  ;;  %p12262_p9 = scmp.lt.s32.totalorder %s1904_s16, %s1904_s16 }
 0x142   : > { %p12263_p10 = scmp.lt.s32.totalorder %s12261_s2, %s12255_s1 }
 0x143   : > { %p12257_p7 = pnand %p12256_p6, %p11012_p3 }
 0x144   : > { %p12264_p11 = por %p12263_p10, %p12262_p9 }
 0x145   : > { %p12258_p8 = pneg %p12257_p7 }
 0x147   : > { %p12265_p12 = pnand %p12264_p11, %p12258_p8 }
 0x149   : > { %12268 = shalt.err (!%p12265_p12)
}
 0x14a   : > { %s15079_s7 = sld [smem:[#allocation122_spill]]  ;;  %s12279_s28 = scalar_lea.vmem %s1928_s18, 16 }
 0x14b   : > { %p12280_p13 = scmp.ne.s32.totalorder %s1928_s18, %s12279_s28  ;;  %s12285_s11 = scalar_lea.vmem %s1928_s18, 32 }
 0x14c   : > { %p12286_p4 = scmp.lt.s32.totalorder %s1928_s18, %s1928_s18  ;;  %p12287_p5 = scmp.lt.s32.totalorder %s12285_s11, %s12279_s28 }
 0x14d   : > { %p12281_p0 = pnand %p12280_p13, %p11012_p3 }
 0x14e   : > { %p12288_p6 = por %p12287_p5, %p12286_p4 }
 0x14f   : > { %p12282_p1 = pneg %p12281_p0 }
 0x150   : > { %10883 = dma.hbm_to_vmem [thread:$0]  (%p11012_p3), %s15079_s7, 16, %s1904_s16, [#allocation47]  }
 0x151   : > { %p12289_p7 = pnand %p12288_p6, %p12282_p1 }
 0x153   : > { %12292 = shalt.err (!%p12289_p7)
}
 0x154   : > { %s15080_s2 = sld [smem:[#allocation124_spill]]  ;;  %s13224_s26 = smov [#allocation52]  }
 0x155   : > { %s1951_s1 = sshll.u32 %s13224_s26, 4  ;;  %s13225_s16 = smov [#allocation55]   ;;  %s1952_s1 = int_to_ptr.vmem [resolvable:$true] %s1951_s1 }
 0x156   : > { %s1975_s7 = sshll.u32 %s13225_s16, 4  ;;  %s12303_s10 = scalar_lea.vmem %s1952_s1, 16  ;;  %s1976_s7 = int_to_ptr.vmem [resolvable:$true] %s1975_s7 }
 0x157   : > { %p12304_p8 = scmp.ne.s32.totalorder %s1952_s1, %s12303_s10  ;;  %s12309_s4 = scalar_lea.vmem %s1952_s1, 32 }
 0x158   : > { %p12310_p11 = scmp.lt.s32.totalorder %s1952_s1, %s1952_s1  ;;  %p12311_p12 = scmp.lt.s32.totalorder %s12309_s4, %s12303_s10 }
 0x159   : > { %p12305_p9 = pnand %p12304_p8, %p11012_p3 }
 0x15a   : > { %10887 = dma.hbm_to_vmem [thread:$0]  (%p11012_p3), %s15080_s2, 16, %s1928_s18, [#allocation50]  }
 0x15b   : > { %p12306_p10 = pneg %p12305_p9  ;;  %p12312_p13 = por %p12311_p12, %p12310_p11 }
 0x15d   : > { %p12313_p0 = pnand %p12312_p13, %p12306_p10 }
 0x15f   : > { %12316 = shalt.err (!%p12313_p0)
}
 0x160   : > { %s15081_s28 = sld [smem:[#allocation126_spill]]  ;;  %s12327_s18 = scalar_lea.vmem %s1976_s7, 16 }
 0x161   : > { %p12328_p1 = scmp.ne.s32.totalorder %s1976_s7, %s12327_s18  ;;  %s12333_s11 = scalar_lea.vmem %s1976_s7, 32 }
 0x162   : > { %p12334_p6 = scmp.lt.s32.totalorder %s1976_s7, %s1976_s7  ;;  %p12335_p7 = scmp.lt.s32.totalorder %s12333_s11, %s12327_s18 }
 0x163   : > { %p12329_p4 = pnand %p12328_p1, %p11012_p3 }
 0x164   : > { %p12336_p8 = por %p12335_p7, %p12334_p6 }
 0x165   : > { %p12330_p5 = pneg %p12329_p4 }
 0x166   : > { %10891 = dma.hbm_to_vmem [thread:$0]  (%p11012_p3), %s15081_s28, 16, %s1952_s1, [#allocation53]  }
 0x167   : > { %p12337_p9 = pnand %p12336_p8, %p12330_p5 }
 0x169   : > { %12340 = shalt.err (!%p12337_p9)
}
 0x16a   : > { %s15082_s4 = sld [smem:[#allocation128_spill]]  ;;  %s13226_s10 = smov [#allocation58]  }
 0x16b   : > { %s1999_s2 = sshll.u32 %s13226_s10, 4  ;;  %s13227_s26 = smov [#allocation61]   ;;  %s2000_s2 = int_to_ptr.vmem [resolvable:$true] %s1999_s2 }
 0x16c   : > { %s2027_s1 = sshll.u32 %s13227_s26, 4  ;;  %s12351_s16 = scalar_lea.vmem %s2000_s2, 16  ;;  %s2028_s1 = int_to_ptr.vmem [resolvable:$true] %s2027_s1 }
 0x16d   : > { %p12352_p10 = scmp.ne.s32.totalorder %s2000_s2, %s12351_s16  ;;  %s12357_s28 = scalar_lea.vmem %s2000_s2, 32 }
 0x16e   : > { %p12358_p13 = scmp.lt.s32.totalorder %s2000_s2, %s2000_s2  ;;  %p12359_p0 = scmp.lt.s32.totalorder %s12357_s28, %s12351_s16 }
 0x16f   : > { %p12353_p11 = pnand %p12352_p10, %p11012_p3 }
 0x170   : > { %10895 = dma.hbm_to_vmem [thread:$0]  (%p11012_p3), %s15082_s4, 16, %s1976_s7, [#allocation56]  }
 0x171   : > { %p12354_p12 = pneg %p12353_p11  ;;  %p12360_p1 = por %p12359_p0, %p12358_p13 }
 0x173   : > { %p12361_p4 = pnand %p12360_p1, %p12354_p12 }
 0x175   : > { %12364 = shalt.err (!%p12361_p4)
}
 0x176   : > { %s15083_s18 = sld [smem:[#allocation130_spill]]  ;;  %s12375_s7 = scalar_lea.vmem %s2028_s1, 64 }
 0x177   : > { %p12376_p5 = scmp.ne.s32.totalorder %s2028_s1, %s12375_s7  ;;  %p12382_p8 = scmp.lt.s32.totalorder %s2028_s1, %s2028_s1 }
 0x178   : > { %p12383_p9 = scmp.lt.s32.totalorder %s12375_s7, %s12375_s7 }
 0x179   : > { %p12377_p6 = pnand %p12376_p5, %p11012_p3 }
 0x17a   : > { %p12384_p10 = por %p12383_p9, %p12382_p8 }
 0x17b   : > { %p12378_p7 = pneg %p12377_p6 }
 0x17c   : > { %10899 = dma.hbm_to_vmem [thread:$0]  (%p11012_p3), %s15083_s18, 16, %s2000_s2, [#allocation59]  }
 0x17d   : > { %p12385_p11 = pnand %p12384_p10, %p12378_p7 }
 0x17f   : > { %12388 = shalt.err (!%p12385_p11)
}
 0x180   : > { %s15084_s11 = sld [smem:[#allocation134_spill]]  ;;  %s13228_s4 = smov [#allocation64]  }
 0x181   : > { %s2061_s10 = sshll.u32 %s13228_s4, 4  ;;  %s13229_s2 = smov [#allocation67]   ;;  %s2062_s10 = int_to_ptr.vmem [resolvable:$true] %s2061_s10 }
 0x182   : > { %s2085_s26 = sshll.u32 %s13229_s2, 4  ;;  %s12399_s16 = scalar_lea.vmem %s2062_s10, 16  ;;  %s2086_s26 = int_to_ptr.vmem [resolvable:$true] %s2085_s26 }
 0x183   : > { %p12400_p12 = scmp.ne.s32.totalorder %s2062_s10, %s12399_s16  ;;  %s12405_s28 = scalar_lea.vmem %s2062_s10, 32 }
 0x184   : > { %p12406_p1 = scmp.lt.s32.totalorder %s2062_s10, %s2062_s10  ;;  %p12407_p4 = scmp.lt.s32.totalorder %s12405_s28, %s12399_s16 }
 0x185   : > { %p12401_p13 = pnand %p12400_p12, %p11012_p3 }
 0x186   : > { %10903 = dma.hbm_to_vmem [thread:$0]  (%p11012_p3), %s15084_s11, 64, %s2028_s1, [#allocation62]  }
 0x187   : > { %p12402_p0 = pneg %p12401_p13  ;;  %p12408_p5 = por %p12407_p4, %p12406_p1 }
 0x189   : > { %p12409_p6 = pnand %p12408_p5, %p12402_p0 }
 0x18b   : > { %12412 = shalt.err (!%p12409_p6)
}
 0x18c   : > { %s15085_s18 = sld [smem:[#allocation140_spill]]  ;;  %s12423_s1 = scalar_lea.vmem %s2086_s26, 16 }
 0x18d   : > { %p12424_p7 = scmp.ne.s32.totalorder %s2086_s26, %s12423_s1  ;;  %s12429_s7 = scalar_lea.vmem %s2086_s26, 32 }
 0x18e   : > { %p12430_p10 = scmp.lt.s32.totalorder %s2086_s26, %s2086_s26  ;;  %p12431_p11 = scmp.lt.s32.totalorder %s12429_s7, %s12423_s1 }
 0x18f   : > { %p12425_p8 = pnand %p12424_p7, %p11012_p3 }
 0x190   : > { %p12432_p12 = por %p12431_p11, %p12430_p10 }
 0x191   : > { %p12426_p9 = pneg %p12425_p8 }
 0x192   : > { %10907 = dma.hbm_to_vmem [thread:$0]  (%p11012_p3), %s15085_s18, 16, %s2062_s10, [#allocation65]  }
 0x193   : > { %p12433_p13 = pnand %p12432_p12, %p12426_p9 }
 0x195   : > { %12436 = shalt.err (!%p12433_p13)
}
 0x196   : > { %s15086_s11 = sld [smem:[#allocation142_spill]]  ;;  %s13230_s4 = smov [#allocation70]  }
 0x197   : > { %s2113_s2 = sshll.u32 %s13230_s4, 4  ;;  %s2114_s2 = int_to_ptr.vmem [resolvable:$true] %s2113_s2 }
 0x198   : > { %s12447_s10 = scalar_lea.vmem %s2114_s2, 16  ;;  %s12453_s16 = scalar_lea.vmem %s2114_s2, 32 }
 0x199   : > { %p12448_p0 = scmp.ne.s32.totalorder %s2114_s2, %s12447_s10  ;;  %p12454_p5 = scmp.lt.s32.totalorder %s2114_s2, %s2114_s2 }
 0x19a   : > { %p12455_p6 = scmp.lt.s32.totalorder %s12453_s16, %s12447_s10 }
 0x19b   : > { %p12449_p1 = pnand %p12448_p0, %p11012_p3 }
 0x19c   : > { %10911 = dma.hbm_to_vmem [thread:$0]  (%p11012_p3), %s15086_s11, 16, %s2086_s26, [#allocation68]  }
 0x19d   : > { %p12450_p4 = pneg %p12449_p1  ;;  %p12456_p7 = por %p12455_p6, %p12454_p5 }
 0x19f   : > { %p12457_p8 = pnand %p12456_p7, %p12450_p4 }
 0x1a1   : > { %12460 = shalt.err (!%p12457_p8)
}
 0x1a2   : > { %s15087_s28 = sld [smem:[#allocation146_spill]]  ;;  %s13231_s26 = smov [#allocation2]  }
 0x1a3   : > { %s1548_s18 = sshll.u32 %s13231_s26, 4  ;;  %s13232_s1 = smov [#allocation6]   ;;  %s1549_s18 = int_to_ptr.vmem [resolvable:$true] %s1548_s18 }
 0x1a4   : > { %s1574_s7 = sshll.u32 %s13232_s1, 4  ;;  %s12471_s11 = scalar_lea.vmem %s1549_s18, 384  ;;  %s1575_s7 = int_to_ptr.vmem [resolvable:$true] %s1574_s7 }
 0x1a5   : > { %p12472_p9 = scmp.ne.s32.totalorder %s1549_s18, %s12471_s11  ;;  %p12478_p12 = scmp.lt.s32.totalorder %s1549_s18, %s1549_s18 }
 0x1a6   : > { %p12479_p13 = scmp.lt.s32.totalorder %s12471_s11, %s12471_s11 }
 0x1a7   : > { %p12473_p10 = pnand %p12472_p9, %p11012_p3 }
 0x1a8   : > { %10915 = dma.hbm_to_vmem [thread:$0]  (%p11012_p3), %s15087_s28, 16, %s2114_s2, [#allocation71]  }
 0x1a9   : > { %p12474_p11 = pneg %p12473_p10  ;;  %p12480_p0 = por %p12479_p13, %p12478_p12 }
 0x1ab   : > { %p12481_p1 = pnand %p12480_p0, %p12474_p11 }
 0x1ad   : > { %12484 = shalt.err (!%p12481_p1)
}
 0x1ae   : > { %s15088_s4 = smov 4   ;;  %s15089_s2 = sld [smem:[#allocation100_spill]] }
 0x1af   : > { %s12495_s10 = scalar_lea.vmem %s1575_s7, 2048  ;;  %p12502_p7 = scmp.lt.s32.totalorder %s1575_s7, %s1575_s7 }
 0x1b0   : > { %p12496_p4 = scmp.ne.s32.totalorder %s1575_s7, %s12495_s10  ;;  %p12503_p8 = scmp.lt.s32.totalorder %s12495_s10, %s12495_s10 }
 0x1b2   : > { %p12497_p5 = pnand %p12496_p4, %p11012_p3  ;;  %p12504_p9 = por %p12503_p8, %p12502_p7 }
 0x1b4   : > { %10825 = dma.hbm_to_vmem [thread:$0]  (%p11012_p3), %s15089_s2, 384, %s1549_s18, [#allocation3], %s15075_s15, %s15075_s15, %s15088_s4  }
 0x1b5   : > { %p12498_p6 = pneg %p12497_p5 }
 0x1b7   : > { %p12505_p10 = pnand %p12504_p9, %p12498_p6 }
 0x1b9   : > { %12508 = shalt.err (!%p12505_p10)
}
 0x1ba   : > { %s15090_s16 = sld [smem:[#allocation101_spill]]  ;;  %s13233_s28 = smov [#allocation9]  }
 0x1bb   : > { %s1599_s26 = sshll.u32 %s13233_s28, 4  ;;  %s13234_s18 = smov [#allocation12]   ;;  %s1600_s26 = int_to_ptr.vmem [resolvable:$true] %s1599_s26 }
 0x1bc   : > { %s1620_s1 = sshll.u32 %s13234_s18, 4  ;;  %s12519_s11 = scalar_lea.vmem %s1600_s26, 64  ;;  %s1621_s1 = int_to_ptr.vmem [resolvable:$true] %s1620_s1 }
 0x1bd   : > { %p12520_p11 = scmp.ne.s32.totalorder %s1600_s26, %s12519_s11  ;;  %p12526_p0 = scmp.lt.s32.totalorder %s1600_s26, %s1600_s26 }
 0x1be   : > { %p12527_p1 = scmp.lt.s32.totalorder %s12519_s11, %s12519_s11 }
 0x1bf   : > { %p12521_p12 = pnand %p12520_p11, %p11012_p3 }
 0x1c0   : > { %10829 = dma.hbm_to_vmem [thread:$0]  (%p11012_p3), %s15090_s16, 2048, %s1575_s7, [#allocation5], %s15075_s15, %s15075_s15, %s15088_s4  }
 0x1c1   : > { %p12522_p13 = pneg %p12521_p12  ;;  %p12528_p4 = por %p12527_p1, %p12526_p0 }
 0x1c3   : > { %p12529_p5 = pnand %p12528_p4, %p12522_p13 }
 0x1c5   : > { %12532 = shalt.err (!%p12529_p5)
}
 0x1c6   : > { %s15091_s2 = sld [smem:[#allocation102_spill]]  ;;  %s12543_s7 = scalar_lea.vmem %s1621_s1, 256 }
 0x1c7   : > { %p12544_p6 = scmp.ne.s32.totalorder %s1621_s1, %s12543_s7  ;;  %p12550_p9 = scmp.lt.s32.totalorder %s1621_s1, %s1621_s1 }
 0x1c8   : > { %p12551_p10 = scmp.lt.s32.totalorder %s12543_s7, %s12543_s7 }
 0x1c9   : > { %p12545_p7 = pnand %p12544_p6, %p11012_p3 }
 0x1ca   : > { %p12552_p11 = por %p12551_p10, %p12550_p9 }
 0x1cb   : > { %p12546_p8 = pneg %p12545_p7 }
 0x1cc   : > { %10833 = dma.hbm_to_vmem [thread:$0]  (%p11012_p3), %s15091_s2, 64, %s1600_s26, [#allocation8]  }
 0x1cd   : > { %p12553_p12 = pnand %p12552_p11, %p12546_p8 }
 0x1cf   : > { %12556 = shalt.err (!%p12553_p12)
}
 0x1d0   : > { %s15092_s10 = sld [smem:[#allocation104_spill]]  ;;  %s13235_s16 = smov [#allocation15]  }
 0x1d1   : > { %s1644_s28 = sshll.u32 %s13235_s16, 4  ;;  %s13236_s26 = smov [#allocation18]   ;;  %s1645_s28 = int_to_ptr.vmem [resolvable:$true] %s1644_s28 }
 0x1d2   : > { %s1668_s18 = sshll.u32 %s13236_s26, 4  ;;  %s12567_s11 = scalar_lea.vmem %s1645_s28, 512  ;;  %s1669_s18 = int_to_ptr.vmem [resolvable:$true] %s1668_s18 }
 0x1d3   : > { %p12568_p13 = scmp.ne.s32.totalorder %s1645_s28, %s12567_s11  ;;  %p12574_p4 = scmp.lt.s32.totalorder %s1645_s28, %s1645_s28 }
 0x1d4   : > { %p12575_p5 = scmp.lt.s32.totalorder %s12567_s11, %s12567_s11 }
 0x1d5   : > { %p12569_p0 = pnand %p12568_p13, %p11012_p3 }
 0x1d6   : > { %10837 = dma.hbm_to_vmem [thread:$0]  (%p11012_p3), %s15092_s10, 256, %s1621_s1, [#allocation11], %s15075_s15, %s15075_s15, %s15088_s4  }
 0x1d7   : > { %p12570_p1 = pneg %p12569_p0  ;;  %p12576_p6 = por %p12575_p5, %p12574_p4 }
 0x1d9   : > { %p12577_p7 = pnand %p12576_p6, %p12570_p1 }
 0x1db   : > { %12580 = shalt.err (!%p12577_p7)
}
 0x1dc   : > { %s15093_s1 = sld [smem:[#allocation105_spill]]  ;;  %s12591_s2 = scalar_lea.vmem %s1669_s18, 2048 }
 0x1dd   : > { %p12592_p8 = scmp.ne.s32.totalorder %s1669_s18, %s12591_s2  ;;  %p12598_p11 = scmp.lt.s32.totalorder %s1669_s18, %s1669_s18 }
 0x1de   : > { %p12599_p12 = scmp.lt.s32.totalorder %s12591_s2, %s12591_s2 }
 0x1df   : > { %p12593_p9 = pnand %p12592_p8, %p11012_p3 }
 0x1e0   : > { %p12600_p13 = por %p12599_p12, %p12598_p11 }
 0x1e1   : > { %p12594_p10 = pneg %p12593_p9 }
 0x1e2   : > { %10841 = dma.hbm_to_vmem [thread:$0]  (%p11012_p3), %s15093_s1, 512, %s1645_s28, [#allocation14], %s15075_s15, %s15075_s15, %s15088_s4  }
 0x1e3   : > { %p12601_p0 = pnand %p12600_p13, %p12594_p10 }
 0x1e5   : > { %12604 = shalt.err (!%p12601_p0)
}
 0x1e6   : > { %s15094_s7 = smov 8   ;;  %s15095_s10 = smov 128  }
 0x1e7   : > { %s15096_s16 = sld [smem:[#allocation106_spill]]  ;;  %s13237_s28 = smov [#allocation21]  }
 0x1e8   : > { %s1692_s26 = sshll.u32 %s13237_s28, 4  ;;  %s13238_s11 = smov [#allocation24]   ;;  %s1693_s26 = int_to_ptr.vmem [resolvable:$true] %s1692_s26 }
 0x1e9   : > { %s1717_s1 = sshll.u32 %s13238_s11, 4  ;;  %s12615_s5 = scalar_lea.vmem %s1693_s26, 4096  ;;  %s1718_s1 = int_to_ptr.vmem [resolvable:$true] %s1717_s1 }
 0x1ea   : > { %p12616_p1 = scmp.ne.s32.totalorder %s1693_s26, %s12615_s5  ;;  %p12622_p6 = scmp.lt.s32.totalorder %s1693_s26, %s1693_s26 }
 0x1eb   : > { %p12623_p7 = scmp.lt.s32.totalorder %s12615_s5, %s12615_s5 }
 0x1ec   : > { %p12617_p4 = pnand %p12616_p1, %p11012_p3 }
 0x1ed   : > { %10845 = dma.hbm_to_vmem [thread:$0]  (%p11012_p3), %s15096_s16, 2048, %s1669_s18, [#allocation17], %s15095_s10, %s15095_s10, %s15094_s7  }
 0x1ee   : > { %p12618_p5 = pneg %p12617_p4  ;;  %p12624_p8 = por %p12623_p7, %p12622_p6 }
 0x1f0   : > { %p12625_p9 = pnand %p12624_p8, %p12618_p5 }
 0x1f2   : > { %12628 = shalt.err (!%p12625_p9)
}
 0x1f3   : > { %s15097_s18 = sld [smem:[#allocation107_spill]]  ;;  %s12639_s2 = scalar_lea.vmem %s1718_s1, 32 }
 0x1f4   : > { %p12640_p10 = scmp.ne.s32.totalorder %s1718_s1, %s12639_s2  ;;  %p12646_p13 = scmp.lt.s32.totalorder %s1718_s1, %s1718_s1 }
 0x1f5   : > { %p12647_p0 = scmp.lt.s32.totalorder %s12639_s2, %s12639_s2 }
 0x1f6   : > { %p12641_p11 = pnand %p12640_p10, %p11012_p3 }
 0x1f7   : > { %p12648_p1 = por %p12647_p0, %p12646_p13 }
 0x1f8   : > { %p12642_p12 = pneg %p12641_p11 }
 0x1f9   : > { %10849 = dma.hbm_to_vmem [thread:$0]  (%p11012_p3), %s15097_s18, 4096, %s1693_s26, [#allocation20], %s15095_s10, %s15095_s10, %s15094_s7  }
 0x1fa   : > { %p12649_p4 = pnand %p12648_p1, %p12642_p12 }
 0x1fc   : > { %12652 = shalt.err (!%p12649_p4)
}
 0x1fd   : > { %s15098_s5 = sld [smem:[#allocation108_spill]]  ;;  %s13239_s16 = smov [#allocation27]  }
 0x1fe   : > { %s1739_s28 = sshll.u32 %s13239_s16, 4  ;;  %s13240_s26 = smov [#allocation30]   ;;  %s1740_s28 = int_to_ptr.vmem [resolvable:$true] %s1739_s28 }
 0x1ff   : > { %s1763_s11 = sshll.u32 %s13240_s26, 4  ;;  %s12663_s18 = scalar_lea.vmem %s1740_s28, 16  ;;  %s1764_s11 = int_to_ptr.vmem [resolvable:$true] %s1763_s11 }
 0x200   : > { %p12664_p5 = scmp.ne.s32.totalorder %s1740_s28, %s12663_s18  ;;  %s12669_s6 = scalar_lea.vmem %s1740_s28, 32 }
 0x201   : > { %p12670_p8 = scmp.lt.s32.totalorder %s1740_s28, %s1740_s28  ;;  %p12671_p9 = scmp.lt.s32.totalorder %s12669_s6, %s12663_s18 }
 0x202   : > { %p12665_p6 = pnand %p12664_p5, %p11012_p3 }
 0x203   : > { %10853 = dma.hbm_to_vmem [thread:$0]  (%p11012_p3), %s15098_s5, 32, %s1718_s1, [#allocation23]  }
 0x204   : > { %p12666_p7 = pneg %p12665_p6  ;;  %p12672_p10 = por %p12671_p9, %p12670_p8 }
 0x206   : > { %p12673_p11 = pnand %p12672_p10, %p12666_p7 }
 0x208   : > { %12676 = shalt.err (!%p12673_p11)
}
 0x209   : > { %s15099_s2 = sld [smem:[#allocation109_spill]]  ;;  %s12687_s1 = scalar_lea.vmem %s1764_s11, 16 }
 0x20a   : > { %p12688_p12 = scmp.ne.s32.totalorder %s1764_s11, %s12687_s1  ;;  %s12693_s5 = scalar_lea.vmem %s1764_s11, 32 }
 0x20b   : > { %p12694_p1 = scmp.lt.s32.totalorder %s1764_s11, %s1764_s11  ;;  %p12695_p4 = scmp.lt.s32.totalorder %s12693_s5, %s12687_s1 }
 0x20c   : > { %p12689_p13 = pnand %p12688_p12, %p11012_p3 }
 0x20d   : > { %p12696_p5 = por %p12695_p4, %p12694_p1 }
 0x20e   : > { %p12690_p0 = pneg %p12689_p13 }
 0x20f   : > { %10857 = dma.hbm_to_vmem [thread:$0]  (%p11012_p3), %s15099_s2, 16, %s1740_s28, [#allocation26]  }
 0x210   : > { %p12697_p6 = pnand %p12696_p5, %p12690_p0 }
 0x212   : > { %12700 = shalt.err (!%p12697_p6)
}
 0x213   : > { %s15100_s6 = sld [smem:[#allocation111_spill]]  ;;  %s13241_s16 = smov [#allocation33]  }
 0x214   : > { %s1787_s26 = sshll.u32 %s13241_s16, 4  ;;  %s13242_s28 = smov [#allocation36]   ;;  %s1788_s26 = int_to_ptr.vmem [resolvable:$true] %s1787_s26 }
 0x215   : > { %s1811_s18 = sshll.u32 %s13242_s28, 4  ;;  %s12711_s2 = scalar_lea.vmem %s1788_s26, 16  ;;  %s1812_s18 = int_to_ptr.vmem [resolvable:$true] %s1811_s18 }
 0x216   : > { %p12712_p7 = scmp.ne.s32.totalorder %s1788_s26, %s12711_s2  ;;  %s12717_s8 = scalar_lea.vmem %s1788_s26, 32 }
 0x217   : > { %p12718_p10 = scmp.lt.s32.totalorder %s1788_s26, %s1788_s26  ;;  %p12719_p11 = scmp.lt.s32.totalorder %s12717_s8, %s12711_s2 }
 0x218   : > { %p12713_p8 = pnand %p12712_p7, %p11012_p3 }
 0x219   : > { %10861 = dma.hbm_to_vmem [thread:$0]  (%p11012_p3), %s15100_s6, 16, %s1764_s11, [#allocation29]  }
 0x21a   : > { %p12714_p9 = pneg %p12713_p8  ;;  %p12720_p12 = por %p12719_p11, %p12718_p10 }
 0x21c   : > { %p12721_p13 = pnand %p12720_p12, %p12714_p9 }
 0x21e   : > { %12724 = shalt.err (!%p12721_p13)
}
 0x21f   : > { %s15101_s1 = sld [smem:[#allocation112_spill]]  ;;  %s12735_s11 = scalar_lea.vmem %s1812_s18, 32 }
 0x220   : > { %p12736_p0 = scmp.ne.s32.totalorder %s1812_s18, %s12735_s11  ;;  %p12742_p5 = scmp.lt.s32.totalorder %s1812_s18, %s1812_s18 }
 0x221   : > { %p12743_p6 = scmp.lt.s32.totalorder %s12735_s11, %s12735_s11 }
 0x222   : > { %p12737_p1 = pnand %p12736_p0, %p11012_p3 }
 0x223   : > { %p12744_p7 = por %p12743_p6, %p12742_p5 }
 0x224   : > { %p12738_p4 = pneg %p12737_p1 }
 0x225   : > { %10865 = dma.hbm_to_vmem [thread:$0]  (%p11012_p3), %s15101_s1, 16, %s1788_s26, [#allocation32]  }
 0x226   : > { %p12745_p8 = pnand %p12744_p7, %p12738_p4 }
 0x228   : > { %12748 = shalt.err (!%p12745_p8)
}
 0x229   : > { %s15102_s8 = sld [smem:[#allocation114_spill]]  ;;  %s13243_s5 = smov [#allocation39]  }
 0x22a   : > { %s1835_s6 = sshll.u32 %s13243_s5, 4  ;;  %s13244_s16 = smov [#allocation42]   ;;  %s1836_s6 = int_to_ptr.vmem [resolvable:$true] %s1835_s6 }
 0x22b   : > { %s1859_s26 = sshll.u32 %s13244_s16, 4  ;;  %s12759_s28 = scalar_lea.vmem %s1836_s6, 32  ;;  %s1860_s26 = int_to_ptr.vmem [resolvable:$true] %s1859_s26 }
 0x22c   : > { %p12760_p9 = scmp.ne.s32.totalorder %s1836_s6, %s12759_s28  ;;  %p12766_p12 = scmp.lt.s32.totalorder %s1836_s6, %s1836_s6 }
 0x22d   : > { %p12767_p13 = scmp.lt.s32.totalorder %s12759_s28, %s12759_s28 }
 0x22e   : > { %p12761_p10 = pnand %p12760_p9, %p11012_p3 }
 0x22f   : > { %10869 = dma.hbm_to_vmem [thread:$0]  (%p11012_p3), %s15102_s8, 32, %s1812_s18, [#allocation35]  }
 0x230   : > { %p12762_p11 = pneg %p12761_p10  ;;  %p12768_p0 = por %p12767_p13, %p12766_p12 }
 0x232   : > { %p12769_p1 = pnand %p12768_p0, %p12762_p11 }
 0x234   : > { %12772 = shalt.err (!%p12769_p1)
}
 0x235   : > { %s15103_s2 = sld [smem:[#allocation115_spill]]  ;;  %s12783_s18 = scalar_lea.vmem %s1860_s26, 4096 }
 0x236   : > { %p12784_p4 = scmp.ne.s32.totalorder %s1860_s26, %s12783_s18  ;;  %p12790_p7 = scmp.lt.s32.totalorder %s1860_s26, %s1860_s26 }
 0x237   : > { %p12791_p8 = scmp.lt.s32.totalorder %s12783_s18, %s12783_s18 }
 0x238   : > { %p12785_p5 = pnand %p12784_p4, %p11012_p3 }
 0x239   : > { %p12792_p9 = por %p12791_p8, %p12790_p7 }
 0x23a   : > { %p12786_p6 = pneg %p12785_p5 }
 0x23b   : > { %10873 = dma.hbm_to_vmem [thread:$0]  (%p11012_p3), %s15103_s2, 32, %s1836_s6, [#allocation38]  }
 0x23c   : > { %p12793_p10 = pnand %p12792_p9, %p12786_p6 }
 0x23e   : > { %12796 = shalt.err (!%p12793_p10)
}
 0x23f   : > { %s15104_s1 = sld [smem:[#allocation118_spill]]  ;;  %s13245_s11 = smov [#allocation45]  }
 0x240   : > { %s1889_s8 = sshll.u32 %s13245_s11, 4  ;;  %s13246_s5 = smov [#allocation48]   ;;  %s1890_s8 = int_to_ptr.vmem [resolvable:$true] %s1889_s8 }
 0x241   : > { %s1913_s6 = sshll.u32 %s13246_s5, 4  ;;  %s12807_s16 = scalar_lea.vmem %s1890_s8, 2048  ;;  %s1914_s6 = int_to_ptr.vmem [resolvable:$true] %s1913_s6 }
 0x242   : > { %p12808_p11 = scmp.ne.s32.totalorder %s1890_s8, %s12807_s16  ;;  %p12814_p0 = scmp.lt.s32.totalorder %s1890_s8, %s1890_s8 }
 0x243   : > { %p12815_p1 = scmp.lt.s32.totalorder %s12807_s16, %s12807_s16 }
 0x244   : > { %p12809_p12 = pnand %p12808_p11, %p11012_p3 }
 0x245   : > { %10877 = dma.hbm_to_vmem [thread:$0]  (%p11012_p3), %s15104_s1, 4096, %s1860_s26, [#allocation41], %s15095_s10, %s15095_s10, %s15094_s7  }
 0x246   : > { %p12810_p13 = pneg %p12809_p12  ;;  %p12816_p4 = por %p12815_p1, %p12814_p0 }
 0x248   : > { %p12817_p5 = pnand %p12816_p4, %p12810_p13 }
 0x24a   : > { %12820 = shalt.err (!%p12817_p5)
}
 0x24b   : > { %s15105_s7 = sld [smem:[#allocation121_spill]]  ;;  %s12831_s10 = scalar_lea.vmem %s1914_s6, 1024 }
 0x24c   : > { %p12832_p6 = scmp.ne.s32.totalorder %s1914_s6, %s12831_s10  ;;  %p12838_p9 = scmp.lt.s32.totalorder %s1914_s6, %s1914_s6 }
 0x24d   : > { %p12839_p10 = scmp.lt.s32.totalorder %s12831_s10, %s12831_s10 }
 0x24e   : > { %p12833_p7 = pnand %p12832_p6, %p11012_p3 }
 0x24f   : > { %p12840_p11 = por %p12839_p10, %p12838_p9 }
 0x250   : > { %p12834_p8 = pneg %p12833_p7 }
 0x251   : > { %10881 = dma.hbm_to_vmem [thread:$0]  (%p11012_p3), %s15105_s7, 2048, %s1890_s8, [#allocation44], %s15075_s15, %s15075_s15, %s15088_s4  }
 0x252   : > { %p12841_p12 = pnand %p12840_p11, %p12834_p8 }
 0x254   : > { %12844 = shalt.err (!%p12841_p12)
}
 0x255   : > { %s15106_s26 = sld [smem:[#allocation123_spill]]  ;;  %s13247_s28 = smov [#allocation51]  }
 0x256   : > { %s1937_s2 = sshll.u32 %s13247_s28, 4  ;;  %s13248_s18 = smov [#allocation54]   ;;  %s1938_s2 = int_to_ptr.vmem [resolvable:$true] %s1937_s2 }
 0x257   : > { %s1961_s1 = sshll.u32 %s13248_s18, 4  ;;  %s12855_s11 = scalar_lea.vmem %s1938_s2, 1024  ;;  %s1962_s1 = int_to_ptr.vmem [resolvable:$true] %s1961_s1 }
 0x258   : > { %p12856_p13 = scmp.ne.s32.totalorder %s1938_s2, %s12855_s11  ;;  %p12862_p4 = scmp.lt.s32.totalorder %s1938_s2, %s1938_s2 }
 0x259   : > { %p12863_p5 = scmp.lt.s32.totalorder %s12855_s11, %s12855_s11 }
 0x25a   : > { %p12857_p0 = pnand %p12856_p13, %p11012_p3 }
 0x25b   : > { %10885 = dma.hbm_to_vmem [thread:$0]  (%p11012_p3), %s15106_s26, 1024, %s1914_s6, [#allocation47], %s15075_s15, %s15075_s15, %s15088_s4  }
 0x25c   : > { %p12858_p1 = pneg %p12857_p0  ;;  %p12864_p6 = por %p12863_p5, %p12862_p4 }
 0x25e   : > { %p12865_p7 = pnand %p12864_p6, %p12858_p1 }
 0x260   : > { %12868 = shalt.err (!%p12865_p7)
}
 0x261   : > { %s15107_s8 = sld [smem:[#allocation125_spill]]  ;;  %s12879_s5 = scalar_lea.vmem %s1962_s1, 256 }
 0x262   : > { %p12880_p8 = scmp.ne.s32.totalorder %s1962_s1, %s12879_s5  ;;  %p12886_p11 = scmp.lt.s32.totalorder %s1962_s1, %s1962_s1 }
 0x263   : > { %p12887_p12 = scmp.lt.s32.totalorder %s12879_s5, %s12879_s5 }
 0x264   : > { %p12881_p9 = pnand %p12880_p8, %p11012_p3 }
 0x265   : > { %p12888_p13 = por %p12887_p12, %p12886_p11 }
 0x266   : > { %p12882_p10 = pneg %p12881_p9 }
 0x267   : > { %10889 = dma.hbm_to_vmem [thread:$0]  (%p11012_p3), %s15107_s8, 1024, %s1938_s2, [#allocation50], %s15075_s15, %s15075_s15, %s15088_s4  }
 0x268   : > { %p12889_p0 = pnand %p12888_p13, %p12882_p10 }
 0x26a   : > { %12892 = shalt.err (!%p12889_p0)
}
 0x26b   : > { %s15108_s6 = sld [smem:[#allocation127_spill]]  ;;  %s13249_s16 = smov [#allocation57]  }
 0x26c   : > { %s1985_s7 = sshll.u32 %s13249_s16, 4  ;;  %s13250_s10 = smov [#allocation60]   ;;  %s1986_s7 = int_to_ptr.vmem [resolvable:$true] %s1985_s7 }
 0x26d   : > { %s2013_s26 = sshll.u32 %s13250_s10, 4  ;;  %s12903_s28 = scalar_lea.vmem %s1986_s7, 256  ;;  %s2014_s26 = int_to_ptr.vmem [resolvable:$true] %s2013_s26 }
 0x26e   : > { %p12904_p1 = scmp.ne.s32.totalorder %s1986_s7, %s12903_s28  ;;  %p12910_p6 = scmp.lt.s32.totalorder %s1986_s7, %s1986_s7 }
 0x26f   : > { %p12911_p7 = scmp.lt.s32.totalorder %s12903_s28, %s12903_s28 }
 0x270   : > { %p12905_p4 = pnand %p12904_p1, %p11012_p3 }
 0x271   : > { %10893 = dma.hbm_to_vmem [thread:$0]  (%p11012_p3), %s15108_s6, 256, %s1962_s1, [#allocation53], %s15075_s15, %s15075_s15, %s15088_s4  }
 0x272   : > { %p12906_p5 = pneg %p12905_p4  ;;  %p12912_p8 = por %p12911_p7, %p12910_p6 }
 0x274   : > { %p12913_p9 = pnand %p12912_p8, %p12906_p5 }
 0x276   : > { %12916 = shalt.err (!%p12913_p9)
}
 0x277   : > { %s15109_s2 = sld [smem:[#allocation129_spill]]  ;;  %s12927_s18 = scalar_lea.vmem %s2014_s26, 32 }
 0x278   : > { %p12928_p10 = scmp.ne.s32.totalorder %s2014_s26, %s12927_s18  ;;  %p12934_p13 = scmp.lt.s32.totalorder %s2014_s26, %s2014_s26 }
 0x279   : > { %p12935_p0 = scmp.lt.s32.totalorder %s12927_s18, %s12927_s18 }
 0x27a   : > { %p12929_p11 = pnand %p12928_p10, %p11012_p3 }
 0x27b   : > { %p12936_p1 = por %p12935_p0, %p12934_p13 }
 0x27c   : > { %p12930_p12 = pneg %p12929_p11 }
 0x27d   : > { %10897 = dma.hbm_to_vmem [thread:$0]  (%p11012_p3), %s15109_s2, 256, %s1986_s7, [#allocation56], %s15075_s15, %s15075_s15, %s15088_s4  }
 0x27e   : > { %p12937_p4 = pnand %p12936_p1, %p12930_p12 }
 0x280   : > { %12940 = shalt.err (!%p12937_p4)
}
 0x281   : > { %s15110_s1 = sld [smem:[#allocation132_spill]]  ;;  %s13251_s11 = smov [#allocation63]  }
 0x282   : > { %s2041_s8 = sshll.u32 %s13251_s11, 4  ;;  %s13252_s5 = smov [#allocation66]   ;;  %s2042_s8 = int_to_ptr.vmem [resolvable:$true] %s2041_s8 }
 0x283   : > { %s2071_s6 = sshll.u32 %s13252_s5, 4  ;;  %s12951_s16 = scalar_lea.vmem %s2042_s8, 32  ;;  %s2072_s6 = int_to_ptr.vmem [resolvable:$true] %s2071_s6 }
 0x284   : > { %p12952_p5 = scmp.ne.s32.totalorder %s2042_s8, %s12951_s16  ;;  %p12958_p8 = scmp.lt.s32.totalorder %s2042_s8, %s2042_s8 }
 0x285   : > { %p12959_p9 = scmp.lt.s32.totalorder %s12951_s16, %s12951_s16 }
 0x286   : > { %p12953_p6 = pnand %p12952_p5, %p11012_p3 }
 0x287   : > { %10901 = dma.hbm_to_vmem [thread:$0]  (%p11012_p3), %s15110_s1, 32, %s2014_s26, [#allocation59]  }
 0x288   : > { %p12954_p7 = pneg %p12953_p6  ;;  %p12960_p10 = por %p12959_p9, %p12958_p8 }
 0x28a   : > { %p12961_p11 = pnand %p12960_p10, %p12954_p7 }
 0x28c   : > { %12964 = shalt.err (!%p12961_p11)
}
 0x28d   : > { %s15111_s7 = sld [smem:[#allocation136_spill]]  ;;  %s12975_s10 = scalar_lea.vmem %s2072_s6, 1024 }
 0x28e   : > { %p12976_p12 = scmp.ne.s32.totalorder %s2072_s6, %s12975_s10  ;;  %p12982_p1 = scmp.lt.s32.totalorder %s2072_s6, %s2072_s6 }
 0x28f   : > { %p12983_p4 = scmp.lt.s32.totalorder %s12975_s10, %s12975_s10 }
 0x290   : > { %p12977_p13 = pnand %p12976_p12, %p11012_p3 }
 0x291   : > { %p12984_p5 = por %p12983_p4, %p12982_p1 }
 0x292   : > { %p12978_p0 = pneg %p12977_p13 }
 0x293   : > { %10905 = dma.hbm_to_vmem [thread:$0]  (%p11012_p3), %s15111_s7, 32, %s2042_s8, [#allocation62]  }
 0x294   : > { %p12985_p6 = pnand %p12984_p5, %p12978_p0 }
 0x296   : > { %12988 = shalt.err (!%p12985_p6)
}
 0x297   : > { %s15112_s26 = sld [smem:[#allocation141_spill]]  ;;  %s13253_s28 = smov [#allocation69]  }
 0x298   : > { %s2099_s2 = sshll.u32 %s13253_s28, 4  ;;  %s13254_s18 = smov [#allocation72]   ;;  %s2100_s2 = int_to_ptr.vmem [resolvable:$true] %s2099_s2 }
 0x299   : > { %s2127_s1 = sshll.u32 %s13254_s18, 4  ;;  %s12999_s11 = scalar_lea.vmem %s2100_s2, 16  ;;  %s2128_s1 = int_to_ptr.vmem [resolvable:$true] %s2127_s1 }
 0x29a   : > { %p13000_p7 = scmp.ne.s32.totalorder %s2100_s2, %s12999_s11  ;;  %s13005_s8 = scalar_lea.vmem %s2100_s2, 32 }
 0x29b   : > { %p13006_p10 = scmp.lt.s32.totalorder %s2100_s2, %s2100_s2  ;;  %p13007_p11 = scmp.lt.s32.totalorder %s13005_s8, %s12999_s11 }
 0x29c   : > { %p13001_p8 = pnand %p13000_p7, %p11012_p3 }
 0x29d   : > { %10909 = dma.hbm_to_vmem [thread:$0]  (%p11012_p3), %s15112_s26, 1024, %s2072_s6, [#allocation65], %s15075_s15, %s15075_s15, %s15088_s4  }
 0x29e   : > { %p13002_p9 = pneg %p13001_p8  ;;  %p13008_p12 = por %p13007_p11, %p13006_p10 }
 0x2a0   : > { %p13009_p13 = pnand %p13008_p12, %p13002_p9 }
 0x2a2   : > { %13012 = shalt.err (!%p13009_p13)
}
 0x2a3   : > { %s15113_s5 = sld [smem:[#allocation144_spill]]  ;;  %s13023_s15 = scalar_lea.vmem %s2128_s1, 16 }
 0x2a4   : > { %p13024_p0 = scmp.ne.s32.totalorder %s2128_s1, %s13023_s15  ;;  %s13029_s4 = scalar_lea.vmem %s2128_s1, 32 }
 0x2a5   : > { %p13030_p5 = scmp.lt.s32.totalorder %s2128_s1, %s2128_s1  ;;  %p13031_p6 = scmp.lt.s32.totalorder %s13029_s4, %s13023_s15 }
 0x2a6   : > { %p13025_p1 = pnand %p13024_p0, %p11012_p3 }
 0x2a7   : > { %p13032_p7 = por %p13031_p6, %p13030_p5 }
 0x2a8   : > { %p13026_p4 = pneg %p13025_p1 }
 0x2a9   : > { %10913 = dma.hbm_to_vmem [thread:$0]  (%p11012_p3), %s15113_s5, 16, %s2100_s2, [#allocation68]  }
 0x2aa   : > { %p13033_p8 = pnand %p13032_p7, %p13026_p4 }
 0x2ac   : > { %13036 = shalt.err (!%p13033_p8)
}
 0x2ad   : > { %10917 = dma.hbm_to_vmem [thread:$0]  (%p11012_p3), %s13572_s25, 16, %s2128_s1, [#allocation71]  }
 0x2ae PF: > { %2167 = sbr.rel (%p13594_p2) target bundleno = 9774 (0x262e), region = 268  ;;  %p11059_p9 = scmp.eq.s32.totalorder (!%p13594_p2), %s13590_s22, 0 }
 0x2b3   : > { %13042 = dma.done.wait (%p11059_p9), [#allocation3], 384  }
 0x2b4   : > { %13044 = vsyncadd (%p11059_p9), [#allocation3], 4294966912 }
 0x2b5   : > { %13046 = dma.done.wait (%p11059_p9), [#allocation5], 2176  }
 0x2b6   : > { %13048 = vsyncadd (%p11059_p9), [#allocation5], 4294965120 }
 0x2b7   : > { %13050 = dma.done.wait (%p11059_p9), [#allocation8], 128  }
 0x2b8   : > { %13052 = vsyncadd (%p11059_p9), [#allocation8], 4294967168 }
 0x2b9   : > { %13054 = dma.done.wait (%p11059_p9), [#allocation11], 272  }
 0x2ba   : > { %13056 = vsyncadd (%p11059_p9), [#allocation11], 4294967024 }
 0x2bb   : > { %13058 = dma.done.wait (%p11059_p9), [#allocation14], 528  }
 0x2bc   : > { %13060 = vsyncadd (%p11059_p9), [#allocation14], 4294966768 }
 0x2bd   : > { %13062 = dma.done.wait (%p11059_p9), [#allocation17], 2064  }
 0x2be   : > { %13064 = vsyncadd (%p11059_p9), [#allocation17], 4294965232 }
 0x2bf   : > { %13066 = dma.done.wait (%p11059_p9), [#allocation20], 4128  }
 0x2c0   : > { %13068 = vsyncadd (%p11059_p9), [#allocation20], 4294963168 }
 0x2c1   : > { %13070 = dma.done.wait (%p11059_p9), [#allocation23], 64  }
 0x2c2   : > { %13072 = vsyncadd (%p11059_p9), [#allocation23], 4294967232 }
 0x2c3   : > { %13074 = dma.done.wait (%p11059_p9), [#allocation26], 48  }
 0x2c4   : > { %13076 = vsyncadd (%p11059_p9), [#allocation26], 4294967248 }
 0x2c5   : > { %13078 = dma.done.wait (%p11059_p9), [#allocation29], 272  }
 0x2c6   : > { %13080 = vsyncadd (%p11059_p9), [#allocation29], 4294967024 }
 0x2c7   : > { %13082 = dma.done.wait (%p11059_p9), [#allocation32], 528  }
 0x2c8   : > { %13084 = vsyncadd (%p11059_p9), [#allocation32], 4294966768 }
 0x2c9   : > { %13086 = dma.done.wait (%p11059_p9), [#allocation35], 2080  }
 0x2ca   : > { %13088 = vsyncadd (%p11059_p9), [#allocation35], 4294965216 }
 0x2cb   : > { %13090 = dma.done.wait (%p11059_p9), [#allocation38], 4128  }
 0x2cc   : > { %13092 = vsyncadd (%p11059_p9), [#allocation38], 4294963168 }
 0x2cd   : > { %13094 = dma.done.wait (%p11059_p9), [#allocation41], 4160  }
 0x2ce   : > { %13096 = vsyncadd (%p11059_p9), [#allocation41], 4294963136 }
 0x2cf   : > { %13098 = dma.done.wait (%p11059_p9), [#allocation44], 2080  }
 0x2d0   : > { %13100 = vsyncadd (%p11059_p9), [#allocation44], 4294965216 }
 0x2d1   : > { %13102 = dma.done.wait (%p11059_p9), [#allocation47], 1040  }
 0x2d2   : > { %13104 = vsyncadd (%p11059_p9), [#allocation47], 4294966256 }
 0x2d3   : > { %13106 = dma.done.wait (%p11059_p9), [#allocation50], 1040  }
 0x2d4   : > { %13108 = vsyncadd (%p11059_p9), [#allocation50], 4294966256 }
 0x2d5   : > { %13110 = dma.done.wait (%p11059_p9), [#allocation53], 272  }
 0x2d6   : > { %13112 = vsyncadd (%p11059_p9), [#allocation53], 4294967024 }
 0x2d7   : > { %13114 = dma.done.wait (%p11059_p9), [#allocation56], 272  }
 0x2d8   : > { %13116 = vsyncadd (%p11059_p9), [#allocation56], 4294967024 }
 0x2d9   : > { %13118 = dma.done.wait (%p11059_p9), [#allocation59], 48  }
 0x2da   : > { %13120 = vsyncadd (%p11059_p9), [#allocation59], 4294967248 }
 0x2db   : > { %13122 = dma.done.wait (%p11059_p9), [#allocation62], 96  }
 0x2dc   : > { %13124 = vsyncadd (%p11059_p9), [#allocation62], 4294967200 }
 0x2dd   : > { %13126 = dma.done.wait (%p11059_p9), [#allocation65], 1040  }
 0x2de   : > { %13128 = vsyncadd (%p11059_p9), [#allocation65], 4294966256 }
 0x2df   : > { %13130 = dma.done.wait (%p11059_p9), [#allocation68], 32  }
 0x2e0   : > { %13132 = vsyncadd (%p11059_p9), [#allocation68], 4294967264 }
 0x2e1   : > { %13134 = dma.done.wait (%p11059_p9), [#allocation71], 32  }
 0x2e2   : > { %13136 = vsyncadd (%p11059_p9), [#allocation71], 4294967264  ;;  %s15114_s23 = sld [smem:[#allocation97_spill]]  ;;  %s2510_s6 = smul.u32 6, %s13590_s22  ;;  %v13255_v0 = vmov 0.0   ;;  %vm13256_vm0 = vmmov 0  }
 0x2e3   : > { %10412 = vmatprep.subr.bf16.mxu0 %v13255_v0  ;;  %10418 = vmatprep.mubr.msk.bf16.mxu0 %vm13256_vm0, %v13255_v0  ;;  %v11234_v10 = vld [vmem:[#allocation2] sm:$0xff]   ;;  %vm3134_vm1 = vcmask 392192   ;;  %v11235_v11 = vld [vmem:[#allocation2 + $0x8] sm:$0xff]   ;;  %v11236_v12 = vld [vmem:[#allocation2 + $0x10] sm:$0xff]   ;;  %vm3220_vm2 = vcmask 1042432   ;;  %vm3221_vm3 = vcmask 1043456  }
 0x2e4   : > { %p2511_p2 = scmp.lt.s32.totalorder %s2510_s6, 11  ;;  %10430 = vmatprep.subr.bf16.mxu1 %v13255_v0  ;;  %10432 = vmatprep.mubr.msk.bf16.mxu1 %vm13256_vm0, %v13255_v0  ;;  %v13257_v13 = vmov 65535   ;;  %v2596_v15 = vld [vmem:[#allocation9] sm:$0xf]  ;;  %vm3210_vm4 = vcmask 56320   ;;  %v14031_v62 = vld [vmem:[#allocation2 + $0x8] sm:$0xff]  }
 0x2e5   : > { %v3222_v14 = vsel %vm3220_vm2, 4294967295, %v13257_v13  ;;  %v9624_v42 = vld [vmem:[#allocation10] ss:$0 sm:$0xff]  ;;  %v14025_v61 = vld [vmem:[#allocation2] sm:$0xff]   ;;  %v14037_v63 = vld [vmem:[#allocation2 + $0x10] sm:$0xff]   ;;  %vm3371_vm5 = vcmask 261120  }
 0x2e6   : > { %s15143_s6 = smov (!%p2511_p2, %s2510_s6), 11  ;;  %v3223_v16 = vsel %vm3221_vm3, %v3222_v14, 0  ;;  %vm3537_vm6 = vcmask 523264   ;;  %s15115_s10 = sld [smem:[#allocation99_spill]]  ;;  %vm4162_vm7 = vcmask 130048   ;;  %vm4218_vm8 = vcmask 1041408  }
 0x2e7   : > { %s13996_s16 = sshll.u32 %s15143_s6, 3  ;;  %v3225_v17 = vand.u32 %v3223_v16, %v2596_v15  ;;  %s9613_s26 = sshll.u32 %s13590_s22, 1  ;;  %vm4214_vm9 = vcmask 31744  }
 0x2e8   : > { %s2514_s7 = scalar_lea.vmem %s15114_s23, %s13996_s16  ;;  %p2523_p3 = scmp.lt.s32.totalorder %s9613_s26, 3 }
 0x2e9   : > { %v2545_v1 = vld [vmem:[%s2514_s7 + $0x20] sm:$0xff]  ;;  %v2546_v2 = vld [vmem:[%s2514_s7 + $0x28] sm:$0xff]  ;;  %v2543_v3 = vld [vmem:[%s2514_s7 + $0x10] sm:$0xff]  ;;  %10431 = vmatpush3.bf16.msra.mxu1 %v3225_v17  ;;  %s15116_s22 = sld [smem:[#allocation98_spill]]  ;;  %s2532_s4 = scalar_lea.vmem %s13577_s3, %s13996_s16 }
 0x2ea   : > { %v3118_v4 = vpack.c.bf16 %v2546_v2, %v2545_v1  ;;  %v2544_v5 = vld [vmem:[%s2514_s7 + $0x18] sm:$0xff]  ;;  %v2541_v6 = vld [vmem:[%s2514_s7] sm:$0xff]  ;;  %v2542_v8 = vld [vmem:[%s2514_s7 + $0x8] sm:$0xff]  ;;  %10444 = vmatprep.subr.bf16.mxu1 %v13255_v0  ;;  %s15145_s26 = smov (!%p2523_p3, %s9613_s26), 3  ;;  %s15117_s1 = sld [smem:[#allocation116_spill]] }
 0x2eb   : > { %v3117_v7 = vpack.c.bf16 %v2544_v5, %v2543_v3  ;;  %v3116_v9 = vpack.c.bf16 %v2542_v8, %v2541_v6  ;;  %v11237_v1 = vld [vmem:[#allocation12 + $0x8] sm:$0xff]   ;;  %v11238_v2 = vld [vmem:[#allocation12] sm:$0xff]   ;;  %s9614_s28 = sshll.u32 %s15145_s26, 3  ;;  %s15129_s11 = sld [smem:[#allocation119_spill]] }
 0x2ec   : > { %10413 = vmatpush3.bf16.msra.mxu0 %v3118_v4  ;;  %s2526_s2 = scalar_lea.vmem %s15115_s10, %s9614_s28  ;;  %s15130_s8 = sld [smem:[#allocation120_spill]] }
 0x2ed   : > { %10414 = vmatprep.subr.bf16.mxu0 %v13255_v0  ;;  %s15131_s5 = sld [smem:[#allocation131_spill]] }
 0x2ee   : > { %s15132_s15 = sld [smem:[#allocation133_spill]] }
 0x2ef   : > { %s2520_s18 = scalar_lea.vmem %s15116_s22, %s13996_s16  ;;  %s15133_s23 = sld [smem:[#allocation135_spill]] }
 0x2f0   : > { %10415 = vmatpush3.bf16.msra.mxu0 %v3117_v7  ;;  %s15137_s6 = sld [smem:[#allocation139_spill]]  ;;  %s2538_s22 = scalar_lea.vmem %s13582_s17, %s9614_s28 }
 0x2f1   : > { %10416 = vmatprep.subr.bf16.mxu0 %v13255_v0  ;;  %s15138_s16 = sld [smem:[#allocation137_spill]] }
 0x2f2   : > { %s15139_s7 = sld [smem:[#allocation138_spill]] }
 0x2f3   : > { %s15140_s10 = sld [smem:[#allocation143_spill]] }
 0x2f4   : > { %10417 = vmatpush3.bf16.msra.mxu0 %v3116_v9 }
 0x2f5   : > { %10462 = vmatprep.subr.bf16.mxu0 %v13255_v0 }
 0x2f7   : > { %10419 = vmatmul.mubr.msk.bf16.vlgmr.msra.gmra.mxu0 %vm3134_vm1, %v11234_v10 }
 0x2f8   : > { %10422 = vmatprep.mubr.msk.bf16.mxu0 %vm13256_vm0, %v13255_v0  ;;  %10463 = vmatpush3.bf16.msra.mxu0 %v11237_v1 }
 0x2f9   : > { %10464 = vmatprep.subr.bf16.mxu0 %v13255_v0 }
 0x2fc   : > { %10465 = vmatpush3.bf16.msra.mxu0 %v11238_v2 }
 0x2fd   : > { %10496 = vmatprep.subr.bf16.mxu0 %v13255_v0 }
 0x2ff   : > { %10423 = vmatmul.mubr.msk.bf16.gmra.mxu0 %vm3134_vm1, %v11235_v11 }
 0x300   : > { %10426 = vmatprep.mubr.msk.bf16.mxu0 %vm13256_vm0, %v13255_v0 }
 0x307   : > { %10427 = vmatmul.mubr.msk.bf16.gmra.mxu0 %vm3134_vm1, %v11236_v12 }
 0x308   : > { %10466 = vmatprep.mubr.msk.bf16.mxu0 %vm13256_vm0, %v13255_v0 }
 0x3b7   : > { %v3178_v18 = vpop.f32.mrf.mxu0 }
 0x3b9   : > { %v10420_v19 = vpop.f32.mrf.mxu0 }
 0x3ba   : > { %v11240_v19 = vld [vmem:[#allocation15 + $0x10] sm:$0xff]  }
 0x3bb   : > { %v3181_v20 = vpop.f32.mrf.mxu0 }
 0x3bc   : > { %v3201_v21 = vpack.c.bf16 %v3181_v20, %v3178_v18  ;;  %v11239_v18 = vld [vmem:[#allocation15 + $0x18] sm:$0xff]  }
 0x3bd   : > { %v10421_v22 = vpop.f32.mrf.mxu0 }
 0x3be   : > { %10433 = vmatmul.mubr.msk.bf16.vlgmr.msra.gmra.mxu1 %vm3210_vm4, %v3201_v21 }
 0x3bf   : > { %v3186_v23 = vpop.f32.mrf.mxu0  ;;  %10436 = vmatprep.mubr.msk.bf16.mxu1 %vm13256_vm0, %v13255_v0 }
 0x3c1   : > { %v10424_v24 = vpop.f32.mrf.mxu0 }
 0x3c3   : > { %v3189_v25 = vpop.f32.mrf.mxu0 }
 0x3c4   : > { %v3202_v26 = vpack.c.bf16 %v3189_v25, %v3186_v23 }
 0x3c5   : > { %v10425_v27 = vpop.f32.mrf.mxu0 }
 0x3c6   : > { %10437 = vmatmul.mubr.msk.bf16.gmra.mxu1 %vm3210_vm4, %v3202_v26 }
 0x3c7   : > { %v3194_v28 = vpop.f32.mrf.mxu0  ;;  %10440 = vmatprep.mubr.msk.bf16.mxu1 %vm13256_vm0, %v13255_v0 }
 0x3c9   : > { %v10428_v29 = vpop.f32.mrf.mxu0 }
 0x3ca   : > { %v9631_v29 = vld [vmem:[#allocation13] ss:$0 sm:$0xff] }
 0x3cb   : > { %v3197_v30 = vpop.f32.mrf.mxu0 }
 0x3cc   : > { %v3203_v31 = vpack.c.bf16 %v3197_v30, %v3194_v28 }
 0x3cd   : > { %v10429_v32 = vpop.f32.mrf.mxu0 }
 0x3ce   : > { %10441 = vmatmul.mubr.msk.bf16.gmra.mxu1 %vm3210_vm4, %v3203_v31 }
 0x3cf   : > { %10450 = vmatprep.mubr.msk.bf16.mxu1 %vm13256_vm0, %v13255_v0 }
 0x47e   : > { %v3261_v33 = vpop.f32.mrf.mxu1 }
 0x47f   : > { %v3262_v55 = vadd.f32 %v9624_v42, %v3261_v33 }
 0x480   : > { %v10434_v34 = vpop.f32.mrf.mxu1 }
 0x481   : > { %v3284_v59 = vmax.f32 %v3262_v55, 0.0 }
 0x482   : > { %v3264_v35 = vpop.f32.mrf.mxu1 }
 0x483   : > { %v3265_v52 = vadd.f32 %v9624_v42, %v3264_v35 }
 0x484   : > { %v10435_v36 = vpop.f32.mrf.mxu1 }
 0x485   : > { %v3285_v57 = vmax.f32 %v3265_v52, 0.0 }
 0x486   : > { %v3269_v37 = vpop.f32.mrf.mxu1 }
 0x487   : > { %v3270_v49 = vadd.f32 %v9624_v42, %v3269_v37  ;;  %v3290_v60 = vpack.c.bf16 %v3285_v57, %v3284_v59 }
 0x488   : > { %v10438_v38 = vpop.f32.mrf.mxu1 }
 0x489   : > { %v3286_v56 = vmax.f32 %v3270_v49, 0.0  ;;  %v11242_v49 = vld [vmem:[#allocation15] sm:$0xff]  }
 0x48a   : > { %v3272_v39 = vpop.f32.mrf.mxu1 }
 0x48b   : > { %v3273_v46 = vadd.f32 %v9624_v42, %v3272_v39 }
 0x48c   : > { %v10439_v40 = vpop.f32.mrf.mxu1 }
 0x48d   : > { %v3287_v53 = vmax.f32 %v3273_v46, 0.0 }
 0x48e   : > { %v3277_v41 = vpop.f32.mrf.mxu1 }
 0x48f   : > { %v3278_v44 = vadd.f32 %v9624_v42, %v3277_v41  ;;  %v3291_v58 = vpack.c.bf16 %v3287_v53, %v3286_v56 }
 0x490   : > { %v10442_v43 = vpop.f32.mrf.mxu1 }
 0x491   : > { %v3288_v50 = vmax.f32 %v3278_v44, 0.0 }
 0x492   : > { %v3280_v45 = vpop.f32.mrf.mxu1 }
 0x493   : > { %v3281_v47 = vadd.f32 %v9624_v42, %v3280_v45 }
 0x494   : > { %v10443_v48 = vpop.f32.mrf.mxu1 }
 0x495   : > { %v3289_v51 = vmax.f32 %v3281_v47, 0.0  ;;  %v11241_v48 = vld [vmem:[#allocation15 + $0x8] sm:$0xff]  }
 0x497   : > { %v3292_v54 = vpack.c.bf16 %v3289_v51, %v3288_v50 }
 0x499   : > { %10445 = vmatpush3.bf16.msra.mxu1 %v3292_v54 }
 0x49a   : > { %10446 = vmatprep.subr.bf16.mxu1 %v13255_v0 }
 0x49d   : > { %10447 = vmatpush3.bf16.msra.mxu1 %v3291_v58 }
 0x49e   : > { %10448 = vmatprep.subr.bf16.mxu1 %v13255_v0 }
 0x4a1   : > { %10449 = vmatpush3.bf16.msra.mxu1 %v3290_v60 }
 0x4a2   : > { %10478 = vmatprep.subr.bf16.mxu1 %v13255_v0 }
 0x4a4   : > { %10451 = vmatmul.mubr.msk.bf16.vlgmr.msra.gmra.mxu1 %vm3134_vm1, %v14025_v61 }
 0x4a5   : > { %10454 = vmatprep.mubr.msk.bf16.mxu1 %vm13256_vm0, %v13255_v0 }
 0x4ac   : > { %10455 = vmatmul.mubr.msk.bf16.gmra.mxu1 %vm3134_vm1, %v14031_v62 }
 0x4ad   : > { %10458 = vmatprep.mubr.msk.bf16.mxu1 %vm13256_vm0, %v13255_v0 }
 0x4b4   : > { %10459 = vmatmul.mubr.msk.bf16.gmra.mxu1 %vm3134_vm1, %v14037_v63 }
 0x4b5   : > { %10484 = vmatprep.mubr.msk.bf16.mxu1 %vm13256_vm0, %v13255_v0 }
 0x564   : > { %v3327_v3 = vpop.f32.mrf.mxu1 }
 0x566   : > { %v10452_v4 = vpop.f32.mrf.mxu1 }
 0x568   : > { %v3330_v5 = vpop.f32.mrf.mxu1 }
 0x569   : > { %v3350_v6 = vpack.c.bf16 %v3330_v5, %v3327_v3  ;;  %v11243_v5 = vld [vmem:[#allocation18 + $0x70] ss:$8 sps:$4 sm:$0xff]  }
 0x56a   : > { %v10453_v7 = vpop.f32.mrf.mxu1 }
 0x56b   : > { %10467 = vmatmul.mubr.msk.bf16.vlgmr.msra.gmra.mxu0 %vm3371_vm5, %v3350_v6  ;;  %v11245_v6 = vld [vmem:[#allocation18 + $0x74] ss:$8 sps:$4 sm:$0xff]   ;;  %v11248_v7 = vld [vmem:[#allocation18 + $0x64] ss:$8 sps:$4 sm:$0xff]  }
 0x56c   : > { %v3335_v8 = vpop.f32.mrf.mxu1  ;;  %10470 = vmatprep.mubr.msk.bf16.mxu0 %vm13256_vm0, %v13255_v0  ;;  %10497 = vmatpush3.bf16.msra.mxu0 %v11239_v18  ;;  %v11261_v18 = vld [vmem:[#allocation18 + $0x10] ss:$8 sps:$4 sm:$0xff]  }
 0x56d   : > { %10498 = vmatprep.subr.bf16.mxu0 %v13255_v0 }
 0x56e   : > { %v10456_v9 = vpop.f32.mrf.mxu1 }
 0x56f   : > { %v11251_v9 = vld [vmem:[#allocation18 + $0x54] ss:$8 sps:$4 sm:$0xff]  }
 0x570   : > { %v3338_v10 = vpop.f32.mrf.mxu1  ;;  %10499 = vmatpush3.bf16.msra.mxu0 %v11240_v19 }
 0x571   : > { %v3351_v11 = vpack.c.bf16 %v3338_v10, %v3335_v8  ;;  %10500 = vmatprep.subr.bf16.mxu0 %v13255_v0  ;;  %v11246_v8 = vld [vmem:[#allocation18 + $0x60] ss:$8 sps:$4 sm:$0xff]   ;;  %v11249_v10 = vld [vmem:[#allocation18 + $0x50] ss:$8 sps:$4 sm:$0xff]  }
 0x572   : > { %v10457_v12 = vpop.f32.mrf.mxu1 }
 0x573   : > { %10471 = vmatmul.mubr.msk.bf16.gmra.mxu0 %vm3371_vm5, %v3351_v11  ;;  %v11254_v11 = vld [vmem:[#allocation18 + $0x44] ss:$8 sps:$4 sm:$0xff]   ;;  %v11252_v12 = vld [vmem:[#allocation18 + $0x40] ss:$8 sps:$4 sm:$0xff]  }
 0x574   : > { %v3343_v13 = vpop.f32.mrf.mxu1  ;;  %10474 = vmatprep.mubr.msk.bf16.mxu0 %vm13256_vm0, %v13255_v0  ;;  %10501 = vmatpush3.bf16.msra.mxu0 %v11241_v48  ;;  %v11264_v48 = vld [vmem:[#allocation18] ss:$8 sps:$4 sm:$0xff]  }
 0x575   : > { %10502 = vmatprep.subr.bf16.mxu0 %v13255_v0 }
 0x576   : > { %v10460_v14 = vpop.f32.mrf.mxu1 }
 0x577   : > { %v11255_v14 = vld [vmem:[#allocation18 + $0x30] ss:$8 sps:$4 sm:$0xff]  }
 0x578   : > { %v3346_v15 = vpop.f32.mrf.mxu1  ;;  %10503 = vmatpush3.bf16.msra.mxu0 %v11242_v49  ;;  %v15021_v49 = vmov 0  }
 0x579   : > { %v3352_v16 = vpack.c.bf16 %v3346_v15, %v3343_v13  ;;  %3764 = vmatprep.subr.bf16.mxu0 %v11245_v6  ;;  %v11257_v13 = vld [vmem:[#allocation18 + $0x34] ss:$8 sps:$4 sm:$0xff]   ;;  %v11260_v15 = vld [vmem:[#allocation18 + $0x24] ss:$8 sps:$4 sm:$0xff]   ;;  %11232 = vset.pattern.permute.xlu0 %v15021_v49 }
 0x57a   : > { %v10461_v17 = vpop.f32.mrf.mxu1  ;;  %11233 = vset.pattern.permute.xlu1 %v15021_v49  ;;  %v11295_v6 = vld [vmem:[#allocation21 + $0xe0] ss:$8 sps:$4 sm:$0xff]  }
 0x57b   : > { %10475 = vmatmul.mubr.msk.bf16.gmra.mxu0 %vm3371_vm5, %v3352_v16  ;;  %v11258_v16 = vld [vmem:[#allocation18 + $0x20] ss:$8 sps:$4 sm:$0xff]   ;;  %v11263_v17 = vld [vmem:[#allocation18 + $0x14] ss:$8 sps:$4 sm:$0xff]  }
 0x57c   : > { %10504 = vmatprep.mubr.msk.bf16.mxu0 %vm13256_vm0, %v13255_v0 }
 0x62b   : > { %v3415_v20 = vpop.f32.mrf.mxu0 }
 0x62c   : > { %v3416_v42 = vadd.f32 %v9631_v29, %v3415_v20 }
 0x62d   : > { %v10468_v21 = vpop.f32.mrf.mxu0 }
 0x62e   : > { %v3438_v46 = vmax.f32 %v3416_v42, 0.0 }
 0x62f   : > { %v3418_v22 = vpop.f32.mrf.mxu0 }
 0x630   : > { %v3419_v39 = vadd.f32 %v9631_v29, %v3418_v22 }
 0x631   : > { %v10469_v23 = vpop.f32.mrf.mxu0 }
 0x632   : > { %v3439_v44 = vmax.f32 %v3419_v39, 0.0 }
 0x633   : > { %v3423_v24 = vpop.f32.mrf.mxu0 }
 0x634   : > { %v3424_v36 = vadd.f32 %v9631_v29, %v3423_v24  ;;  %v3444_v47 = vpack.c.bf16 %v3439_v44, %v3438_v46 }
 0x635   : > { %v10472_v25 = vpop.f32.mrf.mxu0 }
 0x636   : > { %v3440_v43 = vmax.f32 %v3424_v36, 0.0 }
 0x637   : > { %v3426_v26 = vpop.f32.mrf.mxu0 }
 0x638   : > { %v3427_v33 = vadd.f32 %v9631_v29, %v3426_v26 }
 0x639   : > { %v10473_v27 = vpop.f32.mrf.mxu0 }
 0x63a   : > { %v3441_v40 = vmax.f32 %v3427_v33, 0.0 }
 0x63b   : > { %v3431_v28 = vpop.f32.mrf.mxu0 }
 0x63c   : > { %v3432_v31 = vadd.f32 %v9631_v29, %v3431_v28  ;;  %v3445_v45 = vpack.c.bf16 %v3441_v40, %v3440_v43  ;;  %v9640_v28 = vld [vmem:[#allocation16] ss:$0 sm:$0xff] }
 0x63d   : > { %v10476_v30 = vpop.f32.mrf.mxu0 }
 0x63e   : > { %v3442_v37 = vmax.f32 %v3432_v31, 0.0 }
 0x63f   : > { %v3434_v32 = vpop.f32.mrf.mxu0 }
 0x640   : > { %v3435_v34 = vadd.f32 %v9631_v29, %v3434_v32 }
 0x641   : > { %v10477_v35 = vpop.f32.mrf.mxu0 }
 0x642   : > { %v3443_v38 = vmax.f32 %v3435_v34, 0.0 }
 0x644   : > { %v3446_v41 = vpack.c.bf16 %v3443_v38, %v3442_v37 }
 0x646   : > { %10479 = vmatpush3.bf16.msra.mxu1 %v3446_v41 }
 0x647   : > { %10480 = vmatprep.subr.bf16.mxu1 %v13255_v0 }
 0x64a   : > { %10481 = vmatpush3.bf16.msra.mxu1 %v3445_v45 }
 0x64b   : > { %10482 = vmatprep.subr.bf16.mxu1 %v13255_v0 }
 0x64e   : > { %10483 = vmatpush3.bf16.msra.mxu1 %v3444_v47  ;;  %v11266_v47 = vld [vmem:[#allocation18 + $0x4] ss:$8 sps:$4 sm:$0xff]  }
 0x64f   : > { %10516 = vmatprep.subr.bf16.mxu1 %v13255_v0 }
 0x651   : > { %10485 = vmatmul.mubr.msk.bf16.vlgmr.msra.gmra.mxu1 %vm3134_vm1, %v14025_v61 }
 0x652   : > { %10488 = vmatprep.mubr.msk.bf16.mxu1 %vm13256_vm0, %v13255_v0 }
 0x659   : > { %10489 = vmatmul.mubr.msk.bf16.gmra.mxu1 %vm3134_vm1, %v14031_v62 }
 0x65a   : > { %10492 = vmatprep.mubr.msk.bf16.mxu1 %vm13256_vm0, %v13255_v0 }
 0x661   : > { %10493 = vmatmul.mubr.msk.bf16.gmra.mxu1 %vm3134_vm1, %v14037_v63 }
 0x662   : > { %10522 = vmatprep.mubr.msk.bf16.mxu1 %vm13256_vm0, %v13255_v0 }
 0x711   : > { %v3481_v50 = vpop.f32.mrf.mxu1 }
 0x713   : > { %v10486_v51 = vpop.f32.mrf.mxu1 }
 0x714   : > { %v11271_v51 = vld [vmem:[#allocation21 + $0x60] ss:$8 sps:$4 sm:$0xff]  }
 0x715   : > { %v3484_v52 = vpop.f32.mrf.mxu1 }
 0x716   : > { %v3504_v53 = vpack.c.bf16 %v3484_v52, %v3481_v50  ;;  %v11273_v50 = vld [vmem:[#allocation21 + $0x64] ss:$8 sps:$4 sm:$0xff]   ;;  %v11274_v52 = vld [vmem:[#allocation21 + $0x50] ss:$8 sps:$4 sm:$0xff]  }
 0x717   : > { %v10487_v54 = vpop.f32.mrf.mxu1 }
 0x718   : > { %10505 = vmatmul.mubr.msk.bf16.vlgmr.msra.gmra.mxu0 %vm3537_vm6, %v3504_v53  ;;  %v11279_v53 = vld [vmem:[#allocation21 + $0x44] ss:$8 sps:$4 sm:$0xff]   ;;  %v11277_v54 = vld [vmem:[#allocation21 + $0x40] ss:$8 sps:$4 sm:$0xff]  }
 0x719   : > { %v3489_v55 = vpop.f32.mrf.mxu1  ;;  %10508 = vmatprep.mubr.msk.bf16.mxu0 %vm13256_vm0, %v13255_v0  ;;  %3765 = vmatpush1.bf16.msra.mxu0 %v11243_v5  ;;  %v11297_v5 = vld [vmem:[#allocation21 + $0xe4] ss:$8 sps:$4 sm:$0xff]  }
 0x71a   : > { %3766 = vmatprep.subr.bf16.mxu0 %v11248_v7  ;;  %v11300_v7 = vld [vmem:[#allocation21 + $0xd4] ss:$8 sps:$4 sm:$0xff]  }
 0x71b   : > { %v10490_v56 = vpop.f32.mrf.mxu1 }
 0x71c   : > { %v11280_v56 = vld [vmem:[#allocation21 + $0x30] ss:$8 sps:$4 sm:$0xff]  }
 0x71d   : > { %v3492_v57 = vpop.f32.mrf.mxu1  ;;  %3767 = vmatpush1.bf16.msra.mxu0 %v11246_v8  ;;  %v11298_v8 = vld [vmem:[#allocation21 + $0xd0] ss:$8 sps:$4 sm:$0xff]  }
 0x71e   : > { %v3505_v58 = vpack.c.bf16 %v3492_v57, %v3489_v55  ;;  %3768 = vmatprep.subr.bf16.mxu0 %v11251_v9  ;;  %v11282_v55 = vld [vmem:[#allocation21 + $0x34] ss:$8 sps:$4 sm:$0xff]   ;;  %v11285_v57 = vld [vmem:[#allocation21 + $0x24] ss:$8 sps:$4 sm:$0xff]  }
 0x71f   : > { %v10491_v59 = vpop.f32.mrf.mxu1  ;;  %v11303_v9 = vld [vmem:[#allocation21 + $0xc4] ss:$8 sps:$4 sm:$0xff]  }
 0x720   : > { %10509 = vmatmul.mubr.msk.bf16.gmra.mxu0 %vm3537_vm6, %v3505_v58  ;;  %v11283_v58 = vld [vmem:[#allocation21 + $0x20] ss:$8 sps:$4 sm:$0xff]   ;;  %v11288_v59 = vld [vmem:[#allocation21 + $0x14] ss:$8 sps:$4 sm:$0xff]  }
 0x721   : > { %v3497_v60 = vpop.f32.mrf.mxu1  ;;  %10512 = vmatprep.mubr.msk.bf16.mxu0 %vm13256_vm0, %v13255_v0  ;;  %3769 = vmatpush1.bf16.msra.mxu0 %v11249_v10  ;;  %v11301_v10 = vld [vmem:[#allocation21 + $0xc0] ss:$8 sps:$4 sm:$0xff]  }
 0x722   : > { %3770 = vmatprep.subr.bf16.mxu0 %v11254_v11  ;;  %v11306_v11 = vld [vmem:[#allocation21 + $0xb4] ss:$8 sps:$4 sm:$0xff]  }
 0x723   : > { %v10494_v1 = vpop.f32.mrf.mxu1 }
 0x724   : > { %v11291_v1 = vld [vmem:[#allocation21 + $0x4] ss:$8 sps:$4 sm:$0xff]  }
 0x725   : > { %v3500_v2 = vpop.f32.mrf.mxu1  ;;  %3771 = vmatpush1.bf16.msra.mxu0 %v11252_v12  ;;  %v11304_v12 = vld [vmem:[#allocation21 + $0xb0] ss:$8 sps:$4 sm:$0xff]  }
 0x726   : > { %v3506_v3 = vpack.c.bf16 %v3500_v2, %v3497_v60  ;;  %3772 = vmatprep.subr.bf16.mxu0 %v11257_v13  ;;  %v11286_v60 = vld [vmem:[#allocation21 + $0x10] ss:$8 sps:$4 sm:$0xff]   ;;  %v11289_v2 = vld [vmem:[#allocation21] ss:$8 sps:$4 sm:$0xff]  }
 0x727   : > { %v10495_v4 = vpop.f32.mrf.mxu1 }
 0x728   : > { %10513 = vmatmul.mubr.msk.bf16.gmra.mxu0 %vm3537_vm6, %v3506_v3  ;;  %v11294_v3 = vld [vmem:[#allocation21 + $0xf4] ss:$8 sps:$4 sm:$0xff]   ;;  %v11292_v4 = vld [vmem:[#allocation21 + $0xf0] ss:$8 sps:$4 sm:$0xff]  }
 0x729   : > { %3773 = vmatpush1.bf16.msra.mxu0 %v11255_v14  ;;  %3796 = vmatprep.mubr.bf16.mxu0 %v15021_v49  ;;  %v2553_v14 = vld [vmem:[%s2526_s2] sm:$0xff] }
 0x72a   : > { %3774 = vmatprep.subr.bf16.mxu0 %v11260_v15  ;;  %v2554_v15 = vld [vmem:[%s2526_s2 + $0x8] sm:$0xff]  ;;  %s15141_s2 = sld [smem:[#allocation145_spill]] }
 0x72d   : > { %3775 = vmatpush1.bf16.msra.mxu0 %v11258_v16 }
 0x72e   : > { %3776 = vmatprep.subr.bf16.mxu0 %v11263_v17 }
 0x731   : > { %3777 = vmatpush1.bf16.msra.mxu0 %v11261_v18  ;;  %v4156_v18 = vpack.c.bf16 %v2554_v15, %v2553_v14 }
 0x732   : > { %3778 = vmatprep.subr.bf16.mxu0 %v11266_v47 }
 0x735   : > { %3779 = vmatpush1.bf16.msra.mxu0 %v11264_v48 }
 0x736   : > { %10534 = vmatprep.subr.bf16.mxu0 %v13255_v0 }
 0x7d8   : > { %v3581_v19 = vpop.f32.mrf.mxu0 }
 0x7d9   : > { %v3582_v41 = vadd.f32 %v9640_v28, %v3581_v19 }
 0x7da   : > { %v10506_v20 = vpop.f32.mrf.mxu0 }
 0x7db   : > { %v3604_v45 = vmax.f32 %v3582_v41, 0.0  ;;  %v2549_v41 = vld [vmem:[%s2520_s18 + $0x10] sm:$0xff] }
 0x7dc   : > { %v3584_v21 = vpop.f32.mrf.mxu0  ;;  %3857 = vperm.xlu1 %11233, %v2549_v41  }
 0x7dd   : > { %v3585_v38 = vadd.f32 %v9640_v28, %v3584_v21 }
 0x7de   : > { %v10507_v22 = vpop.f32.mrf.mxu0 }
 0x7df   : > { %v3605_v43 = vmax.f32 %v3585_v38, 0.0  ;;  %v2663_v38 = vld [vmem:[#allocation25] sm:$0x3] }
 0x7e0   : > { %v3589_v23 = vpop.f32.mrf.mxu0 }
 0x7e1   : > { %v3590_v35 = vadd.f32 %v9640_v28, %v3589_v23  ;;  %v3610_v46 = vpack.c.bf16 %v3605_v43, %v3604_v45  ;;  %v2550_v43 = vld [vmem:[%s2520_s18 + $0x18] sm:$0xff]  ;;  %v2552_v45 = vld [vmem:[%s2520_s18 + $0x28] sm:$0xff] }
 0x7e2   : > { %v10510_v24 = vpop.f32.mrf.mxu0  ;;  %3862 = vperm.xlu1 %11233, %v2550_v43  }
 0x7e3   : > { %v3606_v42 = vmax.f32 %v3590_v35, 0.0  ;;  %v11310_v35 = vld [vmem:[#allocation21 + $0x90] ss:$8 sps:$4 sm:$0xff]  }
 0x7e4   : > { %v3592_v25 = vpop.f32.mrf.mxu0 }
 0x7e5   : > { %v3593_v32 = vadd.f32 %v9640_v28, %v3592_v25 }
 0x7e6   : > { %v10511_v26 = vpop.f32.mrf.mxu0  ;;  %3872 = vperm.xlu1 %11233, %v2552_v45   ;;  %v9701_v45 = vld [vmem:[#allocation27] ss:$0 sm:$0xff] }
 0x7e7   : > { %v3607_v39 = vmax.f32 %v3593_v32, 0.0  ;;  %v11309_v32 = vld [vmem:[#allocation21 + $0xa4] ss:$8 sps:$4 sm:$0xff]  }
 0x7e8   : > { %v3597_v27 = vpop.f32.mrf.mxu0 }
 0x7e9   : > { %v3598_v30 = vadd.f32 %v9640_v28, %v3597_v27  ;;  %v3611_v44 = vpack.c.bf16 %v3607_v39, %v3606_v42  ;;  %v4220_v39 = vsel %vm4218_vm8, %v2663_v38, 0  ;;  %v2548_v42 = vld [vmem:[%s2520_s18 + $0x8] sm:$0xff] }
 0x7ea   : > { %v10514_v29 = vpop.f32.mrf.mxu0 }
 0x7eb   : > { %v3608_v36 = vmax.f32 %v3598_v30, 0.0 }
 0x7ec   : > { %v3600_v31 = vpop.f32.mrf.mxu0 }
 0x7ed   : > { %v3601_v33 = vadd.f32 %v9640_v28, %v3600_v31  ;;  %v14107_v31 = vld [vmem:[#allocation4] sm:$0xff]  }
 0x7ee   : > { %v10515_v34 = vpop.f32.mrf.mxu0 }
 0x7ef   : > { %v3609_v37 = vmax.f32 %v3601_v33, 0.0  ;;  %v11307_v33 = vld [vmem:[#allocation21 + $0xa0] ss:$8 sps:$4 sm:$0xff]   ;;  %v11312_v34 = vld [vmem:[#allocation21 + $0x94] ss:$8 sps:$4 sm:$0xff]  }
 0x7f1   : > { %v3612_v40 = vpack.c.bf16 %v3609_v37, %v3608_v36  ;;  %v11315_v36 = vld [vmem:[#allocation21 + $0x84] ss:$8 sps:$4 sm:$0xff]   ;;  %v11313_v37 = vld [vmem:[#allocation21 + $0x80] ss:$8 sps:$4 sm:$0xff]  }
 0x7f3   : > { %10517 = vmatpush3.bf16.msra.mxu1 %v3612_v40  ;;  %v2547_v40 = vld [vmem:[%s2520_s18] sm:$0xff] }
 0x7f4   : > { %10518 = vmatprep.subr.bf16.mxu1 %v13255_v0  ;;  %3847 = vperm.xlu0 %11232, %v2547_v40  }
 0x7f7   : > { %10519 = vmatpush3.bf16.msra.mxu1 %v3611_v44  ;;  %v2551_v44 = vld [vmem:[%s2520_s18 + $0x20] sm:$0xff] }
 0x7f8   : > { %10520 = vmatprep.subr.bf16.mxu1 %v13255_v0  ;;  %3852 = vperm.xlu0 %11232, %v2548_v42  }
 0x7fb   : > { %10521 = vmatpush3.bf16.msra.mxu1 %v3610_v46  ;;  %v3674_v46 = vlaneseq }
 0x7fc   : > { %3867 = vperm.xlu0 %11232, %v2551_v44  }
 0x7fd   : > { %v14118_v47 = vshrl.u32 %v3674_v46, 7 }
 0x7fe   : > { %10523 = vmatmul.mubr.msk.bf16.vlgmr.msra.gmra.mxu1 %vm3134_vm1, %v14025_v61  ;;  %v11268_v61 = vld [vmem:[#allocation21 + $0x70] ss:$8 sps:$4 sm:$0xff]  }
 0x7ff   : > { %10526 = vmatprep.mubr.msk.bf16.mxu1 %vm13256_vm0, %v13255_v0  ;;  %v14121_v48 = vsub.s32 1, %v14118_v47 }
 0x806   : > { %10527 = vmatmul.mubr.msk.bf16.gmra.mxu1 %vm3134_vm1, %v14031_v62  ;;  %v11270_v62 = vld [vmem:[#allocation21 + $0x74] ss:$8 sps:$4 sm:$0xff]  }
 0x807   : > { %10530 = vmatprep.mubr.msk.bf16.mxu1 %vm13256_vm0, %v13255_v0  ;;  %4058 = vmatprep.subr.bf16.mxu1 %v11270_v62  ;;  %v2628_v62 = vld [vmem:[#allocation19] sm:$0x3] }
 0x808   : > { %4059 = vmatpush1.bf16.msra.mxu1 %v11268_v61  ;;  %v14124_v61 = vsub.s32 0, %v14118_v47 }
 0x809   : > { %4060 = vmatprep.subr.bf16.mxu1 %v11273_v50 }
 0x80c   : > { %4061 = vmatpush1.bf16.msra.mxu1 %v11271_v51  ;;  %v3681_v51 = vrot.slane %v2628_v62, %v14121_v48 }
 0x80e   : > { %10531 = vmatmul.mubr.msk.bf16.gmra.mxu1 %vm3134_vm1, %v14037_v63  ;;  %v11276_v63 = vld [vmem:[#allocation21 + $0x54] ss:$8 sps:$4 sm:$0xff]  }
 0x80f   : > { %4062 = vmatprep.subr.bf16.mxu1 %v11276_v63  ;;  %v3677_v63 = vrot.slane %v2628_v62, %v14124_v61 }
 0x810   : > { %4063 = vmatpush1.bf16.msra.mxu1 %v11274_v52 }
 0x811   : > { %4064 = vmatprep.subr.bf16.mxu1 %v11279_v53 }
 0x814   : > { %4065 = vmatpush1.bf16.msra.mxu1 %v11277_v54 }
 0x815   : > { %4066 = vmatprep.subr.bf16.mxu1 %v11282_v55 }
 0x818   : > { %4067 = vmatpush1.bf16.msra.mxu1 %v11280_v56 }
 0x819   : > { %4068 = vmatprep.subr.bf16.mxu1 %v11285_v57 }
 0x81c   : > { %4069 = vmatpush1.bf16.msra.mxu1 %v11283_v58 }
 0x81d   : > { %4070 = vmatprep.subr.bf16.mxu1 %v11288_v59 }
 0x820   : > { %4071 = vmatpush1.bf16.msra.mxu1 %v11286_v60 }
 0x821   : > { %4072 = vmatprep.subr.bf16.mxu1 %v11291_v1 }
 0x824   : > { %4073 = vmatpush1.bf16.msra.mxu1 %v11289_v2 }
 0x825   : > { %4074 = vmatprep.subr.bf16.mxu1 %v11294_v3 }
 0x828   : > { %4075 = vmatpush2.bf16.msra.mxu1 %v11292_v4 }
 0x829   : > { %4076 = vmatprep.subr.bf16.mxu1 %v11297_v5 }
 0x82c   : > { %4077 = vmatpush2.bf16.msra.mxu1 %v11295_v6 }
 0x82d   : > { %4078 = vmatprep.subr.bf16.mxu1 %v11300_v7 }
 0x830   : > { %4079 = vmatpush2.bf16.msra.mxu1 %v11298_v8 }
 0x831   : > { %4080 = vmatprep.subr.bf16.mxu1 %v11303_v9 }
 0x834   : > { %4081 = vmatpush2.bf16.msra.mxu1 %v11301_v10 }
 0x835   : > { %4082 = vmatprep.subr.bf16.mxu1 %v11306_v11 }
 0x838   : > { %4083 = vmatpush2.bf16.msra.mxu1 %v11304_v12 }
 0x839   : > { %4084 = vmatprep.subr.bf16.mxu1 %v11309_v32 }
 0x83c   : > { %4085 = vmatpush2.bf16.msra.mxu1 %v11307_v33 }
 0x83d   : > { %4086 = vmatprep.subr.bf16.mxu1 %v11312_v34 }
 0x840   : > { %4087 = vmatpush2.bf16.msra.mxu1 %v11310_v35 }
 0x841   : > { %4088 = vmatprep.subr.bf16.mxu1 %v11315_v36 }
 0x844   : > { %4089 = vmatpush2.bf16.msra.mxu1 %v11313_v37 }
 0x845   : > { %10578 = vmatprep.subr.bf16.mxu1 %v13255_v0 }
 0x86f   : > { %v14139_v41 = vpop.permute.xlu0 %3847 }
 0x8be   : > { %v3647_v13 = vpop.f32.mrf.mxu1 }
 0x8c0   : > { %v10524_v16 = vpop.f32.mrf.mxu1 }
 0x8c2   : > { %v3650_v17 = vpop.f32.mrf.mxu1 }
 0x8c3   : > { %v3670_v19 = vpack.c.bf16 %v3650_v17, %v3647_v13 }
 0x8c4   : > { %v10525_v20 = vpop.f32.mrf.mxu1 }
 0x8c5   : > { %3797 = vmatmul.mubr.bf16.vlgmr.msra.gmra.mxu0 %v3670_v19 }
 0x8c6   : > { %v3655_v21 = vpop.f32.mrf.mxu1  ;;  %3806 = vmatprep.mubr.bf16.mxu0 %v15021_v49  ;;  %10535 = vmatpush3.bf16.msra.mxu0 %v4156_v18 }
 0x8c7   : > { %10540 = vmatprep.subr.bf16.mxu0 %v13255_v0 }
 0x8c8   : > { %v10528_v22 = vpop.f32.mrf.mxu1 }
 0x8ca   : > { %v3658_v23 = vpop.f32.mrf.mxu1 }
 0x8cb   : > { %v3671_v24 = vpack.c.bf16 %v3658_v23, %v3655_v21 }
 0x8cc   : > { %v10529_v25 = vpop.f32.mrf.mxu1 }
 0x8cd   : > { %3807 = vmatmul.mubr.bf16.gmra.mxu0 %v3671_v24 }
 0x8ce   : > { %v3663_v26 = vpop.f32.mrf.mxu1  ;;  %3816 = vmatprep.mubr.bf16.mxu0 %v15021_v49 }
 0x8d0   : > { %v10532_v27 = vpop.f32.mrf.mxu1 }
 0x8d2   : > { %v3666_v28 = vpop.f32.mrf.mxu1 }
 0x8d3   : > { %v3672_v29 = vpack.c.bf16 %v3666_v28, %v3663_v26 }
 0x8d4   : > { %v10533_v30 = vpop.f32.mrf.mxu1 }
 0x8d5   : > { %3817 = vmatmul.mubr.bf16.gmra.mxu0 %v3672_v29 }
 0x8d6   : > { %10536 = vmatprep.mubr.msk.bf16.mxu0 %vm13256_vm0, %v13255_v0 }
 0x8dd   : > { %10537 = vmatmul.mubr.msk.bf16.vlgmr.msra.gmra.mxu0 %vm4162_vm7, %v14107_v31 }
 0x8de   : > { %10542 = vmatprep.mubr.msk.bf16.mxu0 %vm13256_vm0, %v13255_v0  ;;  %10541 = vmatpush3.bf16.msra.mxu0 %v4220_v39  ;;  %v14133_v39 = vld [vmem:[#allocation22] sm:$0x3] }
 0x8df   : > { %10546 = vmatprep.subr.bf16.mxu0 %v13255_v0  ;;  %v14137_v40 = vrot.slane %v14133_v39, %v14124_v61 }
 0x8e1   : > { %v3886_v42 = vmul.f32 %v14137_v40, %v14139_v41 }
 0x985   : > { %v3798_v50 = vpop.f32.mrf.mxu0 }
 0x986   : > { %v3799_v56 = vadd.f32 %v3798_v50, %v3677_v63 }
 0x987   : > { %v3800_v52 = vpop.f32.mrf.mxu0 }
 0x988   : > { %v3801_v54 = vadd.f32 %v3800_v52, %v3681_v51  ;;  %v3827_v3 = vmax.f32 %v3799_v56, 0.0  ;;  %v11316_v56 = vld [vmem:[#allocation28 + $0x8] sm:$0xff]  }
 0x989   : > { %v3802_v53 = vpop.f32.mrf.mxu0 }
 0x98a   : > { %v3803_v55 = vadd.f32 %v3802_v53, %v3677_v63  ;;  %v3828_v1 = vmax.f32 %v3801_v54, 0.0 }
 0x98b   : > { %v3804_v57 = vpop.f32.mrf.mxu0 }
 0x98c   : > { %v3805_v58 = vadd.f32 %v3804_v57, %v3681_v51  ;;  %v3829_v59 = vmax.f32 %v3803_v55, 0.0  ;;  %v11317_v57 = vld [vmem:[#allocation28] sm:$0xff]  }
 0x98d   : > { %v3808_v60 = vpop.f32.mrf.mxu0 }
 0x98e   : > { %v3830_v2 = vmax.f32 %v3805_v58, 0.0  ;;  %v3839_v6 = vpack.c.bf16 %v3829_v59, %v3827_v3  ;;  %v3809_v10 = vadd.f32 %v3808_v60, %v3677_v63  ;;  %v9704_v3 = vld [vmem:[#allocation30] ss:$0 sm:$0xff] }
 0x98f   : > { %v3810_v4 = vpop.f32.mrf.mxu0 }
 0x990   : > { %v3840_v5 = vpack.c.bf16 %v3830_v2, %v3828_v1  ;;  %v3811_v8 = vadd.f32 %v3810_v4, %v3681_v51  ;;  %v3831_v17 = vmax.f32 %v3809_v10, 0.0 }
 0x991   : > { %v3812_v7 = vpop.f32.mrf.mxu0 }
 0x992   : > { %v3813_v9 = vadd.f32 %v3812_v7, %v3677_v63  ;;  %4090 = vmatprep.mubr.bf16.mxu1 %v3840_v5  ;;  %v3832_v15 = vmax.f32 %v3811_v8, 0.0 }
 0x993   : > { %v3814_v11 = vpop.f32.mrf.mxu0  ;;  %4091 = vmatmul.mubr.bf16.vlgmr.msra.gmra.mxu1 %v3839_v6 }
 0x994   : > { %v3815_v12 = vadd.f32 %v3814_v11, %v3681_v51  ;;  %v3833_v13 = vmax.f32 %v3813_v9, 0.0 }
 0x995   : > { %v3818_v14 = vpop.f32.mrf.mxu0 }
 0x996   : > { %v3834_v16 = vmax.f32 %v3815_v12, 0.0  ;;  %v3841_v20 = vpack.c.bf16 %v3833_v13, %v3831_v17  ;;  %v3819_v24 = vadd.f32 %v3818_v14, %v3677_v63  ;;  %v11318_v13 = vld [vmem:[#allocation31 + $0x18] sm:$0xff]   ;;  %v11319_v14 = vld [vmem:[#allocation31 + $0x10] sm:$0xff]  }
 0x997   : > { %v3820_v18 = vpop.f32.mrf.mxu0 }
 0x998   : > { %v3842_v19 = vpack.c.bf16 %v3834_v16, %v3832_v15  ;;  %v3821_v22 = vadd.f32 %v3820_v18, %v3681_v51  ;;  %v3835_v32 = vmax.f32 %v3819_v24, 0.0  ;;  %v11320_v15 = vld [vmem:[#allocation31 + $0x8] sm:$0xff]   ;;  %v11321_v16 = vld [vmem:[#allocation31] sm:$0xff]   ;;  %v14169_v24 = vrot.slane %v14133_v39, %v14121_v48 }
 0x999   : > { %v3822_v21 = vpop.f32.mrf.mxu0 }
 0x99a   : > { %v3823_v23 = vadd.f32 %v3822_v21, %v3677_v63  ;;  %4100 = vmatprep.mubr.bf16.mxu1 %v3842_v19  ;;  %v3836_v29 = vmax.f32 %v3821_v22, 0.0 }
 0x99b   : > { %v3824_v25 = vpop.f32.mrf.mxu0  ;;  %4101 = vmatmul.mubr.bf16.gmra.mxu1 %v3841_v20 }
 0x99c   : > { %v3825_v26 = vadd.f32 %v3824_v25, %v3681_v51  ;;  %v3837_v27 = vmax.f32 %v3823_v23, 0.0  ;;  %v14171_v25 = vpop.permute.xlu0 %3852 }
 0x99d   : > { %v4200_v28 = vpop.f32.mrf.mxu0 }
 0x99e   : > { %v3838_v30 = vmax.f32 %v3825_v26, 0.0  ;;  %v3843_v35 = vpack.c.bf16 %v3837_v27, %v3835_v32  ;;  %v3889_v26 = vmul.f32 %v14169_v24, %v14171_v25 }
 0x99f   : > { %v10538_v33 = vpop.f32.mrf.mxu0 }
 0x9a0   : > { %v3844_v34 = vpack.c.bf16 %v3838_v30, %v3836_v29  ;;  %v9709_v29 = vld [vmem:[#allocation33] ss:$0 sm:$0xff]  ;;  %v14177_v33 = vld [vmem:[#allocation24] sm:$0x3] }
 0x9a1   : > { %v4203_v36 = vpop.f32.mrf.mxu0 }
 0x9a2   : > { %v4207_v37 = vpack.c.bf16 %v4203_v36, %v4200_v28  ;;  %4110 = vmatprep.mubr.bf16.mxu1 %v3844_v34  ;;  %v3887_v28 = vmul.f32 %v14169_v24, %v14139_v41  ;;  %v14181_v36 = vrot.slane %v14177_v33, %v14121_v48 }
 0x9a3   : > { %4111 = vmatmul.mubr.bf16.gmra.mxu1 %v3843_v35  ;;  %v10539_v38 = vpop.f32.mrf.mxu0 }
 0x9a4   : > { %10543 = vmatmul.mubr.msk.bf16.vlgmr.msra.gmra.mxu0 %vm4214_vm9, %v4207_v37  ;;  %10580 = vmatprep.mubr.msk.bf16.mxu1 %vm13256_vm0, %v13255_v0 }
 0x9a5   : > { %10548 = vmatprep.mubr.msk.bf16.mxu0 %vm13256_vm0, %v13255_v0 }
 0xa53   : > { %v4092_v43 = vpop.f32.mrf.mxu1 }
 0xa54   : > { %v14143_v44 = vadd.f32 %v4092_v43, %v3886_v42 }
 0xa55   : > { %v4094_v22 = vpop.f32.mrf.mxu1 }
 0xa56   : > { %v4095_v35 = vadd.f32 %v4094_v22, %v3887_v28  ;;  %v11435_v22 = vld [vmem:[#allocation34 + $0x24] ss:$8 sps:$4 sm:$0xff]   ;;  %v11433_v28 = vld [vmem:[#allocation34 + $0x20] ss:$8 sps:$4 sm:$0xff]  }
 0xa57   : > { %v14165_v23 = vpop.f32.mrf.mxu1 }
 0xa58   : > { %v14187_v41 = vadd.f32 %v14181_v36, %v4095_v35  ;;  %v11436_v35 = vld [vmem:[#allocation34 + $0x10] ss:$8 sps:$4 sm:$0xff]  }
 0xa59   : > { %v4098_v27 = vpop.f32.mrf.mxu1 }
 0xa5a   : > { %v4099_v32 = vadd.f32 %v4098_v27, %v3889_v26  ;;  %v11349_v26 = vld [vmem:[#allocation37 + $0xe0] ss:$8 sps:$4 sm:$0xff]   ;;  %v11354_v27 = vld [vmem:[#allocation37 + $0xd4] ss:$8 sps:$4 sm:$0xff]  }
 0xa5c   : > { %v14184_v39 = vadd.f32 %v14181_v36, %v4099_v32  ;;  %v11352_v32 = vld [vmem:[#allocation37 + $0xd0] ss:$8 sps:$4 sm:$0xff]  }
 0xa64   : > { %v4256_v46 = vpop.f32.mrf.mxu0 }
 0xa65   : > { %v4257_v50 = vadd.f32 %v9701_v45, %v4256_v46 }
 0xa66   : > { %v10544_v62 = vpop.f32.mrf.mxu0 }
 0xa67   : > { %v4263_v53 = vmax.f32 %v4257_v50, 0.0  ;;  %v11324_v62 = vld [vmem:[#allocation37 + $0x74] ss:$8 sps:$4 sm:$0xff]   ;;  %v15016_v50 = vmax.f32 %v14184_v39, 0.0 }
 0xa68   : > { %v4259_v51 = vpop.f32.mrf.mxu0 }
 0xa69   : > { %v4260_v63 = vadd.f32 %v9701_v45, %v4259_v51 }
 0xa6a   : > { %v10545_v52 = vpop.f32.mrf.mxu0 }
 0xa6b   : > { %v4264_v54 = vmax.f32 %v4260_v63, 0.0  ;;  %v15018_v63 = vmax.f32 %v14187_v41, 0.0  ;;  %v11322_v52 = vld [vmem:[#allocation37 + $0x70] ss:$8 sps:$4 sm:$0xff]  }
 0xa6d   : > { %v4265_v55 = vpack.c.bf16 %v4264_v54, %v4263_v53  ;;  %v11327_v53 = vld [vmem:[#allocation37 + $0x64] ss:$8 sps:$4 sm:$0xff]   ;;  %v14195_v54 = vpack.c.bf16 %v15016_v50, %v15018_v63 }
 0xa6f   : > { %10547 = vmatpush3.bf16.msra.mxu0 %v4265_v55  ;;  %v11325_v55 = vld [vmem:[#allocation37 + $0x60] ss:$8 sps:$4 sm:$0xff]  }
 0xa70   : > { %10552 = vmatprep.subr.bf16.mxu0 %v13255_v0 }
 0xa72   : > { %10549 = vmatmul.mubr.msk.bf16.vlgmr.msra.gmra.mxu0 %vm4162_vm7, %v14107_v31 }
 0xa73   : > { %10556 = vmatprep.mubr.msk.bf16.mxu0 %vm13256_vm0, %v13255_v0  ;;  %10553 = vmatpush3.bf16.msra.mxu0 %v11316_v56  ;;  %v11330_v56 = vld [vmem:[#allocation37 + $0x54] ss:$8 sps:$4 sm:$0xff]  }
 0xa74   : > { %10554 = vmatprep.subr.bf16.mxu0 %v13255_v0 }
 0xa77   : > { %10555 = vmatpush3.bf16.msra.mxu0 %v11317_v57  ;;  %v11328_v57 = vld [vmem:[#allocation37 + $0x50] ss:$8 sps:$4 sm:$0xff]  }
 0xa78   : > { %10560 = vmatprep.subr.bf16.mxu0 %v13255_v0 }
 0xb32   : > { %v4300_v58 = vpop.f32.mrf.mxu0 }
 0xb34   : > { %v10550_v59 = vpop.f32.mrf.mxu0 }
 0xb35   : > { %v11331_v59 = vld [vmem:[#allocation37 + $0x40] ss:$8 sps:$4 sm:$0xff]  }
 0xb36   : > { %v4303_v60 = vpop.f32.mrf.mxu0 }
 0xb37   : > { %v4307_v1 = vpack.c.bf16 %v4303_v60, %v4300_v58  ;;  %v11333_v58 = vld [vmem:[#allocation37 + $0x44] ss:$8 sps:$4 sm:$0xff]   ;;  %v11336_v60 = vld [vmem:[#allocation37 + $0x34] ss:$8 sps:$4 sm:$0xff]  }
 0xb38   : > { %v10551_v2 = vpop.f32.mrf.mxu0 }
 0xb39   : > { %10557 = vmatmul.mubr.msk.bf16.vlgmr.msra.gmra.mxu0 %vm3371_vm5, %v4307_v1  ;;  %v11334_v1 = vld [vmem:[#allocation37 + $0x30] ss:$8 sps:$4 sm:$0xff]   ;;  %v11339_v2 = vld [vmem:[#allocation37 + $0x24] ss:$8 sps:$4 sm:$0xff]  }
 0xb3a   : > { %10562 = vmatprep.mubr.msk.bf16.mxu0 %vm13256_vm0, %v13255_v0 }
 0xbf9   : > { %v4363_v4 = vpop.f32.mrf.mxu0 }
 0xbfa   : > { %v4364_v6 = vadd.f32 %v9704_v3, %v4363_v4  ;;  %v11337_v4 = vld [vmem:[#allocation37 + $0x20] ss:$8 sps:$4 sm:$0xff]  }
 0xbfb   : > { %v10558_v5 = vpop.f32.mrf.mxu0 }
 0xbfc   : > { %v4370_v10 = vmax.f32 %v4364_v6, 0.0  ;;  %v11423_v5 = vld [vmem:[#allocation34 + $0x64] ss:$8 sps:$4 sm:$0xff]   ;;  %v11342_v6 = vld [vmem:[#allocation37 + $0x14] ss:$8 sps:$4 sm:$0xff]  }
 0xbfd   : > { %v4366_v7 = vpop.f32.mrf.mxu0 }
 0xbfe   : > { %v4367_v8 = vadd.f32 %v9704_v3, %v4366_v7  ;;  %v11418_v3 = vld [vmem:[#allocation34 + $0x70] ss:$8 sps:$4 sm:$0xff]   ;;  %v11421_v7 = vld [vmem:[#allocation34 + $0x60] ss:$8 sps:$4 sm:$0xff]  }
 0xbff   : > { %v10559_v9 = vpop.f32.mrf.mxu0 }
 0xc00   : > { %v4371_v11 = vmax.f32 %v4367_v8, 0.0  ;;  %v11426_v8 = vld [vmem:[#allocation34 + $0x54] ss:$8 sps:$4 sm:$0xff]  }
 0xc01   : > { %v11340_v9 = vld [vmem:[#allocation37 + $0x10] ss:$8 sps:$4 sm:$0xff]  }
 0xc02   : > { %v4372_v12 = vpack.c.bf16 %v4371_v11, %v4370_v10  ;;  %v11345_v10 = vld [vmem:[#allocation37 + $0x4] ss:$8 sps:$4 sm:$0xff]  }
 0xc03   : > { %v11424_v11 = vld [vmem:[#allocation34 + $0x50] ss:$8 sps:$4 sm:$0xff]  }
 0xc04   : > { %10561 = vmatpush3.bf16.msra.mxu0 %v4372_v12  ;;  %v11429_v12 = vld [vmem:[#allocation34 + $0x44] ss:$8 sps:$4 sm:$0xff]  }
 0xc05   : > { %10566 = vmatprep.subr.bf16.mxu0 %v13255_v0 }
 0xc07   : > { %10563 = vmatmul.mubr.msk.bf16.vlgmr.msra.gmra.mxu0 %vm4162_vm7, %v14107_v31 }
 0xc08   : > { %10567 = vmatpush3.bf16.msra.mxu0 %v11318_v13  ;;  %10574 = vmatprep.mubr.msk.bf16.mxu0 %vm13256_vm0, %v13255_v0  ;;  %v11343_v13 = vld [vmem:[#allocation37] ss:$8 sps:$4 sm:$0xff]  }
 0xc09   : > { %10568 = vmatprep.subr.bf16.mxu0 %v13255_v0 }
 0xc0c   : > { %10569 = vmatpush3.bf16.msra.mxu0 %v11319_v14  ;;  %v11348_v14 = vld [vmem:[#allocation37 + $0xf4] ss:$8 sps:$4 sm:$0xff]  }
 0xc0d   : > { %10570 = vmatprep.subr.bf16.mxu0 %v13255_v0 }
 0xc10   : > { %10571 = vmatpush3.bf16.msra.mxu0 %v11320_v15  ;;  %v11427_v15 = vld [vmem:[#allocation34 + $0x40] ss:$8 sps:$4 sm:$0xff]  }
 0xc11   : > { %10572 = vmatprep.subr.bf16.mxu0 %v13255_v0 }
 0xc14   : > { %10573 = vmatpush3.bf16.msra.mxu0 %v11321_v16  ;;  %v14200_v16 = vpop.f32.mrf.mxu1 }
 0xcc7   : > { %v4407_v17 = vpop.f32.mrf.mxu0 }
 0xcc9   : > { %v10564_v18 = vpop.f32.mrf.mxu0 }
 0xcca   : > { %v11346_v18 = vld [vmem:[#allocation37 + $0xf0] ss:$8 sps:$4 sm:$0xff]  }
 0xccb   : > { %v4410_v19 = vpop.f32.mrf.mxu0 }
 0xccc   : > { %v4414_v20 = vpack.c.bf16 %v4410_v19, %v4407_v17  ;;  %v11432_v17 = vld [vmem:[#allocation34 + $0x34] ss:$8 sps:$4 sm:$0xff]   ;;  %v11351_v19 = vld [vmem:[#allocation37 + $0xe4] ss:$8 sps:$4 sm:$0xff]  }
 0xccd   : > { %v10565_v21 = vpop.f32.mrf.mxu0 }
 0xcce   : > { %10575 = vmatmul.mubr.msk.bf16.vlgmr.msra.gmra.mxu0 %vm3537_vm6, %v4414_v20  ;;  %v11430_v20 = vld [vmem:[#allocation34 + $0x30] ss:$8 sps:$4 sm:$0xff]   ;;  %v4104_v21 = vpop.f32.mrf.mxu1 }
 0xccf   : > { %4657 = vmatprep.mubr.bf16.mxu0 %v15021_v49 }
 0xd8e   : > { %v4482_v30 = vpop.f32.mrf.mxu0 }
 0xd8f   : > { %v4483_v37 = vadd.f32 %v9709_v29, %v4482_v30  ;;  %v11438_v30 = vld [vmem:[#allocation34 + $0x14] ss:$8 sps:$4 sm:$0xff]  }
 0xd90   : > { %v10576_v34 = vpop.f32.mrf.mxu0 }
 0xd91   : > { %v4489_v45 = vmax.f32 %v4483_v37, 0.0  ;;  %v11357_v34 = vld [vmem:[#allocation37 + $0xc4] ss:$8 sps:$4 sm:$0xff]   ;;  %v3858_v37 = vpop.permute.xlu1 %3857 }
 0xd92   : > { %v4485_v38 = vpop.f32.mrf.mxu0 }
 0xd93   : > { %v4486_v42 = vadd.f32 %v9709_v29, %v4485_v38  ;;  %v4106_v29 = vpop.f32.mrf.mxu1 }
 0xd94   : > { %v10577_v43 = vpop.f32.mrf.mxu0 }
 0xd95   : > { %v4490_v46 = vmax.f32 %v4486_v42, 0.0  ;;  %v4108_v38 = vpop.f32.mrf.mxu1  ;;  %v11355_v42 = vld [vmem:[#allocation37 + $0xc0] ss:$8 sps:$4 sm:$0xff]   ;;  %v11360_v43 = vld [vmem:[#allocation37 + $0xb4] ss:$8 sps:$4 sm:$0xff]  }
 0xd97   : > { %v4491_v51 = vpack.c.bf16 %v4490_v46, %v4489_v45  ;;  %v14202_v45 = vpop.f32.mrf.mxu1  ;;  %v11358_v46 = vld [vmem:[#allocation37 + $0xb0] ss:$8 sps:$4 sm:$0xff]  }
 0xd99   : > { %10579 = vmatpush3.bf16.msra.mxu1 %v4491_v51  ;;  %v3863_v51 = vpop.permute.xlu1 %3862 }
 0xd9a   : > { %4849 = vmatprep.subr.bf16.mxu1 %v11324_v62  ;;  %v3888_v62 = vmul.f32 %v14137_v40, %v14171_v25 }
 0xd9c   : > { %10581 = vmatmul.mubr.msk.bf16.vlgmr.msra.gmra.mxu1 %vm4162_vm7, %v14107_v31  ;;  %v11420_v31 = vld [vmem:[#allocation34 + $0x74] ss:$8 sps:$4 sm:$0xff]  }
 0xd9d   : > { %4850 = vmatpush1.bf16.msra.mxu1 %v11322_v52  ;;  %4881 = vmatprep.mubr.bf16.mxu1 %v14195_v54  ;;  %v11363_v52 = vld [vmem:[#allocation37 + $0xa4] ss:$8 sps:$4 sm:$0xff]  }
 0xd9e   : > { %4851 = vmatprep.subr.bf16.mxu1 %v11327_v53  ;;  %4625 = vmatprep.subr.bf16.mxu0 %v11420_v31  ;;  %v3893_v53 = vmul.f32 %v14169_v24, %v3863_v51 }
 0xd9f   : > { %4626 = vmatpush1.bf16.msra.mxu0 %v11418_v3  ;;  %v11364_v3 = vld [vmem:[#allocation37 + $0x90] ss:$8 sps:$4 sm:$0xff]  }
 0xda0   : > { %4627 = vmatprep.subr.bf16.mxu0 %v11423_v5  ;;  %v3873_v5 = vpop.permute.xlu1 %3872 }
 0xda1   : > { %4852 = vmatpush1.bf16.msra.mxu1 %v11325_v55  ;;  %v4114_v55 = vpop.f32.mrf.mxu1 }
 0xda2   : > { %4853 = vmatprep.subr.bf16.mxu1 %v11330_v56  ;;  %v3891_v56 = vmul.f32 %v14169_v24, %v3858_v37 }
 0xda3   : > { %4628 = vmatpush1.bf16.msra.mxu0 %v11421_v7  ;;  %v4116_v25 = vpop.f32.mrf.mxu1  ;;  %v3897_v7 = vmul.f32 %v14169_v24, %v3873_v5 }
 0xda4   : > { %4629 = vmatprep.subr.bf16.mxu0 %v11426_v8  ;;  %v3890_v8 = vmul.f32 %v14137_v40, %v3858_v37 }
 0xda5   : > { %4854 = vmatpush1.bf16.msra.mxu1 %v11328_v57  ;;  %v11361_v57 = vld [vmem:[#allocation37 + $0xa0] ss:$8 sps:$4 sm:$0xff]  }
 0xda6   : > { %4855 = vmatprep.subr.bf16.mxu1 %v11333_v58  ;;  %v4097_v58 = vadd.f32 %v14165_v23, %v3888_v62  ;;  %v11369_v23 = vld [vmem:[#allocation37 + $0x84] ss:$8 sps:$4 sm:$0xff]  }
 0xda7   : > { %4630 = vmatpush1.bf16.msra.mxu0 %v11424_v11  ;;  %v11378_v62 = vld [vmem:[%s15117_s1 + $0xac] ss:$16 sps:$4 sm:$0xff]  }
 0xda8   : > { %4631 = vmatprep.subr.bf16.mxu0 %v11429_v12 }
 0xda9   : > { %4856 = vmatpush1.bf16.msra.mxu1 %v11331_v59  ;;  %v11366_v59 = vld [vmem:[#allocation37 + $0x94] ss:$8 sps:$4 sm:$0xff]  }
 0xdaa   : > { %4857 = vmatprep.subr.bf16.mxu1 %v11336_v60  ;;  %v4109_v60 = vadd.f32 %v4108_v38, %v3893_v53  ;;  %v11373_v38 = vld [vmem:[%s15117_s1 + $0xc8] ss:$16 sps:$4 sm:$0xff]  }
 0xdab   : > { %4632 = vmatpush1.bf16.msra.mxu0 %v11427_v15 }
 0xdac   : > { %4633 = vmatprep.subr.bf16.mxu0 %v11432_v17  ;;  %v11372_v17 = vld [vmem:[%s15117_s1 + $0xec] ss:$16 sps:$4 sm:$0xff]  }
 0xdad   : > { %4858 = vmatpush1.bf16.msra.mxu1 %v11334_v1  ;;  %v14211_v1 = vrot.slane %v14177_v33, %v14124_v61 }
 0xdae   : > { %4859 = vmatprep.subr.bf16.mxu1 %v11339_v2  ;;  %v4105_v2 = vadd.f32 %v4104_v21, %v3891_v56 }
 0xdaf   : > { %4634 = vmatpush1.bf16.msra.mxu0 %v11430_v20  ;;  %v14214_v31 = vadd.f32 %v14211_v1, %v4097_v58  ;;  %v14223_v33 = vadd.f32 %v14211_v1, %v14143_v44  ;;  %v4103_v20 = vadd.f32 %v14200_v16, %v3890_v8  ;;  %v11375_v16 = vld [vmem:[%s15117_s1 + $0xcc] ss:$16 sps:$4 sm:$0xff]   ;;  %v11388_v8 = vld [vmem:[%s15117_s1 + $0x28] ss:$16 sps:$4 sm:$0xff]  }
 0xdb0   : > { %4635 = vmatprep.subr.bf16.mxu0 %v11435_v22  ;;  %v14227_v11 = vadd.f32 %v14181_v36, %v4105_v2  ;;  %v11381_v58 = vld [vmem:[%s15117_s1 + $0x8c] ss:$16 sps:$4 sm:$0xff]  }
 0xdb1   : > { %4860 = vmatpush1.bf16.msra.mxu1 %v11337_v4  ;;  %v3892_v4 = vmul.f32 %v14137_v40, %v3863_v51  ;;  %v11384_v2 = vld [vmem:[%s15117_s1 + $0x6c] ss:$16 sps:$4 sm:$0xff]  }
 0xdb2   : > { %4861 = vmatprep.subr.bf16.mxu1 %v11342_v6  ;;  %v14218_v6 = vadd.f32 %v14181_v36, %v4109_v60  ;;  %v15014_v21 = vmax.f32 %v14227_v11, 0.0  ;;  %v11379_v60 = vld [vmem:[%s15117_s1 + $0x88] ss:$16 sps:$4 sm:$0xff]  }
 0xdb3   : > { %4636 = vmatpush1.bf16.msra.mxu0 %v11433_v28  ;;  %v4107_v15 = vadd.f32 %v4106_v29, %v3892_v4  ;;  %v3896_v28 = vmul.f32 %v14137_v40, %v3873_v5  ;;  %v11387_v5 = vld [vmem:[%s15117_s1 + $0x4c] ss:$16 sps:$4 sm:$0xff]  }
 0xdb4   : > { %4637 = vmatprep.subr.bf16.mxu0 %v11438_v30  ;;  %v15012_v44 = vmax.f32 %v14218_v6, 0.0 }
 0xdb5   : > { %4862 = vmatpush1.bf16.msra.mxu1 %v11340_v9  ;;  %v3868_v9 = vpop.permute.xlu0 %3867 }
 0xdb6   : > { %4863 = vmatprep.subr.bf16.mxu1 %v11345_v10  ;;  %v4118_v10 = vpop.f32.mrf.mxu1  ;;  %v3895_v12 = vmul.f32 %v14169_v24, %v3868_v9  ;;  %v11370_v24 = vld [vmem:[%s15117_s1 + $0xe8] ss:$16 sps:$4 sm:$0xff]   ;;  %v14255_v30 = vpack.c.bf16 %v15012_v44, %v15014_v21 }
 0xdb7   : > { %4638 = vmatpush1.bf16.msra.mxu0 %v11436_v35  ;;  %v11441_v35 = vld [vmem:[#allocation34 + $0x4] ss:$8 sps:$4 sm:$0xff]  }
 0xdb8   : > { %v4115_v22 = vadd.f32 %v4114_v55, %v3895_v12  ;;  %4639 = vmatprep.subr.bf16.mxu0 %v11441_v35  ;;  %v11376_v55 = vld [vmem:[%s15117_s1 + $0xa8] ss:$16 sps:$4 sm:$0xff]   ;;  %v11396_v12 = vld [vmem:[%s15117_s1 + $0x1ec] ss:$16 sps:$4 sm:$0xff]  }
 0xdb9   : > { %4864 = vmatpush1.bf16.msra.mxu1 %v11343_v13  ;;  %v11367_v13 = vld [vmem:[#allocation37 + $0x80] ss:$8 sps:$4 sm:$0xff]  }
 0xdba   : > { %4865 = vmatprep.subr.bf16.mxu1 %v11348_v14  ;;  %v15017_v14 = vmax.f32 %v14214_v31, 0.0  ;;  %v14263_v37 = vadd.f32 %v14181_v36, %v4115_v22  ;;  %v11405_v22 = vld [vmem:[%s15117_s1 + $0x18c] ss:$16 sps:$4 sm:$0xff]   ;;  %v11409_v35 = vld [vmem:[%s15117_s1 + $0x148] ss:$16 sps:$4 sm:$0xff]  }
 0xdbc   : > { %v15010_v53 = vmax.f32 %v14263_v37, 0.0 }
 0xdbd   : > { %4866 = vmatpush2.bf16.msra.mxu1 %v11346_v18  ;;  %v4119_v18 = vadd.f32 %v4118_v10, %v3897_v7  ;;  %v11390_v7 = vld [vmem:[%s15117_s1 + $0x2c] ss:$16 sps:$4 sm:$0xff]   ;;  %v11391_v10 = vld [vmem:[%s15117_s1 + $0x8] ss:$16 sps:$4 sm:$0xff]  }
 0xdbe   : > { %4867 = vmatprep.subr.bf16.mxu1 %v11351_v19  ;;  %v4144_v19 = vmax.f32 %v14223_v33, 0.0 }
 0xdbf   : > { %v14249_v29 = vadd.f32 %v14181_v36, %v4119_v18  ;;  %v11402_v18 = vld [vmem:[%s15117_s1 + $0x1ac] ss:$16 sps:$4 sm:$0xff]  }
 0xdc1   : > { %4868 = vmatpush2.bf16.msra.mxu1 %v11349_v26  ;;  %v14241_v26 = vpack.c.bf16 %v15017_v14, %v4144_v19 }
 0xdc2   : > { %4869 = vmatprep.subr.bf16.mxu1 %v11354_v27  ;;  %v14244_v27 = vadd.f32 %v14211_v1, %v4107_v15  ;;  %v11399_v15 = vld [vmem:[%s15117_s1 + $0x1cc] ss:$16 sps:$4 sm:$0xff]  }
 0xdc5   : > { %4870 = vmatpush2.bf16.msra.mxu1 %v11352_v32  ;;  %v14258_v32 = vadd.f32 %v14211_v1, %v4103_v20  ;;  %v11400_v20 = vld [vmem:[%s15117_s1 + $0x1a8] ss:$16 sps:$4 sm:$0xff]  }
 0xdc6   : > { %4871 = vmatprep.subr.bf16.mxu1 %v11357_v34  ;;  %v3894_v34 = vmul.f32 %v14137_v40, %v3868_v9  ;;  %v15008_v40 = vmax.f32 %v14249_v29, 0.0  ;;  %v11393_v9 = vld [vmem:[%s15117_s1 + $0xc] ss:$16 sps:$4 sm:$0xff]  }
 0xdc7   : > { %v15015_v51 = vmax.f32 %v14258_v32, 0.0 }
 0xdc8   : > { %v4113_v36 = vadd.f32 %v14202_v45, %v3894_v34  ;;  %v14289_v45 = vpack.c.bf16 %v15008_v40, %v15010_v53  ;;  %v11411_v34 = vld [vmem:[%s15117_s1 + $0x14c] ss:$16 sps:$4 sm:$0xff]  }
 0xdc9   : > { %4872 = vmatpush2.bf16.msra.mxu1 %v11355_v42  ;;  %v11439_v42 = vld [vmem:[#allocation34] ss:$8 sps:$4 sm:$0xff]  }
 0xdca   : > { %4873 = vmatprep.subr.bf16.mxu1 %v11360_v43  ;;  %v15013_v43 = vmax.f32 %v14244_v27, 0.0  ;;  %4640 = vmatpush1.bf16.msra.mxu0 %v11439_v42  ;;  %v11412_v42 = vld [vmem:[%s15117_s1 + $0x128] ss:$16 sps:$4 sm:$0xff]  }
 0xdcd   : > { %4874 = vmatpush2.bf16.msra.mxu1 %v11358_v46  ;;  %v4117_v46 = vadd.f32 %v4116_v25, %v3896_v28  ;;  %v11408_v28 = vld [vmem:[%s15117_s1 + $0x16c] ss:$16 sps:$4 sm:$0xff]  }
 0xdce   : > { %4875 = vmatprep.subr.bf16.mxu1 %v11363_v52  ;;  %v11444_v52 = vld [vmem:[%s15117_s1 + $0xe4] ss:$16 sps:$4 sm:$0xff]  }
 0xdcf   : > { %v14276_v56 = vadd.f32 %v14211_v1, %v4117_v46  ;;  %5253 = vmatprep.subr.bf16.mxu0 %v11444_v52  ;;  %v11417_v46 = vld [vmem:[%s15117_s1 + $0x10c] ss:$16 sps:$4 sm:$0xff]  }
 0xdd1   : > { %4876 = vmatpush2.bf16.msra.mxu1 %v11361_v57  ;;  %v14282_v57 = vpack.c.bf16 %v15013_v43, %v15015_v51  ;;  %v15009_v25 = vmax.f32 %v14276_v56, 0.0 }
 0xdd2   : > { %4877 = vmatprep.subr.bf16.mxu1 %v11366_v59  ;;  %v14292_v59 = vadd.f32 %v14211_v1, %v4113_v36  ;;  %v11382_v1 = vld [vmem:[%s15117_s1 + $0x68] ss:$16 sps:$4 sm:$0xff]  }
 0xdd5   : > { %4878 = vmatpush2.bf16.msra.mxu1 %v11364_v3  ;;  %v15011_v3 = vmax.f32 %v14292_v59, 0.0 }
 0xdd6   : > { %4879 = vmatprep.subr.bf16.mxu1 %v11369_v23  ;;  %v11385_v23 = vld [vmem:[%s15117_s1 + $0x48] ss:$16 sps:$4 sm:$0xff]  }
 0xdd7   : > { %v14305_v4 = vpack.c.bf16 %v15009_v25, %v15011_v3 }
 0xdd9   : > { %4880 = vmatpush2.bf16.msra.mxu1 %v11367_v13  ;;  %v11394_v13 = vld [vmem:[%s15117_s1 + $0x1e8] ss:$16 sps:$4 sm:$0xff]  }
 0xdda   : > { %5316 = vmatprep.subr.bf16.mxu1 %v11372_v17  ;;  %v11397_v17 = vld [vmem:[%s15117_s1 + $0x1c8] ss:$16 sps:$4 sm:$0xff]  }
 0xddc   : > { %4882 = vmatmul.mubr.bf16.vlgmr.msra.gmra.mxu1 %v14241_v26 }
 0xddd   : > { %4891 = vmatprep.mubr.bf16.mxu1 %v14255_v30  ;;  %5317 = vmatpush1.bf16.msra.mxu1 %v11370_v24  ;;  %v11403_v24 = vld [vmem:[%s15117_s1 + $0x188] ss:$16 sps:$4 sm:$0xff]  }
 0xdde   : > { %5318 = vmatprep.subr.bf16.mxu1 %v11375_v16  ;;  %v11406_v16 = vld [vmem:[%s15117_s1 + $0x168] ss:$16 sps:$4 sm:$0xff]  }
 0xde1   : > { %5319 = vmatpush1.bf16.msra.mxu1 %v11373_v38  ;;  %v11414_v38 = vld [vmem:[%s15117_s1 + $0x12c] ss:$16 sps:$4 sm:$0xff]  }
 0xde2   : > { %5320 = vmatprep.subr.bf16.mxu1 %v11378_v62  ;;  %v11415_v62 = vld [vmem:[%s15117_s1 + $0x108] ss:$16 sps:$4 sm:$0xff]  }
 0xde4   : > { %4892 = vmatmul.mubr.bf16.gmra.mxu1 %v14282_v57 }
 0xde5   : > { %4901 = vmatprep.mubr.bf16.mxu1 %v14289_v45  ;;  %5321 = vmatpush1.bf16.msra.mxu1 %v11376_v55 }
 0xde6   : > { %5322 = vmatprep.subr.bf16.mxu1 %v11381_v58  ;;  %v11442_v58 = vld [vmem:[%s15117_s1 + $0xe0] ss:$16 sps:$4 sm:$0xff]  }
 0xde9   : > { %5323 = vmatpush1.bf16.msra.mxu1 %v11379_v60 }
 0xdea   : > { %5324 = vmatprep.subr.bf16.mxu1 %v11384_v2  ;;  %v11447_v2 = vld [vmem:[%s15117_s1 + $0xc4] ss:$16 sps:$4 sm:$0xff]  }
 0xdec   : > { %4902 = vmatmul.mubr.bf16.gmra.mxu1 %v14305_v4 }
 0xded   : > { %5325 = vmatpush1.bf16.msra.mxu1 %v11382_v1  ;;  %5348 = vmatprep.mubr.bf16.mxu1 %v14195_v54 }
 0xdee   : > { %5326 = vmatprep.subr.bf16.mxu1 %v11387_v5  ;;  %v11445_v5 = vld [vmem:[%s15117_s1 + $0xc0] ss:$16 sps:$4 sm:$0xff]  }
 0xdf1   : > { %5327 = vmatpush1.bf16.msra.mxu1 %v11385_v23  ;;  %v11450_v23 = vld [vmem:[%s15117_s1 + $0xa4] ss:$16 sps:$4 sm:$0xff]  }
 0xdf2   : > { %5328 = vmatprep.subr.bf16.mxu1 %v11390_v7  ;;  %v11448_v7 = vld [vmem:[%s15117_s1 + $0xa0] ss:$16 sps:$4 sm:$0xff]  }
 0xdf5   : > { %5329 = vmatpush1.bf16.msra.mxu1 %v11388_v8  ;;  %v11453_v8 = vld [vmem:[%s15117_s1 + $0x84] ss:$16 sps:$4 sm:$0xff]  }
 0xdf6   : > { %5330 = vmatprep.subr.bf16.mxu1 %v11393_v9  ;;  %v11451_v9 = vld [vmem:[%s15117_s1 + $0x80] ss:$16 sps:$4 sm:$0xff]  }
 0xdf9   : > { %5331 = vmatpush1.bf16.msra.mxu1 %v11391_v10  ;;  %v11456_v10 = vld [vmem:[%s15117_s1 + $0x64] ss:$16 sps:$4 sm:$0xff]  }
 0xdfa   : > { %5332 = vmatprep.subr.bf16.mxu1 %v11396_v12  ;;  %v11454_v12 = vld [vmem:[%s15117_s1 + $0x60] ss:$16 sps:$4 sm:$0xff]  }
 0xdfd   : > { %5333 = vmatpush2.bf16.msra.mxu1 %v11394_v13  ;;  %v11457_v13 = vld [vmem:[%s15117_s1 + $0x40] ss:$16 sps:$4 sm:$0xff]  }
 0xdfe   : > { %5334 = vmatprep.subr.bf16.mxu1 %v11399_v15  ;;  %v11462_v15 = vld [vmem:[%s15117_s1 + $0x24] ss:$16 sps:$4 sm:$0xff]  }
 0xe01   : > { %5335 = vmatpush2.bf16.msra.mxu1 %v11397_v17  ;;  %v11460_v17 = vld [vmem:[%s15117_s1 + $0x20] ss:$16 sps:$4 sm:$0xff]  }
 0xe02   : > { %5336 = vmatprep.subr.bf16.mxu1 %v11402_v18  ;;  %v11465_v18 = vld [vmem:[%s15117_s1 + $0x4] ss:$16 sps:$4 sm:$0xff]  }
 0xe05   : > { %5337 = vmatpush2.bf16.msra.mxu1 %v11400_v20  ;;  %v11463_v20 = vld [vmem:[%s15117_s1] ss:$16 sps:$4 sm:$0xff]  }
 0xe06   : > { %5338 = vmatprep.subr.bf16.mxu1 %v11405_v22  ;;  %v11468_v22 = vld [vmem:[%s15117_s1 + $0x1e4] ss:$16 sps:$4 sm:$0xff]  }
 0xe09   : > { %5339 = vmatpush2.bf16.msra.mxu1 %v11403_v24  ;;  %v11466_v24 = vld [vmem:[%s15117_s1 + $0x1e0] ss:$16 sps:$4 sm:$0xff]  }
 0xe0a   : > { %5340 = vmatprep.subr.bf16.mxu1 %v11408_v28  ;;  %v11471_v28 = vld [vmem:[%s15117_s1 + $0x1c4] ss:$16 sps:$4 sm:$0xff]  }
 0xe0d   : > { %5341 = vmatpush2.bf16.msra.mxu1 %v11406_v16  ;;  %v11469_v16 = vld [vmem:[%s15117_s1 + $0x1c0] ss:$16 sps:$4 sm:$0xff]  }
 0xe0e   : > { %5342 = vmatprep.subr.bf16.mxu1 %v11411_v34  ;;  %v11474_v34 = vld [vmem:[%s15117_s1 + $0x1a4] ss:$16 sps:$4 sm:$0xff]  }
 0xe11   : > { %5343 = vmatpush2.bf16.msra.mxu1 %v11409_v35  ;;  %v11472_v35 = vld [vmem:[%s15117_s1 + $0x1a0] ss:$16 sps:$4 sm:$0xff]  }
 0xe12   : > { %5344 = vmatprep.subr.bf16.mxu1 %v11414_v38  ;;  %v11477_v38 = vld [vmem:[%s15117_s1 + $0x184] ss:$16 sps:$4 sm:$0xff]  }
 0xe15   : > { %5345 = vmatpush2.bf16.msra.mxu1 %v11412_v42  ;;  %v11475_v42 = vld [vmem:[%s15117_s1 + $0x180] ss:$16 sps:$4 sm:$0xff]  }
 0xe16   : > { %5346 = vmatprep.subr.bf16.mxu1 %v11417_v46  ;;  %v11480_v46 = vld [vmem:[%s15117_s1 + $0x164] ss:$16 sps:$4 sm:$0xff]  }
 0xe19   : > { %5347 = vmatpush2.bf16.msra.mxu1 %v11415_v62  ;;  %v11478_v62 = vld [vmem:[%s15117_s1 + $0x160] ss:$16 sps:$4 sm:$0xff]  }
 0xe1c   : > { %5349 = vmatmul.mubr.bf16.vlgmr.msra.gmra.mxu1 %v14241_v26 }
 0xe1d   : > { %5358 = vmatprep.mubr.bf16.mxu1 %v14255_v30 }
 0xe24   : > { %5359 = vmatmul.mubr.bf16.gmra.mxu1 %v14282_v57 }
 0xe25   : > { %5368 = vmatprep.mubr.bf16.mxu1 %v14289_v45 }
 0xe2c   : > { %5369 = vmatmul.mubr.bf16.gmra.mxu1 %v14305_v4 }
 0xe2d   : > { %5741 = vmatprep.mubr.bf16.mxu1 %v15021_v49 }
 0xe5c   : > { %v4526_v36 = vpop.f32.mrf.mxu1 }
 0xe5e   : > { %v10582_v52 = vpop.f32.mrf.mxu1 }
 0xe5f   : > { %v11481_v52 = vld [vmem:[%s15117_s1 + $0x140] ss:$16 sps:$4 sm:$0xff]  }
 0xe60   : > { %v4529_v55 = vpop.f32.mrf.mxu1 }
 0xe61   : > { %v4533_v60 = vpack.c.bf16 %v4529_v55, %v4526_v36  ;;  %v11483_v36 = vld [vmem:[%s15117_s1 + $0x144] ss:$16 sps:$4 sm:$0xff]  }
 0xe62   : > { %v10583_v1 = vpop.f32.mrf.mxu1  ;;  %v11486_v55 = vld [vmem:[%s15117_s1 + $0x124] ss:$16 sps:$4 sm:$0xff]  }
 0xe63   : > { %4658 = vmatmul.mubr.bf16.vlgmr.msra.gmra.mxu0 %v4533_v60  ;;  %v11489_v60 = vld [vmem:[%s15117_s1 + $0x104] ss:$16 sps:$4 sm:$0xff]   ;;  %v11490_v1 = vld [vmem:[#allocation6 + $0x78] sm:$0xff]  }
 0xe64   : > { %5254 = vmatpush1.bf16.msra.mxu0 %v11442_v58  ;;  %5285 = vmatprep.mubr.bf16.mxu0 %v14195_v54  ;;  %v11459_v54 = vld [vmem:[%s15117_s1 + $0x44] ss:$16 sps:$4 sm:$0xff]   ;;  %v11484_v58 = vld [vmem:[%s15117_s1 + $0x120] ss:$16 sps:$4 sm:$0xff]  }
 0xe65   : > { %5255 = vmatprep.subr.bf16.mxu0 %v11447_v2  ;;  %v11487_v2 = vld [vmem:[%s15117_s1 + $0x100] ss:$16 sps:$4 sm:$0xff]  }
 0xe68   : > { %5256 = vmatpush1.bf16.msra.mxu0 %v11445_v5  ;;  %v11491_v5 = vld [vmem:[#allocation6 + $0x38] sm:$0xff]  }
 0xe69   : > { %5257 = vmatprep.subr.bf16.mxu0 %v11450_v23  ;;  %v11492_v23 = vld [vmem:[#allocation6 + $0x70] sm:$0xff]  }
 0xe6c   : > { %5258 = vmatpush1.bf16.msra.mxu0 %v11448_v7  ;;  %v11493_v7 = vld [vmem:[#allocation6 + $0x30] sm:$0xff]  }
 0xe6d   : > { %5259 = vmatprep.subr.bf16.mxu0 %v11453_v8  ;;  %v11494_v8 = vld [vmem:[#allocation6 + $0x68] sm:$0xff]  }
 0xe70   : > { %5260 = vmatpush1.bf16.msra.mxu0 %v11451_v9  ;;  %v11495_v9 = vld [vmem:[#allocation6 + $0x28] sm:$0xff]  }
 0xe71   : > { %5261 = vmatprep.subr.bf16.mxu0 %v11456_v10  ;;  %v11500_v10 = vld [vmem:[#allocation6 + $0x50] sm:$0xff]  }
 0xe74   : > { %5262 = vmatpush1.bf16.msra.mxu0 %v11454_v12  ;;  %v11501_v12 = vld [vmem:[#allocation6 + $0x10] sm:$0xff]  }
 0xe75   : > { %5263 = vmatprep.subr.bf16.mxu0 %v11459_v54  ;;  %v11502_v54 = vld [vmem:[#allocation6 + $0x48] sm:$0xff]  }
 0xe78   : > { %5264 = vmatpush1.bf16.msra.mxu0 %v11457_v13  ;;  %v11503_v13 = vld [vmem:[#allocation6 + $0x8] sm:$0xff]  }
 0xe79   : > { %5265 = vmatprep.subr.bf16.mxu0 %v11462_v15  ;;  %v11505_v15 = vld [vmem:[#allocation6] sm:$0xff]  }
 0xe7c   : > { %5266 = vmatpush1.bf16.msra.mxu0 %v11460_v17 }
 0xe7d   : > { %5267 = vmatprep.subr.bf16.mxu0 %v11465_v18 }
 0xe80   : > { %5268 = vmatpush1.bf16.msra.mxu0 %v11463_v20 }
 0xe81   : > { %5269 = vmatprep.subr.bf16.mxu0 %v11468_v22 }
 0xe84   : > { %5270 = vmatpush2.bf16.msra.mxu0 %v11466_v24 }
 0xe85   : > { %5271 = vmatprep.subr.bf16.mxu0 %v11471_v28 }
 0xe88   : > { %5272 = vmatpush2.bf16.msra.mxu0 %v11469_v16 }
 0xe89   : > { %5273 = vmatprep.subr.bf16.mxu0 %v11474_v34 }
 0xe8c   : > { %5274 = vmatpush2.bf16.msra.mxu0 %v11472_v35 }
 0xe8d   : > { %5275 = vmatprep.subr.bf16.mxu0 %v11477_v38 }
 0xe90   : > { %5276 = vmatpush2.bf16.msra.mxu0 %v11475_v42 }
 0xe91   : > { %5277 = vmatprep.subr.bf16.mxu0 %v11480_v46 }
 0xe94   : > { %5278 = vmatpush2.bf16.msra.mxu0 %v11478_v62 }
 0xe95   : > { %5279 = vmatprep.subr.bf16.mxu0 %v11483_v36 }
 0xe98   : > { %5280 = vmatpush2.bf16.msra.mxu0 %v11481_v52  ;;  %v2728_v52 = vld [vmem:[#allocation39] sm:$0x3] }
 0xe99   : > { %5281 = vmatprep.subr.bf16.mxu0 %v11486_v55  ;;  %v14382_v55 = vld [vmem:[#allocation40] sm:$0xf] }
 0xe9c   : > { %5282 = vmatpush2.bf16.msra.mxu0 %v11484_v58  ;;  %v4883_v20 = vpop.f32.mrf.mxu1 }
 0xe9d   : > { %5283 = vmatprep.subr.bf16.mxu0 %v11489_v60  ;;  %v14385_v60 = vrot.slane %v2728_v52, %v14121_v48 }
 0xe9e   : > { %v4885_v24 = vpop.f32.mrf.mxu1 }
 0xea0   : > { %5284 = vmatpush2.bf16.msra.mxu0 %v11487_v2  ;;  %v4887_v16 = vpop.f32.mrf.mxu1  ;;  %v4916_v2 = vrot.slane %v14382_v55, %v14124_v61 }
 0xea1   : > { %10182 = vmatprep.subr.bf16.mxu0 %v11490_v1  ;;  %v4920_v1 = vrot.slane %v14382_v55, %v14121_v48 }
 0xea2   : > { %v4889_v38 = vpop.f32.mrf.mxu1 }
 0xea3   : > { %5286 = vmatmul.mubr.bf16.vlgmr.msra.gmra.mxu0 %v14241_v26  ;;  %v11496_v26 = vld [vmem:[#allocation6 + $0x60] sm:$0xff]  }
 0xea4   : > { %5295 = vmatprep.mubr.bf16.mxu0 %v14255_v30  ;;  %10183 = vmatpush3.bf16.msra.mxu0 %v11491_v5  ;;  %v11497_v30 = vld [vmem:[#allocation6 + $0x20] sm:$0xff]   ;;  %v4893_v62 = vpop.f32.mrf.mxu1  ;;  %v14392_v5 = vrot.slane %v2728_v52, %v14124_v61 }
 0xea5   : > { %10184 = vmatprep.subr.bf16.mxu0 %v11492_v23 }
 0xea6   : > { %v4895_v23 = vpop.f32.mrf.mxu1 }
 0xea7   : > { %v4896_v14 = vadd.f32 %v4895_v23, %v14385_v60 }
 0xea8   : > { %10185 = vmatpush3.bf16.msra.mxu0 %v11493_v7 }
 0xea9   : > { %10186 = vmatprep.subr.bf16.mxu0 %v11494_v8 }
 0xeab   : > { %5296 = vmatmul.mubr.bf16.gmra.mxu0 %v14282_v57  ;;  %v11498_v57 = vld [vmem:[#allocation6 + $0x58] sm:$0xff]  }
 0xeac   : > { %5305 = vmatprep.mubr.bf16.mxu0 %v14289_v45  ;;  %10187 = vmatpush3.bf16.msra.mxu0 %v11495_v9  ;;  %v11499_v45 = vld [vmem:[#allocation6 + $0x18] sm:$0xff]  }
 0xead   : > { %10188 = vmatprep.subr.bf16.mxu0 %v11496_v26  ;;  %v4888_v26 = vadd.f32 %v4887_v16, %v14392_v5 }
 0xeb0   : > { %10189 = vmatpush3.bf16.msra.mxu0 %v11497_v30 }
 0xeb1   : > { %10190 = vmatprep.subr.bf16.mxu0 %v11498_v57 }
 0xeb3   : > { %5306 = vmatmul.mubr.bf16.gmra.mxu0 %v14305_v4  ;;  %v11504_v4 = vld [vmem:[#allocation6 + $0x40] sm:$0xff]  }
 0xeb4   : > { %10191 = vmatpush3.bf16.msra.mxu0 %v11499_v45  ;;  %v4886_v45 = vadd.f32 %v4885_v24, %v14385_v60 }
 0xeb5   : > { %10192 = vmatprep.subr.bf16.mxu0 %v11500_v10  ;;  %v4890_v10 = vadd.f32 %v4889_v38, %v14385_v60 }
 0xeb8   : > { %10193 = vmatpush3.bf16.msra.mxu0 %v11501_v12 }
 0xeb9   : > { %10194 = vmatprep.subr.bf16.mxu0 %v11502_v54  ;;  %v4884_v54 = vadd.f32 %v4883_v20, %v14392_v5 }
 0xebc   : > { %10195 = vmatpush3.bf16.msra.mxu0 %v11503_v13  ;;  %v4897_v13 = vpop.f32.mrf.mxu1 }
 0xebd   : > { %10196 = vmatprep.subr.bf16.mxu0 %v11504_v4 }
 0xebe   : > { %v4899_v40 = vpop.f32.mrf.mxu1 }
 0xebf   : > { %v4900_v44 = vadd.f32 %v4899_v40, %v14385_v60 }
 0xec0   : > { %10197 = vmatpush3.bf16.msra.mxu0 %v11505_v15  ;;  %v4903_v51 = vpop.f32.mrf.mxu1 }
 0xf23   : > { %v14374_v17 = vpop.f32.mrf.mxu0 }
 0xf25   : > { %v14376_v18 = vpop.f32.mrf.mxu0 }
 0xf27   : > { %v14378_v22 = vpop.f32.mrf.mxu0 }
 0xf29   : > { %v14380_v28 = vpop.f32.mrf.mxu0 }
 0xf63   : > { %v5287_v34 = vpop.f32.mrf.mxu0 }
 0xf64   : > { %v5288_v40 = vadd.f32 %v5287_v34, %v4916_v2 }
 0xf65   : > { %v5289_v35 = vpop.f32.mrf.mxu0 }
 0xf66   : > { %v5290_v43 = vadd.f32 %v5289_v35, %v4920_v1 }
 0xf67   : > { %v5291_v42 = vpop.f32.mrf.mxu0 }
 0xf69   : > { %v5293_v46 = vpop.f32.mrf.mxu0 }
 0xf6a   : > { %v5294_v38 = vadd.f32 %v5293_v46, %v4920_v1 }
 0xf6b   : > { %v5297_v36 = vpop.f32.mrf.mxu0 }
 0xf6c   : > { %v14399_v30 = vadd.f32 %v5297_v36, %v4916_v2  ;;  %v5390_v63 = vmul.f32 %v5294_v38, %v4900_v44 }
 0xf6d   : > { %v5299_v58 = vpop.f32.mrf.mxu0 }
 0xf6e   : > { %v14394_v8 = vadd.f32 %v5299_v58, %v4920_v1  ;;  %v5379_v16 = vmul.f32 %v14399_v30, %v4884_v54 }
 0xf6f   : > { %v5301_v7 = vpop.f32.mrf.mxu0 }
 0xf70   : > { %v14396_v9 = vadd.f32 %v5301_v7, %v4916_v2  ;;  %v5380_v52 = vmul.f32 %v14394_v8, %v4886_v45 }
 0xf71   : > { %v5303_v57 = vpop.f32.mrf.mxu0 }
 0xf72   : > { %v14403_v12 = vadd.f32 %v5303_v57, %v4920_v1  ;;  %v5381_v4 = vmul.f32 %v14396_v9, %v4888_v26 }
 0xf73   : > { %v5307_v15 = vpop.f32.mrf.mxu0 }
 0xf74   : > { %v5382_v58 = vmul.f32 %v14403_v12, %v4890_v10  ;;  %v5403_v24 = vpack.c.bf16 %v5381_v4, %v5379_v16  ;;  %v5308_v20 = vadd.f32 %v5307_v15, %v4916_v2  ;;  %v5388_v16 = vmul.f32 %v5290_v43, %v4896_v14 }
 0xf75   : > { %v5309_v36 = vpop.f32.mrf.mxu0 }
 0xf76   : > { %v5404_v7 = vpack.c.bf16 %v5382_v58, %v5380_v52  ;;  %v5310_v57 = vadd.f32 %v5309_v36, %v4920_v1  ;;  %v5383_v4 = vmul.f32 %v5308_v20, %v4884_v54  ;;  %v4905_v36 = vpop.f32.mrf.mxu1  ;;  %v5408_v15 = vpack.c.bf16 %v5390_v63, %v5388_v16 }
 0xf77   : > { %v5311_v25 = vpop.f32.mrf.mxu0 }
 0xf78   : > { %v5312_v53 = vadd.f32 %v5311_v25, %v4916_v2  ;;  %5543 = vmatprep.mubr.bf16.mxu0 %v5404_v7  ;;  %v5384_v52 = vmul.f32 %v5310_v57, %v4886_v45  ;;  %v5292_v25 = vadd.f32 %v5291_v42, %v4916_v2  ;;  %v4907_v35 = vpop.f32.mrf.mxu1  ;;  %v5392_v45 = vmul.f32 %v5310_v57, %v4896_v14 }
 0xf79   : > { %v5313_v3 = vpop.f32.mrf.mxu0  ;;  %5544 = vmatmul.mubr.bf16.vlgmr.msra.gmra.mxu0 %v5403_v24  ;;  %v4898_v24 = vadd.f32 %v4897_v13, %v14392_v5  ;;  %v4906_v42 = vadd.f32 %v4905_v36, %v14385_v60  ;;  %v4904_v14 = vadd.f32 %v4903_v51, %v14392_v5 }
 0xf7a   : > { %v5314_v21 = vadd.f32 %v5313_v3, %v4920_v1  ;;  %v5385_v50 = vmul.f32 %v5312_v53, %v4888_v26  ;;  %v4894_v3 = vadd.f32 %v4893_v62, %v14392_v5 }
 0xf7b   : > { %v5389_v1 = vmul.f32 %v5292_v25, %v4898_v24  ;;  %v5393_v63 = vmul.f32 %v5312_v53, %v4898_v24  ;;  %v5396_v13 = vmul.f32 %v5290_v43, %v4906_v42  ;;  %v5395_v57 = vmul.f32 %v5288_v40, %v4904_v14  ;;  %v11520_v24 = vld [vmem:[#allocation42 + $0x34] ss:$8 sps:$4 sm:$0xff]  }
 0xf7c   : > { %v5386_v58 = vmul.f32 %v5314_v21, %v4890_v10  ;;  %v5405_v7 = vpack.c.bf16 %v5385_v50, %v5383_v4  ;;  %v5394_v23 = vmul.f32 %v5314_v21, %v4900_v44  ;;  %v5387_v26 = vmul.f32 %v5288_v40, %v4894_v3  ;;  %v4909_v10 = vpop.f32.mrf.mxu1  ;;  %v11518_v40 = vld [vmem:[#allocation42 + $0x30] ss:$8 sps:$4 sm:$0xff]  }
 0xf7d   : > { %v4910_v50 = vadd.f32 %v4909_v10, %v14385_v60  ;;  %v5391_v2 = vmul.f32 %v5308_v20, %v4894_v3  ;;  %v4908_v4 = vadd.f32 %v4907_v35, %v14392_v5  ;;  %v5400_v16 = vmul.f32 %v14394_v8, %v4906_v42  ;;  %v9844_v20 = vld.sshfl [vmem:[#allocation7] sm:$0x33 pattern:$0x76325410]  ;;  %v11506_v5 = vld [vmem:[#allocation42 + $0x70] ss:$8 sps:$4 sm:$0xff]  }
 0xf7e   : > { %v5406_v46 = vpack.c.bf16 %v5386_v58, %v5384_v52  ;;  %v5407_v54 = vpack.c.bf16 %v5389_v1, %v5387_v26  ;;  %v5410_v52 = vpack.c.bf16 %v5394_v23, %v5392_v45  ;;  %v5399_v60 = vmul.f32 %v14399_v30, %v4904_v14  ;;  %v11508_v8 = vld [vmem:[#allocation42 + $0x74] ss:$8 sps:$4 sm:$0xff]   ;;  %v11523_v3 = vld [vmem:[#allocation42 + $0x24] ss:$8 sps:$4 sm:$0xff]   ;;  %v11521_v35 = vld [vmem:[#allocation42 + $0x20] ss:$8 sps:$4 sm:$0xff]  }
 0xf7f   : > { %v5398_v34 = vmul.f32 %v5294_v38, %v4910_v50  ;;  %v5409_v58 = vpack.c.bf16 %v5393_v63, %v5391_v2  ;;  %v5397_v44 = vmul.f32 %v5292_v25, %v4908_v4  ;;  %v5402_v21 = vmul.f32 %v14403_v12, %v4910_v50  ;;  %v11511_v12 = vld [vmem:[#allocation42 + $0x64] ss:$8 sps:$4 sm:$0xff]   ;;  %6015 = vmatprep.subr.bf16.mxu0 %v11508_v8  ;;  %v11514_v30 = vld [vmem:[#allocation42 + $0x54] ss:$8 sps:$4 sm:$0xff]   ;;  %v11512_v25 = vld [vmem:[#allocation42 + $0x50] ss:$8 sps:$4 sm:$0xff]  }
 0xf80   : > { %5551 = vmatprep.mubr.bf16.mxu0 %v5406_v46  ;;  %v5401_v43 = vmul.f32 %v14396_v9, %v4908_v4  ;;  %v14422_v36 = vcombine.high %v9844_v20, %v9844_v20  ;;  %v14427_v51 = vsel %vm4218_vm8, %v9844_v20, 0  ;;  %6016 = vmatpush1.bf16.msra.mxu0 %v11506_v5  ;;  %v11509_v9 = vld [vmem:[#allocation42 + $0x60] ss:$8 sps:$4 sm:$0xff]   ;;  %v11526_v1 = vld [vmem:[#allocation42 + $0x14] ss:$8 sps:$4 sm:$0xff]  }
 0xf81   : > { %5552 = vmatmul.mubr.bf16.gmra.mxu0 %v5405_v7  ;;  %v5412_v62 = vpack.c.bf16 %v5398_v34, %v5396_v13  ;;  %v5411_v53 = vpack.c.bf16 %v5397_v44, %v5395_v57  ;;  %v5414_v46 = vpack.c.bf16 %v5402_v21, %v5400_v16  ;;  %6017 = vmatprep.subr.bf16.mxu0 %v11511_v12  ;;  %v11517_v7 = vld [vmem:[#allocation42 + $0x44] ss:$8 sps:$4 sm:$0xff]   ;;  %v11524_v23 = vld [vmem:[#allocation42 + $0x10] ss:$8 sps:$4 sm:$0xff]   ;;  %v11527_v10 = vld [vmem:[#allocation42] ss:$8 sps:$4 sm:$0xff]  }
 0xf82   : > { %5559 = vmatprep.mubr.bf16.mxu0 %v5408_v15  ;;  %v5413_v38 = vpack.c.bf16 %v5401_v43, %v5399_v60  ;;  %9845 = vmatprep.subr.msk.bf16.mxu1 %vm4218_vm8, %v14422_v36  ;;  %v11515_v15 = vld [vmem:[#allocation42 + $0x40] ss:$8 sps:$4 sm:$0xff]   ;;  %v11529_v26 = vld [vmem:[#allocation42 + $0x4] ss:$8 sps:$4 sm:$0xff]   ;;  %v11530_v63 = vld [vmem:[#allocation42 + $0xf0] ss:$8 sps:$4 sm:$0xff]  }
 0xf83   : > { %5724 = vmatpush1.bf16.msra.mxu1 %v14427_v51  ;;  %v11535_v42 = vld [vmem:[#allocation42 + $0xe4] ss:$8 sps:$4 sm:$0xff]   ;;  %v11533_v13 = vld [vmem:[#allocation42 + $0xe0] ss:$8 sps:$4 sm:$0xff]   ;;  %v11536_v21 = vld [vmem:[#allocation42 + $0xd0] ss:$8 sps:$4 sm:$0xff]  }
 0xf84   : > { %6018 = vmatpush1.bf16.msra.mxu0 %v11509_v9 }
 0xf85   : > { %6019 = vmatprep.subr.bf16.mxu0 %v11514_v30 }
 0xf88   : > { %6020 = vmatpush1.bf16.msra.mxu0 %v11512_v25 }
 0xf89   : > { %5560 = vmatmul.mubr.bf16.gmra.mxu0 %v5407_v54  ;;  %6021 = vmatprep.subr.bf16.mxu0 %v11517_v7  ;;  %v11532_v54 = vld [vmem:[#allocation42 + $0xf4] ss:$8 sps:$4 sm:$0xff]  }
 0xf8a   : > { %5567 = vmatprep.mubr.bf16.mxu0 %v5410_v52 }
 0xf8c   : > { %6022 = vmatpush1.bf16.msra.mxu0 %v11515_v15 }
 0xf8d   : > { %6023 = vmatprep.subr.bf16.mxu0 %v11520_v24 }
 0xf90   : > { %6024 = vmatpush1.bf16.msra.mxu0 %v11518_v40 }
 0xf91   : > { %5568 = vmatmul.mubr.bf16.gmra.mxu0 %v5409_v58  ;;  %6025 = vmatprep.subr.bf16.mxu0 %v11523_v3 }
 0xf92   : > { %5575 = vmatprep.mubr.bf16.mxu0 %v5412_v62  ;;  %v11538_v62 = vld [vmem:[#allocation42 + $0xd4] ss:$8 sps:$4 sm:$0xff]  }
 0xf94   : > { %6026 = vmatpush1.bf16.msra.mxu0 %v11521_v35 }
 0xf95   : > { %6027 = vmatprep.subr.bf16.mxu0 %v11526_v1 }
 0xf98   : > { %6028 = vmatpush1.bf16.msra.mxu0 %v11524_v23 }
 0xf99   : > { %5576 = vmatmul.mubr.bf16.gmra.mxu0 %v5411_v53  ;;  %6029 = vmatprep.subr.bf16.mxu0 %v11529_v26 }
 0xf9a   : > { %5583 = vmatprep.mubr.bf16.mxu0 %v5414_v46 }
 0xf9c   : > { %6030 = vmatpush1.bf16.msra.mxu0 %v11527_v10 }
 0xf9d   : > { %6031 = vmatprep.subr.bf16.mxu0 %v11532_v54 }
 0xfa0   : > { %6032 = vmatpush2.bf16.msra.mxu0 %v11530_v63 }
 0xfa1   : > { %5584 = vmatmul.mubr.bf16.gmra.mxu0 %v5413_v38  ;;  %6033 = vmatprep.subr.bf16.mxu0 %v11535_v42 }
 0xfa4   : > { %6034 = vmatpush2.bf16.msra.mxu0 %v11533_v13 }
 0xfa5   : > { %6035 = vmatprep.subr.bf16.mxu0 %v11538_v62 }
 0xfa8   : > { %6036 = vmatpush2.bf16.msra.mxu0 %v11536_v21 }
0x1039   : > { %v10198_v45 = vpop.f32.mrf.mxu0 }
0x103b   : > { %v10199_v52 = vpop.f32.mrf.mxu0 }
0x103c   : > { %v10200_v58 = vadd.f32 %v10199_v52, %v10198_v45 }
0x103d   : > { %v10201_v50 = vpop.f32.mrf.mxu0 }
0x103e   : > { %v5592_v57 = vmul.f32 0.125, %v10200_v58 }
0x103f   : > { %v10202_v34 = vpop.f32.mrf.mxu0 }
0x1040   : > { %v10203_v16 = vadd.f32 %v10202_v34, %v10201_v50 }
0x1041   : > { %v10204_v2 = vpop.f32.mrf.mxu0 }
0x1042   : > { %v5593_v20 = vmul.f32 0.125, %v10203_v16 }
0x1043   : > { %v10205_v4 = vpop.f32.mrf.mxu0 }
0x1044   : > { %v10206_v14 = vadd.f32 %v10205_v4, %v10204_v2 }
0x1045   : > { %v10207_v44 = vpop.f32.mrf.mxu0 }
0x1046   : > { %v5594_v53 = vmul.f32 0.125, %v10206_v14 }
0x1047   : > { %v10208_v46 = vpop.f32.mrf.mxu0 }
0x1048   : > { %v5604_v43 = vmax.f32 %v5592_v57, %v5594_v53  ;;  %v10209_v60 = vadd.f32 %v10208_v46, %v10207_v44 }
0x1049   : > { %v10210_v38 = vpop.f32.mrf.mxu0 }
0x104a   : > { %v5610_v5 = vsub.f32 %v5592_v57, %v5604_v43  ;;  %v5612_v8 = vsub.f32 %v5594_v53, %v5604_v43  ;;  %v5595_v12 = vmul.f32 0.125, %v10209_v60 }
0x104b   : > { %v10211_v9 = vpop.f32.mrf.mxu0 }
0x104c   : > { %v5622_v30 = vmul.f32 1.442695, %v5610_v5  ;;  %v5626_v25 = vmul.f32 1.442695, %v5612_v8  ;;  %v5605_v7 = vmax.f32 %v5593_v20, %v5595_v12  ;;  %v10212_v26 = vadd.f32 %v10211_v9, %v10210_v38 }
0x104d   : > { %v10213_v15 = vpop.f32.mrf.mxu0 }
0x104e   : > { %11818 = vpow2.f32 %v5622_v30  ;;  %v5611_v24 = vsub.f32 %v5593_v20, %v5605_v7  ;;  %v5613_v40 = vsub.f32 %v5595_v12, %v5605_v7  ;;  %v5596_v52 = vmul.f32 0.125, %v10212_v26 }
0x104f   : > { %11820 = vpow2.f32 %v5626_v25  ;;  %v10214_v3 = vpop.f32.mrf.mxu0 }
0x1050   : > { %v5624_v35 = vmul.f32 1.442695, %v5611_v24  ;;  %v5628_v1 = vmul.f32 1.442695, %v5613_v40  ;;  %v10215_v50 = vadd.f32 %v10214_v3, %v10213_v15 }
0x1051   : > { %v10216_v23 = vpop.f32.mrf.mxu0 }
0x1052   : > { %11822 = vpow2.f32 %v5624_v35  ;;  %v5597_v58 = vmul.f32 0.125, %v10215_v50 }
0x1053   : > { %11824 = vpow2.f32 %v5628_v1  ;;  %v10217_v45 = vpop.f32.mrf.mxu0 }
0x1054   : > { %v10218_v10 = vadd.f32 %v10217_v45, %v10216_v23 }
0x1055   : > { %v10219_v54 = vpop.f32.mrf.mxu0 }
0x1056   : > { %v5598_v63 = vmul.f32 0.125, %v10218_v10 }
0x1057   : > { %v10220_v42 = vpop.f32.mrf.mxu0 }
0x1058   : > { %v5606_v34 = vmax.f32 %v5596_v52, %v5598_v63  ;;  %v10221_v2 = vadd.f32 %v10220_v42, %v10219_v54 }
0x1059   : > { %v10222_v13 = vpop.f32.mrf.mxu0 }
0x105a   : > { %v5614_v62 = vsub.f32 %v5596_v52, %v5606_v34  ;;  %v5616_v4 = vsub.f32 %v5598_v63, %v5606_v34  ;;  %v5599_v14 = vmul.f32 0.125, %v10221_v2 }
0x105b   : > { %v11819_v44 = vpop.eup %11818  ;;  %v10223_v21 = vpop.f32.mrf.mxu0 }
0x105c   : > { %v11821_v57 = vpop.eup %11820  ;;  %v5630_v16 = vmul.f32 1.442695, %v5614_v62  ;;  %v5634_v53 = vmul.f32 1.442695, %v5616_v4  ;;  %v5607_v46 = vmax.f32 %v5597_v58, %v5599_v14  ;;  %v10224_v15 = vadd.f32 %v10223_v21, %v10222_v13 }
0x105d   : > { %v5646_v43 = vadd.f32 %v11821_v57, %v11819_v44  ;;  %v10225_v60 = vpop.f32.mrf.mxu0 }
0x105e   : > { %11826 = vpow2.f32 %v5630_v16  ;;  %v5615_v38 = vsub.f32 %v5597_v58, %v5607_v46  ;;  %v5617_v20 = vsub.f32 %v5599_v14, %v5607_v46  ;;  %v5600_v35 = vmul.f32 0.125, %v10224_v15 }
0x105f   : > { %v11823_v5 = vpop.eup %11822  ;;  %v10226_v8 = vpop.f32.mrf.mxu0  ;;  %11828 = vpow2.f32 %v5634_v53 }
0x1060   : > { %v11825_v12 = vpop.eup %11824  ;;  %v5632_v9 = vmul.f32 1.442695, %v5615_v38  ;;  %v5636_v30 = vmul.f32 1.442695, %v5617_v20  ;;  %11830 = vrcp.f32 %v5646_v43  ;;  %v10227_v1 = vadd.f32 %v10226_v8, %v10225_v60 }
0x1061   : > { %v5647_v25 = vadd.f32 %v11825_v12, %v11823_v5  ;;  %v10228_v7 = vpop.f32.mrf.mxu0 }
0x1062   : > { %11832 = vpow2.f32 %v5632_v9  ;;  %v5601_v54 = vmul.f32 0.125, %v10227_v1 }
0x1063   : > { %11834 = vrcp.f32 %v5647_v25  ;;  %v10229_v24 = vpop.f32.mrf.mxu0 }
0x1064   : > { %11836 = vpow2.f32 %v5636_v30  ;;  %v10230_v40 = vadd.f32 %v10229_v24, %v10228_v7 }
0x1065   : > { %v10231_v3 = vpop.f32.mrf.mxu0 }
0x1066   : > { %v5602_v23 = vmul.f32 0.125, %v10230_v40 }
0x1067   : > { %v10232_v26 = vpop.f32.mrf.mxu0 }
0x1068   : > { %v5608_v45 = vmax.f32 %v5600_v35, %v5602_v23  ;;  %v10233_v10 = vadd.f32 %v10232_v26, %v10231_v3 }
0x106a   : > { %v5618_v52 = vsub.f32 %v5600_v35, %v5608_v45  ;;  %v5620_v50 = vsub.f32 %v5602_v23, %v5608_v45  ;;  %v5603_v63 = vmul.f32 0.125, %v10233_v10 }
0x106b   : > { %v11827_v42 = vpop.eup %11826 }
0x106c   : > { %v5638_v34 = vmul.f32 1.442695, %v5618_v52  ;;  %v5642_v2 = vmul.f32 1.442695, %v5620_v50  ;;  %v5609_v58 = vmax.f32 %v5601_v54, %v5603_v63  ;;  %v11829_v13 = vpop.eup %11828 }
0x106d   : > { %v11831_v62 = vpop.eup %11830  ;;  %v5654_v4 = vadd.f32 %v11829_v13, %v11827_v42 }
0x106e   : > { %11838 = vpow2.f32 %v5638_v34  ;;  %v5619_v14 = vsub.f32 %v5601_v54, %v5609_v58  ;;  %v5621_v21 = vsub.f32 %v5603_v63, %v5609_v58  ;;  %v5650_v38 = vmul.f32 %v11831_v62, %v11819_v44 }
0x106f   : > { %v11833_v16 = vpop.eup %11832  ;;  %11840 = vpow2.f32 %v5642_v2  ;;  %v5652_v25 = vmul.f32 %v11831_v62, %v11821_v57  ;;  %v11539_v62 = vld [vmem:[#allocation42 + $0xc0] ss:$8 sps:$4 sm:$0xff]  }
0x1070   : > { %v11835_v53 = vpop.eup %11834  ;;  %v5640_v46 = vmul.f32 1.442695, %v5619_v14  ;;  %v5644_v43 = vmul.f32 1.442695, %v5621_v21  ;;  %11842 = vrcp.f32 %v5654_v4  ;;  %v11544_v4 = vld [vmem:[#allocation42 + $0xb4] ss:$8 sps:$4 sm:$0xff]  }
0x1071   : > { %v11837_v60 = vpop.eup %11836  ;;  %v5651_v20 = vmul.f32 %v11835_v53, %v11823_v5  ;;  %v5653_v30 = vmul.f32 %v11835_v53, %v11825_v12  ;;  %v11542_v14 = vld [vmem:[#allocation42 + $0xb0] ss:$8 sps:$4 sm:$0xff]   ;;  %v11547_v21 = vld [vmem:[#allocation42 + $0xa4] ss:$8 sps:$4 sm:$0xff]   ;;  %v11550_v53 = vld [vmem:[#allocation42 + $0x94] ss:$8 sps:$4 sm:$0xff]  }
0x1072   : > { %v5655_v8 = vadd.f32 %v11837_v60, %v11833_v16  ;;  %11844 = vpow2.f32 %v5640_v46  ;;  %v11548_v46 = vld [vmem:[#allocation42 + $0x90] ss:$8 sps:$4 sm:$0xff]  }
0x1073   : > { %11846 = vpow2.f32 %v5644_v43  ;;  %v5670_v9 = vpack.c.bf16 %v5651_v20, %v5650_v38  ;;  %v5671_v15 = vpack.c.bf16 %v5653_v30, %v5652_v25  ;;  %v11553_v43 = vld [vmem:[#allocation42 + $0x84] ss:$8 sps:$4 sm:$0xff]   ;;  %v5350_v38 = vpop.f32.mrf.mxu1 }
0x1074   : > { %11848 = vrcp.f32 %v5655_v8 }
0x1075   : > { %9846 = vmatmul.mubr.msk.bf16.vlgmr.msra.gmra.mxu1 %vm4214_vm9, %v5670_v9  ;;  %v5352_v20 = vpop.f32.mrf.mxu1 }
0x1076   : > { %5751 = vmatprep.mubr.bf16.mxu1 %v15021_v49 }
0x1077   : > { %v5354_v8 = vpop.f32.mrf.mxu1 }
0x1079   : > { %v5356_v9 = vpop.f32.mrf.mxu1 }
0x107b   : > { %v11839_v7 = vpop.eup %11838  ;;  %v5360_v30 = vpop.f32.mrf.mxu1 }
0x107c   : > { %v11841_v24 = vpop.eup %11840 }
0x107d   : > { %v5662_v40 = vadd.f32 %v11841_v24, %v11839_v7  ;;  %9847 = vmatmul.mubr.msk.bf16.gmra.mxu1 %vm4214_vm9, %v5671_v15  ;;  %v11843_v3 = vpop.eup %11842  ;;  %v5362_v25 = vpop.f32.mrf.mxu1 }
0x107e   : > { %5761 = vmatprep.mubr.bf16.mxu1 %v15021_v49  ;;  %v5658_v23 = vmul.f32 %v11843_v3, %v11827_v42  ;;  %v5660_v12 = vmul.f32 %v11843_v3, %v11829_v13  ;;  %v11541_v13 = vld [vmem:[#allocation42 + $0xc4] ss:$8 sps:$4 sm:$0xff]  }
0x107f   : > { %v11845_v44 = vpop.eup %11844  ;;  %11850 = vrcp.f32 %v5662_v40  ;;  %6037 = vmatprep.subr.bf16.mxu0 %v11541_v13 }
0x1080   : > { %v11847_v5 = vpop.eup %11846  ;;  %6038 = vmatpush2.bf16.msra.mxu0 %v11539_v62 }
0x1081   : > { %v11849_v35 = vpop.eup %11848  ;;  %v5663_v1 = vadd.f32 %v11847_v5, %v11845_v44  ;;  %6039 = vmatprep.subr.bf16.mxu0 %v11544_v4 }
0x1082   : > { %v5659_v26 = vmul.f32 %v11849_v35, %v11833_v16  ;;  %v5661_v57 = vmul.f32 %v11849_v35, %v11837_v60  ;;  %v11545_v16 = vld [vmem:[#allocation42 + $0xa0] ss:$8 sps:$4 sm:$0xff]  }
0x1083   : > { %11852 = vrcp.f32 %v5663_v1  ;;  %v11551_v60 = vld [vmem:[#allocation42 + $0x80] ss:$8 sps:$4 sm:$0xff]  }
0x1084   : > { %v5672_v45 = vpack.c.bf16 %v5659_v26, %v5658_v23  ;;  %v5673_v10 = vpack.c.bf16 %v5661_v57, %v5660_v12  ;;  %6040 = vmatpush2.bf16.msra.mxu0 %v11542_v14  ;;  %v15019_v23 = vsub.s32 2, %v14118_v47  ;;  %v15020_v26 = vsub.s32 3, %v14118_v47 }
0x1085   : > { %6041 = vmatprep.subr.bf16.mxu0 %v11547_v21 }
0x1086   : > { %9848 = vmatmul.mubr.msk.bf16.gmra.mxu1 %vm4214_vm9, %v5672_v45  ;;  %v4924_v12 = vrot.slane %v14382_v55, %v15019_v23 }
0x1087   : > { %5771 = vmatprep.mubr.bf16.mxu1 %v15021_v49 }
0x1088   : > { %6042 = vmatpush2.bf16.msra.mxu0 %v11545_v16  ;;  %v5361_v14 = vadd.f32 %v5360_v30, %v4924_v12 }
0x1089   : > { %6043 = vmatprep.subr.bf16.mxu0 %v11550_v53 }
0x108c   : > { %v11851_v54 = vpop.eup %11850  ;;  %6044 = vmatpush2.bf16.msra.mxu0 %v11548_v46 }
0x108d   : > { %v5666_v50 = vmul.f32 %v11851_v54, %v11839_v7  ;;  %v5668_v2 = vmul.f32 %v11851_v54, %v11841_v24  ;;  %6045 = vmatprep.subr.bf16.mxu0 %v11553_v43  ;;  %v5364_v7 = vpop.f32.mrf.mxu1 }
0x108e   : > { %9849 = vmatmul.mubr.msk.bf16.gmra.mxu1 %vm4214_vm9, %v5673_v10  ;;  %v4928_v10 = vrot.slane %v14382_v55, %v15020_v26 }
0x108f   : > { %5781 = vmatprep.mubr.bf16.mxu1 %v15021_v49  ;;  %v5366_v15 = vpop.f32.mrf.mxu1 }
0x1090   : > { %v11853_v52 = vpop.eup %11852  ;;  %6046 = vmatpush2.bf16.msra.mxu0 %v11551_v60 }
0x1091   : > { %v5667_v63 = vmul.f32 %v11853_v52, %v11845_v44  ;;  %v5669_v42 = vmul.f32 %v11853_v52, %v11847_v5  ;;  %10584 = vmatprep.subr.bf16.mxu0 %v13255_v0  ;;  %v5370_v24 = vpop.f32.mrf.mxu1 }
0x1093   : > { %v5674_v34 = vpack.c.bf16 %v5667_v63, %v5666_v50  ;;  %v5675_v58 = vpack.c.bf16 %v5669_v42, %v5668_v2  ;;  %v5372_v40 = vpop.f32.mrf.mxu1  ;;  %v5363_v63 = vadd.f32 %v5362_v25, %v4928_v10  ;;  %v5371_v42 = vadd.f32 %v5370_v24, %v4924_v12 }
0x1094   : > { %v5373_v52 = vadd.f32 %v5372_v40, %v4928_v10 }
0x1095   : > { %v5374_v3 = vpop.f32.mrf.mxu1 }
0x1096   : > { %9850 = vmatmul.mubr.msk.bf16.gmra.mxu1 %vm4214_vm9, %v5674_v34  ;;  %v5375_v50 = vadd.f32 %v5374_v3, %v4924_v12  ;;  %v5365_v34 = vadd.f32 %v5364_v7, %v4924_v12 }
0x1097   : > { %5791 = vmatprep.mubr.bf16.mxu1 %v15021_v49  ;;  %v5376_v44 = vpop.f32.mrf.mxu1 }
0x1098   : > { %v5377_v13 = vadd.f32 %v5376_v44, %v4928_v10 }
0x109e   : > { %9851 = vmatmul.mubr.msk.bf16.gmra.mxu1 %vm4214_vm9, %v5675_v58  ;;  %v5367_v58 = vadd.f32 %v5366_v15, %v4928_v10 }
0x1135   : > { %v5743_v5 = vpop.f32.mrf.mxu1 }
0x1136   : > { %v5802_v23 = vmul.f32 %v5743_v5, %v5361_v14 }
0x1137   : > { %v5745_v35 = vpop.f32.mrf.mxu1 }
0x1138   : > { %v5803_v46 = vmul.f32 %v5745_v35, %v5363_v63  ;;  %v5353_v35 = vadd.f32 %v5352_v20, %v4928_v10 }
0x1139   : > { %v5747_v1 = vpop.f32.mrf.mxu1 }
0x113a   : > { %v5804_v21 = vmul.f32 %v5747_v1, %v5365_v34 }
0x113b   : > { %v5749_v45 = vpop.f32.mrf.mxu1 }
0x113c   : > { %v5805_v43 = vmul.f32 %v5749_v45, %v5367_v58  ;;  %v5357_v45 = vadd.f32 %v5356_v9, %v4928_v10 }
0x113d   : > { %v5753_v57 = vpop.f32.mrf.mxu1 }
0x113e   : > { %v5806_v16 = vmul.f32 %v5753_v57, %v5371_v42  ;;  %v5355_v57 = vadd.f32 %v5354_v8, %v4924_v12 }
0x113f   : > { %v5755_v54 = vpop.f32.mrf.mxu1 }
0x1140   : > { %v5807_v62 = vmul.f32 %v5755_v54, %v5373_v52  ;;  %v5810_v25 = vadd.f32 %v5806_v16, %v5802_v23 }
0x1141   : > { %v5757_v2 = vpop.f32.mrf.mxu1 }
0x1142   : > { %v5808_v4 = vmul.f32 %v5757_v2, %v5375_v50  ;;  %v5811_v26 = vadd.f32 %v5807_v62, %v5803_v46 }
0x1143   : > { %v5759_v53 = vpop.f32.mrf.mxu1 }
0x1144   : > { %v5809_v60 = vmul.f32 %v5759_v53, %v5377_v13  ;;  %v5812_v55 = vadd.f32 %v5808_v4, %v5804_v21  ;;  %v5351_v4 = vadd.f32 %v5350_v38, %v4924_v12 }
0x1146   : > { %v5813_v40 = vadd.f32 %v5809_v60, %v5805_v43  ;;  %v5763_v3 = vpop.f32.mrf.mxu1  ;;  %v5838_v49 = vpack.c.bf16 %v5812_v55, %v5810_v25 }
0x1147   : > { %v5814_v46 = vmul.f32 %v5763_v3, %v5351_v4 }
0x1148   : > { %v5765_v7 = vpop.f32.mrf.mxu1  ;;  %v5839_v24 = vpack.c.bf16 %v5813_v40, %v5811_v26 }
0x1149   : > { %v5815_v23 = vmul.f32 %v5765_v7, %v5353_v35 }
0x114a   : > { %v5767_v15 = vpop.f32.mrf.mxu1  ;;  %6047 = vmatprep.mubr.bf16.mxu0 %v5839_v24 }
0x114b   : > { %6048 = vmatmul.mubr.bf16.vlgmr.msra.gmra.mxu0 %v5838_v49  ;;  %v5816_v62 = vmul.f32 %v5767_v15, %v5355_v57 }
0x114c   : > { %v5769_v44 = vpop.f32.mrf.mxu1 }
0x114d   : > { %v5817_v16 = vmul.f32 %v5769_v44, %v5357_v45 }
0x114e   : > { %v5773_v30 = vpop.f32.mrf.mxu1 }
0x114f   : > { %v5818_v21 = vmul.f32 %v5773_v30, %v5371_v42 }
0x1150   : > { %v5775_v1 = vpop.f32.mrf.mxu1 }
0x1151   : > { %v5819_v2 = vmul.f32 %v5775_v1, %v5373_v52  ;;  %v5822_v40 = vadd.f32 %v5818_v21, %v5814_v46 }
0x1152   : > { %v5777_v54 = vpop.f32.mrf.mxu1 }
0x1153   : > { %v5820_v5 = vmul.f32 %v5777_v54, %v5375_v50  ;;  %v5823_v49 = vadd.f32 %v5819_v2, %v5815_v23  ;;  %v15118_v23 = vmax.f32 %v14187_v41, 0.0  ;;  %v15121_v41 = vmax.f32 %v14258_v32, 0.0 }
0x1154   : > { %v5779_v53 = vpop.f32.mrf.mxu1 }
0x1155   : > { %v5821_v26 = vmul.f32 %v5779_v53, %v5377_v13  ;;  %v5824_v43 = vadd.f32 %v5820_v5, %v5816_v62 }
0x1156   : > { %v5783_v60 = vpop.f32.mrf.mxu1 }
0x1157   : > { %v5825_v55 = vadd.f32 %v5821_v26, %v5817_v16  ;;  %v5840_v24 = vpack.c.bf16 %v5824_v43, %v5822_v40  ;;  %v5826_v30 = vmul.f32 %v5783_v60, %v5351_v4  ;;  %v15120_v40 = vmax.f32 %v14184_v39, 0.0 }
0x1158   : > { %v5785_v25 = vpop.f32.mrf.mxu1  ;;  %v15123_v39 = vmax.f32 %v14244_v27, 0.0 }
0x1159   : > { %v5841_v8 = vpack.c.bf16 %v5825_v55, %v5823_v49  ;;  %v5827_v7 = vmul.f32 %v5785_v25, %v5353_v35  ;;  %v15119_v49 = vmax.f32 %v14214_v31, 0.0 }
0x115a   : > { %v5787_v20 = vpop.f32.mrf.mxu1 }
0x115b   : > { %6057 = vmatprep.mubr.bf16.mxu0 %v5841_v8  ;;  %v5828_v42 = vmul.f32 %v5787_v20, %v5355_v57 }
0x115c   : > { %v5789_v9 = vpop.f32.mrf.mxu1  ;;  %6058 = vmatmul.mubr.bf16.gmra.mxu0 %v5840_v24 }
0x115d   : > { %v5829_v15 = vmul.f32 %v5789_v9, %v5357_v45 }
0x115e   : > { %v5793_v38 = vpop.f32.mrf.mxu1 }
0x115f   : > { %v5830_v13 = vmul.f32 %v5793_v38, %v5361_v14 }
0x1160   : > { %v5795_v12 = vpop.f32.mrf.mxu1 }
0x1161   : > { %v5831_v52 = vmul.f32 %v5795_v12, %v5363_v63  ;;  %v5834_v5 = vadd.f32 %v5830_v13, %v5826_v30  ;;  %v2826_v63 = vld [vmem:[#allocation43] sm:$0x3]  ;;  %v15122_v12 = vmax.f32 %v14227_v11, 0.0  ;;  %v15125_v11 = vmax.f32 %v14292_v59, 0.0 }
0x1162   : > { %v5797_v10 = vpop.f32.mrf.mxu1  ;;  %v5852_v14 = vrot.slane %v2826_v63, %v14121_v48 }
0x1163   : > { %v5832_v50 = vmul.f32 %v5797_v10, %v5365_v34  ;;  %v5835_v54 = vadd.f32 %v5831_v52, %v5827_v7  ;;  %v5848_v34 = vrot.slane %v2826_v63, %v14124_v61 }
0x1164   : > { %v5799_v3 = vpop.f32.mrf.mxu1 }
0x1165   : > { %v5833_v44 = vmul.f32 %v5799_v3, %v5367_v58  ;;  %v5836_v1 = vadd.f32 %v5832_v50, %v5828_v42  ;;  %v15124_v3 = vmax.f32 %v14218_v6, 0.0 }
0x1167   : > { %v5837_v2 = vadd.f32 %v5833_v44, %v5829_v15  ;;  %v5842_v21 = vpack.c.bf16 %v5836_v1, %v5834_v5  ;;  %v15126_v5 = vmax.f32 %v14263_v37, 0.0 }
0x1169   : > { %v5843_v62 = vpack.c.bf16 %v5837_v2, %v5835_v54 }
0x116b   : > { %6067 = vmatprep.mubr.bf16.mxu0 %v5843_v62 }
0x116c   : > { %6068 = vmatmul.mubr.bf16.gmra.mxu0 %v5842_v21 }
0x116d   : > { %10590 = vmatprep.mubr.msk.bf16.mxu0 %vm13256_vm0, %v13255_v0 }
0x120b   : > { %v6049_v57 = vpop.f32.mrf.mxu0 }
0x120c   : > { %v6050_v35 = vadd.f32 %v6049_v57, %v5848_v34  ;;  %v15127_v57 = vmax.f32 %v14276_v56, 0.0 }
0x120d   : > { %v6051_v58 = vpop.f32.mrf.mxu0 }
0x120e   : > { %v6052_v45 = vadd.f32 %v6051_v58, %v5852_v14  ;;  %v6078_v53 = vadd.f32 %v6050_v35, %v4144_v19  ;;  %v15128_v58 = vmax.f32 %v14249_v29, 0.0 }
0x120f   : > { %v6053_v4 = vpop.f32.mrf.mxu0 }
0x1210   : > { %v6079_v16 = vadd.f32 %v6052_v45, %v15118_v23  ;;  %v6054_v26 = vadd.f32 %v6053_v4, %v5848_v34  ;;  %v11554_v45 = vld [vmem:[#allocation45 + $0x78] sm:$0xff]  }
0x1211   : > { %v6055_v46 = vpop.f32.mrf.mxu0  ;;  %10234 = vmatprep.subr.bf16.mxu1 %v11554_v45 }
0x1212   : > { %v6056_v43 = vadd.f32 %v6055_v46, %v5852_v14  ;;  %v6090_v60 = vadd.f32 %v6079_v16, %v6078_v53  ;;  %v6080_v55 = vadd.f32 %v6054_v26, %v15119_v49 }
0x1214   : > { %6091 = vadd.xlane.f32.xlu0 %v6090_v60  ;;  %v6081_v25 = vadd.f32 %v6056_v43, %v15120_v40 }
0x1216   : > { %v6093_v8 = vadd.f32 %v6081_v25, %v6080_v55 }
0x1218   : > { %6094 = vadd.xlane.f32.xlu1 %v6093_v8 }
0x121c   : > { %v6059_v24 = vpop.f32.mrf.mxu0 }
0x121d   : > { %v6060_v20 = vadd.f32 %v6059_v24, %v5848_v34 }
0x121e   : > { %v6061_v33 = vpop.f32.mrf.mxu0 }
0x121f   : > { %v6062_v19 = vadd.f32 %v6061_v33, %v5852_v14  ;;  %v6082_v38 = vadd.f32 %v6060_v20, %v15121_v41  ;;  %v11555_v20 = vld [vmem:[#allocation45 + $0x38] sm:$0xff]  }
0x1220   : > { %v6063_v9 = vpop.f32.mrf.mxu0  ;;  %10235 = vmatpush3.bf16.msra.mxu1 %v11555_v20 }
0x1221   : > { %v6083_v10 = vadd.f32 %v6062_v19, %v15122_v12  ;;  %v6064_v52 = vadd.f32 %v6063_v9, %v5848_v34 }
0x1222   : > { %v6065_v31 = vpop.f32.mrf.mxu0 }
0x1223   : > { %v6066_v50 = vadd.f32 %v6065_v31, %v5852_v14  ;;  %v6096_v42 = vadd.f32 %v6083_v10, %v6082_v38  ;;  %v6084_v13 = vadd.f32 %v6064_v52, %v15123_v39  ;;  %v11557_v52 = vld [vmem:[#allocation45 + $0x30] sm:$0xff]  }
0x1225   : > { %6097 = vadd.xlane.f32.xlu0 %v6096_v42  ;;  %v6085_v7 = vadd.f32 %v6066_v50, %v15124_v3  ;;  %v11559_v3 = vld [vmem:[#allocation45 + $0x28] sm:$0xff]  }
0x1227   : > { %v6099_v15 = vadd.f32 %v6085_v7, %v6084_v13 }
0x1229   : > { %6100 = vadd.xlane.f32.xlu0 %v6099_v15 }
0x122c   : > { %v6069_v44 = vpop.f32.mrf.mxu0 }
0x122d   : > { %v6070_v30 = vadd.f32 %v6069_v44, %v5848_v34  ;;  %v11560_v44 = vld [vmem:[#allocation45 + $0x60] sm:$0xff]  }
0x122e   : > { %v6071_v32 = vpop.f32.mrf.mxu0 }
0x122f   : > { %v6072_v1 = vadd.f32 %v6071_v32, %v5852_v14  ;;  %v14472_v2 = vadd.f32 %v6070_v30, %v15125_v11  ;;  %v11562_v30 = vld [vmem:[#allocation45 + $0x58] sm:$0xff]  }
0x1230   : > { %v6073_v54 = vpop.f32.mrf.mxu0 }
0x1231   : > { %v14476_v62 = vadd.f32 %v6072_v1, %v15126_v5  ;;  %v6074_v27 = vadd.f32 %v6073_v54, %v5848_v34  ;;  %v11563_v1 = vld [vmem:[#allocation45 + $0x18] sm:$0xff]  }
0x1232   : > { %v6075_v21 = vpop.f32.mrf.mxu0 }
0x1233   : > { %v6076_v63 = vadd.f32 %v6075_v21, %v5852_v14  ;;  %v6102_v6 = vadd.f32 %v14476_v62, %v14472_v2  ;;  %v14482_v35 = vadd.f32 %v6074_v27, %v15127_v57  ;;  %v11564_v27 = vld [vmem:[#allocation45 + $0x50] sm:$0xff]  }
0x1234   : > { %v11565_v57 = vld [vmem:[#allocation45 + $0x10] sm:$0xff]  }
0x1235   : > { %6103 = vadd.xlane.f32.xlu1 %v6102_v6  ;;  %v14486_v59 = vadd.f32 %v6076_v63, %v15128_v58 }
0x1237   : > { %v6105_v37 = vadd.f32 %v14486_v59, %v14482_v35 }
0x1239   : > { %6106 = vadd.xlane.f32.xlu0 %v6105_v37  ;;  %v11566_v37 = vld [vmem:[#allocation45 + $0x48] sm:$0xff]  }
0x129d   : > { %v6092_v34 = vpop.xlane.xlu0 %6091 }
0x129e   : > { %v6109_v14 = vmul.f32 0.00390625, %v6092_v34 }
0x12a0   : > { %v14490_v4 = vsub.f32 %v6078_v53, %v6109_v14  ;;  %v14492_v23 = vsub.f32 %v6079_v16, %v6109_v14  ;;  %v11567_v14 = vld [vmem:[#allocation45 + $0x8] sm:$0xff]  }
0x12a1   : > { %v6095_v56 = vpop.xlane.xlu1 %6094 }
0x12a2   : > { %v6110_v26 = vmul.f32 0.00390625, %v6095_v56  ;;  %v6127_v46 = vmul.f32 %v14490_v4, %v14490_v4  ;;  %v6128_v29 = vmul.f32 %v14492_v23, %v14492_v23 }
0x12a4   : > { %v14498_v43 = vsub.f32 %v6080_v55, %v6110_v26  ;;  %v14500_v60 = vsub.f32 %v6081_v25, %v6110_v26  ;;  %v6139_v49 = vadd.f32 %v6128_v29, %v6127_v46  ;;  %v11556_v25 = vld [vmem:[#allocation45 + $0x70] sm:$0xff]   ;;  %v11569_v26 = vld [vmem:[#allocation45] sm:$0xff]  }
0x12a5   : > { %10236 = vmatprep.subr.bf16.mxu1 %v11556_v25 }
0x12a6   : > { %6140 = vadd.xlane.f32.xlu1 %v6139_v49  ;;  %v6129_v53 = vmul.f32 %v14498_v43, %v14498_v43  ;;  %v6130_v16 = vmul.f32 %v14500_v60, %v14500_v60  ;;  %10237 = vmatpush3.bf16.msra.mxu1 %v11557_v52 }
0x12a8   : > { %v6142_v40 = vadd.f32 %v6130_v16, %v6129_v53 }
0x12aa   : > { %6143 = vadd.xlane.f32.xlu0 %v6142_v40  ;;  %v2827_v40 = vld [vmem:[%s15129_s11] sm:$0x3] }
0x12ae   : > { %v6098_v8 = vpop.xlane.xlu0 %6097 }
0x12af   : > { %v6111_v24 = vmul.f32 0.00390625, %v6098_v8 }
0x12b1   : > { %v14506_v33 = vsub.f32 %v6082_v38, %v6111_v24  ;;  %v14508_v19 = vsub.f32 %v6083_v10, %v6111_v24  ;;  %v11558_v10 = vld [vmem:[#allocation45 + $0x68] sm:$0xff]  }
0x12b2   : > { %v6101_v55 = vpop.xlane.xlu0 %6100  ;;  %10238 = vmatprep.subr.bf16.mxu1 %v11558_v10 }
0x12b3   : > { %v6112_v9 = vmul.f32 0.00390625, %v6101_v55  ;;  %v6131_v41 = vmul.f32 %v14506_v33, %v14506_v33  ;;  %v6132_v12 = vmul.f32 %v14508_v19, %v14508_v19  ;;  %10239 = vmatpush3.bf16.msra.mxu1 %v11559_v3  ;;  %v14545_v55 = vrot.slane %v2827_v40, %v14124_v61 }
0x12b4   : > { %10240 = vmatprep.subr.bf16.mxu1 %v11560_v44 }
0x12b5   : > { %v14514_v31 = vsub.f32 %v6084_v13, %v6112_v9  ;;  %v14516_v50 = vsub.f32 %v6085_v7, %v6112_v9  ;;  %v6145_v38 = vadd.f32 %v6132_v12, %v6131_v41  ;;  %v11561_v13 = vld [vmem:[#allocation45 + $0x20] sm:$0xff]   ;;  %v2828_v9 = vld [vmem:[%s15130_s8] sm:$0x3]  ;;  %v6195_v12 = vrot.slane %v2827_v40, %v14121_v48 }
0x12b6   : > { %v6218_v3 = vrot.slane %v2828_v9, %v14121_v48 }
0x12b7   : > { %6146 = vadd.xlane.f32.xlu1 %v6145_v38  ;;  %v6133_v42 = vmul.f32 %v14514_v31, %v14514_v31  ;;  %v6134_v39 = vmul.f32 %v14516_v50, %v14516_v50  ;;  %10241 = vmatpush3.bf16.msra.mxu1 %v11561_v13 }
0x12b8   : > { %10242 = vmatprep.subr.bf16.mxu1 %v11562_v30 }
0x12b9   : > { %v6148_v15 = vadd.f32 %v6134_v39, %v6133_v42  ;;  %v6214_v39 = vrot.slane %v2828_v9, %v14124_v61 }
0x12bb   : > { %6149 = vadd.xlane.f32.xlu0 %v6148_v15  ;;  %10243 = vmatpush3.bf16.msra.mxu1 %v11563_v1 }
0x12bc   : > { %10244 = vmatprep.subr.bf16.mxu1 %v11564_v27 }
0x12be   : > { %v6104_v7 = vpop.xlane.xlu1 %6103 }
0x12bf   : > { %v6113_v32 = vmul.f32 0.00390625, %v6104_v7  ;;  %10245 = vmatpush3.bf16.msra.mxu1 %v11565_v57 }
0x12c0   : > { %10246 = vmatprep.subr.bf16.mxu1 %v11566_v37 }
0x12c1   : > { %v14523_v54 = vsub.f32 %v14472_v2, %v6113_v32  ;;  %v14526_v11 = vsub.f32 %v14476_v62, %v6113_v32 }
0x12c2   : > { %v6107_v5 = vpop.xlane.xlu0 %6106 }
0x12c3   : > { %v6114_v21 = vmul.f32 0.00390625, %v6107_v5  ;;  %v6135_v63 = vmul.f32 %v14523_v54, %v14523_v54  ;;  %v6136_v6 = vmul.f32 %v14526_v11, %v14526_v11  ;;  %10247 = vmatpush3.bf16.msra.mxu1 %v11567_v14 }
0x12c5   : > { %v14533_v58 = vsub.f32 %v14482_v35, %v6114_v21  ;;  %v14536_v2 = vsub.f32 %v14486_v59, %v6114_v21  ;;  %v6151_v62 = vadd.f32 %v6136_v6, %v6135_v63  ;;  %v11568_v35 = vld [vmem:[#allocation45 + $0x40] sm:$0xff]  }
0x12c6   : > { %10248 = vmatprep.subr.bf16.mxu1 %v11568_v35 }
0x12c7   : > { %6152 = vadd.xlane.f32.xlu1 %v6151_v62  ;;  %v6137_v45 = vmul.f32 %v14533_v58, %v14533_v58  ;;  %v6138_v34 = vmul.f32 %v14536_v2, %v14536_v2  ;;  %10249 = vmatpush3.bf16.msra.mxu1 %v11569_v26 }
0x12c8   : > { %10602 = vmatprep.subr.bf16.mxu1 %v13255_v0 }
0x12c9   : > { %v6154_v56 = vadd.f32 %v6138_v34, %v6137_v45 }
0x12cb   : > { %6155 = vadd.xlane.f32.xlu0 %v6154_v56 }
0x132f   : > { %v6141_v59 = vpop.xlane.xlu1 %6140 }
0x1330   : > { %v6157_v46 = vmul.f32 0.00390625, %v6141_v59 }
0x1332   : > { %v6163_v29 = vadd.f32 1e-05, %v6157_v46 }
0x1333   : > { %v6144_v49 = vpop.xlane.xlu0 %6143 }
0x1334   : > { %11854 = vrsqrt.f32 %v6163_v29  ;;  %v6158_v53 = vmul.f32 0.00390625, %v6144_v49 }
0x1336   : > { %v6164_v16 = vadd.f32 1e-05, %v6158_v53 }
0x1338   : > { %11856 = vrsqrt.f32 %v6164_v16 }
0x1340   : > { %v6147_v8 = vpop.xlane.xlu1 %6146 }
0x1341   : > { %v11855_v24 = vpop.eup %11854  ;;  %v6159_v20 = vmul.f32 0.00390625, %v6147_v8 }
0x1342   : > { %v6175_v25 = vmul.f32 %v11855_v24, %v14490_v4  ;;  %v6176_v41 = vmul.f32 %v11855_v24, %v14492_v23 }
0x1343   : > { %v6165_v52 = vadd.f32 1e-05, %v6159_v20 }
0x1344   : > { %v6150_v38 = vpop.xlane.xlu0 %6149  ;;  %v6198_v15 = vmul.f32 %v14545_v55, %v6175_v25  ;;  %v6199_v13 = vmul.f32 %v6195_v12, %v6176_v41 }
0x1345   : > { %v11857_v10 = vpop.eup %11856  ;;  %11858 = vrsqrt.f32 %v6165_v52  ;;  %v6160_v42 = vmul.f32 0.00390625, %v6150_v38 }
0x1346   : > { %v6177_v44 = vmul.f32 %v11857_v10, %v14498_v43  ;;  %v6178_v4 = vmul.f32 %v11857_v10, %v14500_v60  ;;  %v6222_v32 = vadd.f32 %v6218_v3, %v6199_v13  ;;  %v6221_v5 = vadd.f32 %v6214_v39, %v6198_v15 }
0x1347   : > { %v6166_v7 = vadd.f32 1e-05, %v6160_v42 }
0x1348   : > { %v6200_v23 = vmul.f32 %v14545_v55, %v6177_v44  ;;  %v6201_v30 = vmul.f32 %v6195_v12, %v6178_v4 }
0x1349   : > { %11860 = vrsqrt.f32 %v6166_v7 }
0x134a   : > { %v6224_v1 = vadd.f32 %v6218_v3, %v6201_v30  ;;  %v6223_v27 = vadd.f32 %v6214_v39, %v6200_v23 }
0x134c   : > { %v14557_v21 = vpack.c.bf16 %v6224_v1, %v6222_v32  ;;  %v14559_v63 = vpack.c.bf16 %v6223_v27, %v6221_v5 }
0x134e   : > { %6367 = vmatprep.mubr.bf16.mxu1 %v14557_v21 }
0x134f   : > { %6368 = vmatmul.mubr.bf16.vlgmr.msra.gmra.mxu1 %v14559_v63 }
0x1350   : > { %v6153_v43 = vpop.xlane.xlu1 %6152 }
0x1351   : > { %v6161_v60 = vmul.f32 0.00390625, %v6153_v43 }
0x1352   : > { %v11859_v6 = vpop.eup %11858 }
0x1353   : > { %v6167_v57 = vadd.f32 1e-05, %v6161_v60  ;;  %v6180_v62 = vmul.f32 %v11859_v6, %v14508_v19  ;;  %v6179_v37 = vmul.f32 %v11859_v6, %v14506_v33 }
0x1354   : > { %v6156_v45 = vpop.xlane.xlu0 %6155 }
0x1355   : > { %11862 = vrsqrt.f32 %v6167_v57  ;;  %v6162_v34 = vmul.f32 0.00390625, %v6156_v45  ;;  %v6203_v56 = vmul.f32 %v6195_v12, %v6180_v62  ;;  %v6202_v46 = vmul.f32 %v14545_v55, %v6179_v37 }
0x1356   : > { %v11861_v14 = vpop.eup %11860 }
0x1357   : > { %v6168_v35 = vadd.f32 1e-05, %v6162_v34  ;;  %v6182_v26 = vmul.f32 %v11861_v14, %v14516_v50  ;;  %v6181_v59 = vmul.f32 %v11861_v14, %v14514_v31  ;;  %v6226_v53 = vadd.f32 %v6218_v3, %v6203_v56 }
0x1358   : > { %v6225_v16 = vadd.f32 %v6214_v39, %v6202_v46  ;;  %v14603_v46 = vld [vmem:[#allocation2 + $0x8] sm:$0xff]  }
0x1359   : > { %11864 = vrsqrt.f32 %v6168_v35  ;;  %v6205_v29 = vmul.f32 %v6195_v12, %v6182_v26  ;;  %v6204_v49 = vmul.f32 %v14545_v55, %v6181_v59  ;;  %v14597_v59 = vld [vmem:[#allocation2] sm:$0xff]  }
0x135b   : > { %v6228_v19 = vadd.f32 %v6218_v3, %v6205_v29  ;;  %v6227_v33 = vadd.f32 %v6214_v39, %v6204_v49  ;;  %v14609_v29 = vld [vmem:[#allocation2 + $0x10] sm:$0xff]   ;;  %v11575_v49 = vld [vmem:[#allocation48 + $0x10] sm:$0xff]  }
0x135d   : > { %v14569_v40 = vpack.c.bf16 %v6228_v19, %v6226_v53  ;;  %v14571_v8 = vpack.c.bf16 %v6227_v33, %v6225_v16  ;;  %v11576_v53 = vld [vmem:[#allocation48 + $0x8] sm:$0xff]   ;;  %v11577_v19 = vld [vmem:[#allocation48] sm:$0xff]   ;;  %v9900_v16 = vld [vmem:[#allocation46] ss:$0 sm:$0xff] }
0x135f   : > { %6375 = vmatprep.mubr.bf16.mxu1 %v14569_v40 }
0x1360   : > { %6376 = vmatmul.mubr.bf16.gmra.mxu1 %v14571_v8 }
0x1362   : > { %v11863_v50 = vpop.eup %11862 }
0x1363   : > { %v6184_v31 = vmul.f32 %v11863_v50, %v14526_v11  ;;  %v6183_v24 = vmul.f32 %v11863_v50, %v14523_v54  ;;  %v11570_v54 = vld [vmem:[#allocation48 + $0x38] sm:$0xff]  }
0x1364   : > { %10603 = vmatpush3.bf16.msra.mxu1 %v11570_v54 }
0x1365   : > { %v6207_v9 = vmul.f32 %v6195_v12, %v6184_v31  ;;  %v6206_v52 = vmul.f32 %v14545_v55, %v6183_v24  ;;  %10604 = vmatprep.subr.bf16.mxu1 %v13255_v0 }
0x1366   : > { %v11865_v20 = vpop.eup %11864 }
0x1367   : > { %v6186_v25 = vmul.f32 %v11865_v20, %v14536_v2  ;;  %v6185_v41 = vmul.f32 %v11865_v20, %v14533_v58  ;;  %v6230_v42 = vadd.f32 %v6218_v3, %v6207_v9  ;;  %v6229_v44 = vadd.f32 %v6214_v39, %v6206_v52  ;;  %v11571_v58 = vld [vmem:[#allocation48 + $0x30] sm:$0xff]   ;;  %v11572_v2 = vld [vmem:[#allocation48 + $0x28] sm:$0xff]  }
0x1368   : > { %10605 = vmatpush3.bf16.msra.mxu1 %v11571_v58 }
0x1369   : > { %v6209_v38 = vmul.f32 %v6195_v12, %v6186_v25  ;;  %v6208_v10 = vmul.f32 %v14545_v55, %v6185_v41  ;;  %10606 = vmatprep.subr.bf16.mxu1 %v13255_v0  ;;  %v11573_v55 = vld [vmem:[#allocation48 + $0x20] sm:$0xff]   ;;  %v11574_v12 = vld [vmem:[#allocation48 + $0x18] sm:$0xff]  }
0x136b   : > { %v6232_v15 = vadd.f32 %v6218_v3, %v6209_v38  ;;  %v6231_v4 = vadd.f32 %v6214_v39, %v6208_v10 }
0x136c   : > { %10607 = vmatpush3.bf16.msra.mxu1 %v11572_v2 }
0x136d   : > { %v14581_v13 = vpack.c.bf16 %v6232_v15, %v6230_v42  ;;  %v14583_v11 = vpack.c.bf16 %v6231_v4, %v6229_v44  ;;  %10608 = vmatprep.subr.bf16.mxu1 %v13255_v0 }
0x136f   : > { %6383 = vmatprep.mubr.bf16.mxu1 %v14581_v13 }
0x1370   : > { %6384 = vmatmul.mubr.bf16.gmra.mxu1 %v14583_v11 }
0x1371   : > { %10618 = vmatprep.mubr.msk.bf16.mxu1 %vm13256_vm0, %v13255_v0  ;;  %10609 = vmatpush3.bf16.msra.mxu1 %v11573_v55 }
0x1372   : > { %10610 = vmatprep.subr.bf16.mxu1 %v13255_v0 }
0x1375   : > { %10611 = vmatpush3.bf16.msra.mxu1 %v11574_v12 }
0x1376   : > { %10612 = vmatprep.subr.bf16.mxu1 %v13255_v0 }
0x1379   : > { %10613 = vmatpush3.bf16.msra.mxu1 %v11575_v49 }
0x137a   : > { %10614 = vmatprep.subr.bf16.mxu1 %v13255_v0 }
0x137d   : > { %10615 = vmatpush3.bf16.msra.mxu1 %v11576_v53 }
0x137e   : > { %10616 = vmatprep.subr.bf16.mxu1 %v13255_v0 }
0x1381   : > { %10617 = vmatpush3.bf16.msra.mxu1 %v11577_v19 }
0x1382   : > { %10648 = vmatprep.subr.bf16.mxu1 %v13255_v0 }
0x140f   : > { %v10250_v39 = vpop.f32.mrf.mxu1 }
0x1411   : > { %v10251_v3 = vpop.f32.mrf.mxu1 }
0x1412   : > { %v10252_v35 = vadd.f32 %v10251_v3, %v10250_v39 }
0x1413   : > { %v10253_v7 = vpop.f32.mrf.mxu1 }
0x1415   : > { %v10254_v23 = vpop.f32.mrf.mxu1 }
0x1416   : > { %v10255_v14 = vadd.f32 %v10254_v23, %v10253_v7 }
0x1418   : > { %v6392_v26 = vpack.c.bf16 %v10255_v14, %v10252_v35 }
0x1420   : > { %v10256_v30 = vpop.f32.mrf.mxu1 }
0x1422   : > { %v10257_v32 = vpop.f32.mrf.mxu1 }
0x1423   : > { %v10258_v34 = vadd.f32 %v10257_v32, %v10256_v30 }
0x1424   : > { %v10259_v1 = vpop.f32.mrf.mxu1 }
0x1426   : > { %v10260_v5 = vpop.f32.mrf.mxu1 }
0x1427   : > { %v10261_v37 = vadd.f32 %v10260_v5, %v10259_v1  ;;  %v11578_v5 = vld [vmem:[#allocation51 + $0x38] sm:$0xff]  }
0x1429   : > { %v6393_v56 = vpack.c.bf16 %v10261_v37, %v10258_v34 }
0x1430   : > { %v10262_v27 = vpop.f32.mrf.mxu1 }
0x1432   : > { %v10263_v43 = vpop.f32.mrf.mxu1 }
0x1433   : > { %v10264_v57 = vadd.f32 %v10263_v43, %v10262_v27  ;;  %v11579_v27 = vld [vmem:[#allocation51 + $0x30] sm:$0xff]   ;;  %v11580_v43 = vld [vmem:[#allocation51 + $0x28] sm:$0xff]  }
0x1434   : > { %v10265_v60 = vpop.f32.mrf.mxu1 }
0x1436   : > { %v10266_v6 = vpop.f32.mrf.mxu1 }
0x1437   : > { %v10267_v62 = vadd.f32 %v10266_v6, %v10265_v60  ;;  %v11581_v60 = vld [vmem:[#allocation51 + $0x20] sm:$0xff]   ;;  %v11582_v6 = vld [vmem:[#allocation51 + $0x18] sm:$0xff]  }
0x1439   : > { %v6394_v45 = vpack.c.bf16 %v10267_v62, %v10264_v57 }
0x143b   : > { %10585 = vmatpush3.bf16.msra.mxu0 %v6394_v45 }
0x143c   : > { %10586 = vmatprep.subr.bf16.mxu0 %v13255_v0 }
0x143f   : > { %10587 = vmatpush3.bf16.msra.mxu0 %v6393_v56 }
0x1440   : > { %10588 = vmatprep.subr.bf16.mxu0 %v13255_v0 }
0x1443   : > { %10589 = vmatpush3.bf16.msra.mxu0 %v6392_v26 }
0x1444   : > { %10630 = vmatprep.subr.bf16.mxu0 %v13255_v0 }
0x1446   : > { %10591 = vmatmul.mubr.msk.bf16.vlgmr.msra.gmra.mxu0 %vm3134_vm1, %v14597_v59 }
0x1447   : > { %10594 = vmatprep.mubr.msk.bf16.mxu0 %vm13256_vm0, %v13255_v0 }
0x144e   : > { %10595 = vmatmul.mubr.msk.bf16.gmra.mxu0 %vm3134_vm1, %v14603_v46 }
0x144f   : > { %10598 = vmatprep.mubr.msk.bf16.mxu0 %vm13256_vm0, %v13255_v0 }
0x1456   : > { %10599 = vmatmul.mubr.msk.bf16.gmra.mxu0 %vm3134_vm1, %v14609_v29 }
0x1457   : > { %10636 = vmatprep.mubr.msk.bf16.mxu0 %vm13256_vm0, %v13255_v0 }
0x1506   : > { %v6435_v33 = vpop.f32.mrf.mxu0 }
0x1507   : > { %v6436_v31 = vadd.f32 %v9900_v16, %v6435_v33 }
0x1508   : > { %v10592_v50 = vpop.f32.mrf.mxu0 }
0x1509   : > { %v6458_v9 = vmax.f32 %v6436_v31, 0.0  ;;  %v11583_v31 = vld [vmem:[#allocation51 + $0x10] sm:$0xff]  }
0x150a   : > { %v6438_v24 = vpop.f32.mrf.mxu0 }
0x150b   : > { %v6439_v20 = vadd.f32 %v9900_v16, %v6438_v24  ;;  %v11584_v24 = vld [vmem:[#allocation51 + $0x8] sm:$0xff]  }
0x150c   : > { %v10593_v25 = vpop.f32.mrf.mxu0 }
0x150d   : > { %v6459_v41 = vmax.f32 %v6439_v20, 0.0  ;;  %v11585_v20 = vld [vmem:[#allocation51] sm:$0xff]   ;;  %v9912_v25 = vld [vmem:[#allocation49] ss:$0 sm:$0xff] }
0x150e   : > { %v6443_v52 = vpop.f32.mrf.mxu0 }
0x150f   : > { %v6464_v38 = vpack.c.bf16 %v6459_v41, %v6458_v9  ;;  %v6444_v42 = vadd.f32 %v9900_v16, %v6443_v52 }
0x1510   : > { %v10596_v10 = vpop.f32.mrf.mxu0 }
0x1511   : > { %10619 = vmatmul.mubr.bf16.vlgmr.msra.gmra.mxu1 %v6464_v38  ;;  %v6460_v54 = vmax.f32 %v6444_v42, 0.0 }
0x1512   : > { %v6446_v15 = vpop.f32.mrf.mxu0  ;;  %10622 = vmatprep.mubr.msk.bf16.mxu1 %vm13256_vm0, %v13255_v0  ;;  %10649 = vmatpush3.bf16.msra.mxu1 %v11578_v5 }
0x1513   : > { %v6447_v44 = vadd.f32 %v9900_v16, %v6446_v15  ;;  %10650 = vmatprep.subr.bf16.mxu1 %v13255_v0 }
0x1514   : > { %v10597_v4 = vpop.f32.mrf.mxu0 }
0x1515   : > { %v6461_v58 = vmax.f32 %v6447_v44, 0.0 }
0x1516   : > { %v6451_v2 = vpop.f32.mrf.mxu0  ;;  %10651 = vmatpush3.bf16.msra.mxu1 %v11579_v27 }
0x1517   : > { %v6465_v55 = vpack.c.bf16 %v6461_v58, %v6460_v54  ;;  %v6452_v39 = vadd.f32 %v9900_v16, %v6451_v2  ;;  %10652 = vmatprep.subr.bf16.mxu1 %v13255_v0 }
0x1518   : > { %v10600_v12 = vpop.f32.mrf.mxu0 }
0x1519   : > { %10623 = vmatmul.mubr.bf16.gmra.mxu1 %v6465_v55  ;;  %v6462_v30 = vmax.f32 %v6452_v39, 0.0 }
0x151a   : > { %v6454_v3 = vpop.f32.mrf.mxu0  ;;  %10626 = vmatprep.mubr.msk.bf16.mxu1 %vm13256_vm0, %v13255_v0  ;;  %10653 = vmatpush3.bf16.msra.mxu1 %v11580_v43 }
0x151b   : > { %v6455_v7 = vadd.f32 %v9900_v16, %v6454_v3  ;;  %10654 = vmatprep.subr.bf16.mxu1 %v13255_v0 }
0x151c   : > { %v10601_v23 = vpop.f32.mrf.mxu0 }
0x151d   : > { %v6463_v32 = vmax.f32 %v6455_v7, 0.0 }
0x151e   : > { %10655 = vmatpush3.bf16.msra.mxu1 %v11581_v60 }
0x151f   : > { %v6466_v1 = vpack.c.bf16 %v6463_v32, %v6462_v30  ;;  %10656 = vmatprep.subr.bf16.mxu1 %v13255_v0 }
0x1521   : > { %10627 = vmatmul.mubr.bf16.gmra.mxu1 %v6466_v1 }
0x1522   : > { %10664 = vmatprep.mubr.msk.bf16.mxu1 %vm13256_vm0, %v13255_v0  ;;  %10657 = vmatpush3.bf16.msra.mxu1 %v11582_v6 }
0x1523   : > { %10658 = vmatprep.subr.bf16.mxu1 %v13255_v0 }
0x1526   : > { %10659 = vmatpush3.bf16.msra.mxu1 %v11583_v31 }
0x1527   : > { %10660 = vmatprep.subr.bf16.mxu1 %v13255_v0 }
0x152a   : > { %10661 = vmatpush3.bf16.msra.mxu1 %v11584_v24  ;;  %v11586_v24 = vld [vmem:[#allocation54 + $0x8] sm:$0xff]  }
0x152b   : > { %10662 = vmatprep.subr.bf16.mxu1 %v13255_v0 }
0x152e   : > { %10663 = vmatpush3.bf16.msra.mxu1 %v11585_v20  ;;  %v11587_v20 = vld [vmem:[#allocation54] sm:$0xff]  }
0x152f   : > { %10710 = vmatprep.subr.bf16.mxu1 %v13255_v0 }
0x15d1   : > { %v6549_v57 = vpop.f32.mrf.mxu1 }
0x15d3   : > { %v10620_v62 = vpop.f32.mrf.mxu1 }
0x15d5   : > { %v6552_v37 = vpop.f32.mrf.mxu1 }
0x15d6   : > { %v6572_v50 = vpack.c.bf16 %v6552_v37, %v6549_v57 }
0x15d7   : > { %v10621_v45 = vpop.f32.mrf.mxu1 }
0x15d9   : > { %v6557_v34 = vpop.f32.mrf.mxu1 }
0x15db   : > { %v10624_v14 = vpop.f32.mrf.mxu1 }
0x15dd   : > { %v6560_v56 = vpop.f32.mrf.mxu1 }
0x15de   : > { %v6573_v33 = vpack.c.bf16 %v6560_v56, %v6557_v34 }
0x15df   : > { %v10625_v35 = vpop.f32.mrf.mxu1 }
0x15e1   : > { %v6565_v26 = vpop.f32.mrf.mxu1 }
0x15e3   : > { %v10628_v49 = vpop.f32.mrf.mxu1 }
0x15e5   : > { %v6568_v53 = vpop.f32.mrf.mxu1 }
0x15e6   : > { %v6574_v19 = vpack.c.bf16 %v6568_v53, %v6565_v26 }
0x15e7   : > { %v10629_v16 = vpop.f32.mrf.mxu1 }
0x15e8   : > { %10631 = vmatpush3.bf16.msra.mxu0 %v6574_v19 }
0x15e9   : > { %10632 = vmatprep.subr.bf16.mxu0 %v13255_v0 }
0x15ec   : > { %10633 = vmatpush3.bf16.msra.mxu0 %v6573_v33 }
0x15ed   : > { %10634 = vmatprep.subr.bf16.mxu0 %v13255_v0 }
0x15f0   : > { %10635 = vmatpush3.bf16.msra.mxu0 %v6572_v50 }
0x15f1   : > { %10676 = vmatprep.subr.bf16.mxu0 %v13255_v0 }
0x15f3   : > { %10637 = vmatmul.mubr.msk.bf16.vlgmr.msra.gmra.mxu0 %vm3134_vm1, %v14597_v59 }
0x15f4   : > { %10640 = vmatprep.mubr.msk.bf16.mxu0 %vm13256_vm0, %v13255_v0 }
0x15fb   : > { %10641 = vmatmul.mubr.msk.bf16.gmra.mxu0 %vm3134_vm1, %v14603_v46 }
0x15fc   : > { %10644 = vmatprep.mubr.msk.bf16.mxu0 %vm13256_vm0, %v13255_v0 }
0x1603   : > { %10645 = vmatmul.mubr.msk.bf16.gmra.mxu0 %vm3134_vm1, %v14609_v29 }
0x1604   : > { %10682 = vmatprep.mubr.msk.bf16.mxu0 %vm13256_vm0, %v13255_v0 }
0x16b3   : > { %v6615_v9 = vpop.f32.mrf.mxu0 }
0x16b4   : > { %v6616_v52 = vadd.f32 %v9912_v25, %v6615_v9 }
0x16b5   : > { %v10638_v41 = vpop.f32.mrf.mxu0 }
0x16b6   : > { %v6638_v15 = vmax.f32 %v6616_v52, 0.0 }
0x16b7   : > { %v6618_v38 = vpop.f32.mrf.mxu0 }
0x16b8   : > { %v6619_v10 = vadd.f32 %v9912_v25, %v6618_v38 }
0x16b9   : > { %v10639_v42 = vpop.f32.mrf.mxu0 }
0x16ba   : > { %v6639_v44 = vmax.f32 %v6619_v10, 0.0 }
0x16bb   : > { %v6623_v4 = vpop.f32.mrf.mxu0 }
0x16bc   : > { %v6644_v54 = vpack.c.bf16 %v6639_v44, %v6638_v15  ;;  %v6624_v2 = vadd.f32 %v9912_v25, %v6623_v4 }
0x16bd   : > { %v10642_v58 = vpop.f32.mrf.mxu0 }
0x16be   : > { %10665 = vmatmul.mubr.bf16.vlgmr.msra.gmra.mxu1 %v6644_v54  ;;  %v6640_v3 = vmax.f32 %v6624_v2, 0.0 }
0x16bf   : > { %v6626_v55 = vpop.f32.mrf.mxu0  ;;  %10668 = vmatprep.mubr.msk.bf16.mxu1 %vm13256_vm0, %v13255_v0 }
0x16c0   : > { %v6627_v12 = vadd.f32 %v9912_v25, %v6626_v55 }
0x16c1   : > { %v10643_v39 = vpop.f32.mrf.mxu0 }
0x16c2   : > { %v6641_v7 = vmax.f32 %v6627_v12, 0.0 }
0x16c3   : > { %v6631_v23 = vpop.f32.mrf.mxu0 }
0x16c4   : > { %v6645_v30 = vpack.c.bf16 %v6641_v7, %v6640_v3  ;;  %v6632_v1 = vadd.f32 %v9912_v25, %v6631_v23 }
0x16c5   : > { %v10646_v32 = vpop.f32.mrf.mxu0 }
0x16c6   : > { %10669 = vmatmul.mubr.bf16.gmra.mxu1 %v6645_v30  ;;  %v6642_v60 = vmax.f32 %v6632_v1, 0.0 }
0x16c7   : > { %v6634_v5 = vpop.f32.mrf.mxu0  ;;  %10672 = vmatprep.mubr.msk.bf16.mxu1 %vm13256_vm0, %v13255_v0 }
0x16c8   : > { %v6635_v27 = vadd.f32 %v9912_v25, %v6634_v5  ;;  %v9924_v25 = vld [vmem:[#allocation52] ss:$0 sm:$0xff] }
0x16c9   : > { %v10647_v43 = vpop.f32.mrf.mxu0 }
0x16ca   : > { %v6643_v6 = vmax.f32 %v6635_v27, 0.0 }
0x16cc   : > { %v6646_v57 = vpack.c.bf16 %v6643_v6, %v6642_v60 }
0x16ce   : > { %10673 = vmatmul.mubr.bf16.gmra.mxu1 %v6646_v57 }
0x16cf   : > { %10716 = vmatprep.mubr.msk.bf16.mxu1 %vm13256_vm0, %v13255_v0 }
0x177e   : > { %v6729_v62 = vpop.f32.mrf.mxu1 }
0x1780   : > { %v10666_v37 = vpop.f32.mrf.mxu1 }
0x1782   : > { %v6732_v45 = vpop.f32.mrf.mxu1 }
0x1783   : > { %v6752_v31 = vpack.c.bf16 %v6732_v45, %v6729_v62 }
0x1784   : > { %v10667_v34 = vpop.f32.mrf.mxu1 }
0x1786   : > { %v6737_v14 = vpop.f32.mrf.mxu1 }
0x1788   : > { %v10670_v56 = vpop.f32.mrf.mxu1 }
0x178a   : > { %v6740_v35 = vpop.f32.mrf.mxu1 }
0x178b   : > { %v6753_v50 = vpack.c.bf16 %v6740_v35, %v6737_v14 }
0x178c   : > { %v10671_v26 = vpop.f32.mrf.mxu1 }
0x178e   : > { %v6745_v49 = vpop.f32.mrf.mxu1 }
0x1790   : > { %v10674_v53 = vpop.f32.mrf.mxu1 }
0x1792   : > { %v6748_v19 = vpop.f32.mrf.mxu1 }
0x1793   : > { %v6754_v16 = vpack.c.bf16 %v6748_v19, %v6745_v49 }
0x1794   : > { %v10675_v33 = vpop.f32.mrf.mxu1 }
0x1795   : > { %10677 = vmatpush3.bf16.msra.mxu0 %v6754_v16 }
0x1796   : > { %10678 = vmatprep.subr.bf16.mxu0 %v13255_v0 }
0x1799   : > { %10679 = vmatpush3.bf16.msra.mxu0 %v6753_v50 }
0x179a   : > { %10680 = vmatprep.subr.bf16.mxu0 %v13255_v0 }
0x179d   : > { %10681 = vmatpush3.bf16.msra.mxu0 %v6752_v31  ;;  %v11590_v31 = vld [vmem:[%s15131_s5 + $0x74] ss:$8 sps:$4 sm:$0xff]  }
0x179e   : > { %10694 = vmatprep.subr.bf16.mxu0 %v13255_v0 }
0x17a0   : > { %10683 = vmatmul.mubr.msk.bf16.vlgmr.msra.gmra.mxu0 %vm3134_vm1, %v14597_v59 }
0x17a1   : > { %10686 = vmatprep.mubr.msk.bf16.mxu0 %vm13256_vm0, %v13255_v0  ;;  %10695 = vmatpush3.bf16.msra.mxu0 %v11586_v24 }
0x17a2   : > { %10696 = vmatprep.subr.bf16.mxu0 %v13255_v0 }
0x17a5   : > { %10697 = vmatpush3.bf16.msra.mxu0 %v11587_v20  ;;  %v11588_v20 = vld [vmem:[%s15131_s5 + $0x70] ss:$8 sps:$4 sm:$0xff]  }
0x17a6   : > { %10728 = vmatprep.subr.bf16.mxu0 %v13255_v0 }
0x17a8   : > { %10687 = vmatmul.mubr.msk.bf16.gmra.mxu0 %vm3134_vm1, %v14603_v46 }
0x17a9   : > { %10690 = vmatprep.mubr.msk.bf16.mxu0 %vm13256_vm0, %v13255_v0 }
0x17b0   : > { %10691 = vmatmul.mubr.msk.bf16.gmra.mxu0 %vm3134_vm1, %v14609_v29 }
0x17b1   : > { %10698 = vmatprep.mubr.msk.bf16.mxu0 %vm13256_vm0, %v13255_v0 }
0x1860   : > { %v6795_v9 = vpop.f32.mrf.mxu0 }
0x1861   : > { %v6796_v52 = vadd.f32 %v9924_v25, %v6795_v9  ;;  %v11591_v9 = vld [vmem:[%s15131_s5 + $0x60] ss:$8 sps:$4 sm:$0xff]  }
0x1862   : > { %v10684_v41 = vpop.f32.mrf.mxu0 }
0x1863   : > { %v6818_v15 = vmax.f32 %v6796_v52, 0.0  ;;  %v11596_v41 = vld [vmem:[%s15131_s5 + $0x54] ss:$8 sps:$4 sm:$0xff]  }
0x1864   : > { %v6798_v38 = vpop.f32.mrf.mxu0  ;;  %v2695_v52 = vld [vmem:[#allocation36] sm:$0x3] }
0x1865   : > { %v6799_v10 = vadd.f32 %v9924_v25, %v6798_v38  ;;  %v4542_v38 = vrot.slane %v2695_v52, %v14121_v48 }
0x1866   : > { %v10685_v42 = vpop.f32.mrf.mxu0 }
0x1867   : > { %v6819_v44 = vmax.f32 %v6799_v10, 0.0  ;;  %v11594_v10 = vld [vmem:[%s15131_s5 + $0x50] ss:$8 sps:$4 sm:$0xff]   ;;  %v11599_v42 = vld [vmem:[%s15131_s5 + $0x44] ss:$8 sps:$4 sm:$0xff]  }
0x1868   : > { %v6803_v4 = vpop.f32.mrf.mxu0 }
0x1869   : > { %v6824_v54 = vpack.c.bf16 %v6819_v44, %v6818_v15  ;;  %v6804_v2 = vadd.f32 %v9924_v25, %v6803_v4  ;;  %v14699_v15 = vadd.f32 %v14376_v18, %v4542_v38  ;;  %v11597_v44 = vld [vmem:[%s15131_s5 + $0x40] ss:$8 sps:$4 sm:$0xff]   ;;  %v11602_v4 = vld [vmem:[%s15131_s5 + $0x34] ss:$8 sps:$4 sm:$0xff]   ;;  %v11605_v18 = vld [vmem:[%s15131_s5 + $0x24] ss:$8 sps:$4 sm:$0xff]  }
0x186a   : > { %v10688_v58 = vpop.f32.mrf.mxu0 }
0x186b   : > { %10699 = vmatmul.mubr.msk.bf16.vlgmr.msra.gmra.mxu0 %vm3371_vm5, %v6824_v54  ;;  %v6820_v3 = vmax.f32 %v6804_v2, 0.0  ;;  %v11603_v2 = vld [vmem:[%s15131_s5 + $0x20] ss:$8 sps:$4 sm:$0xff]  }
0x186c   : > { %v6806_v55 = vpop.f32.mrf.mxu0  ;;  %10702 = vmatprep.mubr.msk.bf16.mxu0 %vm13256_vm0, %v13255_v0 }
0x186d   : > { %v6807_v12 = vadd.f32 %v9924_v25, %v6806_v55  ;;  %v11608_v55 = vld [vmem:[%s15131_s5 + $0x14] ss:$8 sps:$4 sm:$0xff]  }
0x186e   : > { %v10689_v39 = vpop.f32.mrf.mxu0 }
0x186f   : > { %v6821_v7 = vmax.f32 %v6807_v12, 0.0  ;;  %v11606_v12 = vld [vmem:[%s15131_s5 + $0x10] ss:$8 sps:$4 sm:$0xff]   ;;  %v11611_v39 = vld [vmem:[%s15131_s5 + $0x4] ss:$8 sps:$4 sm:$0xff]  }
0x1870   : > { %v6811_v23 = vpop.f32.mrf.mxu0 }
0x1871   : > { %v6825_v30 = vpack.c.bf16 %v6821_v7, %v6820_v3  ;;  %v6812_v1 = vadd.f32 %v9924_v25, %v6811_v23  ;;  %v11609_v3 = vld [vmem:[%s15131_s5] ss:$8 sps:$4 sm:$0xff]   ;;  %v11614_v7 = vld [vmem:[%s15131_s5 + $0xf4] ss:$8 sps:$4 sm:$0xff]   ;;  %v11617_v23 = vld [vmem:[%s15131_s5 + $0xe4] ss:$8 sps:$4 sm:$0xff]  }
0x1872   : > { %v10692_v32 = vpop.f32.mrf.mxu0 }
0x1873   : > { %10703 = vmatmul.mubr.msk.bf16.gmra.mxu0 %vm3371_vm5, %v6825_v30  ;;  %v6822_v60 = vmax.f32 %v6812_v1, 0.0  ;;  %v11615_v30 = vld [vmem:[%s15131_s5 + $0xe0] ss:$8 sps:$4 sm:$0xff]   ;;  %v11620_v32 = vld [vmem:[%s15131_s5 + $0xd4] ss:$8 sps:$4 sm:$0xff]  }
0x1874   : > { %v6814_v5 = vpop.f32.mrf.mxu0  ;;  %10706 = vmatprep.mubr.msk.bf16.mxu0 %vm13256_vm0, %v13255_v0  ;;  %v11618_v1 = vld [vmem:[%s15131_s5 + $0xd0] ss:$8 sps:$4 sm:$0xff]  }
0x1875   : > { %v6815_v27 = vadd.f32 %v9924_v25, %v6814_v5  ;;  %v11593_v25 = vld [vmem:[%s15131_s5 + $0x64] ss:$8 sps:$4 sm:$0xff]  }
0x1876   : > { %v10693_v43 = vpop.f32.mrf.mxu0  ;;  %v11623_v5 = vld [vmem:[%s15131_s5 + $0xc4] ss:$8 sps:$4 sm:$0xff]  }
0x1877   : > { %v6823_v6 = vmax.f32 %v6815_v27, 0.0  ;;  %v11621_v27 = vld [vmem:[%s15131_s5 + $0xc0] ss:$8 sps:$4 sm:$0xff]   ;;  %v11626_v43 = vld [vmem:[%s15131_s5 + $0xb4] ss:$8 sps:$4 sm:$0xff]  }
0x1879   : > { %v6826_v57 = vpack.c.bf16 %v6823_v6, %v6822_v60  ;;  %v11624_v60 = vld [vmem:[%s15131_s5 + $0xb0] ss:$8 sps:$4 sm:$0xff]   ;;  %v11629_v6 = vld [vmem:[%s15131_s5 + $0xa4] ss:$8 sps:$4 sm:$0xff]  }
0x187b   : > { %10707 = vmatmul.mubr.msk.bf16.gmra.mxu0 %vm3371_vm5, %v6826_v57  ;;  %v11627_v57 = vld [vmem:[%s15131_s5 + $0xa0] ss:$8 sps:$4 sm:$0xff]  }
0x187c   : > { %10732 = vmatprep.mubr.msk.bf16.mxu0 %vm13256_vm0, %v13255_v0 }
0x192b   : > { %v6882_v62 = vpop.f32.mrf.mxu0 }
0x192d   : > { %v10700_v37 = vpop.f32.mrf.mxu0 }
0x192e   : > { %v4538_v37 = vrot.slane %v2695_v52, %v14124_v61  ;;  %v11648_v52 = vld [vmem:[%s15132_s15 + $0x68] ss:$16 sps:$4 sm:$0xff]  }
0x192f   : > { %v6885_v45 = vpop.f32.mrf.mxu0 }
0x1930   : > { %v6905_v24 = vpack.c.bf16 %v6885_v45, %v6882_v62  ;;  %v11632_v62 = vld [vmem:[%s15131_s5 + $0x94] ss:$8 sps:$4 sm:$0xff]   ;;  %v11630_v45 = vld [vmem:[%s15131_s5 + $0x90] ss:$8 sps:$4 sm:$0xff]  }
0x1931   : > { %v10701_v34 = vpop.f32.mrf.mxu0 }
0x1932   : > { %v14736_v34 = vadd.f32 %v14378_v22, %v4538_v37 }
0x1933   : > { %v6890_v14 = vpop.f32.mrf.mxu0 }
0x1935   : > { %v10704_v56 = vpop.f32.mrf.mxu0 }
0x1936   : > { %v14740_v56 = vadd.f32 %v14374_v17, %v4538_v37  ;;  %v11641_v17 = vld [vmem:[%s15132_s15 + $0xcc] ss:$16 sps:$4 sm:$0xff]  }
0x1937   : > { %v6893_v35 = vpop.f32.mrf.mxu0 }
0x1938   : > { %v6906_v50 = vpack.c.bf16 %v6893_v35, %v6890_v14  ;;  %v11635_v14 = vld [vmem:[%s15131_s5 + $0x84] ss:$8 sps:$4 sm:$0xff]   ;;  %v11633_v35 = vld [vmem:[%s15131_s5 + $0x80] ss:$8 sps:$4 sm:$0xff]  }
0x1939   : > { %v10705_v26 = vpop.f32.mrf.mxu0 }
0x193a   : > { %v4670_v26 = vmax.f32 %v14736_v34, 0.0 }
0x193b   : > { %v6898_v49 = vpop.f32.mrf.mxu0 }
0x193d   : > { %v10708_v53 = vpop.f32.mrf.mxu0 }
0x193e   : > { %v4668_v53 = vmax.f32 %v14740_v56, 0.0 }
0x193f   : > { %v6901_v19 = vpop.f32.mrf.mxu0 }
0x1940   : > { %v6907_v16 = vpack.c.bf16 %v6901_v19, %v6898_v49  ;;  %v11638_v49 = vld [vmem:[%s15132_s15 + $0xec] ss:$16 sps:$4 sm:$0xff]   ;;  %v11636_v19 = vld [vmem:[%s15132_s15 + $0xe8] ss:$16 sps:$4 sm:$0xff]   ;;  %v7070_v22 = vpack.c.bf16 %v4670_v26, %v4668_v53 }
0x1941   : > { %v10709_v33 = vpop.f32.mrf.mxu0 }
0x1942   : > { %10711 = vmatpush3.bf16.msra.mxu1 %v6907_v16  ;;  %v11639_v16 = vld [vmem:[%s15132_s15 + $0xc8] ss:$16 sps:$4 sm:$0xff]   ;;  %v11644_v33 = vld [vmem:[%s15132_s15 + $0xac] ss:$16 sps:$4 sm:$0xff]  }
0x1943   : > { %10712 = vmatprep.subr.bf16.mxu1 %v13255_v0 }
0x1946   : > { %10713 = vmatpush3.bf16.msra.mxu1 %v6906_v50  ;;  %v11684_v50 = vld [vmem:[#allocation57 + $0x8] sm:$0xff]  }
0x1947   : > { %10714 = vmatprep.subr.bf16.mxu1 %v13255_v0  ;;  %10729 = vmatpush3.bf16.msra.mxu0 %v11684_v50 }
0x1948   : > { %10730 = vmatprep.subr.bf16.mxu0 %v13255_v0 }
0x194a   : > { %10715 = vmatpush3.bf16.msra.mxu1 %v6905_v24  ;;  %v11647_v24 = vld [vmem:[%s15132_s15 + $0x8c] ss:$16 sps:$4 sm:$0xff]  }
0x194b   : > { %7243 = vmatprep.subr.bf16.mxu1 %v11590_v31  ;;  %v11642_v31 = vld [vmem:[%s15132_s15 + $0xa8] ss:$16 sps:$4 sm:$0xff]  }
0x194d   : > { %10717 = vmatmul.mubr.msk.bf16.vlgmr.msra.gmra.mxu1 %vm3134_vm1, %v14597_v59  ;;  %v14694_v59 = vadd.f32 %v14380_v28, %v4542_v38  ;;  %v4669_v28 = vmax.f32 %v14699_v15, 0.0  ;;  %v11653_v38 = vld [vmem:[%s15132_s15 + $0x4c] ss:$16 sps:$4 sm:$0xff]  }
0x194e   : > { %7244 = vmatpush1.bf16.msra.mxu1 %v11588_v20  ;;  %10720 = vmatprep.mubr.msk.bf16.mxu1 %vm13256_vm0, %v13255_v0  ;;  %v11685_v20 = vld [vmem:[#allocation57] sm:$0xff]  }
0x194f   : > { %7245 = vmatprep.subr.bf16.mxu1 %v11593_v25  ;;  %v4671_v54 = vmax.f32 %v14694_v59, 0.0  ;;  %10731 = vmatpush3.bf16.msra.mxu0 %v11685_v20  ;;  %v11645_v25 = vld [vmem:[%s15132_s15 + $0x88] ss:$16 sps:$4 sm:$0xff]  }
0x1951   : > { %v7071_v58 = vpack.c.bf16 %v4671_v54, %v4669_v28 }
0x1952   : > { %7246 = vmatpush1.bf16.msra.mxu1 %v11591_v9  ;;  %v11688_v9 = vld [vmem:[%s15132_s15 + $0xe4] ss:$16 sps:$4 sm:$0xff]  }
0x1953   : > { %7247 = vmatprep.subr.bf16.mxu1 %v11596_v41  ;;  %v11650_v41 = vld [vmem:[%s15132_s15 + $0x6c] ss:$16 sps:$4 sm:$0xff]   ;;  %7627 = vmatprep.subr.bf16.mxu0 %v11688_v9  ;;  %v11694_v9 = vld [vmem:[%s15132_s15 + $0xa4] ss:$16 sps:$4 sm:$0xff]  }
0x1955   : > { %10721 = vmatmul.mubr.msk.bf16.gmra.mxu1 %vm3134_vm1, %v14603_v46  ;;  %v11600_v46 = vld [vmem:[%s15131_s5 + $0x30] ss:$8 sps:$4 sm:$0xff]  }
0x1956   : > { %7248 = vmatpush1.bf16.msra.mxu1 %v11594_v10  ;;  %10724 = vmatprep.mubr.msk.bf16.mxu1 %vm13256_vm0, %v13255_v0  ;;  %v11651_v10 = vld [vmem:[%s15132_s15 + $0x48] ss:$16 sps:$4 sm:$0xff]  }
0x1957   : > { %7249 = vmatprep.subr.bf16.mxu1 %v11599_v42  ;;  %v11656_v42 = vld [vmem:[%s15132_s15 + $0x2c] ss:$16 sps:$4 sm:$0xff]  }
0x195a   : > { %7250 = vmatpush1.bf16.msra.mxu1 %v11597_v44  ;;  %v11654_v44 = vld [vmem:[%s15132_s15 + $0x28] ss:$16 sps:$4 sm:$0xff]  }
0x195b   : > { %7251 = vmatprep.subr.bf16.mxu1 %v11602_v4  ;;  %v11659_v4 = vld [vmem:[%s15132_s15 + $0xc] ss:$16 sps:$4 sm:$0xff]  }
0x195d   : > { %10725 = vmatmul.mubr.msk.bf16.gmra.mxu1 %vm3134_vm1, %v14609_v29  ;;  %v11612_v29 = vld [vmem:[%s15131_s5 + $0xf0] ss:$8 sps:$4 sm:$0xff]  }
0x195e   : > { %7252 = vmatpush1.bf16.msra.mxu1 %v11600_v46  ;;  %7275 = vmatprep.mubr.bf16.mxu1 %v7071_v58  ;;  %v11657_v46 = vld [vmem:[%s15132_s15 + $0x8] ss:$16 sps:$4 sm:$0xff]  }
0x195f   : > { %7253 = vmatprep.subr.bf16.mxu1 %v11605_v18  ;;  %v11662_v18 = vld [vmem:[%s15132_s15 + $0x1ec] ss:$16 sps:$4 sm:$0xff]   ;;  %v11660_v58 = vld [vmem:[%s15132_s15 + $0x1e8] ss:$16 sps:$4 sm:$0xff]  }
0x1962   : > { %7254 = vmatpush1.bf16.msra.mxu1 %v11603_v2  ;;  %v11665_v2 = vld [vmem:[%s15132_s15 + $0x1cc] ss:$16 sps:$4 sm:$0xff]  }
0x1963   : > { %7255 = vmatprep.subr.bf16.mxu1 %v11608_v55  ;;  %v11663_v55 = vld [vmem:[%s15132_s15 + $0x1c8] ss:$16 sps:$4 sm:$0xff]  }
0x1966   : > { %7256 = vmatpush1.bf16.msra.mxu1 %v11606_v12  ;;  %v11668_v12 = vld [vmem:[%s15132_s15 + $0x1ac] ss:$16 sps:$4 sm:$0xff]  }
0x1967   : > { %7257 = vmatprep.subr.bf16.mxu1 %v11611_v39  ;;  %v11666_v39 = vld [vmem:[%s15132_s15 + $0x1a8] ss:$16 sps:$4 sm:$0xff]  }
0x196a   : > { %7258 = vmatpush1.bf16.msra.mxu1 %v11609_v3  ;;  %v11671_v3 = vld [vmem:[%s15132_s15 + $0x18c] ss:$16 sps:$4 sm:$0xff]  }
0x196b   : > { %7259 = vmatprep.subr.bf16.mxu1 %v11614_v7  ;;  %v11669_v7 = vld [vmem:[%s15132_s15 + $0x188] ss:$16 sps:$4 sm:$0xff]  }
0x196e   : > { %7260 = vmatpush2.bf16.msra.mxu1 %v11612_v29  ;;  %v11674_v29 = vld [vmem:[%s15132_s15 + $0x16c] ss:$16 sps:$4 sm:$0xff]  }
0x196f   : > { %7261 = vmatprep.subr.bf16.mxu1 %v11617_v23  ;;  %v11672_v23 = vld [vmem:[%s15132_s15 + $0x168] ss:$16 sps:$4 sm:$0xff]  }
0x1972   : > { %7262 = vmatpush2.bf16.msra.mxu1 %v11615_v30  ;;  %v11677_v30 = vld [vmem:[%s15132_s15 + $0x14c] ss:$16 sps:$4 sm:$0xff]  }
0x1973   : > { %7263 = vmatprep.subr.bf16.mxu1 %v11620_v32  ;;  %v11675_v32 = vld [vmem:[%s15132_s15 + $0x148] ss:$16 sps:$4 sm:$0xff]  }
0x1976   : > { %7264 = vmatpush2.bf16.msra.mxu1 %v11618_v1  ;;  %v11680_v1 = vld [vmem:[%s15132_s15 + $0x12c] ss:$16 sps:$4 sm:$0xff]  }
0x1977   : > { %7265 = vmatprep.subr.bf16.mxu1 %v11623_v5  ;;  %v11678_v5 = vld [vmem:[%s15132_s15 + $0x128] ss:$16 sps:$4 sm:$0xff]  }
0x197a   : > { %7266 = vmatpush2.bf16.msra.mxu1 %v11621_v27  ;;  %v11683_v27 = vld [vmem:[%s15132_s15 + $0x10c] ss:$16 sps:$4 sm:$0xff]  }
0x197b   : > { %7267 = vmatprep.subr.bf16.mxu1 %v11626_v43  ;;  %v11681_v43 = vld [vmem:[%s15132_s15 + $0x108] ss:$16 sps:$4 sm:$0xff]  }
0x197e   : > { %7268 = vmatpush2.bf16.msra.mxu1 %v11624_v60  ;;  %v9933_v60 = vld [vmem:[#allocation55] ss:$0 sm:$0xff] }
0x197f   : > { %7269 = vmatprep.subr.bf16.mxu1 %v11629_v6 }
0x1982   : > { %7270 = vmatpush2.bf16.msra.mxu1 %v11627_v57 }
0x1983   : > { %7271 = vmatprep.subr.bf16.mxu1 %v11632_v62 }
0x1986   : > { %7272 = vmatpush2.bf16.msra.mxu1 %v11630_v45 }
0x1987   : > { %7273 = vmatprep.subr.bf16.mxu1 %v11635_v14 }
0x198a   : > { %7274 = vmatpush2.bf16.msra.mxu1 %v11633_v35 }
0x198b   : > { %7690 = vmatprep.subr.bf16.mxu1 %v11638_v49 }
0x198d   : > { %7276 = vmatmul.mubr.bf16.vlgmr.msra.gmra.mxu1 %v7070_v22  ;;  %v11686_v22 = vld [vmem:[%s15132_s15 + $0xe0] ss:$16 sps:$4 sm:$0xff]  }
0x198e   : > { %7691 = vmatpush1.bf16.msra.mxu1 %v11636_v19  ;;  %7722 = vmatprep.mubr.bf16.mxu1 %v14557_v21 }
0x198f   : > { %7692 = vmatprep.subr.bf16.mxu1 %v11641_v17 }
0x1992   : > { %7693 = vmatpush1.bf16.msra.mxu1 %v11639_v16 }
0x1993   : > { %7694 = vmatprep.subr.bf16.mxu1 %v11644_v33  ;;  %v11691_v33 = vld [vmem:[%s15132_s15 + $0xc4] ss:$16 sps:$4 sm:$0xff]  }
0x1996   : > { %7695 = vmatpush1.bf16.msra.mxu1 %v11642_v31 }
0x1997   : > { %7696 = vmatprep.subr.bf16.mxu1 %v11647_v24  ;;  %v11689_v24 = vld [vmem:[%s15132_s15 + $0xc0] ss:$16 sps:$4 sm:$0xff]  }
0x199a   : > { %7697 = vmatpush1.bf16.msra.mxu1 %v11645_v25 }
0x199b   : > { %7698 = vmatprep.subr.bf16.mxu1 %v11650_v41 }
0x199e   : > { %7699 = vmatpush1.bf16.msra.mxu1 %v11648_v52 }
0x199f   : > { %7700 = vmatprep.subr.bf16.mxu1 %v11653_v38 }
0x19a2   : > { %7701 = vmatpush1.bf16.msra.mxu1 %v11651_v10  ;;  %v11692_v10 = vld [vmem:[%s15132_s15 + $0xa0] ss:$16 sps:$4 sm:$0xff]  }
0x19a3   : > { %7702 = vmatprep.subr.bf16.mxu1 %v11656_v42 }
0x19a6   : > { %7703 = vmatpush1.bf16.msra.mxu1 %v11654_v44 }
0x19a7   : > { %7704 = vmatprep.subr.bf16.mxu1 %v11659_v4  ;;  %v11697_v4 = vld [vmem:[%s15132_s15 + $0x84] ss:$16 sps:$4 sm:$0xff]  }
0x19aa   : > { %7705 = vmatpush1.bf16.msra.mxu1 %v11657_v46 }
0x19ab   : > { %7706 = vmatprep.subr.bf16.mxu1 %v11662_v18 }
0x19ae   : > { %7707 = vmatpush2.bf16.msra.mxu1 %v11660_v58  ;;  %v11695_v58 = vld [vmem:[%s15132_s15 + $0x80] ss:$16 sps:$4 sm:$0xff]  }
0x19af   : > { %7708 = vmatprep.subr.bf16.mxu1 %v11665_v2 }
0x19b2   : > { %7709 = vmatpush2.bf16.msra.mxu1 %v11663_v55 }
0x19b3   : > { %7710 = vmatprep.subr.bf16.mxu1 %v11668_v12  ;;  %v11700_v12 = vld [vmem:[%s15132_s15 + $0x64] ss:$16 sps:$4 sm:$0xff]  }
0x19b6   : > { %7711 = vmatpush2.bf16.msra.mxu1 %v11666_v39 }
0x19b7   : > { %7712 = vmatprep.subr.bf16.mxu1 %v11671_v3 }
0x19ba   : > { %7713 = vmatpush2.bf16.msra.mxu1 %v11669_v7  ;;  %v11698_v7 = vld [vmem:[%s15132_s15 + $0x60] ss:$16 sps:$4 sm:$0xff]  }
0x19bb   : > { %7714 = vmatprep.subr.bf16.mxu1 %v11674_v29 }
0x19be   : > { %7715 = vmatpush2.bf16.msra.mxu1 %v11672_v23  ;;  %v11703_v23 = vld [vmem:[%s15132_s15 + $0x44] ss:$16 sps:$4 sm:$0xff]  }
0x19bf   : > { %7716 = vmatprep.subr.bf16.mxu1 %v11677_v30  ;;  %v11701_v30 = vld [vmem:[%s15132_s15 + $0x40] ss:$16 sps:$4 sm:$0xff]  }
0x19c2   : > { %7717 = vmatpush2.bf16.msra.mxu1 %v11675_v32  ;;  %v11706_v32 = vld [vmem:[%s15132_s15 + $0x24] ss:$16 sps:$4 sm:$0xff]  }
0x19c3   : > { %7718 = vmatprep.subr.bf16.mxu1 %v11680_v1  ;;  %v11704_v1 = vld [vmem:[%s15132_s15 + $0x20] ss:$16 sps:$4 sm:$0xff]  }
0x19c6   : > { %7719 = vmatpush2.bf16.msra.mxu1 %v11678_v5  ;;  %v11709_v5 = vld [vmem:[%s15132_s15 + $0x4] ss:$16 sps:$4 sm:$0xff]  }
0x19c7   : > { %7720 = vmatprep.subr.bf16.mxu1 %v11683_v27  ;;  %v11707_v27 = vld [vmem:[%s15132_s15] ss:$16 sps:$4 sm:$0xff]  }
0x19ca   : > { %7721 = vmatpush2.bf16.msra.mxu1 %v11681_v43  ;;  %v11712_v43 = vld [vmem:[%s15132_s15 + $0x1e4] ss:$16 sps:$4 sm:$0xff]  }
0x19cd   : > { %7723 = vmatmul.mubr.bf16.vlgmr.msra.gmra.mxu1 %v14559_v63 }
0x19ce   : > { %7732 = vmatprep.mubr.bf16.mxu1 %v14569_v40 }
0x19d5   : > { %7733 = vmatmul.mubr.bf16.gmra.mxu1 %v14571_v8 }
0x19d6   : > { %7742 = vmatprep.mubr.bf16.mxu1 %v14581_v13 }
0x19dd   : > { %7743 = vmatmul.mubr.bf16.gmra.mxu1 %v14583_v11 }
0x1a0d   : > { %v6948_v6 = vpop.f32.mrf.mxu1 }
0x1a0e   : > { %v6949_v62 = vadd.f32 %v9933_v60, %v6948_v6  ;;  %v11713_v6 = vld [vmem:[%s15132_s15 + $0x1c0] ss:$16 sps:$4 sm:$0xff]  }
0x1a0f   : > { %v10718_v57 = vpop.f32.mrf.mxu1 }
0x1a10   : > { %v6971_v35 = vmax.f32 %v6949_v62, 0.0  ;;  %v11718_v57 = vld [vmem:[%s15132_s15 + $0x1a4] ss:$16 sps:$4 sm:$0xff]   ;;  %v11716_v62 = vld [vmem:[%s15132_s15 + $0x1a0] ss:$16 sps:$4 sm:$0xff]  }
0x1a11   : > { %v6951_v37 = vpop.f32.mrf.mxu1 }
0x1a12   : > { %v6952_v45 = vadd.f32 %v9933_v60, %v6951_v37  ;;  %v11721_v37 = vld [vmem:[%s15132_s15 + $0x184] ss:$16 sps:$4 sm:$0xff]  }
0x1a13   : > { %v10719_v14 = vpop.f32.mrf.mxu1 }
0x1a14   : > { %v6972_v49 = vmax.f32 %v6952_v45, 0.0  ;;  %v11719_v45 = vld [vmem:[%s15132_s15 + $0x180] ss:$16 sps:$4 sm:$0xff]   ;;  %v11724_v14 = vld [vmem:[%s15132_s15 + $0x164] ss:$16 sps:$4 sm:$0xff]  }
0x1a15   : > { %v6956_v19 = vpop.f32.mrf.mxu1 }
0x1a16   : > { %v6977_v17 = vpack.c.bf16 %v6972_v49, %v6971_v35  ;;  %v6957_v16 = vadd.f32 %v9933_v60, %v6956_v19  ;;  %v11722_v35 = vld [vmem:[%s15132_s15 + $0x160] ss:$16 sps:$4 sm:$0xff]   ;;  %v11727_v49 = vld [vmem:[%s15132_s15 + $0x144] ss:$16 sps:$4 sm:$0xff]  }
0x1a17   : > { %v10722_v50 = vpop.f32.mrf.mxu1  ;;  %v11725_v19 = vld [vmem:[%s15132_s15 + $0x140] ss:$16 sps:$4 sm:$0xff]  }
0x1a18   : > { %10733 = vmatmul.mubr.msk.bf16.vlgmr.msra.gmra.mxu0 %vm3371_vm5, %v6977_v17  ;;  %v6973_v20 = vmax.f32 %v6957_v16, 0.0  ;;  %v11728_v17 = vld [vmem:[%s15132_s15 + $0x120] ss:$16 sps:$4 sm:$0xff]   ;;  %v11733_v16 = vld [vmem:[%s15132_s15 + $0x104] ss:$16 sps:$4 sm:$0xff]   ;;  %v11892_v50 = vld [vmem:[#allocation6 + $0x78] sm:$0xff]  }
0x1a19   : > { %7628 = vmatpush1.bf16.msra.mxu0 %v11686_v22  ;;  %v6959_v31 = vpop.f32.mrf.mxu1  ;;  %10736 = vmatprep.mubr.msk.bf16.mxu0 %vm13256_vm0, %v13255_v0  ;;  %v11730_v22 = vld [vmem:[%s15132_s15 + $0x124] ss:$16 sps:$4 sm:$0xff]  }
0x1a1a   : > { %v6960_v25 = vadd.f32 %v9933_v60, %v6959_v31  ;;  %7629 = vmatprep.subr.bf16.mxu0 %v11691_v33  ;;  %v11731_v33 = vld [vmem:[%s15132_s15 + $0x100] ss:$16 sps:$4 sm:$0xff]   ;;  %v11893_v31 = vld [vmem:[#allocation6 + $0x38] sm:$0xff]  }
0x1a1b   : > { %v10723_v41 = vpop.f32.mrf.mxu1 }
0x1a1c   : > { %v6974_v52 = vmax.f32 %v6960_v25, 0.0  ;;  %v11896_v25 = vld [vmem:[#allocation6 + $0x68] sm:$0xff]   ;;  %v11898_v41 = vld [vmem:[#allocation6 + $0x60] sm:$0xff]  }
0x1a1d   : > { %7630 = vmatpush1.bf16.msra.mxu0 %v11689_v24  ;;  %v6964_v38 = vpop.f32.mrf.mxu1  ;;  %v11894_v24 = vld [vmem:[#allocation6 + $0x70] sm:$0xff]  }
0x1a1e   : > { %v6978_v42 = vpack.c.bf16 %v6974_v52, %v6973_v20  ;;  %v6965_v44 = vadd.f32 %v9933_v60, %v6964_v38  ;;  %7631 = vmatprep.subr.bf16.mxu0 %v11694_v9  ;;  %v11895_v20 = vld [vmem:[#allocation6 + $0x30] sm:$0xff]   ;;  %v11897_v9 = vld [vmem:[#allocation6 + $0x28] sm:$0xff]   ;;  %v11899_v52 = vld [vmem:[#allocation6 + $0x20] sm:$0xff]  }
0x1a1f   : > { %v10726_v46 = vpop.f32.mrf.mxu1  ;;  %v11902_v38 = vld [vmem:[#allocation6 + $0x50] sm:$0xff]  }
0x1a20   : > { %10737 = vmatmul.mubr.msk.bf16.gmra.mxu0 %vm3371_vm5, %v6978_v42  ;;  %v6975_v2 = vmax.f32 %v6965_v44, 0.0  ;;  %v11906_v42 = vld [vmem:[#allocation6 + $0x40] sm:$0xff]  }
0x1a21   : > { %7632 = vmatpush1.bf16.msra.mxu0 %v11692_v10  ;;  %v6967_v18 = vpop.f32.mrf.mxu1  ;;  %10740 = vmatprep.mubr.msk.bf16.mxu0 %vm13256_vm0, %v13255_v0  ;;  %v11903_v10 = vld [vmem:[#allocation6 + $0x10] sm:$0xff]   ;;  %v11907_v44 = vld [vmem:[#allocation6] sm:$0xff]  }
0x1a22   : > { %v6968_v55 = vadd.f32 %v9933_v60, %v6967_v18  ;;  %7633 = vmatprep.subr.bf16.mxu0 %v11697_v4  ;;  %v11710_v60 = vld [vmem:[%s15132_s15 + $0x1e0] ss:$16 sps:$4 sm:$0xff]  }
0x1a23   : > { %v10727_v39 = vpop.f32.mrf.mxu1 }
0x1a24   : > { %v6976_v3 = vmax.f32 %v6968_v55, 0.0 }
0x1a25   : > { %7634 = vmatpush1.bf16.msra.mxu0 %v11695_v58 }
0x1a26   : > { %v6979_v29 = vpack.c.bf16 %v6976_v3, %v6975_v2  ;;  %7635 = vmatprep.subr.bf16.mxu0 %v11700_v12 }
0x1a28   : > { %10741 = vmatmul.mubr.msk.bf16.gmra.mxu0 %vm3371_vm5, %v6979_v29 }
0x1a29   : > { %7636 = vmatpush1.bf16.msra.mxu0 %v11698_v7  ;;  %7659 = vmatprep.mubr.bf16.mxu0 %v14557_v21  ;;  %v11715_v21 = vld [vmem:[%s15132_s15 + $0x1c4] ss:$16 sps:$4 sm:$0xff]  }
0x1a2a   : > { %7637 = vmatprep.subr.bf16.mxu0 %v11703_v23 }
0x1a2d   : > { %7638 = vmatpush1.bf16.msra.mxu0 %v11701_v30 }
0x1a2e   : > { %7639 = vmatprep.subr.bf16.mxu0 %v11706_v32 }
0x1a31   : > { %7640 = vmatpush1.bf16.msra.mxu0 %v11704_v1 }
0x1a32   : > { %7641 = vmatprep.subr.bf16.mxu0 %v11709_v5 }
0x1a35   : > { %7642 = vmatpush1.bf16.msra.mxu0 %v11707_v27 }
0x1a36   : > { %7643 = vmatprep.subr.bf16.mxu0 %v11712_v43 }
0x1a39   : > { %7644 = vmatpush2.bf16.msra.mxu0 %v11710_v60 }
0x1a3a   : > { %7645 = vmatprep.subr.bf16.mxu0 %v11715_v21 }
0x1a3d   : > { %7646 = vmatpush2.bf16.msra.mxu0 %v11713_v6  ;;  %v14837_v6 = vld [vmem:[#allocation61] sm:$0xf] }
0x1a3e   : > { %7647 = vmatprep.subr.bf16.mxu0 %v11718_v57 }
0x1a41   : > { %7648 = vmatpush2.bf16.msra.mxu0 %v11716_v62  ;;  %v2938_v62 = vld [vmem:[#allocation60] sm:$0x3] }
0x1a42   : > { %7649 = vmatprep.subr.bf16.mxu0 %v11721_v37  ;;  %v7294_v37 = vrot.slane %v14837_v6, %v14121_v48 }
0x1a45   : > { %7650 = vmatpush2.bf16.msra.mxu0 %v11719_v45  ;;  %v7290_v45 = vrot.slane %v14837_v6, %v14124_v61 }
0x1a46   : > { %7651 = vmatprep.subr.bf16.mxu0 %v11724_v14 }
0x1a49   : > { %7652 = vmatpush2.bf16.msra.mxu0 %v11722_v35  ;;  %v7080_v35 = vrot.slane %v2938_v62, %v14121_v48 }
0x1a4a   : > { %7653 = vmatprep.subr.bf16.mxu0 %v11727_v49  ;;  %v7076_v49 = vrot.slane %v2938_v62, %v14124_v61  ;;  %v15134_v62 = vmov 0  }
0x1a4d   : > { %7654 = vmatpush2.bf16.msra.mxu0 %v11725_v19  ;;  %v7277_v43 = vpop.f32.mrf.mxu1 }
0x1a4e   : > { %7655 = vmatprep.subr.bf16.mxu0 %v11730_v22 }
0x1a4f   : > { %v7279_v60 = vpop.f32.mrf.mxu1 }
0x1a51   : > { %7656 = vmatpush2.bf16.msra.mxu0 %v11728_v17  ;;  %v7281_v21 = vpop.f32.mrf.mxu1 }
0x1a52   : > { %7657 = vmatprep.subr.bf16.mxu0 %v11733_v16 }
0x1a53   : > { %v7283_v19 = vpop.f32.mrf.mxu1 }
0x1a55   : > { %7658 = vmatpush2.bf16.msra.mxu0 %v11731_v33  ;;  %v7282_v33 = vadd.f32 %v7281_v21, %v7076_v49 }
0x1a56   : > { %10324 = vmatprep.subr.bf16.mxu0 %v11892_v50 }
0x1a58   : > { %7660 = vmatmul.mubr.bf16.vlgmr.msra.gmra.mxu0 %v14559_v63  ;;  %v11900_v63 = vld [vmem:[#allocation6 + $0x58] sm:$0xff]  }
0x1a59   : > { %7669 = vmatprep.mubr.bf16.mxu0 %v14569_v40  ;;  %10325 = vmatpush3.bf16.msra.mxu0 %v11893_v31  ;;  %v11901_v40 = vld [vmem:[#allocation6 + $0x18] sm:$0xff]  }
0x1a5a   : > { %10326 = vmatprep.subr.bf16.mxu0 %v11894_v24  ;;  %v7280_v24 = vadd.f32 %v7279_v60, %v7080_v35 }
0x1a5d   : > { %10327 = vmatpush3.bf16.msra.mxu0 %v11895_v20  ;;  %v7284_v20 = vadd.f32 %v7283_v19, %v7080_v35  ;;  %v11739_v35 = vld [vmem:[%s15133_s23 + $0x64] ss:$8 sps:$4 sm:$0xff]   ;;  %v11740_v19 = vld [vmem:[%s15133_s23 + $0x50] ss:$8 sps:$4 sm:$0xff]  }
0x1a5e   : > { %10328 = vmatprep.subr.bf16.mxu0 %v11896_v25 }
0x1a60   : > { %7670 = vmatmul.mubr.bf16.gmra.mxu0 %v14571_v8  ;;  %v11904_v8 = vld [vmem:[#allocation6 + $0x48] sm:$0xff]  }
0x1a61   : > { %7679 = vmatprep.mubr.bf16.mxu0 %v14581_v13  ;;  %10329 = vmatpush3.bf16.msra.mxu0 %v11897_v9  ;;  %v11905_v13 = vld [vmem:[#allocation6 + $0x8] sm:$0xff]   ;;  %v7278_v9 = vadd.f32 %v7277_v43, %v7076_v49  ;;  %v11742_v49 = vld [vmem:[%s15133_s23 + $0x54] ss:$8 sps:$4 sm:$0xff]  }
0x1a62   : > { %10330 = vmatprep.subr.bf16.mxu0 %v11898_v41 }
0x1a65   : > { %10331 = vmatpush3.bf16.msra.mxu0 %v11899_v52 }
0x1a66   : > { %10332 = vmatprep.subr.bf16.mxu0 %v11900_v63 }
0x1a68   : > { %7680 = vmatmul.mubr.bf16.gmra.mxu0 %v14583_v11  ;;  %v9937_v11 = vld [vmem:[#allocation58] ss:$0 sm:$0xff] }
0x1a69   : > { %10333 = vmatpush3.bf16.msra.mxu0 %v11901_v40 }
0x1a6a   : > { %10334 = vmatprep.subr.bf16.mxu0 %v11902_v38 }
0x1a6d   : > { %10335 = vmatpush3.bf16.msra.mxu0 %v11903_v10 }
0x1a6e   : > { %10336 = vmatprep.subr.bf16.mxu0 %v11904_v8 }
0x1a71   : > { %10337 = vmatpush3.bf16.msra.mxu0 %v11905_v13 }
0x1a72   : > { %10338 = vmatprep.subr.bf16.mxu0 %v11906_v42 }
0x1a75   : > { %10339 = vmatpush3.bf16.msra.mxu0 %v11907_v44 }
0x1a76   : > { %10039 = vmatprep.subr.msk.bf16.mxu0 %vm4218_vm8, %v14422_v36 }
0x1ad8   : > { %v7041_v4 = vpop.f32.mrf.mxu0 }
0x1ad9   : > { %v7042_v46 = vadd.f32 %v9937_v11, %v7041_v4 }
0x1ada   : > { %v10734_v18 = vpop.f32.mrf.mxu0 }
0x1adb   : > { %7064 = vst [vmem:[%s2532_s4] sm:$0xff] %v7042_v46 }
0x1adc   : > { %v7044_v58 = vpop.f32.mrf.mxu0 }
0x1add   : > { %v7045_v2 = vadd.f32 %v9937_v11, %v7044_v58 }
0x1ade   : > { %v10735_v55 = vpop.f32.mrf.mxu0 }
0x1adf   : > { %7065 = vst [vmem:[%s2532_s4 + $0x8] sm:$0xff] %v7045_v2 }
0x1ae0   : > { %v7049_v12 = vpop.f32.mrf.mxu0 }
0x1ae1   : > { %v7050_v39 = vadd.f32 %v9937_v11, %v7049_v12 }
0x1ae2   : > { %v10738_v3 = vpop.f32.mrf.mxu0 }
0x1ae3   : > { %7066 = vst [vmem:[%s2532_s4 + $0x10] sm:$0xff] %v7050_v39 }
0x1ae4   : > { %v7052_v7 = vpop.f32.mrf.mxu0 }
0x1ae5   : > { %v7053_v29 = vadd.f32 %v9937_v11, %v7052_v7 }
0x1ae6   : > { %v10739_v23 = vpop.f32.mrf.mxu0 }
0x1ae7   : > { %7067 = vst [vmem:[%s2532_s4 + $0x18] sm:$0xff] %v7053_v29 }
0x1ae8   : > { %v7057_v30 = vpop.f32.mrf.mxu0 }
0x1ae9   : > { %v7058_v36 = vadd.f32 %v9937_v11, %v7057_v30 }
0x1aea   : > { %v10742_v32 = vpop.f32.mrf.mxu0 }
0x1aeb   : > { %7068 = vst [vmem:[%s2532_s4 + $0x20] sm:$0xff] %v7058_v36 }
0x1aec   : > { %v7060_v1 = vpop.f32.mrf.mxu0 }
0x1aed   : > { %v7061_v5 = vadd.f32 %v9937_v11, %v7060_v1 }
0x1aee   : > { %v10743_v27 = vpop.f32.mrf.mxu0 }
0x1aef   : > { %7069 = vst [vmem:[%s2532_s4 + $0x28] sm:$0xff] %v7061_v5 }
0x1b18   : > { %v7661_v57 = vpop.f32.mrf.mxu0 }
0x1b19   : > { %v7662_v50 = vadd.f32 %v7661_v57, %v7290_v45 }
0x1b1a   : > { %v7663_v14 = vpop.f32.mrf.mxu0 }
0x1b1b   : > { %v7664_v17 = vadd.f32 %v7663_v14, %v7294_v37  ;;  %v7753_v38 = vmul.f32 %v7662_v50, %v7278_v9  ;;  %v11736_v14 = vld [vmem:[%s15133_s23 + $0x74] ss:$8 sps:$4 sm:$0xff]   ;;  %v11751_v50 = vld [vmem:[%s15133_s23 + $0x24] ss:$8 sps:$4 sm:$0xff]  }
0x1b1c   : > { %v7665_v22 = vpop.f32.mrf.mxu0  ;;  %8136 = vmatprep.subr.bf16.mxu1 %v11736_v14 }
0x1b1d   : > { %v7666_v16 = vadd.f32 %v7665_v22, %v7290_v45  ;;  %v7754_v63 = vmul.f32 %v7664_v17, %v7280_v24  ;;  %v11745_v22 = vld [vmem:[%s15133_s23 + $0x44] ss:$8 sps:$4 sm:$0xff]   ;;  %v11743_v17 = vld [vmem:[%s15133_s23 + $0x40] ss:$8 sps:$4 sm:$0xff]  }
0x1b1e   : > { %v7667_v31 = vpop.f32.mrf.mxu0 }
0x1b1f   : > { %v7668_v25 = vadd.f32 %v7667_v31, %v7294_v37  ;;  %v7755_v41 = vmul.f32 %v7666_v16, %v7282_v33  ;;  %v11748_v16 = vld [vmem:[%s15133_s23 + $0x34] ss:$8 sps:$4 sm:$0xff]   ;;  %v11749_v31 = vld [vmem:[%s15133_s23 + $0x20] ss:$8 sps:$4 sm:$0xff]  }
0x1b20   : > { %v7671_v52 = vpop.f32.mrf.mxu0 }
0x1b21   : > { %v7756_v40 = vmul.f32 %v7668_v25, %v7284_v20  ;;  %v7765_v13 = vpack.c.bf16 %v7755_v41, %v7753_v38  ;;  %v7672_v4 = vadd.f32 %v7671_v52, %v7290_v45  ;;  %v11757_v25 = vld [vmem:[%s15133_s23 + $0x4] ss:$8 sps:$4 sm:$0xff]   ;;  %v11760_v41 = vld [vmem:[%s15133_s23 + $0xf4] ss:$8 sps:$4 sm:$0xff]   ;;  %v11758_v52 = vld [vmem:[%s15133_s23 + $0xf0] ss:$8 sps:$4 sm:$0xff]  }
0x1b22   : > { %v7673_v10 = vpop.f32.mrf.mxu0 }
0x1b23   : > { %v7766_v8 = vpack.c.bf16 %v7756_v40, %v7754_v63  ;;  %v7674_v44 = vadd.f32 %v7673_v10, %v7294_v37  ;;  %v7757_v39 = vmul.f32 %v7672_v4, %v7278_v9 }
0x1b24   : > { %v7675_v42 = vpop.f32.mrf.mxu0 }
0x1b25   : > { %v7676_v11 = vadd.f32 %v7675_v42, %v7290_v45  ;;  %7803 = vmatprep.mubr.bf16.mxu0 %v7766_v8  ;;  %v7758_v55 = vmul.f32 %v7674_v44, %v7280_v24 }
0x1b26   : > { %v7677_v46 = vpop.f32.mrf.mxu0  ;;  %7804 = vmatmul.mubr.bf16.vlgmr.msra.gmra.mxu0 %v7765_v13 }
0x1b27   : > { %v7678_v18 = vadd.f32 %v7677_v46, %v7294_v37  ;;  %7895 = vmatpush1.bf16.msra.mxu0 %v14427_v51  ;;  %v7759_v58 = vmul.f32 %v7676_v11, %v7282_v33 }
0x1b28   : > { %v7681_v2 = vpop.f32.mrf.mxu0 }
0x1b29   : > { %v7760_v12 = vmul.f32 %v7678_v18, %v7284_v20  ;;  %v7767_v29 = vpack.c.bf16 %v7759_v58, %v7757_v39  ;;  %v7682_v32 = vadd.f32 %v7681_v2, %v7290_v45 }
0x1b2a   : > { %v7683_v3 = vpop.f32.mrf.mxu0 }
0x1b2b   : > { %v7768_v7 = vpack.c.bf16 %v7760_v12, %v7758_v55  ;;  %v7684_v30 = vadd.f32 %v7683_v3, %v7294_v37  ;;  %v7761_v60 = vmul.f32 %v7682_v32, %v7278_v9  ;;  %v11755_v9 = vld [vmem:[%s15133_s23] ss:$8 sps:$4 sm:$0xff]  }
0x1b2c   : > { %v7685_v23 = vpop.f32.mrf.mxu0 }
0x1b2d   : > { %v7686_v36 = vadd.f32 %v7685_v23, %v7290_v45  ;;  %7811 = vmatprep.mubr.bf16.mxu0 %v7768_v7  ;;  %v7762_v27 = vmul.f32 %v7684_v30, %v7280_v24  ;;  %v11734_v45 = vld [vmem:[%s15133_s23 + $0x70] ss:$8 sps:$4 sm:$0xff]   ;;  %v11754_v24 = vld [vmem:[%s15133_s23 + $0x14] ss:$8 sps:$4 sm:$0xff]  }
0x1b2e   : > { %v7687_v1 = vpop.f32.mrf.mxu0  ;;  %7812 = vmatmul.mubr.bf16.gmra.mxu0 %v7767_v29  ;;  %8137 = vmatpush1.bf16.msra.mxu1 %v11734_v45 }
0x1b2f   : > { %v7688_v51 = vadd.f32 %v7687_v1, %v7294_v37  ;;  %v7763_v5 = vmul.f32 %v7686_v36, %v7282_v33  ;;  %v11737_v37 = vld [vmem:[%s15133_s23 + $0x60] ss:$8 sps:$4 sm:$0xff]   ;;  %8138 = vmatprep.subr.bf16.mxu1 %v11739_v35  ;;  %v11746_v33 = vld [vmem:[%s15133_s23 + $0x30] ss:$8 sps:$4 sm:$0xff]  }
0x1b31   : > { %v7764_v43 = vmul.f32 %v7688_v51, %v7284_v20  ;;  %v7769_v57 = vpack.c.bf16 %v7763_v5, %v7761_v60  ;;  %v11752_v20 = vld [vmem:[%s15133_s23 + $0x10] ss:$8 sps:$4 sm:$0xff]  }
0x1b32   : > { %8139 = vmatpush1.bf16.msra.mxu1 %v11737_v37 }
0x1b33   : > { %v7770_v21 = vpack.c.bf16 %v7764_v43, %v7762_v27  ;;  %8140 = vmatprep.subr.bf16.mxu1 %v11742_v49 }
0x1b35   : > { %7819 = vmatprep.mubr.bf16.mxu0 %v7770_v21 }
0x1b36   : > { %7820 = vmatmul.mubr.bf16.gmra.mxu0 %v7769_v57  ;;  %8141 = vmatpush1.bf16.msra.mxu1 %v11740_v19 }
0x1b37   : > { %7912 = vmatprep.mubr.bf16.mxu0 %v15134_v62  ;;  %8142 = vmatprep.subr.bf16.mxu1 %v11745_v22 }
0x1b3a   : > { %8143 = vmatpush1.bf16.msra.mxu1 %v11743_v17 }
0x1b3b   : > { %8144 = vmatprep.subr.bf16.mxu1 %v11748_v16 }
0x1b3e   : > { %8145 = vmatpush1.bf16.msra.mxu1 %v11746_v33 }
0x1b3f   : > { %8146 = vmatprep.subr.bf16.mxu1 %v11751_v50 }
0x1b42   : > { %8147 = vmatpush1.bf16.msra.mxu1 %v11749_v31 }
0x1b43   : > { %8148 = vmatprep.subr.bf16.mxu1 %v11754_v24 }
0x1b46   : > { %8149 = vmatpush1.bf16.msra.mxu1 %v11752_v20 }
0x1b47   : > { %8150 = vmatprep.subr.bf16.mxu1 %v11757_v25 }
0x1b4a   : > { %8151 = vmatpush1.bf16.msra.mxu1 %v11755_v9 }
0x1b4b   : > { %8152 = vmatprep.subr.bf16.mxu1 %v11760_v41 }
0x1b4e   : > { %8153 = vmatpush2.bf16.msra.mxu1 %v11758_v52 }
0x1be6   : > { %v10340_v63 = vpop.f32.mrf.mxu0 }
0x1be8   : > { %v10341_v40 = vpop.f32.mrf.mxu0 }
0x1be9   : > { %v10342_v4 = vadd.f32 %v10341_v40, %v10340_v63 }
0x1bea   : > { %v10343_v38 = vpop.f32.mrf.mxu0 }
0x1beb   : > { %v7828_v12 = vmul.f32 0.125, %v10342_v4 }
0x1bec   : > { %v10344_v10 = vpop.f32.mrf.mxu0 }
0x1bed   : > { %v10345_v2 = vadd.f32 %v10344_v10, %v10343_v38 }
0x1bee   : > { %v10346_v8 = vpop.f32.mrf.mxu0 }
0x1bef   : > { %v7829_v30 = vmul.f32 0.125, %v10345_v2  ;;  %v11766_v2 = vld [vmem:[%s15133_s23 + $0xd4] ss:$8 sps:$4 sm:$0xff]  }
0x1bf0   : > { %v10347_v13 = vpop.f32.mrf.mxu0 }
0x1bf1   : > { %v10348_v44 = vadd.f32 %v10347_v13, %v10346_v8 }
0x1bf2   : > { %v10349_v42 = vpop.f32.mrf.mxu0 }
0x1bf3   : > { %v7830_v58 = vmul.f32 0.125, %v10348_v44 }
0x1bf4   : > { %v10350_v11 = vpop.f32.mrf.mxu0 }
0x1bf5   : > { %v10351_v46 = vadd.f32 %v10350_v11, %v10349_v42  ;;  %v7834_v29 = vmax.f32 %v7828_v12, %v7830_v58 }
0x1bf6   : > { %v10352_v18 = vpop.f32.mrf.mxu0 }
0x1bf7   : > { %v7831_v3 = vmul.f32 0.125, %v10351_v46 }
0x1bf8   : > { %v10353_v55 = vpop.f32.mrf.mxu0 }
0x1bf9   : > { %v10354_v39 = vadd.f32 %v10353_v55, %v10352_v18  ;;  %v7835_v51 = vmax.f32 %v7829_v30, %v7831_v3  ;;  %v11763_v18 = vld [vmem:[%s15133_s23 + $0xe4] ss:$8 sps:$4 sm:$0xff]   ;;  %v11764_v55 = vld [vmem:[%s15133_s23 + $0xd0] ss:$8 sps:$4 sm:$0xff]  }
0x1bfa   : > { %v10355_v7 = vpop.f32.mrf.mxu0  ;;  %8154 = vmatprep.subr.bf16.mxu1 %v11763_v18 }
0x1bfb   : > { %v7832_v23 = vmul.f32 0.125, %v10354_v39  ;;  %v11772_v39 = vld [vmem:[%s15133_s23 + $0xb4] ss:$8 sps:$4 sm:$0xff]  }
0x1bfc   : > { %v10356_v36 = vpop.f32.mrf.mxu0 }
0x1bfd   : > { %v7836_v32 = vmax.f32 %v7834_v29, %v7832_v23  ;;  %v10357_v1 = vadd.f32 %v10356_v36, %v10355_v7  ;;  %v11775_v7 = vld [vmem:[%s15133_s23 + $0xa4] ss:$8 sps:$4 sm:$0xff]   ;;  %v11773_v29 = vld [vmem:[%s15133_s23 + $0xa0] ss:$8 sps:$4 sm:$0xff]  }
0x1bfe   : > { %v11779_v36 = vld [vmem:[%s15133_s23 + $0x80] ss:$8 sps:$4 sm:$0xff]  }
0x1bff   : > { %v7838_v5 = vsub.f32 %v7828_v12, %v7836_v32  ;;  %v7840_v27 = vsub.f32 %v7830_v58, %v7836_v32  ;;  %v7842_v43 = vsub.f32 %v7832_v23, %v7836_v32  ;;  %v7833_v60 = vmul.f32 0.125, %v10357_v1  ;;  %v11761_v58 = vld [vmem:[%s15133_s23 + $0xe0] ss:$8 sps:$4 sm:$0xff]   ;;  %v11778_v23 = vld [vmem:[%s15133_s23 + $0x94] ss:$8 sps:$4 sm:$0xff]   ;;  %v7724_v1 = vpop.f32.mrf.mxu1 }
0x1c00   : > { %8155 = vmatpush2.bf16.msra.mxu1 %v11761_v58  ;;  %v11767_v12 = vld [vmem:[%s15133_s23 + $0xc0] ss:$8 sps:$4 sm:$0xff]   ;;  %v11781_v32 = vld [vmem:[%s15133_s23 + $0x84] ss:$8 sps:$4 sm:$0xff]  }
0x1c01   : > { %v7844_v21 = vmul.f32 1.442695, %v7838_v5  ;;  %v7848_v57 = vmul.f32 1.442695, %v7840_v27  ;;  %v7837_v45 = vmax.f32 %v7835_v51, %v7833_v60  ;;  %v7852_v14 = vmul.f32 1.442695, %v7842_v43  ;;  %8156 = vmatprep.subr.bf16.mxu1 %v11766_v2  ;;  %v7726_v51 = vpop.f32.mrf.mxu1 }
0x1c03   : > { %11866 = vpow2.f32 %v7844_v21  ;;  %v7839_v35 = vsub.f32 %v7829_v30, %v7837_v45  ;;  %v7841_v37 = vsub.f32 %v7831_v3, %v7837_v45  ;;  %v7843_v49 = vsub.f32 %v7833_v60, %v7837_v45  ;;  %v11770_v3 = vld [vmem:[%s15133_s23 + $0xb0] ss:$8 sps:$4 sm:$0xff]   ;;  %v7728_v5 = vpop.f32.mrf.mxu1 }
0x1c04   : > { %11868 = vpow2.f32 %v7848_v57  ;;  %8157 = vmatpush2.bf16.msra.mxu1 %v11764_v55  ;;  %v11776_v30 = vld [vmem:[%s15133_s23 + $0x90] ss:$8 sps:$4 sm:$0xff]  }
0x1c05   : > { %v7846_v19 = vmul.f32 1.442695, %v7839_v35  ;;  %v7850_v22 = vmul.f32 1.442695, %v7841_v37  ;;  %11870 = vpow2.f32 %v7852_v14  ;;  %v7854_v17 = vmul.f32 1.442695, %v7843_v49  ;;  %v7730_v27 = vpop.f32.mrf.mxu1 }
0x1c07   : > { %11872 = vpow2.f32 %v7846_v19  ;;  %v7734_v43 = vpop.f32.mrf.mxu1 }
0x1c08   : > { %11874 = vpow2.f32 %v7850_v22 }
0x1c09   : > { %11876 = vpow2.f32 %v7854_v17  ;;  %v7736_v60 = vpop.f32.mrf.mxu1 }
0x1c0b   : > { %v7738_v21 = vpop.f32.mrf.mxu1 }
0x1c0d   : > { %v7740_v45 = vpop.f32.mrf.mxu1 }
0x1c0f   : > { %v7744_v37 = vpop.f32.mrf.mxu1 }
0x1c10   : > { %v11867_v16 = vpop.eup %11866 }
0x1c11   : > { %v11869_v33 = vpop.eup %11868  ;;  %v7746_v22 = vpop.f32.mrf.mxu1 }
0x1c12   : > { %v7856_v50 = vadd.f32 %v11869_v33, %v11867_v16  ;;  %v11871_v31 = vpop.eup %11870 }
0x1c14   : > { %v11873_v24 = vpop.eup %11872  ;;  %v7858_v20 = vadd.f32 %v11871_v31, %v7856_v50 }
0x1c15   : > { %v11875_v25 = vpop.eup %11874 }
0x1c16   : > { %v7857_v9 = vadd.f32 %v11875_v25, %v11873_v24  ;;  %v11877_v41 = vpop.eup %11876  ;;  %11878 = vrcp.f32 %v7858_v20  ;;  %v7748_v20 = vpop.f32.mrf.mxu1 }
0x1c18   : > { %v7859_v52 = vadd.f32 %v11877_v41, %v7857_v9 }
0x1c1a   : > { %11880 = vrcp.f32 %v7859_v52 }
0x1c23   : > { %v11879_v63 = vpop.eup %11878 }
0x1c24   : > { %v7862_v38 = vmul.f32 %v11879_v63, %v11867_v16  ;;  %v7864_v42 = vmul.f32 %v11879_v63, %v11869_v33  ;;  %v7866_v4 = vmul.f32 %v11879_v63, %v11871_v31  ;;  %v15135_v33 = vsub.s32 2, %v14118_v47 }
0x1c25   : > { %v15136_v31 = vsub.s32 3, %v14118_v47 }
0x1c26   : > { %v7298_v50 = vrot.slane %v14837_v6, %v15135_v33 }
0x1c27   : > { %v11881_v40 = vpop.eup %11880 }
0x1c28   : > { %v7863_v10 = vmul.f32 %v11881_v40, %v11873_v24  ;;  %v7865_v13 = vmul.f32 %v11881_v40, %v11875_v25  ;;  %v7867_v11 = vmul.f32 %v11881_v40, %v11877_v41  ;;  %v7302_v24 = vrot.slane %v14837_v6, %v15136_v31 }
0x1c29   : > { %v7739_v9 = vadd.f32 %v7738_v21, %v7298_v50  ;;  %v7725_v52 = vadd.f32 %v7724_v1, %v7298_v50  ;;  %v7745_v58 = vadd.f32 %v7744_v37, %v7298_v50 }
0x1c2a   : > { %v7868_v8 = vpack.c.bf16 %v7863_v10, %v7862_v38  ;;  %v7869_v44 = vpack.c.bf16 %v7865_v13, %v7864_v42  ;;  %v7870_v46 = vpack.c.bf16 %v7867_v11, %v7866_v4  ;;  %v7727_v63 = vadd.f32 %v7726_v51, %v7302_v24  ;;  %v7750_v10 = vpop.f32.mrf.mxu1 }
0x1c2b   : > { %v7737_v40 = vadd.f32 %v7736_v60, %v7302_v24  ;;  %v7741_v38 = vadd.f32 %v7740_v45, %v7302_v24  ;;  %v7731_v13 = vadd.f32 %v7730_v27, %v7302_v24  ;;  %v7735_v42 = vadd.f32 %v7734_v43, %v7298_v50 }
0x1c2c   : > { %10040 = vmatmul.mubr.msk.bf16.vlgmr.msra.gmra.mxu0 %vm4214_vm9, %v7868_v8  ;;  %v7729_v8 = vadd.f32 %v7728_v5, %v7298_v50  ;;  %v7747_v4 = vadd.f32 %v7746_v22, %v7302_v24  ;;  %v7751_v6 = vadd.f32 %v7750_v10, %v7302_v24 }
0x1c2d   : > { %7922 = vmatprep.mubr.bf16.mxu0 %v15134_v62 }
0x1c34   : > { %10041 = vmatmul.mubr.msk.bf16.gmra.mxu0 %vm4214_vm9, %v7869_v44 }
0x1c35   : > { %7932 = vmatprep.mubr.bf16.mxu0 %v15134_v62  ;;  %v11769_v62 = vld [vmem:[%s15133_s23 + $0xc4] ss:$8 sps:$4 sm:$0xff]  }
0x1c36   : > { %8158 = vmatprep.subr.bf16.mxu1 %v11769_v62 }
0x1c37   : > { %8159 = vmatpush2.bf16.msra.mxu1 %v11767_v12 }
0x1c38   : > { %8160 = vmatprep.subr.bf16.mxu1 %v11772_v39 }
0x1c3b   : > { %8161 = vmatpush2.bf16.msra.mxu1 %v11770_v3 }
0x1c3c   : > { %10042 = vmatmul.mubr.msk.bf16.gmra.mxu0 %vm4214_vm9, %v7870_v46  ;;  %8162 = vmatprep.subr.bf16.mxu1 %v11775_v7  ;;  %v7749_v46 = vadd.f32 %v7748_v20, %v7298_v50 }
0x1c3f   : > { %8163 = vmatpush2.bf16.msra.mxu1 %v11773_v29 }
0x1c40   : > { %8164 = vmatprep.subr.bf16.mxu1 %v11778_v23 }
0x1c43   : > { %8165 = vmatpush2.bf16.msra.mxu1 %v11776_v30 }
0x1c44   : > { %8166 = vmatprep.subr.bf16.mxu1 %v11781_v32 }
0x1c47   : > { %8167 = vmatpush2.bf16.msra.mxu1 %v11779_v36 }
0x1c48   : > { %10770 = vmatprep.subr.bf16.mxu1 %v13255_v0 }
0x1cec   : > { %v7914_v57 = vpop.f32.mrf.mxu0 }
0x1ced   : > { %v7943_v29 = vmul.f32 %v7914_v57, %v7725_v52 }
0x1cee   : > { %v7916_v14 = vpop.f32.mrf.mxu0 }
0x1cef   : > { %v7944_v12 = vmul.f32 %v7916_v14, %v7727_v63  ;;  %v3036_v14 = vld [vmem:[#allocation63] sm:$0x3]  ;;  %v11782_v63 = vld [vmem:[%s15137_s6 + $0x78] sm:$0xff]  }
0x1cf0   : > { %v7918_v35 = vpop.f32.mrf.mxu0  ;;  %v7969_v57 = vrot.slane %v3036_v14, %v14124_v61  ;;  %v7973_v37 = vrot.slane %v3036_v14, %v14121_v48  ;;  %10358 = vmatprep.subr.bf16.mxu0 %v11782_v63 }
0x1cf1   : > { %v7945_v2 = vmul.f32 %v7918_v35, %v7729_v8 }
0x1cf2   : > { %v7920_v49 = vpop.f32.mrf.mxu0 }
0x1cf3   : > { %v7946_v39 = vmul.f32 %v7920_v49, %v7731_v13 }
0x1cf4   : > { %v7924_v19 = vpop.f32.mrf.mxu0 }
0x1cf5   : > { %v7947_v55 = vmul.f32 %v7924_v19, %v7735_v42 }
0x1cf6   : > { %v7926_v17 = vpop.f32.mrf.mxu0 }
0x1cf7   : > { %v7948_v18 = vmul.f32 %v7926_v17, %v7737_v40  ;;  %v7951_v5 = vadd.f32 %v7947_v55, %v7943_v29  ;;  %v11792_v55 = vld [vmem:[%s15137_s6 + $0x50] sm:$0xff]  }
0x1cf8   : > { %v7928_v16 = vpop.f32.mrf.mxu0 }
0x1cf9   : > { %v7949_v44 = vmul.f32 %v7928_v16, %v7739_v9  ;;  %v7952_v32 = vadd.f32 %v7948_v18, %v7944_v12  ;;  %v11787_v18 = vld [vmem:[%s15137_s6 + $0x28] sm:$0xff]  }
0x1cfa   : > { %v7930_v25 = vpop.f32.mrf.mxu0  ;;  %v11794_v12 = vld [vmem:[%s15137_s6 + $0x48] sm:$0xff]  }
0x1cfb   : > { %v7950_v47 = vmul.f32 %v7930_v25, %v7741_v38  ;;  %v7953_v23 = vadd.f32 %v7949_v44, %v7945_v2  ;;  %v11783_v44 = vld [vmem:[%s15137_s6 + $0x38] sm:$0xff]  }
0x1cfc   : > { %v7934_v41 = vpop.f32.mrf.mxu0  ;;  %10359 = vmatpush3.bf16.msra.mxu0 %v11783_v44  ;;  %v11791_v2 = vld [vmem:[%s15137_s6 + $0x18] sm:$0xff]  }
0x1cfd   : > { %v7955_v30 = vmul.f32 %v7934_v41, %v7745_v58  ;;  %v7954_v1 = vadd.f32 %v7950_v47, %v7946_v39  ;;  %v11788_v47 = vld [vmem:[%s15137_s6 + $0x60] sm:$0xff]   ;;  %v11795_v39 = vld [vmem:[%s15137_s6 + $0x8] sm:$0xff]  }
0x1cfe   : > { %v7936_v11 = vpop.f32.mrf.mxu0  ;;  %v11789_v58 = vld [vmem:[%s15137_s6 + $0x20] sm:$0xff]  }
0x1cff   : > { %v7956_v3 = vmul.f32 %v7936_v11, %v7747_v4  ;;  %v7959_v21 = vadd.f32 %v7955_v30, %v7951_v5  ;;  %v11784_v11 = vld [vmem:[%s15137_s6 + $0x70] sm:$0xff]  }
0x1d00   : > { %v7938_v62 = vpop.f32.mrf.mxu0  ;;  %v11785_v4 = vld [vmem:[%s15137_s6 + $0x30] sm:$0xff]   ;;  %10360 = vmatprep.subr.bf16.mxu0 %v11784_v11 }
0x1d01   : > { %v7957_v7 = vmul.f32 %v7938_v62, %v7749_v46  ;;  %v7960_v43 = vadd.f32 %v7956_v3, %v7952_v32  ;;  %10361 = vmatpush3.bf16.msra.mxu0 %v11785_v4  ;;  %v11786_v46 = vld [vmem:[%s15137_s6 + $0x68] sm:$0xff]   ;;  %v11793_v62 = vld [vmem:[%s15137_s6 + $0x10] sm:$0xff]   ;;  %v11796_v3 = vld [vmem:[%s15137_s6 + $0x40] sm:$0xff]  }
0x1d02   : > { %v7940_v36 = vpop.f32.mrf.mxu0  ;;  %10362 = vmatprep.subr.bf16.mxu0 %v11786_v46 }
0x1d03   : > { %v7958_v51 = vmul.f32 %v7940_v36, %v7751_v6  ;;  %v7961_v27 = vadd.f32 %v7957_v7, %v7953_v23  ;;  %v11790_v6 = vld [vmem:[%s15137_s6 + $0x58] sm:$0xff]   ;;  %v11797_v7 = vld [vmem:[%s15137_s6] sm:$0xff]  }
0x1d05   : > { %v7962_v60 = vadd.f32 %v7958_v51, %v7954_v1  ;;  %v7963_v35 = vpack.c.bf16 %v7961_v27, %v7959_v21  ;;  %10363 = vmatpush3.bf16.msra.mxu0 %v11787_v18  ;;  %v3037_v51 = vld [vmem:[%s15138_s16] sm:$0x3] }
0x1d06   : > { %10364 = vmatprep.subr.bf16.mxu0 %v11788_v47  ;;  %v8219_v21 = vrot.slane %v3037_v51, %v14124_v61 }
0x1d07   : > { %v7964_v45 = vpack.c.bf16 %v7962_v60, %v7960_v43  ;;  %v3038_v43 = vld [vmem:[%s15139_s7] sm:$0x3] }
0x1d08   : > { %v8234_v14 = vrot.slane %v3038_v43, %v14124_v61 }
0x1d09   : > { %8168 = vmatprep.mubr.bf16.mxu1 %v7964_v45  ;;  %10365 = vmatpush3.bf16.msra.mxu0 %v11789_v58  ;;  %v8223_v45 = vrot.slane %v3037_v51, %v14121_v48 }
0x1d0a   : > { %8169 = vmatmul.mubr.bf16.vlgmr.msra.gmra.mxu1 %v7963_v35  ;;  %10366 = vmatprep.subr.bf16.mxu0 %v11790_v6 }
0x1d0b   : > { %10772 = vmatprep.mubr.msk.bf16.mxu1 %vm13256_vm0, %v13255_v0 }
0x1d0d   : > { %10367 = vmatpush3.bf16.msra.mxu0 %v11791_v2 }
0x1d0e   : > { %10368 = vmatprep.subr.bf16.mxu0 %v11792_v55 }
0x1d11   : > { %10369 = vmatpush3.bf16.msra.mxu0 %v11793_v62 }
0x1d12   : > { %10370 = vmatprep.subr.bf16.mxu0 %v11794_v12  ;;  %v11806_v12 = vld [vmem:[%s15140_s10 + $0x38] sm:$0xff]  }
0x1d15   : > { %10371 = vmatpush3.bf16.msra.mxu0 %v11795_v39  ;;  %v11807_v39 = vld [vmem:[%s15140_s10 + $0x30] sm:$0xff]  }
0x1d16   : > { %10372 = vmatprep.subr.bf16.mxu0 %v11796_v3  ;;  %v11808_v3 = vld [vmem:[%s15140_s10 + $0x28] sm:$0xff]  }
0x1d19   : > { %10373 = vmatpush3.bf16.msra.mxu0 %v11797_v7  ;;  %v11809_v7 = vld [vmem:[%s15140_s10 + $0x20] sm:$0xff]  }
0x1d1a   : > { %10744 = vmatprep.subr.bf16.mxu0 %v13255_v0 }
0x1dca   : > { %v8170_v49 = vpop.f32.mrf.mxu1 }
0x1dcb   : > { %v8171_v19 = vadd.f32 %v8170_v49, %v7969_v57 }
0x1dcc   : > { %v8172_v22 = vpop.f32.mrf.mxu1 }
0x1dcd   : > { %v8173_v17 = vadd.f32 %v8172_v22, %v7973_v37  ;;  %v8179_v33 = vadd.f32 %v8171_v19, %v4668_v53 }
0x1dce   : > { %v8174_v16 = vpop.f32.mrf.mxu1 }
0x1dcf   : > { %v8180_v50 = vadd.f32 %v8173_v17, %v4669_v28  ;;  %v8175_v31 = vadd.f32 %v8174_v16, %v7969_v57  ;;  %v8238_v57 = vrot.slane %v3038_v43, %v14121_v48 }
0x1dd0   : > { %v8176_v24 = vpop.f32.mrf.mxu1 }
0x1dd1   : > { %v8177_v20 = vadd.f32 %v8176_v24, %v7973_v37  ;;  %v8183_v25 = vadd.f32 %v8180_v50, %v8179_v33  ;;  %v8181_v9 = vadd.f32 %v8175_v31, %v4670_v26 }
0x1dd3   : > { %v8182_v41 = vadd.f32 %v8177_v20, %v4671_v54  ;;  %8184 = vadd.xlane.f32.xlu1 %v8183_v25 }
0x1dd5   : > { %v8186_v52 = vadd.f32 %v8182_v41, %v8181_v9 }
0x1dd7   : > { %8187 = vadd.xlane.f32.xlu0 %v8186_v52 }
0x1e5c   : > { %v8185_v56 = vpop.xlane.xlu1 %8184 }
0x1e5d   : > { %v8189_v53 = vmul.f32 0.00390625, %v8185_v56 }
0x1e5f   : > { %v8191_v15 = vsub.f32 %v8179_v33, %v8189_v53  ;;  %v8192_v28 = vsub.f32 %v8180_v50, %v8189_v53  ;;  %v11798_v53 = vld [vmem:[#allocation66 + $0x38] sm:$0xff]  }
0x1e60   : > { %v8188_v40 = vpop.xlane.xlu0 %8187 }
0x1e61   : > { %v8190_v38 = vmul.f32 0.00390625, %v8188_v40  ;;  %v8195_v10 = vmul.f32 %v8191_v15, %v8191_v15  ;;  %v8196_v34 = vmul.f32 %v8192_v28, %v8192_v28  ;;  %v11800_v40 = vld [vmem:[#allocation66 + $0x28] sm:$0xff]  }
0x1e63   : > { %v8193_v59 = vsub.f32 %v8181_v9, %v8190_v38  ;;  %v8194_v54 = vsub.f32 %v8182_v41, %v8190_v38  ;;  %v8199_v26 = vadd.f32 %v8196_v34, %v8195_v10  ;;  %v11801_v38 = vld [vmem:[#allocation66 + $0x20] sm:$0xff]   ;;  %v11802_v10 = vld [vmem:[#allocation66 + $0x18] sm:$0xff]   ;;  %v11803_v34 = vld [vmem:[#allocation66 + $0x10] sm:$0xff]  }
0x1e65   : > { %8200 = vadd.xlane.f32.xlu1 %v8199_v26  ;;  %v8197_v8 = vmul.f32 %v8193_v59, %v8193_v59  ;;  %v8198_v13 = vmul.f32 %v8194_v54, %v8194_v54  ;;  %v10091_v26 = vld [vmem:[#allocation64] ss:$0 sm:$0xff] }
0x1e67   : > { %v8202_v42 = vadd.f32 %v8198_v13, %v8197_v8 }
0x1e69   : > { %8203 = vadd.xlane.f32.xlu0 %v8202_v42 }
0x1eee   : > { %v8201_v29 = vpop.xlane.xlu1 %8200 }
0x1eef   : > { %v8205_v23 = vmul.f32 0.00390625, %v8201_v29  ;;  %v11810_v29 = vld [vmem:[%s15140_s10 + $0x18] sm:$0xff]  }
0x1ef1   : > { %v8207_v30 = vadd.f32 1e-05, %v8205_v23  ;;  %v11811_v23 = vld [vmem:[%s15140_s10 + $0x10] sm:$0xff]  }
0x1ef2   : > { %v8204_v36 = vpop.xlane.xlu0 %8203 }
0x1ef3   : > { %11882 = vrsqrt.f32 %v8207_v30  ;;  %v8206_v32 = vmul.f32 0.00390625, %v8204_v36  ;;  %v11812_v30 = vld [vmem:[%s15140_s10 + $0x8] sm:$0xff]   ;;  %v11813_v36 = vld [vmem:[%s15140_s10] sm:$0xff]  }
0x1ef5   : > { %v8208_v1 = vadd.f32 1e-05, %v8206_v32  ;;  %v10101_v32 = vld [vmem:[#allocation67] ss:$0 sm:$0xff] }
0x1ef7   : > { %11884 = vrsqrt.f32 %v8208_v1 }
0x1f00   : > { %v11883_v5 = vpop.eup %11882 }
0x1f01   : > { %v8211_v27 = vmul.f32 %v11883_v5, %v8191_v15  ;;  %v8212_v60 = vmul.f32 %v11883_v5, %v8192_v28  ;;  %v14929_v15 = vld [vmem:[#allocation4] sm:$0xff]   ;;  %v11799_v28 = vld [vmem:[#allocation66 + $0x30] sm:$0xff]  }
0x1f03   : > { %v8226_v19 = vmul.f32 %v8219_v21, %v8211_v27  ;;  %v8227_v22 = vmul.f32 %v8223_v45, %v8212_v60 }
0x1f04   : > { %v11885_v35 = vpop.eup %11884 }
0x1f05   : > { %v8213_v37 = vmul.f32 %v11885_v35, %v8193_v59  ;;  %v8214_v49 = vmul.f32 %v11885_v35, %v8194_v54  ;;  %v8241_v33 = vadd.f32 %v8234_v14, %v8226_v19  ;;  %v8242_v50 = vadd.f32 %v8238_v57, %v8227_v22  ;;  %v11804_v59 = vld [vmem:[#allocation66 + $0x8] sm:$0xff]   ;;  %v11805_v54 = vld [vmem:[#allocation66] sm:$0xff]  }
0x1f06   : > { %v11814_v22 = vld [vmem:[%s15141_s2 + $0x8] sm:$0xff]  }
0x1f07   : > { %v8228_v17 = vmul.f32 %v8219_v21, %v8213_v37  ;;  %v8229_v16 = vmul.f32 %v8223_v45, %v8214_v49 }
0x1f09   : > { %v8243_v31 = vadd.f32 %v8234_v14, %v8228_v17  ;;  %v8244_v24 = vadd.f32 %v8238_v57, %v8229_v16  ;;  %v11815_v17 = vld [vmem:[%s15141_s2] sm:$0xff]   ;;  %v10111_v16 = vld [vmem:[#allocation69] ss:$0 sm:$0xff] }
0x1f0b   : > { %v8245_v20 = vpack.c.bf16 %v8243_v31, %v8241_v33  ;;  %v8246_v25 = vpack.c.bf16 %v8244_v24, %v8242_v50 }
0x1f0d   : > { %8375 = vmatprep.mubr.bf16.mxu0 %v8246_v25 }
0x1f0e   : > { %8376 = vmatmul.mubr.bf16.vlgmr.msra.gmra.mxu0 %v8245_v20 }
0x1f0f   : > { %10746 = vmatprep.mubr.msk.bf16.mxu0 %vm13256_vm0, %v13255_v0 }
0x1fce   : > { %v10374_v61 = vpop.f32.mrf.mxu0 }
0x1fd0   : > { %v10375_v9 = vpop.f32.mrf.mxu0 }
0x1fd1   : > { %v10376_v52 = vadd.f32 %v10375_v9, %v10374_v61 }
0x1fd2   : > { %v10377_v48 = vpop.f32.mrf.mxu0 }
0x1fd4   : > { %v10378_v41 = vpop.f32.mrf.mxu0 }
0x1fd5   : > { %v10379_v63 = vadd.f32 %v10378_v41, %v10377_v48 }
0x1fd7   : > { %v8384_v56 = vpack.c.bf16 %v10379_v63, %v10376_v52 }
0x1fd9   : > { %10745 = vmatpush3.bf16.msra.mxu0 %v8384_v56 }
0x1fda   : > { %10750 = vmatprep.subr.bf16.mxu0 %v13255_v0 }
0x1fdc   : > { %10747 = vmatmul.mubr.msk.bf16.vlgmr.msra.gmra.mxu0 %vm4162_vm7, %v14929_v15 }
0x1fdd   : > { %10751 = vmatpush3.bf16.msra.mxu0 %v11798_v53  ;;  %10766 = vmatprep.mubr.msk.bf16.mxu0 %vm13256_vm0, %v13255_v0 }
0x1fde   : > { %10752 = vmatprep.subr.bf16.mxu0 %v13255_v0 }
0x1fe1   : > { %10753 = vmatpush3.bf16.msra.mxu0 %v11799_v28  ;;  %v11816_v28 = vld [vmem:[%s13567_s14 + $0x8] sm:$0xff]  }
0x1fe2   : > { %10754 = vmatprep.subr.bf16.mxu0 %v13255_v0 }
0x1fe5   : > { %10755 = vmatpush3.bf16.msra.mxu0 %v11800_v40  ;;  %v11817_v40 = vld [vmem:[%s13567_s14] sm:$0xff]  }
0x1fe6   : > { %10756 = vmatprep.subr.bf16.mxu0 %v13255_v0 }
0x1fe9   : > { %10757 = vmatpush3.bf16.msra.mxu0 %v11801_v38  ;;  %v10116_v38 = vld [vmem:[#allocation70] ss:$0 sm:$0xff] }
0x1fea   : > { %10758 = vmatprep.subr.bf16.mxu0 %v13255_v0 }
0x1fed   : > { %10759 = vmatpush3.bf16.msra.mxu0 %v11802_v10 }
0x1fee   : > { %10760 = vmatprep.subr.bf16.mxu0 %v13255_v0 }
0x1ff1   : > { %10761 = vmatpush3.bf16.msra.mxu0 %v11803_v34 }
0x1ff2   : > { %10762 = vmatprep.subr.bf16.mxu0 %v13255_v0 }
0x1ff5   : > { %10763 = vmatpush3.bf16.msra.mxu0 %v11804_v59 }
0x1ff6   : > { %10764 = vmatprep.subr.bf16.mxu0 %v13255_v0 }
0x1ff9   : > { %10765 = vmatpush3.bf16.msra.mxu0 %v11805_v54 }
0x1ffa   : > { %10796 = vmatprep.subr.bf16.mxu0 %v13255_v0 }
0x209c   : > { %v8425_v8 = vpop.f32.mrf.mxu0 }
0x209d   : > { %v8426_v42 = vadd.f32 %v10091_v26, %v8425_v8 }
0x209e   : > { %v10748_v13 = vpop.f32.mrf.mxu0 }
0x209f   : > { %v8432_v46 = vmax.f32 %v8426_v42, 0.0 }
0x20a0   : > { %v8428_v44 = vpop.f32.mrf.mxu0 }
0x20a1   : > { %v8429_v11 = vadd.f32 %v10091_v26, %v8428_v44 }
0x20a2   : > { %v10749_v4 = vpop.f32.mrf.mxu0 }
0x20a3   : > { %v8433_v18 = vmax.f32 %v8429_v11, 0.0 }
0x20a5   : > { %v8434_v47 = vpack.c.bf16 %v8433_v18, %v8432_v46 }
0x20a7   : > { %10767 = vmatmul.mubr.bf16.vlgmr.msra.gmra.mxu0 %v8434_v47 }
0x20a8   : > { %10798 = vmatprep.mubr.msk.bf16.mxu0 %vm13256_vm0, %v13255_v0 }
0x2167   : > { %v8517_v58 = vpop.f32.mrf.mxu0 }
0x2169   : > { %v10768_v6 = vpop.f32.mrf.mxu0 }
0x216b   : > { %v8520_v2 = vpop.f32.mrf.mxu0 }
0x216c   : > { %v8524_v55 = vpack.c.bf16 %v8520_v2, %v8517_v58 }
0x216d   : > { %v10769_v62 = vpop.f32.mrf.mxu0 }
0x216e   : > { %10771 = vmatpush3.bf16.msra.mxu1 %v8524_v55 }
0x216f   : > { %10776 = vmatprep.subr.bf16.mxu1 %v13255_v0 }
0x2171   : > { %10773 = vmatmul.mubr.msk.bf16.vlgmr.msra.gmra.mxu1 %vm4162_vm7, %v14929_v15 }
0x2172   : > { %10777 = vmatpush3.bf16.msra.mxu1 %v11806_v12  ;;  %10792 = vmatprep.mubr.msk.bf16.mxu1 %vm13256_vm0, %v13255_v0 }
0x2173   : > { %10778 = vmatprep.subr.bf16.mxu1 %v13255_v0 }
0x2176   : > { %10779 = vmatpush3.bf16.msra.mxu1 %v11807_v39 }
0x2177   : > { %10780 = vmatprep.subr.bf16.mxu1 %v13255_v0 }
0x217a   : > { %10781 = vmatpush3.bf16.msra.mxu1 %v11808_v3 }
0x217b   : > { %10782 = vmatprep.subr.bf16.mxu1 %v13255_v0 }
0x217e   : > { %10783 = vmatpush3.bf16.msra.mxu1 %v11809_v7 }
0x217f   : > { %10784 = vmatprep.subr.bf16.mxu1 %v13255_v0 }
0x2182   : > { %10785 = vmatpush3.bf16.msra.mxu1 %v11810_v29 }
0x2183   : > { %10786 = vmatprep.subr.bf16.mxu1 %v13255_v0 }
0x2186   : > { %10787 = vmatpush3.bf16.msra.mxu1 %v11811_v23 }
0x2187   : > { %10788 = vmatprep.subr.bf16.mxu1 %v13255_v0 }
0x218a   : > { %10789 = vmatpush3.bf16.msra.mxu1 %v11812_v30 }
0x218b   : > { %10790 = vmatprep.subr.bf16.mxu1 %v13255_v0 }
0x218e   : > { %10791 = vmatpush3.bf16.msra.mxu1 %v11813_v36 }
0x218f   : > { %10816 = vmatprep.subr.bf16.mxu1 %v13255_v0 }
0x2231   : > { %v8565_v1 = vpop.f32.mrf.mxu1 }
0x2232   : > { %v8566_v5 = vadd.f32 %v10101_v32, %v8565_v1 }
0x2233   : > { %v10774_v51 = vpop.f32.mrf.mxu1 }
0x2234   : > { %v8572_v21 = vmax.f32 %v8566_v5, 0.0 }
0x2235   : > { %v8568_v27 = vpop.f32.mrf.mxu1 }
0x2236   : > { %v8569_v43 = vadd.f32 %v10101_v32, %v8568_v27 }
0x2237   : > { %v10775_v60 = vpop.f32.mrf.mxu1 }
0x2238   : > { %v8573_v45 = vmax.f32 %v8569_v43, 0.0 }
0x223a   : > { %v8574_v35 = vpack.c.bf16 %v8573_v45, %v8572_v21 }
0x223c   : > { %10793 = vmatmul.mubr.bf16.vlgmr.msra.gmra.mxu1 %v8574_v35 }
0x223d   : > { %10820 = vmatprep.mubr.msk.bf16.mxu1 %vm13256_vm0, %v13255_v0  ;;  %10817 = vmatpush3.bf16.msra.mxu1 %v11816_v28 }
0x223e   : > { %10818 = vmatprep.subr.bf16.mxu1 %v13255_v0 }
0x2241   : > { %10819 = vmatpush3.bf16.msra.mxu1 %v11817_v40 }
0x22fc   : > { %v8657_v14 = vpop.f32.mrf.mxu1 }
0x22fe   : > { %v10794_v57 = vpop.f32.mrf.mxu1 }
0x2300   : > { %v8660_v37 = vpop.f32.mrf.mxu1 }
0x2301   : > { %v8664_v49 = vpack.c.bf16 %v8660_v37, %v8657_v14 }
0x2302   : > { %v10795_v19 = vpop.f32.mrf.mxu1 }
0x2303   : > { %10797 = vmatpush3.bf16.msra.mxu0 %v8664_v49 }
0x2304   : > { %10802 = vmatprep.subr.bf16.mxu0 %v13255_v0 }
0x2306   : > { %10799 = vmatmul.mubr.msk.bf16.vlgmr.msra.gmra.mxu0 %vm4162_vm7, %v14929_v15 }
0x2307   : > { %10806 = vmatprep.mubr.msk.bf16.mxu0 %vm13256_vm0, %v13255_v0  ;;  %10803 = vmatpush3.bf16.msra.mxu0 %v11814_v22 }
0x2308   : > { %10804 = vmatprep.subr.bf16.mxu0 %v13255_v0 }
0x230b   : > { %10805 = vmatpush3.bf16.msra.mxu0 %v11815_v17 }
0x230c   : > { %10810 = vmatprep.subr.bf16.mxu0 %v13255_v0 }
0x23c6   : > { %v8705_v33 = vpop.f32.mrf.mxu0 }
0x23c7   : > { %v8706_v31 = vadd.f32 %v10111_v16, %v8705_v33 }
0x23c8   : > { %v10800_v50 = vpop.f32.mrf.mxu0 }
0x23c9   : > { %v8712_v61 = vmax.f32 %v8706_v31, 0.0 }
0x23ca   : > { %v8708_v24 = vpop.f32.mrf.mxu0 }
0x23cb   : > { %v8709_v20 = vadd.f32 %v10111_v16, %v8708_v24 }
0x23cc   : > { %v10801_v25 = vpop.f32.mrf.mxu0 }
0x23cd   : > { %v8713_v9 = vmax.f32 %v8709_v20, 0.0 }
0x23cf   : > { %v8714_v48 = vpack.c.bf16 %v8713_v9, %v8712_v61 }
0x23d1   : > { %10807 = vmatmul.mubr.msk.bf16.vlgmr.msra.gmra.mxu0 %vm3371_vm5, %v8714_v48 }
0x23d2   : > { %10812 = vmatprep.mubr.msk.bf16.mxu0 %vm13256_vm0, %v13255_v0 }
0x2491   : > { %v8764_v41 = vpop.f32.mrf.mxu0 }
0x2493   : > { %v10808_v52 = vpop.f32.mrf.mxu0 }
0x2495   : > { %v8767_v63 = vpop.f32.mrf.mxu0 }
0x2496   : > { %v8771_v56 = vpack.c.bf16 %v8767_v63, %v8764_v41 }
0x2497   : > { %v10809_v53 = vpop.f32.mrf.mxu0 }
0x2498   : > { %10811 = vmatpush3.bf16.msra.mxu0 %v8771_v56 }
0x249b   : > { %10813 = vmatmul.mubr.msk.bf16.vlgmr.msra.gmra.mxu0 %vm4162_vm7, %v14929_v15  ;;  %v10118_v15 = vld [vmem:[#allocation72] ss:$0 sm:$0xff] }
0x255b   : > { %v8812_v10 = vpop.f32.mrf.mxu0 }
0x255c   : > { %v8813_v59 = vadd.f32 %v10116_v38, %v8812_v10 }
0x255d   : > { %v10814_v34 = vpop.f32.mrf.mxu0 }
0x255e   : > { %v8819_v13 = vmax.f32 %v8813_v59, 0.0 }
0x255f   : > { %v8815_v54 = vpop.f32.mrf.mxu0 }
0x2560   : > { %v8816_v26 = vadd.f32 %v10116_v38, %v8815_v54 }
0x2561   : > { %v10815_v8 = vpop.f32.mrf.mxu0 }
0x2562   : > { %v8820_v42 = vmax.f32 %v8816_v26, 0.0 }
0x2564   : > { %v8821_v44 = vpack.c.bf16 %v8820_v42, %v8819_v13 }
0x2566   : > { %10821 = vmatmul.mubr.msk.bf16.vlgmr.msra.gmra.mxu1 %vm3371_vm5, %v8821_v44 }
0x2626   : > { %v8877_v11 = vpop.f32.mrf.mxu1 }
0x2627   : > { %v8878_v4 = vadd.f32 %v10118_v15, %v8877_v11 }
0x2628   : > { %v10822_v0 = vpop.f32.mrf.mxu1 }
0x2629   : > { %8884 = vst [vmem:[%s2538_s22] sm:$0xff] %v8878_v4 }
0x262a   : > { %v8880_v46 = vpop.f32.mrf.mxu1 }
0x262b   : > { %v8881_v18 = vadd.f32 %v10118_v15, %v8880_v46 }
0x262c   : > { %v10823_v47 = vpop.f32.mrf.mxu1 }
0x262d   : > { %8885 = vst [vmem:[%s2538_s22 + $0x8] sm:$0xff] %v8881_v18 }
0x262e PF: > { %s162_s0 = sadd.s32 1, %s13139_s0  }
0x262f   : > { %p159_p10 = scmp.ge.s32.totalorder %s162_s0, 4  }
0x2631   :  { %161 = sbr.rel (!%p159_p10) target bundleno = 145 (0x91), region = 568 }
0x2636   :  { %8925 = vsyncpa [#allocation3], 1 }
0x2637   :  { %8927 = vsyncpa [#allocation3 + $0x1], 1 }
0x2638   :  { %8928 = vsyncpa [#allocation5], 1 }
0x2639   :  { %8929 = vsyncpa [#allocation8], 1 }
0x263a   :  { %8930 = vsyncpa [#allocation11], 1 }
0x263b   :  { %8931 = vsyncpa [#allocation14], 1 }
0x263c   :  { %8932 = vsyncpa [#allocation17], 1 }
0x263d   :  { %8933 = vsyncpa [#allocation20], 1 }
0x263e   :  { %8934 = vsyncpa [#allocation23], 1 }
0x263f   :  { %8935 = vsyncpa [#allocation26], 1 }
0x2640   :  { %8936 = vsyncpa [#allocation29], 1 }
0x2641   :  { %8937 = vsyncpa [#allocation32], 1 }
0x2642   :  { %8938 = vsyncpa [#allocation35], 1 }
0x2643   :  { %8939 = vsyncpa [#allocation38], 1 }
0x2644   :  { %8940 = vsyncpa [#allocation41], 1 }
0x2645   :  { %8941 = vsyncpa [#allocation44], 1 }
0x2646   :  { %8942 = vsyncpa [#allocation47], 1 }
0x2647   :  { %8943 = vsyncpa [#allocation50], 1 }
0x2648   :  { %8944 = vsyncpa [#allocation53], 1 }
0x2649   :  { %8945 = vsyncpa [#allocation56], 1 }
0x264a   :  { %8946 = vsyncpa [#allocation59], 1 }
0x264b   :  { %8947 = vsyncpa [#allocation62], 1 }
0x264c   :  { %8948 = vsyncpa [#allocation65], 1 }
0x264d   :  { %8949 = vsyncpa [#allocation68], 1 }
0x264e   :  { %8950 = vsyncpa [#allocation71], 1 }

</bundles_post_ra>
